<compile_context>
chip_gen: v6e
topology: v6e:2x2x1
jax: 0.10.0
libtpu: 0.0.40
codegen_flags: <defaults>
</compile_context>

<pallas_src>
import functools

import jax
import jax.numpy as jnp
import numpy as np
from jax.experimental import pallas as pl
from jax.experimental.pallas import tpu as pltpu


# ---------------------------------------------------------------------------
# Fused Pallas kernel: one grid step == one batch BLOCK, all layers in-kernel
# ---------------------------------------------------------------------------

def _fused_wavenet_kernel(
    x0_ref, adp_ref, adpT_ref,
    w_fg0_ref, w_fg1_ref, b_fg_ref,
    w_s_ref, b_s_ref,
    w_m0_ref, w_m1_ref, b_m_ref,
    w_e1_ref, b_e1_ref, w_e2_ref, b_e2_ref,
    out_ref,
    *, dilations, t_final, gcn_via_matmul,
):
    bb, T, n_nodes, c_res = x0_ref.shape
    bf16 = jnp.bfloat16
    f32 = jnp.float32

    adp = adp_ref[...]                      # (N, N) bf16, adp[v, w]
    x = x0_ref[...]                         # (bb, T, N, Cres) bf16 residual stream

    if not gcn_via_matmul:
        # Fallback gcn path: ONE hoisted broadcast (sliced per layer), batched einsum.
        g_max = bb * (T - dilations[0])
        adpT_b = jnp.broadcast_to(adpT_ref[...], (g_max, n_nodes, n_nodes))

    skip = None
    t_cur = T
    for l, d in enumerate(dilations):       # unrolled at trace time
        t_out = t_cur - d
        m = bb * t_out * n_nodes
        xa = x[:, :t_out].reshape(m, c_res)        # conv tap k = 0          (bf16)
        xb = x[:, d:t_cur].reshape(m, c_res)       # conv tap k = 1 / residual

        # fused dilated filter+gate conv: two accumulating MXU dots (no lane concat)
        fg = (jnp.dot(xa, w_fg0_ref[l], preferred_element_type=f32)
              + jnp.dot(xb, w_fg1_ref[l], preferred_element_type=f32)
              + b_fg_ref[l])
        c_dil = fg.shape[1] // 2
        z = jnp.tanh(fg[:, :c_dil]) * jax.nn.sigmoid(fg[:, c_dil:])   # f32 (m, Cd)
        zb = z.astype(bf16)

        # skip 1x1 conv only on the timesteps the head will read (last t_final)
        z_tail = zb.reshape(bb, t_out, n_nodes, c_dil)[:, t_out - t_final:]
        z_tail = z_tail.reshape(bb * t_final * n_nodes, c_dil)
        s = jnp.dot(z_tail, w_s_ref[l], preferred_element_type=f32) + b_s_ref[l]
        skip = s if skip is None else skip + s

        # gcn (order=1, single adaptive support):
        #   z1[b, t, w, c] = sum_v z[b, t, v, c] * adp[v, w]
        if gcn_via_matmul:
            # single big 2-D matmul: (bb*t*Cd, N) @ (N, N) -- no broadcast, full MXU fill
            zt = jnp.swapaxes(z.reshape(bb, t_out, n_nodes, c_dil), -1, -2)  # f32
            z1 = jnp.dot(zt.reshape(bb * t_out * c_dil, n_nodes).astype(bf16),
                         adp, preferred_element_type=f32)
            z1 = jnp.swapaxes(z1.reshape(bb, t_out, c_dil, n_nodes), -1, -2)
            z1 = z1.reshape(m, c_dil).astype(bf16)
        else:
            z3 = zb.reshape(bb * t_out, n_nodes, c_dil)
            z1 = jnp.einsum("gwv,gvc->gwc", adpT_b[:bb * t_out], z3,
                            preferred_element_type=f32)
            z1 = z1.reshape(m, c_dil).astype(bf16)

        # fused gcn mlp: h = z @ wm0 + z1 @ wm1 + bm  (two accumulating dots)
        h = (jnp.dot(zb, w_m0_ref[l], preferred_element_type=f32)
             + jnp.dot(z1, w_m1_ref[l], preferred_element_type=f32)
             + b_m_ref[l])
        # TODO(synk): gcn's F.dropout(p=0.3) omitted (eval-mode identity).

        # residual connection; carry the stream in bf16 (halves resident VMEM)
        x = (h + xb.astype(f32)).astype(bf16).reshape(bb, t_out, n_nodes, c_res)
        t_cur = t_out

    # head: relu(skip) -> end_conv_1 -> relu -> end_conv_2
    sk = jnp.maximum(skip, 0.0).astype(bf16)
    r = jnp.maximum(
        jnp.dot(sk, w_e1_ref[...], preferred_element_type=f32) + b_e1_ref[...], 0.0)
    out = (jnp.dot(r.astype(bf16), w_e2_ref[...], preferred_element_type=f32)
           + b_e2_ref[...])
    out_ref[...] = out.reshape(bb, t_final, n_nodes, out.shape[1])


# ---------------------------------------------------------------------------
# Wrapper: weight packing + batch-block sizing + one pallas_call
# ---------------------------------------------------------------------------

def _const_spec(shape):
    zeros = (0,) * len(shape)
    return pl.BlockSpec(shape, lambda i, _z=zeros: _z)


def _pack_layer_params(layers):
    """Stack per-layer weights into (L, ...) bf16 arrays (biases stay f32)."""
    b16 = lambda a: a.astype(jnp.bfloat16)
    w_fg0 = jnp.stack([jnp.concatenate([lp["wf0"], lp["wg0"]], axis=1) for lp in layers])
    w_fg1 = jnp.stack([jnp.concatenate([lp["wf1"], lp["wg1"]], axis=1) for lp in layers])
    b_fg = jnp.stack([jnp.concatenate([lp["bf"], lp["bg"]], axis=1) for lp in layers])
    w_s = jnp.stack([lp["ws"] for lp in layers])
    b_s = jnp.stack([lp["bs"] for lp in layers])
    w_m0 = jnp.stack([lp["wm0"] for lp in layers])
    w_m1 = jnp.stack([lp["wm1"] for lp in layers])
    b_m = jnp.stack([lp["bm"] for lp in layers])
    return (b16(w_fg0), b16(w_fg1), b_fg, b16(w_s), b_s, b16(w_m0), b16(w_m1), b_m)


def _pick_batch_block(B, *, T, N, c_res, c_dil, c_skip, c_end, t_final):
    """Pick batch-block size from a per-generation VMEM budget."""
    try:
        kind = jax.devices()[0].device_kind.lower()
    except Exception:
        kind = ""
    big_vmem = any(t in kind for t in ("v4", "v5", "v6"))   # 128 MiB VMEM generations
    vmem_limit = (100 << 20) if big_vmem else (56 << 20)    # v7x/unknown: 64 MiB VMEM
    budget = int(vmem_limit * 0.75)

    lane = 128
    pad = lambda c: -(-c // lane) * lane
    per_elem = (
        2 * T * N * pad(c_res) * 2          # bf16 input block, double-buffered
        + T * N * pad(c_res) * 2            # carried residual stream (bf16)
        + T * N * pad(2 * c_dil) * 4        # filter/gate pre-activation (f32)
        + 3 * T * N * pad(c_dil) * 4        # z / gcn temporaries (f32)
        + t_final * N * pad(c_skip) * 4     # skip accumulator (f32)
        + t_final * N * pad(c_end) * 4      # head temporary (f32)
    )
    blk = max(1, budget // max(per_elem, 1))
    if B >= 2:
        blk = min(blk, (B + 1) // 2)        # keep >= 2 grid steps (v7x: 2 TensorCores)
    return int(min(blk, B)), vmem_limit


def wavenet_forward(params, x_btnf, *, dilations, receptive_field, gcn_via_matmul=True):
    """x_btnf: (B, T, N, in_dim) — the PyTorch module's raw input (pre-permute).

    Returns (B, out_dim, N, T_final) to match the PyTorch NCHW output convention.
    """
    B, T_in, N, _ = x_btnf.shape
    x = x_btnf
    if T_in < receptive_field:
        x = jnp.pad(x, ((0, 0), (receptive_field - T_in, 0), (0, 0), (0, 0)))
    T = max(T_in, receptive_field)

    # adaptive adjacency (tiny parameter prep — plain JAX)
    adp = jax.nn.softmax(
        jnp.maximum(params["nodevec1"] @ params["nodevec2"], 0.0), axis=1)
    adp_b = adp.astype(jnp.bfloat16)
    adpT_b = adp.T.astype(jnp.bfloat16)

    # start_conv (1x1 over in_dim=2) done wrapper-side so the kernel's input block is
    # not a 2-wide lane dim; the kernel input is bf16.
    x0 = (x @ params["w_start"] + params["b_start"]).astype(jnp.bfloat16)

    (w_fg0, w_fg1, b_fg, w_s, b_s, w_m0, w_m1, b_m) = _pack_layer_params(params["layers"])
    w_e1 = params["w_end1"].astype(jnp.bfloat16)
    w_e2 = params["w_end2"].astype(jnp.bfloat16)
    b_e1, b_e2 = params["b_end1"], params["b_end2"]

    c_res = params["w_start"].shape[1]
    c_dil = params["layers"][0]["wf0"].shape[1]
    c_skip = params["layers"][0]["ws"].shape[1]
    c_end = params["w_end1"].shape[1]
    out_dim = params["w_end2"].shape[1]
    t_final = T - sum(dilations)

    b_blk, vmem_limit = _pick_batch_block(
        B, T=T, N=N, c_res=c_res, c_dil=c_dil, c_skip=c_skip, c_end=c_end,
        t_final=t_final)
    b_pad = -(-B // b_blk) * b_blk
    if b_pad != B:
        x0 = jnp.pad(x0, ((0, b_pad - B), (0, 0), (0, 0), (0, 0)))
    n_blocks = b_pad // b_blk

    kernel = functools.partial(
        _fused_wavenet_kernel, dilations=tuple(dilations), t_final=t_final,
        gcn_via_matmul=gcn_via_matmul)

    out = pl.pallas_call(
        kernel,
        out_shape=jax.ShapeDtypeStruct((b_pad, t_final, N, out_dim), jnp.float32),
        grid=(n_blocks,),
        in_specs=[
            pl.BlockSpec((b_blk, T, N, c_res), lambda i: (i, 0, 0, 0)),   # x0
            _const_spec(adp_b.shape), _const_spec(adpT_b.shape),
            _const_spec(w_fg0.shape), _const_spec(w_fg1.shape), _const_spec(b_fg.shape),
            _const_spec(w_s.shape), _const_spec(b_s.shape),
            _const_spec(w_m0.shape), _const_spec(w_m1.shape), _const_spec(b_m.shape),
            _const_spec(w_e1.shape), _const_spec(b_e1.shape),
            _const_spec(w_e2.shape), _const_spec(b_e2.shape),
        ],
        out_specs=pl.BlockSpec((b_blk, t_final, N, out_dim), lambda i: (i, 0, 0, 0)),
        compiler_params=pltpu.CompilerParams(
            dimension_semantics=("parallel",),
            vmem_limit_bytes=int(vmem_limit)),
    )(
        x0, adp_b, adpT_b,
        w_fg0, w_fg1, b_fg, w_s, b_s, w_m0, w_m1, b_m,
        w_e1, b_e1, w_e2, b_e2,
    )

    out = out[:B]
    # PyTorch NCHW convention: (B, out_dim, N, t_final).
    return jnp.transpose(out, (0, 3, 2, 1))


# ---------------------------------------------------------------------------
# Pure-JAX f32 reference (ground truth) and deterministic parameter init
# ---------------------------------------------------------------------------

def reference_forward(params, x_btnf, *, dilations, receptive_field):
    B, T, N, _ = x_btnf.shape
    if T < receptive_field:
        x_btnf = jnp.pad(x_btnf, ((0, 0), (receptive_field - T, 0), (0, 0), (0, 0)))
    adp = jax.nn.softmax(
        jnp.maximum(params["nodevec1"] @ params["nodevec2"], 0.0), axis=1)
    x = x_btnf @ params["w_start"] + params["b_start"]
    skip = None
    for lp, d in zip(params["layers"], dilations):
        T_out = x.shape[1] - d
        xa, xb = x[:, :T_out], x[:, d:]
        f = jnp.tanh(xa @ lp["wf0"] + xb @ lp["wf1"] + lp["bf"])
        g = jax.nn.sigmoid(xa @ lp["wg0"] + xb @ lp["wg1"] + lp["bg"])
        z = f * g
        s = z @ lp["ws"] + lp["bs"]
        skip = s if skip is None else s + skip[:, -T_out:]
        z1 = jnp.einsum("vw,btvc->btwc", adp, z)
        x = z @ lp["wm0"] + z1 @ lp["wm1"] + lp["bm"] + xb
    s = jnp.maximum(skip, 0.0)
    r = jnp.maximum(s @ params["w_end1"] + params["b_end1"], 0.0)
    out = r @ params["w_end2"] + params["b_end2"]
    return jnp.transpose(out, (0, 3, 2, 1))


def init_params(key, *, num_nodes, in_dim, out_dim, c_res, c_dil, c_skip, c_end,
                n_layers):
    def nrm(k, shape, scale=0.1):
        return scale * jax.random.normal(k, shape, jnp.float32)

    keys = iter(jax.random.split(key, 8 + 12 * n_layers))
    p = {
        "nodevec1": nrm(next(keys), (num_nodes, 10), 1.0),
        "nodevec2": nrm(next(keys), (10, num_nodes), 1.0),
        "w_start": nrm(next(keys), (in_dim, c_res)),
        "b_start": nrm(next(keys), (1, c_res)),
        "w_end1": nrm(next(keys), (c_skip, c_end)),
        "b_end1": nrm(next(keys), (1, c_end)),
        "w_end2": nrm(next(keys), (c_end, out_dim)),
        "b_end2": nrm(next(keys), (1, out_dim)),
        "layers": [],
    }
    for _ in range(n_layers):
        p["layers"].append({
            "wf0": nrm(next(keys), (c_res, c_dil)),
            "wf1": nrm(next(keys), (c_res, c_dil)),
            "bf": nrm(next(keys), (1, c_dil)),
            "wg0": nrm(next(keys), (c_res, c_dil)),
            "wg1": nrm(next(keys), (c_res, c_dil)),
            "bg": nrm(next(keys), (1, c_dil)),
            "ws": nrm(next(keys), (c_dil, c_skip)),
            "bs": nrm(next(keys), (1, c_skip)),
            "wm0": nrm(next(keys), (c_dil, c_res)),
            "wm1": nrm(next(keys), (c_dil, c_res)),
            "bm": nrm(next(keys), (1, c_res)),
        })
    return p


# ---------------------------------------------------------------------------
# Main
# ---------------------------------------------------------------------------

if __name__ == "__main__":
    # small but module-consistent configuration
    B, T_IN, NUM_NODES, IN_DIM = 4, 8, 8, 2
    OUT_DIM = 12
    C_RES = C_DIL = 32
    C_SKIP = 64
    C_END = 64
    KERNEL_SIZE = 2
    BLOCKS, LAYERS = 2, 2

    # dilation schedule + receptive field, exactly as in Wavenet.__init__
    dilations = []
    receptive_field = 1
    for _b in range(BLOCKS):
        additional_scope = KERNEL_SIZE - 1
        new_dilation = 1
        for _l in range(LAYERS):
            dilations.append(new_dilation)
            new_dilation *= 2
            receptive_field += additional_scope
            additional_scope *= 2

    key = jax.random.PRNGKey(0)
    kp, kx = jax.random.split(key)
    params = init_params(
        kp, num_nodes=NUM_NODES, in_dim=IN_DIM, out_dim=OUT_DIM,
        c_res=C_RES, c_dil=C_DIL, c_skip=C_SKIP, c_end=C_END,
        n_layers=BLOCKS * LAYERS,
    )
    x = jax.random.normal(kx, (B, T_IN, NUM_NODES, IN_DIM), jnp.float32)

    try:
        out = jax.block_until_ready(
            wavenet_forward(params, x, dilations=dilations,
                            receptive_field=receptive_field, gcn_via_matmul=True))
    except Exception:
        # TODO(synk): fall back to the (proven) batched-einsum gcn if this Mosaic
        # version lacks the minor-dim transpose lowering used by the matmul gcn path.
        out = jax.block_until_ready(
            wavenet_forward(params, x, dilations=dilations,
                            receptive_field=receptive_field, gcn_via_matmul=False))

    t_final = max(T_IN, receptive_field) - sum(dilations)
    assert out.shape == (B, OUT_DIM, NUM_NODES, t_final), out.shape

    ref = reference_forward(
        params, x, dilations=dilations, receptive_field=receptive_field)
    # bf16 MXU operands vs. f32 reference -> loosened tolerance
    np.testing.assert_allclose(np.asarray(out), np.asarray(ref), rtol=3e-2, atol=2e-2)

    print("KERNEL_OK")
</pallas_src>

<mosaic_0001>
module attributes {stable_mosaic.version = 11 : i64} {
  func.func @_fused_wavenet_kernel(%arg0: i32, %arg1: memref<2x8x8x32xbf16, #tpu.memory_space<vmem>>, %arg2: memref<8x8xbf16, #tpu.memory_space<vmem>>, %arg3: memref<8x8xbf16, #tpu.memory_space<vmem>>, %arg4: memref<4x32x64xbf16, #tpu.memory_space<vmem>>, %arg5: memref<4x32x64xbf16, #tpu.memory_space<vmem>>, %arg6: memref<4x1x64xf32, #tpu.memory_space<vmem>>, %arg7: memref<4x32x64xbf16, #tpu.memory_space<vmem>>, %arg8: memref<4x1x64xf32, #tpu.memory_space<vmem>>, %arg9: memref<4x32x32xbf16, #tpu.memory_space<vmem>>, %arg10: memref<4x32x32xbf16, #tpu.memory_space<vmem>>, %arg11: memref<4x1x32xf32, #tpu.memory_space<vmem>>, %arg12: memref<64x64xbf16, #tpu.memory_space<vmem>>, %arg13: memref<1x64xf32, #tpu.memory_space<vmem>>, %arg14: memref<64x12xbf16, #tpu.memory_space<vmem>>, %arg15: memref<1x12xf32, #tpu.memory_space<vmem>>, %arg16: memref<2x2x8x12xf32, #tpu.memory_space<vmem>>) attributes {dimension_semantics = [#tpu.dimension_semantics<parallel>], iteration_bounds = array<i64: 2>, scalar_prefetch = 0 : i64, scratch_operands = 0 : i64, tpu.core_type = #tpu.core_type<tc>, window_params = [{transform_indices = @transform_0, window_bounds = array<i64: 2, 8, 8, 32>}, {pipeline_mode = #tpu.pipeline_mode<synchronous>, transform_indices = @transform_1, window_bounds = array<i64: 8, 8>}, {pipeline_mode = #tpu.pipeline_mode<synchronous>, transform_indices = @transform_2, window_bounds = array<i64: 8, 8>}, {pipeline_mode = #tpu.pipeline_mode<synchronous>, transform_indices = @transform_3, window_bounds = array<i64: 4, 32, 64>}, {pipeline_mode = #tpu.pipeline_mode<synchronous>, transform_indices = @transform_4, window_bounds = array<i64: 4, 32, 64>}, {pipeline_mode = #tpu.pipeline_mode<synchronous>, transform_indices = @transform_5, window_bounds = array<i64: 4, 1, 64>}, {pipeline_mode = #tpu.pipeline_mode<synchronous>, transform_indices = @transform_6, window_bounds = array<i64: 4, 32, 64>}, {pipeline_mode = #tpu.pipeline_mode<synchronous>, transform_indices = @transform_7, window_bounds = array<i64: 4, 1, 64>}, {pipeline_mode = #tpu.pipeline_mode<synchronous>, transform_indices = @transform_8, window_bounds = array<i64: 4, 32, 32>}, {pipeline_mode = #tpu.pipeline_mode<synchronous>, transform_indices = @transform_9, window_bounds = array<i64: 4, 32, 32>}, {pipeline_mode = #tpu.pipeline_mode<synchronous>, transform_indices = @transform_10, window_bounds = array<i64: 4, 1, 32>}, {pipeline_mode = #tpu.pipeline_mode<synchronous>, transform_indices = @transform_11, window_bounds = array<i64: 64, 64>}, {pipeline_mode = #tpu.pipeline_mode<synchronous>, transform_indices = @transform_12, window_bounds = array<i64: 1, 64>}, {pipeline_mode = #tpu.pipeline_mode<synchronous>, transform_indices = @transform_13, window_bounds = array<i64: 64, 12>}, {pipeline_mode = #tpu.pipeline_mode<synchronous>, transform_indices = @transform_14, window_bounds = array<i64: 1, 12>}, {transform_indices = @transform_15, window_bounds = array<i64: 2, 2, 8, 12>}]} {
    %c0 = arith.constant 0 : index
    %c0_0 = arith.constant 0 : index
    %0 = vector.load %arg2[%c0, %c0_0] : memref<8x8xbf16, #tpu.memory_space<vmem>>, vector<8x8xbf16>
    %c0_1 = arith.constant 0 : index
    %c0_2 = arith.constant 0 : index
    %c0_3 = arith.constant 0 : index
    %c0_4 = arith.constant 0 : index
    %1 = vector.load %arg1[%c0_1, %c0_2, %c0_3, %c0_4] : memref<2x8x8x32xbf16, #tpu.memory_space<vmem>>, vector<2x8x8x32xbf16>
    %2 = vector.extract_strided_slice %1 {offsets = [0, 0, 0, 0], sizes = [2, 7, 8, 32], strides = [1, 1, 1, 1]} : vector<2x8x8x32xbf16> to vector<2x7x8x32xbf16>
    %3 = vector.shape_cast %2 : vector<2x7x8x32xbf16> to vector<112x32xbf16>
    %4 = vector.extract_strided_slice %1 {offsets = [0, 1, 0, 0], sizes = [2, 7, 8, 32], strides = [1, 1, 1, 1]} : vector<2x8x8x32xbf16> to vector<2x7x8x32xbf16>
    %5 = vector.shape_cast %4 : vector<2x7x8x32xbf16> to vector<112x32xbf16>
    %c0_5 = arith.constant 0 : index
    %c0_6 = arith.constant 0 : index
    %c0_7 = arith.constant 0 : index
    %6 = vector.load %arg4[%c0_5, %c0_6, %c0_7] : memref<4x32x64xbf16, #tpu.memory_space<vmem>>, vector<1x32x64xbf16>
    %7 = vector.shape_cast %6 : vector<1x32x64xbf16> to vector<32x64xbf16>
    %cst = arith.constant dense<0.000000e+00> : vector<112x64xf32>
    %8 = tpu.matmul %3, %7, %cst {dimension_numbers = #tpu.dot_dimension_numbers<[1], [0], [0], [1], [0, 0, 1, 1], [], []>} : vector<112x32xbf16>, vector<32x64xbf16>, vector<112x64xf32> -> vector<112x64xf32>
    %c0_8 = arith.constant 0 : index
    %c0_9 = arith.constant 0 : index
    %c0_10 = arith.constant 0 : index
    %9 = vector.load %arg5[%c0_8, %c0_9, %c0_10] : memref<4x32x64xbf16, #tpu.memory_space<vmem>>, vector<1x32x64xbf16>
    %10 = vector.shape_cast %9 : vector<1x32x64xbf16> to vector<32x64xbf16>
    %cst_11 = arith.constant dense<0.000000e+00> : vector<112x64xf32>
    %11 = tpu.matmul %5, %10, %cst_11 {dimension_numbers = #tpu.dot_dimension_numbers<[1], [0], [0], [1], [0, 0, 1, 1], [], []>} : vector<112x32xbf16>, vector<32x64xbf16>, vector<112x64xf32> -> vector<112x64xf32>
    %12 = arith.addf %8, %11 : vector<112x64xf32>
    %c0_12 = arith.constant 0 : index
    %c0_13 = arith.constant 0 : index
    %c0_14 = arith.constant 0 : index
    %13 = vector.load %arg6[%c0_12, %c0_13, %c0_14] : memref<4x1x64xf32, #tpu.memory_space<vmem>>, vector<1x1x64xf32>
    %14 = vector.shape_cast %13 : vector<1x1x64xf32> to vector<1x64xf32>
    %15 = vector.broadcast %14 : vector<1x64xf32> to vector<112x64xf32>
    %16 = arith.addf %12, %15 : vector<112x64xf32>
    %17 = vector.extract_strided_slice %16 {offsets = [0, 0], sizes = [112, 32], strides = [1, 1]} : vector<112x64xf32> to vector<112x32xf32>
    %18 = math.tanh %17 : vector<112x32xf32>
    %19 = vector.extract_strided_slice %16 {offsets = [0, 32], sizes = [112, 32], strides = [1, 1]} : vector<112x64xf32> to vector<112x32xf32>
    %20 = arith.negf %19 : vector<112x32xf32>
    %21 = math.exp %20 : vector<112x32xf32>
    %cst_15 = arith.constant 1.000000e+00 : f32
    %22 = vector.broadcast %cst_15 : f32 to vector<112x32xf32>
    %23 = arith.addf %22, %21 : vector<112x32xf32>
    %24 = arith.divf %22, %23 : vector<112x32xf32>
    %25 = arith.mulf %18, %24 : vector<112x32xf32>
    %26 = arith.truncf %25 : vector<112x32xf32> to vector<112x32xbf16>
    %27 = vector.shape_cast %26 : vector<112x32xbf16> to vector<2x7x8x32xbf16>
    %28 = vector.extract_strided_slice %27 {offsets = [0, 5, 0, 0], sizes = [2, 2, 8, 32], strides = [1, 1, 1, 1]} : vector<2x7x8x32xbf16> to vector<2x2x8x32xbf16>
    %29 = vector.shape_cast %28 : vector<2x2x8x32xbf16> to vector<32x32xbf16>
    %c0_16 = arith.constant 0 : index
    %c0_17 = arith.constant 0 : index
    %c0_18 = arith.constant 0 : index
    %30 = vector.load %arg7[%c0_16, %c0_17, %c0_18] : memref<4x32x64xbf16, #tpu.memory_space<vmem>>, vector<1x32x64xbf16>
    %31 = vector.shape_cast %30 : vector<1x32x64xbf16> to vector<32x64xbf16>
    %cst_19 = arith.constant dense<0.000000e+00> : vector<32x64xf32>
    %32 = tpu.matmul %29, %31, %cst_19 {dimension_numbers = #tpu.dot_dimension_numbers<[1], [0], [0], [1], [0, 0, 1, 1], [], []>} : vector<32x32xbf16>, vector<32x64xbf16>, vector<32x64xf32> -> vector<32x64xf32>
    %c0_20 = arith.constant 0 : index
    %c0_21 = arith.constant 0 : index
    %c0_22 = arith.constant 0 : index
    %33 = vector.load %arg8[%c0_20, %c0_21, %c0_22] : memref<4x1x64xf32, #tpu.memory_space<vmem>>, vector<1x1x64xf32>
    %34 = vector.shape_cast %33 : vector<1x1x64xf32> to vector<1x64xf32>
    %35 = vector.broadcast %34 : vector<1x64xf32> to vector<32x64xf32>
    %36 = arith.addf %32, %35 : vector<32x64xf32>
    %37 = vector.shape_cast %25 : vector<112x32xf32> to vector<2x7x8x32xf32>
    %38 = tpu.transpose %37, [0, 1, 3, 2] : vector<2x7x8x32xf32> -> vector<2x7x32x8xf32>
    %39 = vector.shape_cast %38 : vector<2x7x32x8xf32> to vector<448x8xf32>
    %40 = arith.truncf %39 : vector<448x8xf32> to vector<448x8xbf16>
    %cst_23 = arith.constant dense<0.000000e+00> : vector<448x8xf32>
    %41 = tpu.matmul %40, %0, %cst_23 {dimension_numbers = #tpu.dot_dimension_numbers<[1], [0], [0], [1], [0, 0, 1, 1], [], []>} : vector<448x8xbf16>, vector<8x8xbf16>, vector<448x8xf32> -> vector<448x8xf32>
    %42 = vector.shape_cast %41 : vector<448x8xf32> to vector<2x7x32x8xf32>
    %43 = tpu.transpose %42, [0, 1, 3, 2] : vector<2x7x32x8xf32> -> vector<2x7x8x32xf32>
    %44 = vector.shape_cast %43 : vector<2x7x8x32xf32> to vector<112x32xf32>
    %45 = arith.truncf %44 : vector<112x32xf32> to vector<112x32xbf16>
    %c0_24 = arith.constant 0 : index
    %c0_25 = arith.constant 0 : index
    %c0_26 = arith.constant 0 : index
    %46 = vector.load %arg9[%c0_24, %c0_25, %c0_26] : memref<4x32x32xbf16, #tpu.memory_space<vmem>>, vector<1x32x32xbf16>
    %47 = vector.shape_cast %46 : vector<1x32x32xbf16> to vector<32x32xbf16>
    %cst_27 = arith.constant dense<0.000000e+00> : vector<112x32xf32>
    %48 = tpu.matmul %26, %47, %cst_27 {dimension_numbers = #tpu.dot_dimension_numbers<[1], [0], [0], [1], [0, 0, 1, 1], [], []>} : vector<112x32xbf16>, vector<32x32xbf16>, vector<112x32xf32> -> vector<112x32xf32>
    %c0_28 = arith.constant 0 : index
    %c0_29 = arith.constant 0 : index
    %c0_30 = arith.constant 0 : index
    %49 = vector.load %arg10[%c0_28, %c0_29, %c0_30] : memref<4x32x32xbf16, #tpu.memory_space<vmem>>, vector<1x32x32xbf16>
    %50 = vector.shape_cast %49 : vector<1x32x32xbf16> to vector<32x32xbf16>
    %cst_31 = arith.constant dense<0.000000e+00> : vector<112x32xf32>
    %51 = tpu.matmul %45, %50, %cst_31 {dimension_numbers = #tpu.dot_dimension_numbers<[1], [0], [0], [1], [0, 0, 1, 1], [], []>} : vector<112x32xbf16>, vector<32x32xbf16>, vector<112x32xf32> -> vector<112x32xf32>
    %52 = arith.addf %48, %51 : vector<112x32xf32>
    %c0_32 = arith.constant 0 : index
    %c0_33 = arith.constant 0 : index
    %c0_34 = arith.constant 0 : index
    %53 = vector.load %arg11[%c0_32, %c0_33, %c0_34] : memref<4x1x32xf32, #tpu.memory_space<vmem>>, vector<1x1x32xf32>
    %54 = vector.shape_cast %53 : vector<1x1x32xf32> to vector<1x32xf32>
    %55 = vector.broadcast %54 : vector<1x32xf32> to vector<112x32xf32>
    %56 = arith.addf %52, %55 : vector<112x32xf32>
    %57 = arith.extf %5 : vector<112x32xbf16> to vector<112x32xf32>
    %58 = arith.addf %56, %57 : vector<112x32xf32>
    %59 = arith.truncf %58 : vector<112x32xf32> to vector<112x32xbf16>
    %60 = vector.shape_cast %59 : vector<112x32xbf16> to vector<2x7x8x32xbf16>
    %61 = vector.extract_strided_slice %60 {offsets = [0, 0, 0, 0], sizes = [2, 5, 8, 32], strides = [1, 1, 1, 1]} : vector<2x7x8x32xbf16> to vector<2x5x8x32xbf16>
    %62 = vector.shape_cast %61 : vector<2x5x8x32xbf16> to vector<80x32xbf16>
    %63 = vector.extract_strided_slice %60 {offsets = [0, 2, 0, 0], sizes = [2, 5, 8, 32], strides = [1, 1, 1, 1]} : vector<2x7x8x32xbf16> to vector<2x5x8x32xbf16>
    %64 = vector.shape_cast %63 : vector<2x5x8x32xbf16> to vector<80x32xbf16>
    %c1 = arith.constant 1 : index
    %c0_35 = arith.constant 0 : index
    %c0_36 = arith.constant 0 : index
    %65 = vector.load %arg4[%c1, %c0_35, %c0_36] : memref<4x32x64xbf16, #tpu.memory_space<vmem>>, vector<1x32x64xbf16>
    %66 = vector.shape_cast %65 : vector<1x32x64xbf16> to vector<32x64xbf16>
    %cst_37 = arith.constant dense<0.000000e+00> : vector<80x64xf32>
    %67 = tpu.matmul %62, %66, %cst_37 {dimension_numbers = #tpu.dot_dimension_numbers<[1], [0], [0], [1], [0, 0, 1, 1], [], []>} : vector<80x32xbf16>, vector<32x64xbf16>, vector<80x64xf32> -> vector<80x64xf32>
    %c1_38 = arith.constant 1 : index
    %c0_39 = arith.constant 0 : index
    %c0_40 = arith.constant 0 : index
    %68 = vector.load %arg5[%c1_38, %c0_39, %c0_40] : memref<4x32x64xbf16, #tpu.memory_space<vmem>>, vector<1x32x64xbf16>
    %69 = vector.shape_cast %68 : vector<1x32x64xbf16> to vector<32x64xbf16>
    %cst_41 = arith.constant dense<0.000000e+00> : vector<80x64xf32>
    %70 = tpu.matmul %64, %69, %cst_41 {dimension_numbers = #tpu.dot_dimension_numbers<[1], [0], [0], [1], [0, 0, 1, 1], [], []>} : vector<80x32xbf16>, vector<32x64xbf16>, vector<80x64xf32> -> vector<80x64xf32>
    %71 = arith.addf %67, %70 : vector<80x64xf32>
    %c1_42 = arith.constant 1 : index
    %c0_43 = arith.constant 0 : index
    %c0_44 = arith.constant 0 : index
    %72 = vector.load %arg6[%c1_42, %c0_43, %c0_44] : memref<4x1x64xf32, #tpu.memory_space<vmem>>, vector<1x1x64xf32>
    %73 = vector.shape_cast %72 : vector<1x1x64xf32> to vector<1x64xf32>
    %74 = vector.broadcast %73 : vector<1x64xf32> to vector<80x64xf32>
    %75 = arith.addf %71, %74 : vector<80x64xf32>
    %76 = vector.extract_strided_slice %75 {offsets = [0, 0], sizes = [80, 32], strides = [1, 1]} : vector<80x64xf32> to vector<80x32xf32>
    %77 = math.tanh %76 : vector<80x32xf32>
    %78 = vector.extract_strided_slice %75 {offsets = [0, 32], sizes = [80, 32], strides = [1, 1]} : vector<80x64xf32> to vector<80x32xf32>
    %79 = arith.negf %78 : vector<80x32xf32>
    %80 = math.exp %79 : vector<80x32xf32>
    %cst_45 = arith.constant 1.000000e+00 : f32
    %81 = vector.broadcast %cst_45 : f32 to vector<80x32xf32>
    %82 = arith.addf %81, %80 : vector<80x32xf32>
    %83 = arith.divf %81, %82 : vector<80x32xf32>
    %84 = arith.mulf %77, %83 : vector<80x32xf32>
    %85 = arith.truncf %84 : vector<80x32xf32> to vector<80x32xbf16>
    %86 = vector.shape_cast %85 : vector<80x32xbf16> to vector<2x5x8x32xbf16>
    %87 = vector.extract_strided_slice %86 {offsets = [0, 3, 0, 0], sizes = [2, 2, 8, 32], strides = [1, 1, 1, 1]} : vector<2x5x8x32xbf16> to vector<2x2x8x32xbf16>
    %88 = vector.shape_cast %87 : vector<2x2x8x32xbf16> to vector<32x32xbf16>
    %c1_46 = arith.constant 1 : index
    %c0_47 = arith.constant 0 : index
    %c0_48 = arith.constant 0 : index
    %89 = vector.load %arg7[%c1_46, %c0_47, %c0_48] : memref<4x32x64xbf16, #tpu.memory_space<vmem>>, vector<1x32x64xbf16>
    %90 = vector.shape_cast %89 : vector<1x32x64xbf16> to vector<32x64xbf16>
    %cst_49 = arith.constant dense<0.000000e+00> : vector<32x64xf32>
    %91 = tpu.matmul %88, %90, %cst_49 {dimension_numbers = #tpu.dot_dimension_numbers<[1], [0], [0], [1], [0, 0, 1, 1], [], []>} : vector<32x32xbf16>, vector<32x64xbf16>, vector<32x64xf32> -> vector<32x64xf32>
    %c1_50 = arith.constant 1 : index
    %c0_51 = arith.constant 0 : index
    %c0_52 = arith.constant 0 : index
    %92 = vector.load %arg8[%c1_50, %c0_51, %c0_52] : memref<4x1x64xf32, #tpu.memory_space<vmem>>, vector<1x1x64xf32>
    %93 = vector.shape_cast %92 : vector<1x1x64xf32> to vector<1x64xf32>
    %94 = vector.broadcast %93 : vector<1x64xf32> to vector<32x64xf32>
    %95 = arith.addf %91, %94 : vector<32x64xf32>
    %96 = arith.addf %36, %95 : vector<32x64xf32>
    %97 = vector.shape_cast %84 : vector<80x32xf32> to vector<2x5x8x32xf32>
    %98 = tpu.transpose %97, [0, 1, 3, 2] : vector<2x5x8x32xf32> -> vector<2x5x32x8xf32>
    %99 = vector.shape_cast %98 : vector<2x5x32x8xf32> to vector<320x8xf32>
    %100 = arith.truncf %99 : vector<320x8xf32> to vector<320x8xbf16>
    %cst_53 = arith.constant dense<0.000000e+00> : vector<320x8xf32>
    %101 = tpu.matmul %100, %0, %cst_53 {dimension_numbers = #tpu.dot_dimension_numbers<[1], [0], [0], [1], [0, 0, 1, 1], [], []>} : vector<320x8xbf16>, vector<8x8xbf16>, vector<320x8xf32> -> vector<320x8xf32>
    %102 = vector.shape_cast %101 : vector<320x8xf32> to vector<2x5x32x8xf32>
    %103 = tpu.transpose %102, [0, 1, 3, 2] : vector<2x5x32x8xf32> -> vector<2x5x8x32xf32>
    %104 = vector.shape_cast %103 : vector<2x5x8x32xf32> to vector<80x32xf32>
    %105 = arith.truncf %104 : vector<80x32xf32> to vector<80x32xbf16>
    %c1_54 = arith.constant 1 : index
    %c0_55 = arith.constant 0 : index
    %c0_56 = arith.constant 0 : index
    %106 = vector.load %arg9[%c1_54, %c0_55, %c0_56] : memref<4x32x32xbf16, #tpu.memory_space<vmem>>, vector<1x32x32xbf16>
    %107 = vector.shape_cast %106 : vector<1x32x32xbf16> to vector<32x32xbf16>
    %cst_57 = arith.constant dense<0.000000e+00> : vector<80x32xf32>
    %108 = tpu.matmul %85, %107, %cst_57 {dimension_numbers = #tpu.dot_dimension_numbers<[1], [0], [0], [1], [0, 0, 1, 1], [], []>} : vector<80x32xbf16>, vector<32x32xbf16>, vector<80x32xf32> -> vector<80x32xf32>
    %c1_58 = arith.constant 1 : index
    %c0_59 = arith.constant 0 : index
    %c0_60 = arith.constant 0 : index
    %109 = vector.load %arg10[%c1_58, %c0_59, %c0_60] : memref<4x32x32xbf16, #tpu.memory_space<vmem>>, vector<1x32x32xbf16>
    %110 = vector.shape_cast %109 : vector<1x32x32xbf16> to vector<32x32xbf16>
    %cst_61 = arith.constant dense<0.000000e+00> : vector<80x32xf32>
    %111 = tpu.matmul %105, %110, %cst_61 {dimension_numbers = #tpu.dot_dimension_numbers<[1], [0], [0], [1], [0, 0, 1, 1], [], []>} : vector<80x32xbf16>, vector<32x32xbf16>, vector<80x32xf32> -> vector<80x32xf32>
    %112 = arith.addf %108, %111 : vector<80x32xf32>
    %c1_62 = arith.constant 1 : index
    %c0_63 = arith.constant 0 : index
    %c0_64 = arith.constant 0 : index
    %113 = vector.load %arg11[%c1_62, %c0_63, %c0_64] : memref<4x1x32xf32, #tpu.memory_space<vmem>>, vector<1x1x32xf32>
    %114 = vector.shape_cast %113 : vector<1x1x32xf32> to vector<1x32xf32>
    %115 = vector.broadcast %114 : vector<1x32xf32> to vector<80x32xf32>
    %116 = arith.addf %112, %115 : vector<80x32xf32>
    %117 = arith.extf %64 : vector<80x32xbf16> to vector<80x32xf32>
    %118 = arith.addf %116, %117 : vector<80x32xf32>
    %119 = arith.truncf %118 : vector<80x32xf32> to vector<80x32xbf16>
    %120 = vector.shape_cast %119 : vector<80x32xbf16> to vector<2x5x8x32xbf16>
    %121 = vector.extract_strided_slice %120 {offsets = [0, 0, 0, 0], sizes = [2, 4, 8, 32], strides = [1, 1, 1, 1]} : vector<2x5x8x32xbf16> to vector<2x4x8x32xbf16>
    %122 = vector.shape_cast %121 : vector<2x4x8x32xbf16> to vector<64x32xbf16>
    %123 = vector.extract_strided_slice %120 {offsets = [0, 1, 0, 0], sizes = [2, 4, 8, 32], strides = [1, 1, 1, 1]} : vector<2x5x8x32xbf16> to vector<2x4x8x32xbf16>
    %124 = vector.shape_cast %123 : vector<2x4x8x32xbf16> to vector<64x32xbf16>
    %c2 = arith.constant 2 : index
    %c0_65 = arith.constant 0 : index
    %c0_66 = arith.constant 0 : index
    %125 = vector.load %arg4[%c2, %c0_65, %c0_66] : memref<4x32x64xbf16, #tpu.memory_space<vmem>>, vector<1x32x64xbf16>
    %126 = vector.shape_cast %125 : vector<1x32x64xbf16> to vector<32x64xbf16>
    %cst_67 = arith.constant dense<0.000000e+00> : vector<64x64xf32>
    %127 = tpu.matmul %122, %126, %cst_67 {dimension_numbers = #tpu.dot_dimension_numbers<[1], [0], [0], [1], [0, 0, 1, 1], [], []>} : vector<64x32xbf16>, vector<32x64xbf16>, vector<64x64xf32> -> vector<64x64xf32>
    %c2_68 = arith.constant 2 : index
    %c0_69 = arith.constant 0 : index
    %c0_70 = arith.constant 0 : index
    %128 = vector.load %arg5[%c2_68, %c0_69, %c0_70] : memref<4x32x64xbf16, #tpu.memory_space<vmem>>, vector<1x32x64xbf16>
    %129 = vector.shape_cast %128 : vector<1x32x64xbf16> to vector<32x64xbf16>
    %cst_71 = arith.constant dense<0.000000e+00> : vector<64x64xf32>
    %130 = tpu.matmul %124, %129, %cst_71 {dimension_numbers = #tpu.dot_dimension_numbers<[1], [0], [0], [1], [0, 0, 1, 1], [], []>} : vector<64x32xbf16>, vector<32x64xbf16>, vector<64x64xf32> -> vector<64x64xf32>
    %131 = arith.addf %127, %130 : vector<64x64xf32>
    %c2_72 = arith.constant 2 : index
    %c0_73 = arith.constant 0 : index
    %c0_74 = arith.constant 0 : index
    %132 = vector.load %arg6[%c2_72, %c0_73, %c0_74] : memref<4x1x64xf32, #tpu.memory_space<vmem>>, vector<1x1x64xf32>
    %133 = vector.shape_cast %132 : vector<1x1x64xf32> to vector<1x64xf32>
    %134 = vector.broadcast %133 : vector<1x64xf32> to vector<64x64xf32>
    %135 = arith.addf %131, %134 : vector<64x64xf32>
    %136 = vector.extract_strided_slice %135 {offsets = [0, 0], sizes = [64, 32], strides = [1, 1]} : vector<64x64xf32> to vector<64x32xf32>
    %137 = math.tanh %136 : vector<64x32xf32>
    %138 = vector.extract_strided_slice %135 {offsets = [0, 32], sizes = [64, 32], strides = [1, 1]} : vector<64x64xf32> to vector<64x32xf32>
    %139 = arith.negf %138 : vector<64x32xf32>
    %140 = math.exp %139 : vector<64x32xf32>
    %cst_75 = arith.constant 1.000000e+00 : f32
    %141 = vector.broadcast %cst_75 : f32 to vector<64x32xf32>
    %142 = arith.addf %141, %140 : vector<64x32xf32>
    %143 = arith.divf %141, %142 : vector<64x32xf32>
    %144 = arith.mulf %137, %143 : vector<64x32xf32>
    %145 = arith.truncf %144 : vector<64x32xf32> to vector<64x32xbf16>
    %146 = vector.shape_cast %145 : vector<64x32xbf16> to vector<2x4x8x32xbf16>
    %147 = vector.extract_strided_slice %146 {offsets = [0, 2, 0, 0], sizes = [2, 2, 8, 32], strides = [1, 1, 1, 1]} : vector<2x4x8x32xbf16> to vector<2x2x8x32xbf16>
    %148 = vector.shape_cast %147 : vector<2x2x8x32xbf16> to vector<32x32xbf16>
    %c2_76 = arith.constant 2 : index
    %c0_77 = arith.constant 0 : index
    %c0_78 = arith.constant 0 : index
    %149 = vector.load %arg7[%c2_76, %c0_77, %c0_78] : memref<4x32x64xbf16, #tpu.memory_space<vmem>>, vector<1x32x64xbf16>
    %150 = vector.shape_cast %149 : vector<1x32x64xbf16> to vector<32x64xbf16>
    %cst_79 = arith.constant dense<0.000000e+00> : vector<32x64xf32>
    %151 = tpu.matmul %148, %150, %cst_79 {dimension_numbers = #tpu.dot_dimension_numbers<[1], [0], [0], [1], [0, 0, 1, 1], [], []>} : vector<32x32xbf16>, vector<32x64xbf16>, vector<32x64xf32> -> vector<32x64xf32>
    %c2_80 = arith.constant 2 : index
    %c0_81 = arith.constant 0 : index
    %c0_82 = arith.constant 0 : index
    %152 = vector.load %arg8[%c2_80, %c0_81, %c0_82] : memref<4x1x64xf32, #tpu.memory_space<vmem>>, vector<1x1x64xf32>
    %153 = vector.shape_cast %152 : vector<1x1x64xf32> to vector<1x64xf32>
    %154 = vector.broadcast %153 : vector<1x64xf32> to vector<32x64xf32>
    %155 = arith.addf %151, %154 : vector<32x64xf32>
    %156 = arith.addf %96, %155 : vector<32x64xf32>
    %157 = vector.shape_cast %144 : vector<64x32xf32> to vector<2x4x8x32xf32>
    %158 = tpu.transpose %157, [0, 1, 3, 2] : vector<2x4x8x32xf32> -> vector<2x4x32x8xf32>
    %159 = vector.shape_cast %158 : vector<2x4x32x8xf32> to vector<256x8xf32>
    %160 = arith.truncf %159 : vector<256x8xf32> to vector<256x8xbf16>
    %cst_83 = arith.constant dense<0.000000e+00> : vector<256x8xf32>
    %161 = tpu.matmul %160, %0, %cst_83 {dimension_numbers = #tpu.dot_dimension_numbers<[1], [0], [0], [1], [0, 0, 1, 1], [], []>} : vector<256x8xbf16>, vector<8x8xbf16>, vector<256x8xf32> -> vector<256x8xf32>
    %162 = vector.shape_cast %161 : vector<256x8xf32> to vector<2x4x32x8xf32>
    %163 = tpu.transpose %162, [0, 1, 3, 2] : vector<2x4x32x8xf32> -> vector<2x4x8x32xf32>
    %164 = vector.shape_cast %163 : vector<2x4x8x32xf32> to vector<64x32xf32>
    %165 = arith.truncf %164 : vector<64x32xf32> to vector<64x32xbf16>
    %c2_84 = arith.constant 2 : index
    %c0_85 = arith.constant 0 : index
    %c0_86 = arith.constant 0 : index
    %166 = vector.load %arg9[%c2_84, %c0_85, %c0_86] : memref<4x32x32xbf16, #tpu.memory_space<vmem>>, vector<1x32x32xbf16>
    %167 = vector.shape_cast %166 : vector<1x32x32xbf16> to vector<32x32xbf16>
    %cst_87 = arith.constant dense<0.000000e+00> : vector<64x32xf32>
    %168 = tpu.matmul %145, %167, %cst_87 {dimension_numbers = #tpu.dot_dimension_numbers<[1], [0], [0], [1], [0, 0, 1, 1], [], []>} : vector<64x32xbf16>, vector<32x32xbf16>, vector<64x32xf32> -> vector<64x32xf32>
    %c2_88 = arith.constant 2 : index
    %c0_89 = arith.constant 0 : index
    %c0_90 = arith.constant 0 : index
    %169 = vector.load %arg10[%c2_88, %c0_89, %c0_90] : memref<4x32x32xbf16, #tpu.memory_space<vmem>>, vector<1x32x32xbf16>
    %170 = vector.shape_cast %169 : vector<1x32x32xbf16> to vector<32x32xbf16>
    %cst_91 = arith.constant dense<0.000000e+00> : vector<64x32xf32>
    %171 = tpu.matmul %165, %170, %cst_91 {dimension_numbers = #tpu.dot_dimension_numbers<[1], [0], [0], [1], [0, 0, 1, 1], [], []>} : vector<64x32xbf16>, vector<32x32xbf16>, vector<64x32xf32> -> vector<64x32xf32>
    %172 = arith.addf %168, %171 : vector<64x32xf32>
    %c2_92 = arith.constant 2 : index
    %c0_93 = arith.constant 0 : index
    %c0_94 = arith.constant 0 : index
    %173 = vector.load %arg11[%c2_92, %c0_93, %c0_94] : memref<4x1x32xf32, #tpu.memory_space<vmem>>, vector<1x1x32xf32>
    %174 = vector.shape_cast %173 : vector<1x1x32xf32> to vector<1x32xf32>
    %175 = vector.broadcast %174 : vector<1x32xf32> to vector<64x32xf32>
    %176 = arith.addf %172, %175 : vector<64x32xf32>
    %177 = arith.extf %124 : vector<64x32xbf16> to vector<64x32xf32>
    %178 = arith.addf %176, %177 : vector<64x32xf32>
    %179 = arith.truncf %178 : vector<64x32xf32> to vector<64x32xbf16>
    %180 = vector.shape_cast %179 : vector<64x32xbf16> to vector<2x4x8x32xbf16>
    %181 = vector.extract_strided_slice %180 {offsets = [0, 0, 0, 0], sizes = [2, 2, 8, 32], strides = [1, 1, 1, 1]} : vector<2x4x8x32xbf16> to vector<2x2x8x32xbf16>
    %182 = vector.shape_cast %181 : vector<2x2x8x32xbf16> to vector<32x32xbf16>
    %183 = vector.extract_strided_slice %180 {offsets = [0, 2, 0, 0], sizes = [2, 2, 8, 32], strides = [1, 1, 1, 1]} : vector<2x4x8x32xbf16> to vector<2x2x8x32xbf16>
    %184 = vector.shape_cast %183 : vector<2x2x8x32xbf16> to vector<32x32xbf16>
    %c3 = arith.constant 3 : index
    %c0_95 = arith.constant 0 : index
    %c0_96 = arith.constant 0 : index
    %185 = vector.load %arg4[%c3, %c0_95, %c0_96] : memref<4x32x64xbf16, #tpu.memory_space<vmem>>, vector<1x32x64xbf16>
    %186 = vector.shape_cast %185 : vector<1x32x64xbf16> to vector<32x64xbf16>
    %cst_97 = arith.constant dense<0.000000e+00> : vector<32x64xf32>
    %187 = tpu.matmul %182, %186, %cst_97 {dimension_numbers = #tpu.dot_dimension_numbers<[1], [0], [0], [1], [0, 0, 1, 1], [], []>} : vector<32x32xbf16>, vector<32x64xbf16>, vector<32x64xf32> -> vector<32x64xf32>
    %c3_98 = arith.constant 3 : index
    %c0_99 = arith.constant 0 : index
    %c0_100 = arith.constant 0 : index
    %188 = vector.load %arg5[%c3_98, %c0_99, %c0_100] : memref<4x32x64xbf16, #tpu.memory_space<vmem>>, vector<1x32x64xbf16>
    %189 = vector.shape_cast %188 : vector<1x32x64xbf16> to vector<32x64xbf16>
    %cst_101 = arith.constant dense<0.000000e+00> : vector<32x64xf32>
    %190 = tpu.matmul %184, %189, %cst_101 {dimension_numbers = #tpu.dot_dimension_numbers<[1], [0], [0], [1], [0, 0, 1, 1], [], []>} : vector<32x32xbf16>, vector<32x64xbf16>, vector<32x64xf32> -> vector<32x64xf32>
    %191 = arith.addf %187, %190 : vector<32x64xf32>
    %c3_102 = arith.constant 3 : index
    %c0_103 = arith.constant 0 : index
    %c0_104 = arith.constant 0 : index
    %192 = vector.load %arg6[%c3_102, %c0_103, %c0_104] : memref<4x1x64xf32, #tpu.memory_space<vmem>>, vector<1x1x64xf32>
    %193 = vector.shape_cast %192 : vector<1x1x64xf32> to vector<1x64xf32>
    %194 = vector.broadcast %193 : vector<1x64xf32> to vector<32x64xf32>
    %195 = arith.addf %191, %194 : vector<32x64xf32>
    %196 = vector.extract_strided_slice %195 {offsets = [0, 0], sizes = [32, 32], strides = [1, 1]} : vector<32x64xf32> to vector<32x32xf32>
    %197 = math.tanh %196 : vector<32x32xf32>
    %198 = vector.extract_strided_slice %195 {offsets = [0, 32], sizes = [32, 32], strides = [1, 1]} : vector<32x64xf32> to vector<32x32xf32>
    %199 = arith.negf %198 : vector<32x32xf32>
    %200 = math.exp %199 : vector<32x32xf32>
    %cst_105 = arith.constant 1.000000e+00 : f32
    %201 = vector.broadcast %cst_105 : f32 to vector<32x32xf32>
    %202 = arith.addf %201, %200 : vector<32x32xf32>
    %203 = arith.divf %201, %202 : vector<32x32xf32>
    %204 = arith.mulf %197, %203 : vector<32x32xf32>
    %205 = arith.truncf %204 : vector<32x32xf32> to vector<32x32xbf16>
    %206 = vector.shape_cast %205 : vector<32x32xbf16> to vector<2x2x8x32xbf16>
    %207 = vector.shape_cast %206 : vector<2x2x8x32xbf16> to vector<32x32xbf16>
    %c3_106 = arith.constant 3 : index
    %c0_107 = arith.constant 0 : index
    %c0_108 = arith.constant 0 : index
    %208 = vector.load %arg7[%c3_106, %c0_107, %c0_108] : memref<4x32x64xbf16, #tpu.memory_space<vmem>>, vector<1x32x64xbf16>
    %209 = vector.shape_cast %208 : vector<1x32x64xbf16> to vector<32x64xbf16>
    %cst_109 = arith.constant dense<0.000000e+00> : vector<32x64xf32>
    %210 = tpu.matmul %207, %209, %cst_109 {dimension_numbers = #tpu.dot_dimension_numbers<[1], [0], [0], [1], [0, 0, 1, 1], [], []>} : vector<32x32xbf16>, vector<32x64xbf16>, vector<32x64xf32> -> vector<32x64xf32>
    %c3_110 = arith.constant 3 : index
    %c0_111 = arith.constant 0 : index
    %c0_112 = arith.constant 0 : index
    %211 = vector.load %arg8[%c3_110, %c0_111, %c0_112] : memref<4x1x64xf32, #tpu.memory_space<vmem>>, vector<1x1x64xf32>
    %212 = vector.shape_cast %211 : vector<1x1x64xf32> to vector<1x64xf32>
    %213 = vector.broadcast %212 : vector<1x64xf32> to vector<32x64xf32>
    %214 = arith.addf %210, %213 : vector<32x64xf32>
    %215 = arith.addf %156, %214 : vector<32x64xf32>
    %cst_113 = arith.constant 0.000000e+00 : f32
    %216 = vector.broadcast %cst_113 : f32 to vector<32x64xf32>
    %217 = arith.maximumf %215, %216 : vector<32x64xf32>
    %218 = arith.truncf %217 : vector<32x64xf32> to vector<32x64xbf16>
    %c0_114 = arith.constant 0 : index
    %c0_115 = arith.constant 0 : index
    %219 = vector.load %arg12[%c0_114, %c0_115] : memref<64x64xbf16, #tpu.memory_space<vmem>>, vector<64x64xbf16>
    %cst_116 = arith.constant dense<0.000000e+00> : vector<32x64xf32>
    %220 = tpu.matmul %218, %219, %cst_116 {dimension_numbers = #tpu.dot_dimension_numbers<[1], [0], [0], [1], [0, 0, 1, 1], [], []>} : vector<32x64xbf16>, vector<64x64xbf16>, vector<32x64xf32> -> vector<32x64xf32>
    %c0_117 = arith.constant 0 : index
    %c0_118 = arith.constant 0 : index
    %221 = vector.load %arg13[%c0_117, %c0_118] : memref<1x64xf32, #tpu.memory_space<vmem>>, vector<1x64xf32>
    %222 = vector.broadcast %221 : vector<1x64xf32> to vector<32x64xf32>
    %223 = arith.addf %220, %222 : vector<32x64xf32>
    %cst_119 = arith.constant 0.000000e+00 : f32
    %224 = vector.broadcast %cst_119 : f32 to vector<32x64xf32>
    %225 = arith.maximumf %223, %224 : vector<32x64xf32>
    %226 = arith.truncf %225 : vector<32x64xf32> to vector<32x64xbf16>
    %c0_120 = arith.constant 0 : index
    %c0_121 = arith.constant 0 : index
    %227 = vector.load %arg14[%c0_120, %c0_121] : memref<64x12xbf16, #tpu.memory_space<vmem>>, vector<64x12xbf16>
    %cst_122 = arith.constant dense<0.000000e+00> : vector<32x12xf32>
    %228 = tpu.matmul %226, %227, %cst_122 {dimension_numbers = #tpu.dot_dimension_numbers<[1], [0], [0], [1], [0, 0, 1, 1], [], []>} : vector<32x64xbf16>, vector<64x12xbf16>, vector<32x12xf32> -> vector<32x12xf32>
    %c0_123 = arith.constant 0 : index
    %c0_124 = arith.constant 0 : index
    %229 = vector.load %arg15[%c0_123, %c0_124] : memref<1x12xf32, #tpu.memory_space<vmem>>, vector<1x12xf32>
    %230 = vector.broadcast %229 : vector<1x12xf32> to vector<32x12xf32>
    %231 = arith.addf %228, %230 : vector<32x12xf32>
    %232 = vector.shape_cast %231 : vector<32x12xf32> to vector<2x2x8x12xf32>
    %c0_125 = arith.constant 0 : index
    %c0_126 = arith.constant 0 : index
    %c0_127 = arith.constant 0 : index
    %c0_128 = arith.constant 0 : index
    %233 = vector.load %arg16[%c0_125, %c0_126, %c0_127, %c0_128] : memref<2x2x8x12xf32, #tpu.memory_space<vmem>>, vector<2x2x8x12xf32>
    tpu.vector_store %arg16[%c0_125, %c0_126, %c0_127, %c0_128], %232 {strides = array<i32>} : memref<2x2x8x12xf32, #tpu.memory_space<vmem>>, vector<2x2x8x12xf32>,
    return
  }
  func.func @transform_0(%arg0: i32) -> (i32, i32, i32, i32) {
    %c0_i32 = arith.constant 0 : i32
    %c0_i32_0 = arith.constant 0 : i32
    %c0_i32_1 = arith.constant 0 : i32
    %c0_i32_2 = arith.constant 0 : i32
    return %arg0, %c0_i32, %c0_i32_0, %c0_i32_1 : i32, i32, i32, i32
  }
  func.func @transform_1(%arg0: i32) -> (i32, i32) {
    %c0_i32 = arith.constant 0 : i32
    %c0_i32_0 = arith.constant 0 : i32
    %c0_i32_1 = arith.constant 0 : i32
    return %c0_i32, %c0_i32_0 : i32, i32
  }
  func.func @transform_2(%arg0: i32) -> (i32, i32) {
    %c0_i32 = arith.constant 0 : i32
    %c0_i32_0 = arith.constant 0 : i32
    %c0_i32_1 = arith.constant 0 : i32
    return %c0_i32, %c0_i32_0 : i32, i32
  }
  func.func @transform_3(%arg0: i32) -> (i32, i32, i32) {
    %c0_i32 = arith.constant 0 : i32
    %c0_i32_0 = arith.constant 0 : i32
    %c0_i32_1 = arith.constant 0 : i32
    %c0_i32_2 = arith.constant 0 : i32
    return %c0_i32, %c0_i32_0, %c0_i32_1 : i32, i32, i32
  }
  func.func @transform_4(%arg0: i32) -> (i32, i32, i32) {
    %c0_i32 = arith.constant 0 : i32
    %c0_i32_0 = arith.constant 0 : i32
    %c0_i32_1 = arith.constant 0 : i32
    %c0_i32_2 = arith.constant 0 : i32
    return %c0_i32, %c0_i32_0, %c0_i32_1 : i32, i32, i32
  }
  func.func @transform_5(%arg0: i32) -> (i32, i32, i32) {
    %c0_i32 = arith.constant 0 : i32
    %c0_i32_0 = arith.constant 0 : i32
    %c0_i32_1 = arith.constant 0 : i32
    %c0_i32_2 = arith.constant 0 : i32
    return %c0_i32, %c0_i32_0, %c0_i32_1 : i32, i32, i32
  }
  func.func @transform_6(%arg0: i32) -> (i32, i32, i32) {
    %c0_i32 = arith.constant 0 : i32
    %c0_i32_0 = arith.constant 0 : i32
    %c0_i32_1 = arith.constant 0 : i32
    %c0_i32_2 = arith.constant 0 : i32
    return %c0_i32, %c0_i32_0, %c0_i32_1 : i32, i32, i32
  }
  func.func @transform_7(%arg0: i32) -> (i32, i32, i32) {
    %c0_i32 = arith.constant 0 : i32
    %c0_i32_0 = arith.constant 0 : i32
    %c0_i32_1 = arith.constant 0 : i32
    %c0_i32_2 = arith.constant 0 : i32
    return %c0_i32, %c0_i32_0, %c0_i32_1 : i32, i32, i32
  }
  func.func @transform_8(%arg0: i32) -> (i32, i32, i32) {
    %c0_i32 = arith.constant 0 : i32
    %c0_i32_0 = arith.constant 0 : i32
    %c0_i32_1 = arith.constant 0 : i32
    %c0_i32_2 = arith.constant 0 : i32
    return %c0_i32, %c0_i32_0, %c0_i32_1 : i32, i32, i32
  }
  func.func @transform_9(%arg0: i32) -> (i32, i32, i32) {
    %c0_i32 = arith.constant 0 : i32
    %c0_i32_0 = arith.constant 0 : i32
    %c0_i32_1 = arith.constant 0 : i32
    %c0_i32_2 = arith.constant 0 : i32
    return %c0_i32, %c0_i32_0, %c0_i32_1 : i32, i32, i32
  }
  func.func @transform_10(%arg0: i32) -> (i32, i32, i32) {
    %c0_i32 = arith.constant 0 : i32
    %c0_i32_0 = arith.constant 0 : i32
    %c0_i32_1 = arith.constant 0 : i32
    %c0_i32_2 = arith.constant 0 : i32
    return %c0_i32, %c0_i32_0, %c0_i32_1 : i32, i32, i32
  }
  func.func @transform_11(%arg0: i32) -> (i32, i32) {
    %c0_i32 = arith.constant 0 : i32
    %c0_i32_0 = arith.constant 0 : i32
    %c0_i32_1 = arith.constant 0 : i32
    return %c0_i32, %c0_i32_0 : i32, i32
  }
  func.func @transform_12(%arg0: i32) -> (i32, i32) {
    %c0_i32 = arith.constant 0 : i32
    %c0_i32_0 = arith.constant 0 : i32
    %c0_i32_1 = arith.constant 0 : i32
    return %c0_i32, %c0_i32_0 : i32, i32
  }
  func.func @transform_13(%arg0: i32) -> (i32, i32) {
    %c0_i32 = arith.constant 0 : i32
    %c0_i32_0 = arith.constant 0 : i32
    %c0_i32_1 = arith.constant 0 : i32
    return %c0_i32, %c0_i32_0 : i32, i32
  }
  func.func @transform_14(%arg0: i32) -> (i32, i32) {
    %c0_i32 = arith.constant 0 : i32
    %c0_i32_0 = arith.constant 0 : i32
    %c0_i32_1 = arith.constant 0 : i32
    return %c0_i32, %c0_i32_0 : i32, i32
  }
  func.func @transform_15(%arg0: i32) -> (i32, i32, i32, i32) {
    %c0_i32 = arith.constant 0 : i32
    %c0_i32_0 = arith.constant 0 : i32
    %c0_i32_1 = arith.constant 0 : i32
    %c0_i32_2 = arith.constant 0 : i32
    return %arg0, %c0_i32, %c0_i32_0, %c0_i32_1 : i32, i32, i32, i32
  }
}

module attributes {stable_mosaic.version = 11 : i64} {
  func.func @_fused_wavenet_kernel(%arg0: i32, %arg1: memref<2x8x8x32xbf16, #tpu.memory_space<vmem>>, %arg2: memref<8x8xbf16, #tpu.memory_space<vmem>>, %arg3: memref<8x8xbf16, #tpu.memory_space<vmem>>, %arg4: memref<4x32x64xbf16, #tpu.memory_space<vmem>>, %arg5: memref<4x32x64xbf16, #tpu.memory_space<vmem>>, %arg6: memref<4x1x64xf32, #tpu.memory_space<vmem>>, %arg7: memref<4x32x64xbf16, #tpu.memory_space<vmem>>, %arg8: memref<4x1x64xf32, #tpu.memory_space<vmem>>, %arg9: memref<4x32x32xbf16, #tpu.memory_space<vmem>>, %arg10: memref<4x32x32xbf16, #tpu.memory_space<vmem>>, %arg11: memref<4x1x32xf32, #tpu.memory_space<vmem>>, %arg12: memref<64x64xbf16, #tpu.memory_space<vmem>>, %arg13: memref<1x64xf32, #tpu.memory_space<vmem>>, %arg14: memref<64x12xbf16, #tpu.memory_space<vmem>>, %arg15: memref<1x12xf32, #tpu.memory_space<vmem>>, %arg16: memref<2x2x8x12xf32, #tpu.memory_space<vmem>>) attributes {dimension_semantics = [#tpu.dimension_semantics<parallel>], iteration_bounds = array<i64: 2>, scalar_prefetch = 0 : i64, scratch_operands = 0 : i64, tpu.core_type = #tpu.core_type<tc>, window_params = [{transform_indices = @transform_0, window_bounds = array<i64: 2, 8, 8, 32>}, {pipeline_mode = #tpu.pipeline_mode<synchronous>, transform_indices = @transform_1, window_bounds = array<i64: 8, 8>}, {pipeline_mode = #tpu.pipeline_mode<synchronous>, transform_indices = @transform_2, window_bounds = array<i64: 8, 8>}, {pipeline_mode = #tpu.pipeline_mode<synchronous>, transform_indices = @transform_3, window_bounds = array<i64: 4, 32, 64>}, {pipeline_mode = #tpu.pipeline_mode<synchronous>, transform_indices = @transform_4, window_bounds = array<i64: 4, 32, 64>}, {pipeline_mode = #tpu.pipeline_mode<synchronous>, transform_indices = @transform_5, window_bounds = array<i64: 4, 1, 64>}, {pipeline_mode = #tpu.pipeline_mode<synchronous>, transform_indices = @transform_6, window_bounds = array<i64: 4, 32, 64>}, {pipeline_mode = #tpu.pipeline_mode<synchronous>, transform_indices = @transform_7, window_bounds = array<i64: 4, 1, 64>}, {pipeline_mode = #tpu.pipeline_mode<synchronous>, transform_indices = @transform_8, window_bounds = array<i64: 4, 32, 32>}, {pipeline_mode = #tpu.pipeline_mode<synchronous>, transform_indices = @transform_9, window_bounds = array<i64: 4, 32, 32>}, {pipeline_mode = #tpu.pipeline_mode<synchronous>, transform_indices = @transform_10, window_bounds = array<i64: 4, 1, 32>}, {pipeline_mode = #tpu.pipeline_mode<synchronous>, transform_indices = @transform_11, window_bounds = array<i64: 64, 64>}, {pipeline_mode = #tpu.pipeline_mode<synchronous>, transform_indices = @transform_12, window_bounds = array<i64: 1, 64>}, {pipeline_mode = #tpu.pipeline_mode<synchronous>, transform_indices = @transform_13, window_bounds = array<i64: 64, 12>}, {pipeline_mode = #tpu.pipeline_mode<synchronous>, transform_indices = @transform_14, window_bounds = array<i64: 1, 12>}, {transform_indices = @transform_15, window_bounds = array<i64: 2, 2, 8, 12>}]} {
    %c0 = arith.constant 0 : index
    %c0_0 = arith.constant 0 : index
    %c0_1 = arith.constant 0 : index
    %c0_2 = arith.constant 0 : index
    %0 = vector.load %arg1[%c0, %c0_0, %c0_1, %c0_2] : memref<2x8x8x32xbf16, #tpu.memory_space<vmem>>, vector<2x8x8x32xbf16>
    %c0_3 = arith.constant 0 : index
    %c0_4 = arith.constant 0 : index
    %1 = vector.load %arg3[%c0_3, %c0_4] : memref<8x8xbf16, #tpu.memory_space<vmem>>, vector<8x8xbf16>
    %2 = vector.shape_cast %1 : vector<8x8xbf16> to vector<1x8x8xbf16>
    %3 = vector.broadcast %2 : vector<1x8x8xbf16> to vector<14x8x8xbf16>
    %4 = vector.extract_strided_slice %0 {offsets = [0, 0, 0, 0], sizes = [2, 7, 8, 32], strides = [1, 1, 1, 1]} : vector<2x8x8x32xbf16> to vector<2x7x8x32xbf16>
    %5 = vector.shape_cast %4 : vector<2x7x8x32xbf16> to vector<112x32xbf16>
    %6 = vector.extract_strided_slice %0 {offsets = [0, 1, 0, 0], sizes = [2, 7, 8, 32], strides = [1, 1, 1, 1]} : vector<2x8x8x32xbf16> to vector<2x7x8x32xbf16>
    %7 = vector.shape_cast %6 : vector<2x7x8x32xbf16> to vector<112x32xbf16>
    %c0_5 = arith.constant 0 : index
    %c0_6 = arith.constant 0 : index
    %c0_7 = arith.constant 0 : index
    %8 = vector.load %arg4[%c0_5, %c0_6, %c0_7] : memref<4x32x64xbf16, #tpu.memory_space<vmem>>, vector<1x32x64xbf16>
    %9 = vector.shape_cast %8 : vector<1x32x64xbf16> to vector<32x64xbf16>
    %cst = arith.constant dense<0.000000e+00> : vector<112x64xf32>
    %10 = tpu.matmul %5, %9, %cst {dimension_numbers = #tpu.dot_dimension_numbers<[1], [0], [0], [1], [0, 0, 1, 1], [], []>} : vector<112x32xbf16>, vector<32x64xbf16>, vector<112x64xf32> -> vector<112x64xf32>
    %c0_8 = arith.constant 0 : index
    %c0_9 = arith.constant 0 : index
    %c0_10 = arith.constant 0 : index
    %11 = vector.load %arg5[%c0_8, %c0_9, %c0_10] : memref<4x32x64xbf16, #tpu.memory_space<vmem>>, vector<1x32x64xbf16>
    %12 = vector.shape_cast %11 : vector<1x32x64xbf16> to vector<32x64xbf16>
    %cst_11 = arith.constant dense<0.000000e+00> : vector<112x64xf32>
    %13 = tpu.matmul %7, %12, %cst_11 {dimension_numbers = #tpu.dot_dimension_numbers<[1], [0], [0], [1], [0, 0, 1, 1], [], []>} : vector<112x32xbf16>, vector<32x64xbf16>, vector<112x64xf32> -> vector<112x64xf32>
    %14 = arith.addf %10, %13 : vector<112x64xf32>
    %c0_12 = arith.constant 0 : index
    %c0_13 = arith.constant 0 : index
    %c0_14 = arith.constant 0 : index
    %15 = vector.load %arg6[%c0_12, %c0_13, %c0_14] : memref<4x1x64xf32, #tpu.memory_space<vmem>>, vector<1x1x64xf32>
    %16 = vector.shape_cast %15 : vector<1x1x64xf32> to vector<1x64xf32>
    %17 = vector.broadcast %16 : vector<1x64xf32> to vector<112x64xf32>
    %18 = arith.addf %14, %17 : vector<112x64xf32>
    %19 = vector.extract_strided_slice %18 {offsets = [0, 0], sizes = [112, 32], strides = [1, 1]} : vector<112x64xf32> to vector<112x32xf32>
    %20 = math.tanh %19 : vector<112x32xf32>
    %21 = vector.extract_strided_slice %18 {offsets = [0, 32], sizes = [112, 32], strides = [1, 1]} : vector<112x64xf32> to vector<112x32xf32>
    %22 = arith.negf %21 : vector<112x32xf32>
    %23 = math.exp %22 : vector<112x32xf32>
    %cst_15 = arith.constant 1.000000e+00 : f32
    %24 = vector.broadcast %cst_15 : f32 to vector<112x32xf32>
    %25 = arith.addf %24, %23 : vector<112x32xf32>
    %26 = arith.divf %24, %25 : vector<112x32xf32>
    %27 = arith.mulf %20, %26 : vector<112x32xf32>
    %28 = arith.truncf %27 : vector<112x32xf32> to vector<112x32xbf16>
    %29 = vector.shape_cast %28 : vector<112x32xbf16> to vector<2x7x8x32xbf16>
    %30 = vector.extract_strided_slice %29 {offsets = [0, 5, 0, 0], sizes = [2, 2, 8, 32], strides = [1, 1, 1, 1]} : vector<2x7x8x32xbf16> to vector<2x2x8x32xbf16>
    %31 = vector.shape_cast %30 : vector<2x2x8x32xbf16> to vector<32x32xbf16>
    %c0_16 = arith.constant 0 : index
    %c0_17 = arith.constant 0 : index
    %c0_18 = arith.constant 0 : index
    %32 = vector.load %arg7[%c0_16, %c0_17, %c0_18] : memref<4x32x64xbf16, #tpu.memory_space<vmem>>, vector<1x32x64xbf16>
    %33 = vector.shape_cast %32 : vector<1x32x64xbf16> to vector<32x64xbf16>
    %cst_19 = arith.constant dense<0.000000e+00> : vector<32x64xf32>
    %34 = tpu.matmul %31, %33, %cst_19 {dimension_numbers = #tpu.dot_dimension_numbers<[1], [0], [0], [1], [0, 0, 1, 1], [], []>} : vector<32x32xbf16>, vector<32x64xbf16>, vector<32x64xf32> -> vector<32x64xf32>
    %c0_20 = arith.constant 0 : index
    %c0_21 = arith.constant 0 : index
    %c0_22 = arith.constant 0 : index
    %35 = vector.load %arg8[%c0_20, %c0_21, %c0_22] : memref<4x1x64xf32, #tpu.memory_space<vmem>>, vector<1x1x64xf32>
    %36 = vector.shape_cast %35 : vector<1x1x64xf32> to vector<1x64xf32>
    %37 = vector.broadcast %36 : vector<1x64xf32> to vector<32x64xf32>
    %38 = arith.addf %34, %37 : vector<32x64xf32>
    %39 = vector.shape_cast %28 : vector<112x32xbf16> to vector<14x8x32xbf16>
    "tpu.trace_start"() <{level = 10 : i32, message = "gwv,gvc->gwc"}> : () -> ()
    %cst_23 = arith.constant dense<0.000000e+00> : vector<14x8x32xf32>
    %40 = tpu.matmul %3, %39, %cst_23 {dimension_numbers = #tpu.dot_dimension_numbers<[2], [1], [1], [2], [0, 0, 0, 1, 1, 2], [0], [0]>} : vector<14x8x8xbf16>, vector<14x8x32xbf16>, vector<14x8x32xf32> -> vector<14x8x32xf32>
    "tpu.trace_stop"() : () -> ()
    %41 = vector.shape_cast %40 : vector<14x8x32xf32> to vector<112x32xf32>
    %42 = arith.truncf %41 : vector<112x32xf32> to vector<112x32xbf16>
    %c0_24 = arith.constant 0 : index
    %c0_25 = arith.constant 0 : index
    %c0_26 = arith.constant 0 : index
    %43 = vector.load %arg9[%c0_24, %c0_25, %c0_26] : memref<4x32x32xbf16, #tpu.memory_space<vmem>>, vector<1x32x32xbf16>
    %44 = vector.shape_cast %43 : vector<1x32x32xbf16> to vector<32x32xbf16>
    %cst_27 = arith.constant dense<0.000000e+00> : vector<112x32xf32>
    %45 = tpu.matmul %28, %44, %cst_27 {dimension_numbers = #tpu.dot_dimension_numbers<[1], [0], [0], [1], [0, 0, 1, 1], [], []>} : vector<112x32xbf16>, vector<32x32xbf16>, vector<112x32xf32> -> vector<112x32xf32>
    %c0_28 = arith.constant 0 : index
    %c0_29 = arith.constant 0 : index
    %c0_30 = arith.constant 0 : index
    %46 = vector.load %arg10[%c0_28, %c0_29, %c0_30] : memref<4x32x32xbf16, #tpu.memory_space<vmem>>, vector<1x32x32xbf16>
    %47 = vector.shape_cast %46 : vector<1x32x32xbf16> to vector<32x32xbf16>
    %cst_31 = arith.constant dense<0.000000e+00> : vector<112x32xf32>
    %48 = tpu.matmul %42, %47, %cst_31 {dimension_numbers = #tpu.dot_dimension_numbers<[1], [0], [0], [1], [0, 0, 1, 1], [], []>} : vector<112x32xbf16>, vector<32x32xbf16>, vector<112x32xf32> -> vector<112x32xf32>
    %49 = arith.addf %45, %48 : vector<112x32xf32>
    %c0_32 = arith.constant 0 : index
    %c0_33 = arith.constant 0 : index
    %c0_34 = arith.constant 0 : index
    %50 = vector.load %arg11[%c0_32, %c0_33, %c0_34] : memref<4x1x32xf32, #tpu.memory_space<vmem>>, vector<1x1x32xf32>
    %51 = vector.shape_cast %50 : vector<1x1x32xf32> to vector<1x32xf32>
    %52 = vector.broadcast %51 : vector<1x32xf32> to vector<112x32xf32>
    %53 = arith.addf %49, %52 : vector<112x32xf32>
    %54 = arith.extf %7 : vector<112x32xbf16> to vector<112x32xf32>
    %55 = arith.addf %53, %54 : vector<112x32xf32>
    %56 = arith.truncf %55 : vector<112x32xf32> to vector<112x32xbf16>
    %57 = vector.shape_cast %56 : vector<112x32xbf16> to vector<2x7x8x32xbf16>
    %58 = vector.extract_strided_slice %57 {offsets = [0, 0, 0, 0], sizes = [2, 5, 8, 32], strides = [1, 1, 1, 1]} : vector<2x7x8x32xbf16> to vector<2x5x8x32xbf16>
    %59 = vector.shape_cast %58 : vector<2x5x8x32xbf16> to vector<80x32xbf16>
    %60 = vector.extract_strided_slice %57 {offsets = [0, 2, 0, 0], sizes = [2, 5, 8, 32], strides = [1, 1, 1, 1]} : vector<2x7x8x32xbf16> to vector<2x5x8x32xbf16>
    %61 = vector.shape_cast %60 : vector<2x5x8x32xbf16> to vector<80x32xbf16>
    %c1 = arith.constant 1 : index
    %c0_35 = arith.constant 0 : index
    %c0_36 = arith.constant 0 : index
    %62 = vector.load %arg4[%c1, %c0_35, %c0_36] : memref<4x32x64xbf16, #tpu.memory_space<vmem>>, vector<1x32x64xbf16>
    %63 = vector.shape_cast %62 : vector<1x32x64xbf16> to vector<32x64xbf16>
    %cst_37 = arith.constant dense<0.000000e+00> : vector<80x64xf32>
    %64 = tpu.matmul %59, %63, %cst_37 {dimension_numbers = #tpu.dot_dimension_numbers<[1], [0], [0], [1], [0, 0, 1, 1], [], []>} : vector<80x32xbf16>, vector<32x64xbf16>, vector<80x64xf32> -> vector<80x64xf32>
    %c1_38 = arith.constant 1 : index
    %c0_39 = arith.constant 0 : index
    %c0_40 = arith.constant 0 : index
    %65 = vector.load %arg5[%c1_38, %c0_39, %c0_40] : memref<4x32x64xbf16, #tpu.memory_space<vmem>>, vector<1x32x64xbf16>
    %66 = vector.shape_cast %65 : vector<1x32x64xbf16> to vector<32x64xbf16>
    %cst_41 = arith.constant dense<0.000000e+00> : vector<80x64xf32>
    %67 = tpu.matmul %61, %66, %cst_41 {dimension_numbers = #tpu.dot_dimension_numbers<[1], [0], [0], [1], [0, 0, 1, 1], [], []>} : vector<80x32xbf16>, vector<32x64xbf16>, vector<80x64xf32> -> vector<80x64xf32>
    %68 = arith.addf %64, %67 : vector<80x64xf32>
    %c1_42 = arith.constant 1 : index
    %c0_43 = arith.constant 0 : index
    %c0_44 = arith.constant 0 : index
    %69 = vector.load %arg6[%c1_42, %c0_43, %c0_44] : memref<4x1x64xf32, #tpu.memory_space<vmem>>, vector<1x1x64xf32>
    %70 = vector.shape_cast %69 : vector<1x1x64xf32> to vector<1x64xf32>
    %71 = vector.broadcast %70 : vector<1x64xf32> to vector<80x64xf32>
    %72 = arith.addf %68, %71 : vector<80x64xf32>
    %73 = vector.extract_strided_slice %72 {offsets = [0, 0], sizes = [80, 32], strides = [1, 1]} : vector<80x64xf32> to vector<80x32xf32>
    %74 = math.tanh %73 : vector<80x32xf32>
    %75 = vector.extract_strided_slice %72 {offsets = [0, 32], sizes = [80, 32], strides = [1, 1]} : vector<80x64xf32> to vector<80x32xf32>
    %76 = arith.negf %75 : vector<80x32xf32>
    %77 = math.exp %76 : vector<80x32xf32>
    %cst_45 = arith.constant 1.000000e+00 : f32
    %78 = vector.broadcast %cst_45 : f32 to vector<80x32xf32>
    %79 = arith.addf %78, %77 : vector<80x32xf32>
    %80 = arith.divf %78, %79 : vector<80x32xf32>
    %81 = arith.mulf %74, %80 : vector<80x32xf32>
    %82 = arith.truncf %81 : vector<80x32xf32> to vector<80x32xbf16>
    %83 = vector.shape_cast %82 : vector<80x32xbf16> to vector<2x5x8x32xbf16>
    %84 = vector.extract_strided_slice %83 {offsets = [0, 3, 0, 0], sizes = [2, 2, 8, 32], strides = [1, 1, 1, 1]} : vector<2x5x8x32xbf16> to vector<2x2x8x32xbf16>
    %85 = vector.shape_cast %84 : vector<2x2x8x32xbf16> to vector<32x32xbf16>
    %c1_46 = arith.constant 1 : index
    %c0_47 = arith.constant 0 : index
    %c0_48 = arith.constant 0 : index
    %86 = vector.load %arg7[%c1_46, %c0_47, %c0_48] : memref<4x32x64xbf16, #tpu.memory_space<vmem>>, vector<1x32x64xbf16>
    %87 = vector.shape_cast %86 : vector<1x32x64xbf16> to vector<32x64xbf16>
    %cst_49 = arith.constant dense<0.000000e+00> : vector<32x64xf32>
    %88 = tpu.matmul %85, %87, %cst_49 {dimension_numbers = #tpu.dot_dimension_numbers<[1], [0], [0], [1], [0, 0, 1, 1], [], []>} : vector<32x32xbf16>, vector<32x64xbf16>, vector<32x64xf32> -> vector<32x64xf32>
    %c1_50 = arith.constant 1 : index
    %c0_51 = arith.constant 0 : index
    %c0_52 = arith.constant 0 : index
    %89 = vector.load %arg8[%c1_50, %c0_51, %c0_52] : memref<4x1x64xf32, #tpu.memory_space<vmem>>, vector<1x1x64xf32>
    %90 = vector.shape_cast %89 : vector<1x1x64xf32> to vector<1x64xf32>
    %91 = vector.broadcast %90 : vector<1x64xf32> to vector<32x64xf32>
    %92 = arith.addf %88, %91 : vector<32x64xf32>
    %93 = arith.addf %38, %92 : vector<32x64xf32>
    %94 = vector.shape_cast %82 : vector<80x32xbf16> to vector<10x8x32xbf16>
    %95 = vector.extract_strided_slice %3 {offsets = [0, 0, 0], sizes = [10, 8, 8], strides = [1, 1, 1]} : vector<14x8x8xbf16> to vector<10x8x8xbf16>
    "tpu.trace_start"() <{level = 10 : i32, message = "gwv,gvc->gwc"}> : () -> ()
    %cst_53 = arith.constant dense<0.000000e+00> : vector<10x8x32xf32>
    %96 = tpu.matmul %95, %94, %cst_53 {dimension_numbers = #tpu.dot_dimension_numbers<[2], [1], [1], [2], [0, 0, 0, 1, 1, 2], [0], [0]>} : vector<10x8x8xbf16>, vector<10x8x32xbf16>, vector<10x8x32xf32> -> vector<10x8x32xf32>
    "tpu.trace_stop"() : () -> ()
    %97 = vector.shape_cast %96 : vector<10x8x32xf32> to vector<80x32xf32>
    %98 = arith.truncf %97 : vector<80x32xf32> to vector<80x32xbf16>
    %c1_54 = arith.constant 1 : index
    %c0_55 = arith.constant 0 : index
    %c0_56 = arith.constant 0 : index
    %99 = vector.load %arg9[%c1_54, %c0_55, %c0_56] : memref<4x32x32xbf16, #tpu.memory_space<vmem>>, vector<1x32x32xbf16>
    %100 = vector.shape_cast %99 : vector<1x32x32xbf16> to vector<32x32xbf16>
    %cst_57 = arith.constant dense<0.000000e+00> : vector<80x32xf32>
    %101 = tpu.matmul %82, %100, %cst_57 {dimension_numbers = #tpu.dot_dimension_numbers<[1], [0], [0], [1], [0, 0, 1, 1], [], []>} : vector<80x32xbf16>, vector<32x32xbf16>, vector<80x32xf32> -> vector<80x32xf32>
    %c1_58 = arith.constant 1 : index
    %c0_59 = arith.constant 0 : index
    %c0_60 = arith.constant 0 : index
    %102 = vector.load %arg10[%c1_58, %c0_59, %c0_60] : memref<4x32x32xbf16, #tpu.memory_space<vmem>>, vector<1x32x32xbf16>
    %103 = vector.shape_cast %102 : vector<1x32x32xbf16> to vector<32x32xbf16>
    %cst_61 = arith.constant dense<0.000000e+00> : vector<80x32xf32>
    %104 = tpu.matmul %98, %103, %cst_61 {dimension_numbers = #tpu.dot_dimension_numbers<[1], [0], [0], [1], [0, 0, 1, 1], [], []>} : vector<80x32xbf16>, vector<32x32xbf16>, vector<80x32xf32> -> vector<80x32xf32>
    %105 = arith.addf %101, %104 : vector<80x32xf32>
    %c1_62 = arith.constant 1 : index
    %c0_63 = arith.constant 0 : index
    %c0_64 = arith.constant 0 : index
    %106 = vector.load %arg11[%c1_62, %c0_63, %c0_64] : memref<4x1x32xf32, #tpu.memory_space<vmem>>, vector<1x1x32xf32>
    %107 = vector.shape_cast %106 : vector<1x1x32xf32> to vector<1x32xf32>
    %108 = vector.broadcast %107 : vector<1x32xf32> to vector<80x32xf32>
    %109 = arith.addf %105, %108 : vector<80x32xf32>
    %110 = arith.extf %61 : vector<80x32xbf16> to vector<80x32xf32>
    %111 = arith.addf %109, %110 : vector<80x32xf32>
    %112 = arith.truncf %111 : vector<80x32xf32> to vector<80x32xbf16>
    %113 = vector.shape_cast %112 : vector<80x32xbf16> to vector<2x5x8x32xbf16>
    %114 = vector.extract_strided_slice %113 {offsets = [0, 0, 0, 0], sizes = [2, 4, 8, 32], strides = [1, 1, 1, 1]} : vector<2x5x8x32xbf16> to vector<2x4x8x32xbf16>
    %115 = vector.shape_cast %114 : vector<2x4x8x32xbf16> to vector<64x32xbf16>
    %116 = vector.extract_strided_slice %113 {offsets = [0, 1, 0, 0], sizes = [2, 4, 8, 32], strides = [1, 1, 1, 1]} : vector<2x5x8x32xbf16> to vector<2x4x8x32xbf16>
    %117 = vector.shape_cast %116 : vector<2x4x8x32xbf16> to vector<64x32xbf16>
    %c2 = arith.constant 2 : index
    %c0_65 = arith.constant 0 : index
    %c0_66 = arith.constant 0 : index
    %118 = vector.load %arg4[%c2, %c0_65, %c0_66] : memref<4x32x64xbf16, #tpu.memory_space<vmem>>, vector<1x32x64xbf16>
    %119 = vector.shape_cast %118 : vector<1x32x64xbf16> to vector<32x64xbf16>
    %cst_67 = arith.constant dense<0.000000e+00> : vector<64x64xf32>
    %120 = tpu.matmul %115, %119, %cst_67 {dimension_numbers = #tpu.dot_dimension_numbers<[1], [0], [0], [1], [0, 0, 1, 1], [], []>} : vector<64x32xbf16>, vector<32x64xbf16>, vector<64x64xf32> -> vector<64x64xf32>
    %c2_68 = arith.constant 2 : index
    %c0_69 = arith.constant 0 : index
    %c0_70 = arith.constant 0 : index
    %121 = vector.load %arg5[%c2_68, %c0_69, %c0_70] : memref<4x32x64xbf16, #tpu.memory_space<vmem>>, vector<1x32x64xbf16>
    %122 = vector.shape_cast %121 : vector<1x32x64xbf16> to vector<32x64xbf16>
    %cst_71 = arith.constant dense<0.000000e+00> : vector<64x64xf32>
    %123 = tpu.matmul %117, %122, %cst_71 {dimension_numbers = #tpu.dot_dimension_numbers<[1], [0], [0], [1], [0, 0, 1, 1], [], []>} : vector<64x32xbf16>, vector<32x64xbf16>, vector<64x64xf32> -> vector<64x64xf32>
    %124 = arith.addf %120, %123 : vector<64x64xf32>
    %c2_72 = arith.constant 2 : index
    %c0_73 = arith.constant 0 : index
    %c0_74 = arith.constant 0 : index
    %125 = vector.load %arg6[%c2_72, %c0_73, %c0_74] : memref<4x1x64xf32, #tpu.memory_space<vmem>>, vector<1x1x64xf32>
    %126 = vector.shape_cast %125 : vector<1x1x64xf32> to vector<1x64xf32>
    %127 = vector.broadcast %126 : vector<1x64xf32> to vector<64x64xf32>
    %128 = arith.addf %124, %127 : vector<64x64xf32>
    %129 = vector.extract_strided_slice %128 {offsets = [0, 0], sizes = [64, 32], strides = [1, 1]} : vector<64x64xf32> to vector<64x32xf32>
    %130 = math.tanh %129 : vector<64x32xf32>
    %131 = vector.extract_strided_slice %128 {offsets = [0, 32], sizes = [64, 32], strides = [1, 1]} : vector<64x64xf32> to vector<64x32xf32>
    %132 = arith.negf %131 : vector<64x32xf32>
    %133 = math.exp %132 : vector<64x32xf32>
    %cst_75 = arith.constant 1.000000e+00 : f32
    %134 = vector.broadcast %cst_75 : f32 to vector<64x32xf32>
    %135 = arith.addf %134, %133 : vector<64x32xf32>
    %136 = arith.divf %134, %135 : vector<64x32xf32>
    %137 = arith.mulf %130, %136 : vector<64x32xf32>
    %138 = arith.truncf %137 : vector<64x32xf32> to vector<64x32xbf16>
    %139 = vector.shape_cast %138 : vector<64x32xbf16> to vector<2x4x8x32xbf16>
    %140 = vector.extract_strided_slice %139 {offsets = [0, 2, 0, 0], sizes = [2, 2, 8, 32], strides = [1, 1, 1, 1]} : vector<2x4x8x32xbf16> to vector<2x2x8x32xbf16>
    %141 = vector.shape_cast %140 : vector<2x2x8x32xbf16> to vector<32x32xbf16>
    %c2_76 = arith.constant 2 : index
    %c0_77 = arith.constant 0 : index
    %c0_78 = arith.constant 0 : index
    %142 = vector.load %arg7[%c2_76, %c0_77, %c0_78] : memref<4x32x64xbf16, #tpu.memory_space<vmem>>, vector<1x32x64xbf16>
    %143 = vector.shape_cast %142 : vector<1x32x64xbf16> to vector<32x64xbf16>
    %cst_79 = arith.constant dense<0.000000e+00> : vector<32x64xf32>
    %144 = tpu.matmul %141, %143, %cst_79 {dimension_numbers = #tpu.dot_dimension_numbers<[1], [0], [0], [1], [0, 0, 1, 1], [], []>} : vector<32x32xbf16>, vector<32x64xbf16>, vector<32x64xf32> -> vector<32x64xf32>
    %c2_80 = arith.constant 2 : index
    %c0_81 = arith.constant 0 : index
    %c0_82 = arith.constant 0 : index
    %145 = vector.load %arg8[%c2_80, %c0_81, %c0_82] : memref<4x1x64xf32, #tpu.memory_space<vmem>>, vector<1x1x64xf32>
    %146 = vector.shape_cast %145 : vector<1x1x64xf32> to vector<1x64xf32>
    %147 = vector.broadcast %146 : vector<1x64xf32> to vector<32x64xf32>
    %148 = arith.addf %144, %147 : vector<32x64xf32>
    %149 = arith.addf %93, %148 : vector<32x64xf32>
    %150 = vector.shape_cast %138 : vector<64x32xbf16> to vector<8x8x32xbf16>
    %151 = vector.extract_strided_slice %3 {offsets = [0, 0, 0], sizes = [8, 8, 8], strides = [1, 1, 1]} : vector<14x8x8xbf16> to vector<8x8x8xbf16>
    "tpu.trace_start"() <{level = 10 : i32, message = "gwv,gvc->gwc"}> : () -> ()
    %cst_83 = arith.constant dense<0.000000e+00> : vector<8x8x32xf32>
    %152 = tpu.matmul %151, %150, %cst_83 {dimension_numbers = #tpu.dot_dimension_numbers<[2], [1], [1], [2], [0, 0, 0, 1, 1, 2], [0], [0]>} : vector<8x8x8xbf16>, vector<8x8x32xbf16>, vector<8x8x32xf32> -> vector<8x8x32xf32>
    "tpu.trace_stop"() : () -> ()
    %153 = vector.shape_cast %152 : vector<8x8x32xf32> to vector<64x32xf32>
    %154 = arith.truncf %153 : vector<64x32xf32> to vector<64x32xbf16>
    %c2_84 = arith.constant 2 : index
    %c0_85 = arith.constant 0 : index
    %c0_86 = arith.constant 0 : index
    %155 = vector.load %arg9[%c2_84, %c0_85, %c0_86] : memref<4x32x32xbf16, #tpu.memory_space<vmem>>, vector<1x32x32xbf16>
    %156 = vector.shape_cast %155 : vector<1x32x32xbf16> to vector<32x32xbf16>
    %cst_87 = arith.constant dense<0.000000e+00> : vector<64x32xf32>
    %157 = tpu.matmul %138, %156, %cst_87 {dimension_numbers = #tpu.dot_dimension_numbers<[1], [0], [0], [1], [0, 0, 1, 1], [], []>} : vector<64x32xbf16>, vector<32x32xbf16>, vector<64x32xf32> -> vector<64x32xf32>
    %c2_88 = arith.constant 2 : index
    %c0_89 = arith.constant 0 : index
    %c0_90 = arith.constant 0 : index
    %158 = vector.load %arg10[%c2_88, %c0_89, %c0_90] : memref<4x32x32xbf16, #tpu.memory_space<vmem>>, vector<1x32x32xbf16>
    %159 = vector.shape_cast %158 : vector<1x32x32xbf16> to vector<32x32xbf16>
    %cst_91 = arith.constant dense<0.000000e+00> : vector<64x32xf32>
    %160 = tpu.matmul %154, %159, %cst_91 {dimension_numbers = #tpu.dot_dimension_numbers<[1], [0], [0], [1], [0, 0, 1, 1], [], []>} : vector<64x32xbf16>, vector<32x32xbf16>, vector<64x32xf32> -> vector<64x32xf32>
    %161 = arith.addf %157, %160 : vector<64x32xf32>
    %c2_92 = arith.constant 2 : index
    %c0_93 = arith.constant 0 : index
    %c0_94 = arith.constant 0 : index
    %162 = vector.load %arg11[%c2_92, %c0_93, %c0_94] : memref<4x1x32xf32, #tpu.memory_space<vmem>>, vector<1x1x32xf32>
    %163 = vector.shape_cast %162 : vector<1x1x32xf32> to vector<1x32xf32>
    %164 = vector.broadcast %163 : vector<1x32xf32> to vector<64x32xf32>
    %165 = arith.addf %161, %164 : vector<64x32xf32>
    %166 = arith.extf %117 : vector<64x32xbf16> to vector<64x32xf32>
    %167 = arith.addf %165, %166 : vector<64x32xf32>
    %168 = arith.truncf %167 : vector<64x32xf32> to vector<64x32xbf16>
    %169 = vector.shape_cast %168 : vector<64x32xbf16> to vector<2x4x8x32xbf16>
    %170 = vector.extract_strided_slice %169 {offsets = [0, 0, 0, 0], sizes = [2, 2, 8, 32], strides = [1, 1, 1, 1]} : vector<2x4x8x32xbf16> to vector<2x2x8x32xbf16>
    %171 = vector.shape_cast %170 : vector<2x2x8x32xbf16> to vector<32x32xbf16>
    %172 = vector.extract_strided_slice %169 {offsets = [0, 2, 0, 0], sizes = [2, 2, 8, 32], strides = [1, 1, 1, 1]} : vector<2x4x8x32xbf16> to vector<2x2x8x32xbf16>
    %173 = vector.shape_cast %172 : vector<2x2x8x32xbf16> to vector<32x32xbf16>
    %c3 = arith.constant 3 : index
    %c0_95 = arith.constant 0 : index
    %c0_96 = arith.constant 0 : index
    %174 = vector.load %arg4[%c3, %c0_95, %c0_96] : memref<4x32x64xbf16, #tpu.memory_space<vmem>>, vector<1x32x64xbf16>
    %175 = vector.shape_cast %174 : vector<1x32x64xbf16> to vector<32x64xbf16>
    %cst_97 = arith.constant dense<0.000000e+00> : vector<32x64xf32>
    %176 = tpu.matmul %171, %175, %cst_97 {dimension_numbers = #tpu.dot_dimension_numbers<[1], [0], [0], [1], [0, 0, 1, 1], [], []>} : vector<32x32xbf16>, vector<32x64xbf16>, vector<32x64xf32> -> vector<32x64xf32>
    %c3_98 = arith.constant 3 : index
    %c0_99 = arith.constant 0 : index
    %c0_100 = arith.constant 0 : index
    %177 = vector.load %arg5[%c3_98, %c0_99, %c0_100] : memref<4x32x64xbf16, #tpu.memory_space<vmem>>, vector<1x32x64xbf16>
    %178 = vector.shape_cast %177 : vector<1x32x64xbf16> to vector<32x64xbf16>
    %cst_101 = arith.constant dense<0.000000e+00> : vector<32x64xf32>
    %179 = tpu.matmul %173, %178, %cst_101 {dimension_numbers = #tpu.dot_dimension_numbers<[1], [0], [0], [1], [0, 0, 1, 1], [], []>} : vector<32x32xbf16>, vector<32x64xbf16>, vector<32x64xf32> -> vector<32x64xf32>
    %180 = arith.addf %176, %179 : vector<32x64xf32>
    %c3_102 = arith.constant 3 : index
    %c0_103 = arith.constant 0 : index
    %c0_104 = arith.constant 0 : index
    %181 = vector.load %arg6[%c3_102, %c0_103, %c0_104] : memref<4x1x64xf32, #tpu.memory_space<vmem>>, vector<1x1x64xf32>
    %182 = vector.shape_cast %181 : vector<1x1x64xf32> to vector<1x64xf32>
    %183 = vector.broadcast %182 : vector<1x64xf32> to vector<32x64xf32>
    %184 = arith.addf %180, %183 : vector<32x64xf32>
    %185 = vector.extract_strided_slice %184 {offsets = [0, 0], sizes = [32, 32], strides = [1, 1]} : vector<32x64xf32> to vector<32x32xf32>
    %186 = math.tanh %185 : vector<32x32xf32>
    %187 = vector.extract_strided_slice %184 {offsets = [0, 32], sizes = [32, 32], strides = [1, 1]} : vector<32x64xf32> to vector<32x32xf32>
    %188 = arith.negf %187 : vector<32x32xf32>
    %189 = math.exp %188 : vector<32x32xf32>
    %cst_105 = arith.constant 1.000000e+00 : f32
    %190 = vector.broadcast %cst_105 : f32 to vector<32x32xf32>
    %191 = arith.addf %190, %189 : vector<32x32xf32>
    %192 = arith.divf %190, %191 : vector<32x32xf32>
    %193 = arith.mulf %186, %192 : vector<32x32xf32>
    %194 = arith.truncf %193 : vector<32x32xf32> to vector<32x32xbf16>
    %195 = vector.shape_cast %194 : vector<32x32xbf16> to vector<2x2x8x32xbf16>
    %196 = vector.shape_cast %195 : vector<2x2x8x32xbf16> to vector<32x32xbf16>
    %c3_106 = arith.constant 3 : index
    %c0_107 = arith.constant 0 : index
    %c0_108 = arith.constant 0 : index
    %197 = vector.load %arg7[%c3_106, %c0_107, %c0_108] : memref<4x32x64xbf16, #tpu.memory_space<vmem>>, vector<1x32x64xbf16>
    %198 = vector.shape_cast %197 : vector<1x32x64xbf16> to vector<32x64xbf16>
    %cst_109 = arith.constant dense<0.000000e+00> : vector<32x64xf32>
    %199 = tpu.matmul %196, %198, %cst_109 {dimension_numbers = #tpu.dot_dimension_numbers<[1], [0], [0], [1], [0, 0, 1, 1], [], []>} : vector<32x32xbf16>, vector<32x64xbf16>, vector<32x64xf32> -> vector<32x64xf32>
    %c3_110 = arith.constant 3 : index
    %c0_111 = arith.constant 0 : index
    %c0_112 = arith.constant 0 : index
    %200 = vector.load %arg8[%c3_110, %c0_111, %c0_112] : memref<4x1x64xf32, #tpu.memory_space<vmem>>, vector<1x1x64xf32>
    %201 = vector.shape_cast %200 : vector<1x1x64xf32> to vector<1x64xf32>
    %202 = vector.broadcast %201 : vector<1x64xf32> to vector<32x64xf32>
    %203 = arith.addf %199, %202 : vector<32x64xf32>
    %204 = arith.addf %149, %203 : vector<32x64xf32>
    %cst_113 = arith.constant 0.000000e+00 : f32
    %205 = vector.broadcast %cst_113 : f32 to vector<32x64xf32>
    %206 = arith.maximumf %204, %205 : vector<32x64xf32>
    %207 = arith.truncf %206 : vector<32x64xf32> to vector<32x64xbf16>
    %c0_114 = arith.constant 0 : index
    %c0_115 = arith.constant 0 : index
    %208 = vector.load %arg12[%c0_114, %c0_115] : memref<64x64xbf16, #tpu.memory_space<vmem>>, vector<64x64xbf16>
    %cst_116 = arith.constant dense<0.000000e+00> : vector<32x64xf32>
    %209 = tpu.matmul %207, %208, %cst_116 {dimension_numbers = #tpu.dot_dimension_numbers<[1], [0], [0], [1], [0, 0, 1, 1], [], []>} : vector<32x64xbf16>, vector<64x64xbf16>, vector<32x64xf32> -> vector<32x64xf32>
    %c0_117 = arith.constant 0 : index
    %c0_118 = arith.constant 0 : index
    %210 = vector.load %arg13[%c0_117, %c0_118] : memref<1x64xf32, #tpu.memory_space<vmem>>, vector<1x64xf32>
    %211 = vector.broadcast %210 : vector<1x64xf32> to vector<32x64xf32>
    %212 = arith.addf %209, %211 : vector<32x64xf32>
    %cst_119 = arith.constant 0.000000e+00 : f32
    %213 = vector.broadcast %cst_119 : f32 to vector<32x64xf32>
    %214 = arith.maximumf %212, %213 : vector<32x64xf32>
    %215 = arith.truncf %214 : vector<32x64xf32> to vector<32x64xbf16>
    %c0_120 = arith.constant 0 : index
    %c0_121 = arith.constant 0 : index
    %216 = vector.load %arg14[%c0_120, %c0_121] : memref<64x12xbf16, #tpu.memory_space<vmem>>, vector<64x12xbf16>
    %cst_122 = arith.constant dense<0.000000e+00> : vector<32x12xf32>
    %217 = tpu.matmul %215, %216, %cst_122 {dimension_numbers = #tpu.dot_dimension_numbers<[1], [0], [0], [1], [0, 0, 1, 1], [], []>} : vector<32x64xbf16>, vector<64x12xbf16>, vector<32x12xf32> -> vector<32x12xf32>
    %c0_123 = arith.constant 0 : index
    %c0_124 = arith.constant 0 : index
    %218 = vector.load %arg15[%c0_123, %c0_124] : memref<1x12xf32, #tpu.memory_space<vmem>>, vector<1x12xf32>
    %219 = vector.broadcast %218 : vector<1x12xf32> to vector<32x12xf32>
    %220 = arith.addf %217, %219 : vector<32x12xf32>
    %221 = vector.shape_cast %220 : vector<32x12xf32> to vector<2x2x8x12xf32>
    %c0_125 = arith.constant 0 : index
    %c0_126 = arith.constant 0 : index
    %c0_127 = arith.constant 0 : index
    %c0_128 = arith.constant 0 : index
    %222 = vector.load %arg16[%c0_125, %c0_126, %c0_127, %c0_128] : memref<2x2x8x12xf32, #tpu.memory_space<vmem>>, vector<2x2x8x12xf32>
    tpu.vector_store %arg16[%c0_125, %c0_126, %c0_127, %c0_128], %221 {strides = array<i32>} : memref<2x2x8x12xf32, #tpu.memory_space<vmem>>, vector<2x2x8x12xf32>,
    return
  }
  func.func @transform_0(%arg0: i32) -> (i32, i32, i32, i32) {
    %c0_i32 = arith.constant 0 : i32
    %c0_i32_0 = arith.constant 0 : i32
    %c0_i32_1 = arith.constant 0 : i32
    %c0_i32_2 = arith.constant 0 : i32
    return %arg0, %c0_i32, %c0_i32_0, %c0_i32_1 : i32, i32, i32, i32
  }
  func.func @transform_1(%arg0: i32) -> (i32, i32) {
    %c0_i32 = arith.constant 0 : i32
    %c0_i32_0 = arith.constant 0 : i32
    %c0_i32_1 = arith.constant 0 : i32
    return %c0_i32, %c0_i32_0 : i32, i32
  }
  func.func @transform_2(%arg0: i32) -> (i32, i32) {
    %c0_i32 = arith.constant 0 : i32
    %c0_i32_0 = arith.constant 0 : i32
    %c0_i32_1 = arith.constant 0 : i32
    return %c0_i32, %c0_i32_0 : i32, i32
  }
  func.func @transform_3(%arg0: i32) -> (i32, i32, i32) {
    %c0_i32 = arith.constant 0 : i32
    %c0_i32_0 = arith.constant 0 : i32
    %c0_i32_1 = arith.constant 0 : i32
    %c0_i32_2 = arith.constant 0 : i32
    return %c0_i32, %c0_i32_0, %c0_i32_1 : i32, i32, i32
  }
  func.func @transform_4(%arg0: i32) -> (i32, i32, i32) {
    %c0_i32 = arith.constant 0 : i32
    %c0_i32_0 = arith.constant 0 : i32
    %c0_i32_1 = arith.constant 0 : i32
    %c0_i32_2 = arith.constant 0 : i32
    return %c0_i32, %c0_i32_0, %c0_i32_1 : i32, i32, i32
  }
  func.func @transform_5(%arg0: i32) -> (i32, i32, i32) {
    %c0_i32 = arith.constant 0 : i32
    %c0_i32_0 = arith.constant 0 : i32
    %c0_i32_1 = arith.constant 0 : i32
    %c0_i32_2 = arith.constant 0 : i32
    return %c0_i32, %c0_i32_0, %c0_i32_1 : i32, i32, i32
  }
  func.func @transform_6(%arg0: i32) -> (i32, i32, i32) {
    %c0_i32 = arith.constant 0 : i32
    %c0_i32_0 = arith.constant 0 : i32
    %c0_i32_1 = arith.constant 0 : i32
    %c0_i32_2 = arith.constant 0 : i32
    return %c0_i32, %c0_i32_0, %c0_i32_1 : i32, i32, i32
  }
  func.func @transform_7(%arg0: i32) -> (i32, i32, i32) {
    %c0_i32 = arith.constant 0 : i32
    %c0_i32_0 = arith.constant 0 : i32
    %c0_i32_1 = arith.constant 0 : i32
    %c0_i32_2 = arith.constant 0 : i32
    return %c0_i32, %c0_i32_0, %c0_i32_1 : i32, i32, i32
  }
  func.func @transform_8(%arg0: i32) -> (i32, i32, i32) {
    %c0_i32 = arith.constant 0 : i32
    %c0_i32_0 = arith.constant 0 : i32
    %c0_i32_1 = arith.constant 0 : i32
    %c0_i32_2 = arith.constant 0 : i32
    return %c0_i32, %c0_i32_0, %c0_i32_1 : i32, i32, i32
  }
  func.func @transform_9(%arg0: i32) -> (i32, i32, i32) {
    %c0_i32 = arith.constant 0 : i32
    %c0_i32_0 = arith.constant 0 : i32
    %c0_i32_1 = arith.constant 0 : i32
    %c0_i32_2 = arith.constant 0 : i32
    return %c0_i32, %c0_i32_0, %c0_i32_1 : i32, i32, i32
  }
  func.func @transform_10(%arg0: i32) -> (i32, i32, i32) {
    %c0_i32 = arith.constant 0 : i32
    %c0_i32_0 = arith.constant 0 : i32
    %c0_i32_1 = arith.constant 0 : i32
    %c0_i32_2 = arith.constant 0 : i32
    return %c0_i32, %c0_i32_0, %c0_i32_1 : i32, i32, i32
  }
  func.func @transform_11(%arg0: i32) -> (i32, i32) {
    %c0_i32 = arith.constant 0 : i32
    %c0_i32_0 = arith.constant 0 : i32
    %c0_i32_1 = arith.constant 0 : i32
    return %c0_i32, %c0_i32_0 : i32, i32
  }
  func.func @transform_12(%arg0: i32) -> (i32, i32) {
    %c0_i32 = arith.constant 0 : i32
    %c0_i32_0 = arith.constant 0 : i32
    %c0_i32_1 = arith.constant 0 : i32
    return %c0_i32, %c0_i32_0 : i32, i32
  }
  func.func @transform_13(%arg0: i32) -> (i32, i32) {
    %c0_i32 = arith.constant 0 : i32
    %c0_i32_0 = arith.constant 0 : i32
    %c0_i32_1 = arith.constant 0 : i32
    return %c0_i32, %c0_i32_0 : i32, i32
  }
  func.func @transform_14(%arg0: i32) -> (i32, i32) {
    %c0_i32 = arith.constant 0 : i32
    %c0_i32_0 = arith.constant 0 : i32
    %c0_i32_1 = arith.constant 0 : i32
    return %c0_i32, %c0_i32_0 : i32, i32
  }
  func.func @transform_15(%arg0: i32) -> (i32, i32, i32, i32) {
    %c0_i32 = arith.constant 0 : i32
    %c0_i32_0 = arith.constant 0 : i32
    %c0_i32_1 = arith.constant 0 : i32
    %c0_i32_2 = arith.constant 0 : i32
    return %arg0, %c0_i32, %c0_i32_0, %c0_i32_1 : i32, i32, i32, i32
  }
}

</mosaic_0001>

<bundles_post_ra>
// kernel: tpu_custom_call.1
= control target key start
LH: loop header
LB: loop body
LE: loop exit
PB: predicated region body
PF: predicated region fallthrough
CT: control target
= control target key end

     0   :  { %s9643_s0 = inlined_call_operand.hbm [shape: bf16[4,8,8,32], index: 0, kind: input, shape index: {}]   ;;  %s9644_s1 = inlined_call_operand.vmem [shape: bf16[8,8], index: 1, kind: input, shape index: {}]   ;;  %s9645_s2 = inlined_call_operand.vmem [shape: bf16[8,8], index: 2, kind: input, shape index: {}]   ;;  %s9646_s3 = inlined_call_operand.hbm [shape: bf16[4,32,64], index: 3, kind: input, shape index: {}]   ;;  %s9647_s4 = inlined_call_operand.hbm [shape: bf16[4,32,64], index: 4, kind: input, shape index: {}]   ;;  %s9648_s5 = inlined_call_operand.vmem [shape: f32[4,1,64], index: 5, kind: input, shape index: {}]   ;;  %s9649_s6 = inlined_call_operand.hbm [shape: bf16[4,32,64], index: 6, kind: input, shape index: {}]   ;;  %s9650_s7 = inlined_call_operand.vmem [shape: f32[4,1,64], index: 7, kind: input, shape index: {}]   ;;  %s9651_s8 = inlined_call_operand.hbm [shape: bf16[4,32,32], index: 8, kind: input, shape index: {}]   ;;  %s9652_s9 = inlined_call_operand.hbm [shape: bf16[4,32,32], index: 9, kind: input, shape index: {}]   ;;  %s9653_s10 = inlined_call_operand.vmem [shape: f32[4,1,32], index: 10, kind: input, shape index: {}]   ;;  %s9654_s11 = inlined_call_operand.vmem [shape: bf16[64,64], index: 11, kind: input, shape index: {}]   ;;  %s9655_s12 = inlined_call_operand.vmem [shape: f32[1,64], index: 12, kind: input, shape index: {}]   ;;  %s9656_s13 = inlined_call_operand.vmem [shape: bf16[64,12], index: 13, kind: input, shape index: {}]   ;;  %s9657_s14 = inlined_call_operand.vmem [shape: f32[1,12], index: 14, kind: input, shape index: {}]   ;;  %s9658_s15 = inlined_call_operand.hbm [shape: f32[4,2,8,12], index: 15, kind: output, shape index: {}]  }
   0x1   :  { %9667 = sst [smem:[#allocation21_spill]] %s9646_s3 }
   0x2   :  { %9668 = sst [smem:[#allocation22_spill]] %s9647_s4 }
   0x3   :  { %9669 = sst [smem:[#allocation23_spill]] %s9649_s6 }
   0x4   :  { %9670 = sst [smem:[#allocation24_spill]] %s9651_s8 }
   0x5   :  { %9671 = sst [smem:[#allocation25_spill]] %s9652_s9 }
   0x6   :  { %9672 = sst [smem:[#allocation26_spill]] %s9658_s15 }
   0x7   :  { %20 = vsyncpa [#allocation3], 0 }
   0x8   :  { %22 = vsyncpa [#allocation3 + $0x1], 0 }
   0x9   :  { %23 = vsyncpa [#allocation6], 0 }
   0xa   :  { %24 = vsyncpa [#allocation9], 0 }
   0xb   :  { %25 = vsyncpa [#allocation12], 0 }
   0xc   :  { %26 = vsyncpa [#allocation4], 0 }
   0xd   :  { %28 = vsyncpa [#allocation4 + $0x1], 0  ;;  %s8504_s17 = smov 0   ;;  %s8506_s18 = smov 0  }
   0xe   :  { %s8508_s19 = smov 0   ;;  %s8510_s2 = smov 0  }
   0xf LB: > { %9673 = sst [smem:[#allocation19_spill]] %s8404_s19  ;;  %s8410_s20 = smov [#allocation5]   ;;  %s8408_s2 = sphi %s8510_s2, %s9705_s2   ;;  %s8404_s19 = sphi %s8508_s19, %s9702_s19   ;;  %s8400_s18 = sphi %s8506_s18, %s9704_s18   ;;  %s8396_s17 = sphi %s8504_s17, %s9703_s17  }
  0x10   : > { %s403_s21 = sshll.u32 %s8410_s20, 4  ;;  %s8525_s22 = sadd.s32 4294967295, %s8408_s2   ;;  %s404_s21 = int_to_ptr.vmem [resolvable:$true] %s403_s21 }
  0x11   : > { %p6483_p0 = scmp.ge.s32.totalorder %s8408_s2, 1  ;;  %p9662_p1 = scmp.eq.s32.totalorder %s8525_s22, 0 }
  0x12   : > { %p385_p2 = scmp.lt.s32.totalorder %s8408_s2, 3  ;;  %s8411_s24 = smov [#allocation8]  }
  0x13   : > { %s432_s25 = sshll.u32 %s8411_s24, 4  ;;  %s8412_s27 = smov [#allocation7]   ;;  %s8543_s25 = int_to_ptr.vmem [resolvable:$true] %s432_s25 }
  0x14   : > { %p8530_p3 = pnand %p6483_p0, %p385_p2  ;;  %s416_s28 = sshll.u32 %s8412_s27, 4  ;;  %s8545_s28 = int_to_ptr.vmem [resolvable:$true] %s416_s28 }
  0x15   : > { %s8185_s30 = scalar_lea.vmem %s404_s21, 1024  ;;  %p8193_p11 = scmp.lt.s32.totalorder %s404_s21, %s404_s21 }
  0x16   : > { %s9674_s23 = scalar_select %p8530_p3, 1, 0 }
  0x17   : > { %p7507_p5 = pneg %p8530_p3  ;;  %p8186_p8 = scmp.ne.s32.totalorder %s404_s21, %s8185_s30 }
  0x18   : > { %p8194_p12 = scmp.lt.s32.totalorder %s8185_s30, %s8185_s30 }
  0x19   : > { %p8539_p6 = pnand %p7507_p5, %p9662_p1 }
  0x1a   : > { %p8195_p13 = por %p8194_p12, %p8193_p11 }
  0x1b   : > { %p8549_p7 = pneg %p8539_p6 }
  0x1d   : > { %p8188_p9 = pnand %p8186_p8, %p8549_p7 }
  0x1f   : > { %p8189_p10 = pneg %p8188_p9 }
  0x21   : > { %p8196_p0 = pnand %p8195_p13, %p8189_p10 }
  0x23   : > { %8199 = shalt.err (!%p8196_p0)
}
  0x24   : > { %s9660_s16 = smov 64   ;;  %s9661_s20 = smov 4  }
  0x25   : > { %s9677_s3 = sld [smem:[#allocation21_spill]]  ;;  %s8211_s15 = scalar_lea.vmem %s8543_s25, 1024 }
  0x26   : > { %p8212_p2 = scmp.ne.s32.totalorder %s8543_s25, %s8211_s15  ;;  %p8219_p9 = scmp.lt.s32.totalorder %s8543_s25, %s8543_s25 }
  0x27   : > { %p8220_p10 = scmp.lt.s32.totalorder %s8211_s15, %s8211_s15 }
  0x28   : > { %p8214_p5 = pnand %p8212_p2, %p8549_p7 }
  0x29   : > { %p8221_p11 = por %p8220_p10, %p8219_p9 }
  0x2a   : > { %p8215_p8 = pneg %p8214_p5 }
  0x2b   : > { %7510 = dma.hbm_to_vmem [thread:$0]  (!%p8539_p6), %s9677_s3, 1024, %s404_s21, [#allocation6], %s9660_s16, %s9660_s16, %s9661_s20  }
  0x2c   : > { %p8222_p12 = pnand %p8221_p11, %p8215_p8 }
  0x2e   : > { %8225 = shalt.err (!%p8222_p12)
}
  0x2f   : > { %s9678_s6 = sld [smem:[#allocation23_spill]]  ;;  %s8237_s21 = scalar_lea.vmem %s8545_s28, 1024 }
  0x30   : > { %p8238_p13 = scmp.ne.s32.totalorder %s8545_s28, %s8237_s21  ;;  %p8245_p5 = scmp.lt.s32.totalorder %s8545_s28, %s8545_s28 }
  0x31   : > { %p8246_p8 = scmp.lt.s32.totalorder %s8237_s21, %s8237_s21 }
  0x32   : > { %p8240_p0 = pnand %p8238_p13, %p8549_p7 }
  0x33   : > { %p8247_p9 = por %p8246_p8, %p8245_p5 }
  0x34   : > { %p8241_p2 = pneg %p8240_p0 }
  0x35   : > { %7516 = dma.hbm_to_vmem [thread:$0]  (!%p8539_p6), %s9678_s6, 1024, %s8543_s25, [#allocation9], %s9660_s16, %s9660_s16, %s9661_s20  }
  0x36   : > { %p8248_p10 = pnand %p8247_p9, %p8241_p2 }
  0x38   : > { %8251 = shalt.err (!%p8248_p10)
}
  0x39   : > { %s9679_s4 = sld [smem:[#allocation22_spill]]  ;;  %s8415_s25 = smov [#allocation10]  }
  0x3a   : > { %s448_s30 = sshll.u32 %s8415_s25, 4  ;;  %s8416_s24 = smov [#allocation11]   ;;  %s449_s30 = int_to_ptr.vmem [resolvable:$true] %s448_s30 }
  0x3b   : > { %s461_s3 = sshll.u32 %s8416_s24, 4  ;;  %s8263_s21 = scalar_lea.vmem %s449_s30, 1024  ;;  %s462_s3 = int_to_ptr.vmem [resolvable:$true] %s461_s3 }
  0x3c   : > { %p8264_p11 = scmp.ne.s32.totalorder %s449_s30, %s8263_s21  ;;  %p8271_p0 = scmp.lt.s32.totalorder %s449_s30, %s449_s30 }
  0x3d   : > { %p8272_p2 = scmp.lt.s32.totalorder %s8263_s21, %s8263_s21 }
  0x3e   : > { %p8266_p12 = pnand %p8264_p11, %p8549_p7 }
  0x3f   : > { %7513 = dma.hbm_to_vmem [thread:$0]  (!%p8539_p6), %s9679_s4, 1024, %s8545_s28, [#allocation6], %s9660_s16, %s9660_s16, %s9661_s20  }
  0x40   : > { %p8267_p13 = pneg %p8266_p12  ;;  %p8273_p5 = por %p8272_p2, %p8271_p0 }
  0x42   : > { %p8274_p8 = pnand %p8273_p5, %p8267_p13 }
  0x44   : > { %8277 = shalt.err (!%p8274_p8)
}
  0x45   : > { %s9680_s8 = sld [smem:[#allocation24_spill]]  ;;  %s8289_s27 = scalar_lea.vmem %s462_s3, 1024 }
  0x46   : > { %p8290_p9 = scmp.ne.s32.totalorder %s462_s3, %s8289_s27  ;;  %p8297_p12 = scmp.lt.s32.totalorder %s462_s3, %s462_s3 }
  0x47   : > { %p8298_p0 = scmp.lt.s32.totalorder %s8289_s27, %s8289_s27 }
  0x48   : > { %p8292_p10 = pnand %p8290_p9, %p8549_p7 }
  0x49   : > { %p8299_p13 = por %p8298_p0, %p8297_p12 }
  0x4a   : > { %p8293_p11 = pneg %p8292_p10 }
  0x4b   : > { %7519 = dma.hbm_to_vmem [thread:$0]  (!%p8539_p6), %s9680_s8, 1024, %s449_s30, [#allocation9], %s9660_s16, %s9660_s16, %s9661_s20  }
  0x4c   : > { %p8300_p2 = pnand %p8299_p13, %p8293_p11 }
  0x4e   : > { %8303 = shalt.err (!%p8300_p2)
}
  0x4f   : > { %s9681_s9 = sld [smem:[#allocation25_spill]]  ;;  %s6482_s26 = sadd.s32 4294967294, %s8408_s2  }
  0x50   : > { %s8615_s29 = sadd.s32 1, %s8408_s2   ;;  %s41_s30 = sadd.s32 1, %s8404_s19 }
  0x51   : > { %s38_s21 = ssub.s32 %s8408_s2, %s8615_s29  ;;  %p48_p7 = scmp.ne.s32.totalorder %s8404_s19, %s8400_s18 }
  0x52   : > { %p39_p5 = scmp.eq.s32.totalorder %s38_s21, 0  ;;  %p49_p8 = scmp.eq.s32.totalorder %s8408_s2, 0 }
  0x53   : > { %p54_p9 = scmp.ne.s32.totalorder %s8400_s18, %s8396_s17  ;;  %p372_p10 = scmp.eq.s32.totalorder %s8525_s22, 1 }
  0x54   : > { %s8627_s28 = scalar_select %p39_p5, %s8404_s19, %s41_s30  }
  0x55   : > { %7522 = dma.hbm_to_vmem [thread:$0]  (!%p8539_p6), %s9681_s9, 1024, %s462_s3, [#allocation12], %s9660_s16, %s9660_s16, %s9661_s20  }
  0x56   : > { %9682 = sst [smem:[#allocation20_spill]] %s8627_s28  ;;  %p50_p11 = por %p49_p8, %p48_p7 }
  0x57   : > { %p8631_p12 = por %p9662_p1, %p54_p9  ;;  %p8635_p6 = por %p372_p10, %p48_p7 }
  0x58   : > { %p378_p0 = scmp.eq.s32.totalorder %s6482_s26, 1  ;;  %p7536_p13 = scmp.lt.s32.totalorder %s8408_s2, 2 }
  0x59   : > { %s9683_s15 = scalar_select %p8631_p12, 1, 0 }
  0x5a   : > { %s9684_s3 = scalar_select %p8635_p6, 1, 0 }
  0x5b   : > { %s490_s27 = sand.u32 1, %s8404_s19   ;;  %p8641_p2 = por %p378_p0, %p54_p9 }
  0x5c   : > { %s6490_s24 = sshll.u32 %s490_s27, 6  ;;  %s6788_s30 = sshll.u32 %s8408_s2, 10 }
  0x5d   : > { %s9685_s25 = scalar_select %p8641_p2, 1, 0 }
  0x5e   : > { %s8649_s20 = scalar_lea.hbm %s9643_s0, %s6788_s30  ;;  %s494_s4 = scalar_lea.vmem [#allocation2], %s6490_s24 }
  0x5f   : > { %s502_s6 = sshll.u32 %s494_s4, 4  ;;  %p8651_p7 = pnand %p7536_p13, %p50_p11  ;;  %s8655_s6 = int_to_ptr.vmem [resolvable:$true] %s502_s6 }
  0x60   : > { %s8657_s8 = scalar_lea.sflag [#allocation3], %s490_s27  ;;  %s8304_s9 = scalar_lea.hbm %s8649_s20, 1024 }
  0x61   : > { %p8305_p5 = scmp.ne.s32.totalorder %s8649_s20, %s8304_s9  ;;  %p8306_p8 = pneg %p8651_p7 }
  0x62   : > { %s8309_s24 = scalar_lea.hbm %s9643_s0, 2048  ;;  %p8310_p11 = scmp.lt.s32.totalorder %s8649_s20, %s9643_s0 }
  0x63   : > { %p8307_p9 = pnand %p8306_p8, %p8305_p5  ;;  %p8311_p0 = scmp.lt.s32.totalorder %s8309_s24, %s8304_s9 }
  0x65   : > { %p8308_p10 = pneg %p8307_p9  ;;  %p8312_p13 = por %p8311_p0, %p8310_p11 }
  0x67   : > { %p8313_p4 = pnand %p8312_p13, %p8308_p10 }
  0x69   : > { %8316 = shalt.err (!%p8313_p4)
}
  0x6a   : > { %s8317_s27 = scalar_lea.vmem %s8655_s6, 1024  ;;  %s8417_s28 = smov [#allocation2]  }
  0x6b   : > { %p8318_p1 = scmp.ne.s32.totalorder %s8655_s6, %s8317_s27  ;;  %s8322_s19 = sshll.u32 %s8417_s28, 4  ;;  %s8323_s19 = int_to_ptr.vmem [resolvable:$false] %s8322_s19 }
  0x6c   : > { %s8324_s16 = scalar_lea.vmem %s8323_s19, 2048  ;;  %p8325_p9 = scmp.lt.s32.totalorder %s8655_s6, %s8323_s19 }
  0x6d   : > { %p8320_p2 = pnand %p8318_p1, %p8306_p8  ;;  %p8326_p6 = scmp.lt.s32.totalorder %s8324_s16, %s8317_s27 }
  0x6f   : > { %p8321_p5 = pneg %p8320_p2  ;;  %p8327_p12 = por %p8326_p6, %p8325_p9 }
  0x71   : > { %p8328_p3 = pnand %p8327_p12, %p8321_p5 }
  0x73   : > { %8331 = shalt.err (!%p8328_p3)
}
  0x74   : > { %s9687_s9 = smov 4   ;;  %s9688_s30 = smov 64  }
  0x75   : > { %7526 = dma.hbm_to_vmem [thread:$0]  (!%p8651_p7), %s8649_s20, 1024, %s8655_s6, %s8657_s8, %s9688_s30, %s9688_s30, %s9687_s9  }
  0x76   : > { %p9689_p1 = scmp.ne.s32.totalorder %s9674_s23, 0 }
  0x77   : > { %s8684_s28 = sand.u32 (!%p9689_p1), 1, %s8400_s18   ;;  %p9690_p3 = scmp.ne.s32.totalorder (!%p9689_p1), %s9683_s15, 0 }
  0x78   : > { %514 = sbr.rel (%p9689_p1) target bundleno = 4591 (0x11ef), region = 80  ;;  %s6495_s19 = sshll.u32 (!%p9689_p1), %s8684_s28, 6 }
  0x79   : > { %s517_s24 = scalar_lea.sflag (!%p9689_p1), [#allocation3], %s8684_s28  ;;  %s8688_s4 = scalar_lea.vmem (!%p9689_p1), [#allocation2], %s6495_s19 }
  0x7d   : > { %8375 = dma.done.wait (%p9690_p3), %s517_s24, 1024  }
  0x7e   : > { %8377 = vsyncadd (%p9690_p3), %s517_s24, 4294966272  ;;  %p9691_p4 = scmp.eq.s32.totalorder %s8525_s22, 0 }
  0x80   : > { %8379 = dma.done.wait (%p9691_p4), [#allocation6], 2048   ;;  %p9692_p12 = pmov %p9691_p4 }
  0x81   : > { %p9693_p6 = pmov %p9691_p4 }
  0x82   : > { %8381 = vsyncadd (%p9692_p12), [#allocation6], 4294965248 }
  0x83   : > { %8383 = dma.done.wait (%p9693_p6), [#allocation9], 2048   ;;  %p9694_p2 = pmov %p9691_p4 }
  0x85   : > { %8385 = vsyncadd (%p9694_p2), [#allocation9], 4294965248  ;;  %p9695_p7 = pmov %p9694_p2 }
  0x86   : > { %p9696_p8 = pmov %p9694_p2 }
  0x87   : > { %8387 = dma.done.wait (%p9695_p7), [#allocation12], 1024  }
  0x88   : > { %8389 = vsyncadd (%p9696_p8), [#allocation12], 4294966272  ;;  %v8418_v0 = vmov 0.0   ;;  %vm8419_vm0 = vmmov 0   ;;  %v7883_v1 = vld [vmem:[#allocation7 + $0x8] sm:$0xff]   ;;  %v7885_v3 = vld [vmem:[#allocation7] sm:$0xff]  }
  0x89   : > { %7002 = vmatprep.subr.bf16.mxu0 %v8418_v0  ;;  %7034 = vmatprep.subr.bf16.mxu1 %v8418_v0  ;;  %v7884_v2 = vld [vmem:[#allocation5 + $0x8] sm:$0xff]   ;;  %v7886_v4 = vld [vmem:[#allocation5] sm:$0xff]   ;;  %vm662_vm1 = vcmask 261120   ;;  %v595_v11 = vld [vmem:[%s8688_s4 + $0x10] sm:$0xf]  ;;  %s8420_s23 = smov 96  }
  0x8a   : > { %7006 = vmatprep.mubr.msk.bf16.mxu0 %vm8419_vm0, %v8418_v0  ;;  %7038 = vmatprep.mubr.msk.bf16.mxu1 %vm8419_vm0, %v8418_v0  ;;  %v592_v5 = vld [vmem:[%s8688_s4 + $0x4] sm:$0xf]  ;;  %v593_v6 = vld [vmem:[%s8688_s4 + $0x8] sm:$0xf]  ;;  %v591_v7 = vld [vmem:[%s8688_s4] sm:$0xf] }
  0x8b   : > { %7003 = vmatpush3.bf16.msra.mxu0 %v7883_v1  ;;  %7035 = vmatpush3.bf16.msra.mxu1 %v7884_v2  ;;  %v6502_v8 = vcombine.low %v592_v5, %v593_v6  ;;  %v6518_v9 = vcombine.low %v591_v7, %v592_v5  ;;  %v594_v10 = vld [vmem:[%s8688_s4 + $0xc] sm:$0xf]  ;;  %v596_v14 = vld [vmem:[%s8688_s4 + $0x14] sm:$0xf]  ;;  %v597_v15 = vld [vmem:[%s8688_s4 + $0x18] sm:$0xf] }
  0x8c   : > { %7004 = vmatprep.subr.bf16.mxu0 %v8418_v0  ;;  %7036 = vmatprep.subr.bf16.mxu1 %v8418_v0  ;;  %v6503_v12 = vcombine.low %v594_v10, %v595_v11  ;;  %v6519_v13 = vcombine.low %v593_v6, %v594_v10  ;;  %v6504_v16 = vcombine.low %v596_v14, %v597_v15  ;;  %v598_v18 = vld [vmem:[%s8688_s4 + $0x1c] sm:$0xf]  ;;  %v600_v19 = vld [vmem:[%s8688_s4 + $0x24] sm:$0xf]  ;;  %v599_v20 = vld [vmem:[%s8688_s4 + $0x20] sm:$0xf] }
  0x8d   : > { %v6520_v17 = vcombine.low %v595_v11, %v596_v14  ;;  %v6505_v21 = vcombine.low %v598_v18, %v600_v19  ;;  %v6521_v22 = vcombine.low %v597_v15, %v599_v20  ;;  %v601_v23 = vld [vmem:[%s8688_s4 + $0x28] sm:$0xf]  ;;  %v602_v24 = vld [vmem:[%s8688_s4 + $0x2c] sm:$0xf]  ;;  %v603_v27 = vld [vmem:[%s8688_s4 + $0x30] sm:$0xf] }
  0x8e   : > { %v6506_v25 = vcombine.low %v601_v23, %v602_v24  ;;  %v6522_v26 = vcombine.low %v600_v19, %v601_v23  ;;  %v604_v28 = vld [vmem:[%s8688_s4 + $0x34] sm:$0xf]  ;;  %v6523_v30 = vcombine.low %v602_v24, %v603_v27  ;;  %v605_v31 = vld [vmem:[%s8688_s4 + $0x38] sm:$0xf]  ;;  %v606_v32 = vld [vmem:[%s8688_s4 + $0x3c] sm:$0xf] }
  0x8f   : > { %7005 = vmatpush3.bf16.msra.mxu0 %v7885_v3  ;;  %7037 = vmatpush3.bf16.msra.mxu1 %v7886_v4  ;;  %v6507_v29 = vcombine.low %v603_v27, %v604_v28  ;;  %v6508_v33 = vcombine.low %v605_v31, %v606_v32  ;;  %v6524_v34 = vcombine.low %v604_v28, %v605_v31  ;;  %v8771_v37 = vld [vmem:[%s9648_s5] ss:$0 sm:$0xff]  ;;  %vm1750_vm2 = vcmask 1043456   ;;  %s6501_s16 = sshll.u32 %s8684_s28, 5  ;;  %s9697_s20 = sld [smem:[#allocation26_spill]] }
  0x90   : > { %vm1665_vm3 = vcmask 64512   ;;  %vm6185_vm4 = vcmask 523264   ;;  %vm6341_vm5 = vcmask 97280   ;;  %s586_s19 = scalar_lea.vmem [#allocation13], %s6501_s16  ;;  %p9698_p11 = scmp.ne.s32.totalorder %s9684_s3, 0 }
  0x91   : > { %s6361_s24 = sshll.u32 %s586_s19, 4  ;;  %s8421_s21 = smov [#allocation13]   ;;  %s9592_s24 = int_to_ptr.vmem [resolvable:$true] %s6361_s24 }
  0x92   : > { %7007 = vmatmul.mubr.msk.bf16.vlgmr.msra.gmra.mxu0 %vm662_vm1, %v6502_v8  ;;  %7039 = vmatmul.mubr.msk.bf16.vlgmr.msra.gmra.mxu1 %vm662_vm1, %v6518_v9  ;;  %s8332_s26 = scalar_lea.vmem %s9592_s24, 512 }
  0x93   : > { %7010 = vmatprep.mubr.msk.bf16.mxu0 %vm8419_vm0, %v8418_v0  ;;  %7042 = vmatprep.mubr.msk.bf16.mxu1 %vm8419_vm0, %v8418_v0  ;;  %p8333_p10 = scmp.ne.s32.totalorder %s9592_s24, %s8332_s26 }
  0x95   : > { %p8334_p0 = pnand %p8333_p10, %p9698_p11 }
  0x97   : > { %p8335_p13 = pneg %p8334_p0 }
  0x9a   : > { %7011 = vmatmul.mubr.msk.bf16.gmra.mxu0 %vm662_vm1, %v6503_v12  ;;  %7043 = vmatmul.mubr.msk.bf16.gmra.mxu1 %vm662_vm1, %v6519_v13 }
  0x9b   : > { %7014 = vmatprep.mubr.msk.bf16.mxu0 %vm8419_vm0, %v8418_v0  ;;  %7046 = vmatprep.mubr.msk.bf16.mxu1 %vm8419_vm0, %v8418_v0 }
  0xa2   : > { %7015 = vmatmul.mubr.msk.bf16.gmra.mxu0 %vm662_vm1, %v6504_v16  ;;  %7047 = vmatmul.mubr.msk.bf16.gmra.mxu1 %vm662_vm1, %v6520_v17 }
  0xa3   : > { %7018 = vmatprep.mubr.msk.bf16.mxu0 %vm8419_vm0, %v8418_v0  ;;  %7050 = vmatprep.mubr.msk.bf16.mxu1 %vm8419_vm0, %v8418_v0 }
  0xaa   : > { %7019 = vmatmul.mubr.msk.bf16.gmra.mxu0 %vm662_vm1, %v6505_v21  ;;  %7051 = vmatmul.mubr.msk.bf16.gmra.mxu1 %vm662_vm1, %v6521_v22 }
  0xab   : > { %7022 = vmatprep.mubr.msk.bf16.mxu0 %vm8419_vm0, %v8418_v0  ;;  %7054 = vmatprep.mubr.msk.bf16.mxu1 %vm8419_vm0, %v8418_v0 }
  0xb2   : > { %7023 = vmatmul.mubr.msk.bf16.gmra.mxu0 %vm662_vm1, %v6506_v25  ;;  %7055 = vmatmul.mubr.msk.bf16.gmra.mxu1 %vm662_vm1, %v6522_v26 }
  0xb3   : > { %7026 = vmatprep.mubr.msk.bf16.mxu0 %vm8419_vm0, %v8418_v0  ;;  %7058 = vmatprep.mubr.msk.bf16.mxu1 %vm8419_vm0, %v8418_v0 }
  0xba   : > { %7027 = vmatmul.mubr.msk.bf16.gmra.mxu0 %vm662_vm1, %v6507_v29  ;;  %7059 = vmatmul.mubr.msk.bf16.gmra.mxu1 %vm662_vm1, %v6523_v30 }
  0xbb   : > { %7030 = vmatprep.mubr.msk.bf16.mxu0 %vm8419_vm0, %v8418_v0  ;;  %7062 = vmatprep.mubr.msk.bf16.mxu1 %vm8419_vm0, %v8418_v0 }
  0xc2   : > { %7031 = vmatmul.mubr.msk.bf16.gmra.mxu0 %vm662_vm1, %v6508_v33  ;;  %7063 = vmatmul.mubr.msk.bf16.gmra.mxu1 %vm662_vm1, %v6524_v34 }
 0x152   : > { %v718_v35 = vpop.f32.mrf.mxu0  ;;  %v851_v36 = vpop.f32.mrf.mxu1 }
 0x153   : > { %v852_v38 = vadd.f32 %v851_v36, %v718_v35 }
 0x154   : > { %v7008_v39 = vpop.f32.mrf.mxu0  ;;  %v7040_v40 = vpop.f32.mrf.mxu1 }
 0x155   : > { %v8774_v41 = vadd.f32 %v8771_v37, %v852_v38 }
 0x156   : > { %v721_v42 = vpop.f32.mrf.mxu0  ;;  %v854_v43 = vpop.f32.mrf.mxu1 }
 0x157   : > { %v6535_v44 = vmul.f32 -1.442695, %v8774_v41  ;;  %v855_v45 = vadd.f32 %v854_v43, %v721_v42 }
 0x158   : > { %v7009_v46 = vpop.f32.mrf.mxu0  ;;  %v7041_v47 = vpop.f32.mrf.mxu1 }
 0x159   : > { %7941 = vpow2.f32 %v6535_v44  ;;  %v8778_v48 = vadd.f32 %v8771_v37, %v855_v45 }
 0x15a   : > { %v726_v49 = vpop.f32.mrf.mxu0  ;;  %v859_v50 = vpop.f32.mrf.mxu1 }
 0x15b   : > { %v6536_v51 = vmul.f32 -1.442695, %v8778_v48  ;;  %v860_v52 = vadd.f32 %v859_v50, %v726_v49 }
 0x15c   : > { %v7012_v53 = vpop.f32.mrf.mxu0  ;;  %v7044_v54 = vpop.f32.mrf.mxu1 }
 0x15d   : > { %7943 = vpow2.f32 %v6536_v51  ;;  %v8782_v55 = vadd.f32 %v8771_v37, %v860_v52 }
 0x15e   : > { %v729_v56 = vpop.f32.mrf.mxu0  ;;  %v862_v57 = vpop.f32.mrf.mxu1 }
 0x15f   : > { %v6537_v58 = vmul.f32 -1.442695, %v8782_v55  ;;  %v863_v59 = vadd.f32 %v862_v57, %v729_v56 }
 0x160   : > { %v7013_v60 = vpop.f32.mrf.mxu0  ;;  %v7045_v61 = vpop.f32.mrf.mxu1 }
 0x161   : > { %7945 = vpow2.f32 %v6537_v58  ;;  %v8786_v62 = vadd.f32 %v8771_v37, %v863_v59 }
 0x162   : > { %v734_v63 = vpop.f32.mrf.mxu0  ;;  %v867_v1 = vpop.f32.mrf.mxu1 }
 0x163   : > { %v6538_v2 = vmul.f32 -1.442695, %v8786_v62  ;;  %v868_v3 = vadd.f32 %v867_v1, %v734_v63 }
 0x164   : > { %v7016_v4 = vpop.f32.mrf.mxu0  ;;  %v7048_v5 = vpop.f32.mrf.mxu1 }
 0x165   : > { %7947 = vpow2.f32 %v6538_v2  ;;  %v8790_v6 = vadd.f32 %v8771_v37, %v868_v3 }
 0x166   : > { %v737_v7 = vpop.f32.mrf.mxu0  ;;  %v7942_v8 = vpop.eup %7941 }
 0x167   : > { %v870_v9 = vpop.f32.mrf.mxu1  ;;  %v983_v10 = vadd.f32 1.0, %v7942_v8  ;;  %v6539_v11 = vmul.f32 -1.442695, %v8790_v6 }
 0x168   : > { %v871_v12 = vadd.f32 %v870_v9, %v737_v7  ;;  %v7017_v13 = vpop.f32.mrf.mxu0 }
 0x169   : > { %v7049_v14 = vpop.f32.mrf.mxu1  ;;  %7949 = vrcp.f32 %v983_v10 }
 0x16a   : > { %v8794_v15 = vadd.f32 %v8771_v37, %v871_v12  ;;  %v742_v16 = vpop.f32.mrf.mxu0  ;;  %v7944_v17 = vpop.eup %7943  ;;  %7951 = vpow2.f32 %v6539_v11 }
 0x16b   : > { %v875_v18 = vpop.f32.mrf.mxu1  ;;  %v984_v19 = vadd.f32 1.0, %v7944_v17 }
 0x16c   : > { %v6540_v20 = vmul.f32 -1.442695, %v8794_v15  ;;  %v876_v21 = vadd.f32 %v875_v18, %v742_v16  ;;  %v7020_v22 = vpop.f32.mrf.mxu0 }
 0x16d   : > { %v7052_v23 = vpop.f32.mrf.mxu1  ;;  %7953 = vrcp.f32 %v984_v19 }
 0x16e   : > { %v8798_v24 = vadd.f32 %v8771_v37, %v876_v21  ;;  %v745_v25 = vpop.f32.mrf.mxu0  ;;  %v7946_v26 = vpop.eup %7945  ;;  %7955 = vpow2.f32 %v6540_v20 }
 0x16f   : > { %v878_v27 = vpop.f32.mrf.mxu1  ;;  %v985_v28 = vadd.f32 1.0, %v7946_v26 }
 0x170   : > { %v6541_v29 = vmul.f32 -1.442695, %v8798_v24  ;;  %v879_v30 = vadd.f32 %v878_v27, %v745_v25  ;;  %v7021_v31 = vpop.f32.mrf.mxu0 }
 0x171   : > { %v7053_v32 = vpop.f32.mrf.mxu1  ;;  %7957 = vrcp.f32 %v985_v28 }
 0x172   : > { %v8802_v33 = vadd.f32 %v8771_v37, %v879_v30  ;;  %v750_v34 = vpop.f32.mrf.mxu0  ;;  %v7948_v35 = vpop.eup %7947  ;;  %7959 = vpow2.f32 %v6541_v29 }
 0x173   : > { %v883_v36 = vpop.f32.mrf.mxu1  ;;  %v986_v38 = vadd.f32 1.0, %v7948_v35 }
 0x174   : > { %v6542_v39 = vmul.f32 -1.442695, %v8802_v33  ;;  %v884_v40 = vadd.f32 %v883_v36, %v750_v34  ;;  %v7024_v42 = vpop.f32.mrf.mxu0 }
 0x175   : > { %v7056_v43 = vpop.f32.mrf.mxu1  ;;  %7961 = vrcp.f32 %v986_v38 }
 0x176   : > { %v8806_v44 = vadd.f32 %v8771_v37, %v884_v40  ;;  %v753_v45 = vpop.f32.mrf.mxu0  ;;  %v7950_v46 = vpop.eup %7949  ;;  %7963 = vpow2.f32 %v6542_v39 }
 0x177   : > { %v886_v47 = vpop.f32.mrf.mxu1  ;;  %v7952_v49 = vpop.eup %7951  ;;  %1039 = vrot.lane.b32.xlu0 %v7950_v46, %s8420_s23 }
 0x178   : > { %v6543_v50 = vmul.f32 -1.442695, %v8806_v44  ;;  %v887_v51 = vadd.f32 %v886_v47, %v753_v45  ;;  %v7025_v52 = vpop.f32.mrf.mxu0  ;;  %v987_v53 = vadd.f32 1.0, %v7952_v49 }
 0x179   : > { %v7057_v54 = vpop.f32.mrf.mxu1 }
 0x17a   : > { %7965 = vpow2.f32 %v6543_v50  ;;  %v8811_v56 = vadd.f32 %v8771_v37, %v887_v51  ;;  %v758_v57 = vpop.f32.mrf.mxu0  ;;  %v7954_v58 = vpop.eup %7953 }
 0x17b   : > { %7967 = vrcp.f32 %v987_v53  ;;  %v891_v59 = vpop.f32.mrf.mxu1  ;;  %v7956_v60 = vpop.eup %7955  ;;  %1041 = vrot.lane.b32.xlu0 %v7954_v58, %s8420_s23 }
 0x17c   : > { %v6544_v61 = vmul.f32 -1.442695, %v8811_v56  ;;  %v892_v63 = vadd.f32 %v891_v59, %v758_v57  ;;  %v7028_v1 = vpop.f32.mrf.mxu0  ;;  %v988_v2 = vadd.f32 1.0, %v7956_v60 }
 0x17d   : > { %v7060_v3 = vpop.f32.mrf.mxu1 }
 0x17e   : > { %7969 = vpow2.f32 %v6544_v61  ;;  %v8816_v4 = vadd.f32 %v8771_v37, %v892_v63  ;;  %v761_v5 = vpop.f32.mrf.mxu0  ;;  %v7958_v7 = vpop.eup %7957 }
 0x17f   : > { %7971 = vrcp.f32 %v988_v2  ;;  %v894_v8 = vpop.f32.mrf.mxu1  ;;  %v7960_v9 = vpop.eup %7959  ;;  %1043 = vrot.lane.b32.xlu1 %v7958_v7, %s8420_s23  ;;  %v8865_v2 = vld [vmem:[%s9644_s1] sm:$0xf] }
 0x180   : > { %v895_v10 = vadd.f32 %v894_v8, %v761_v5  ;;  %v7029_v11 = vpop.f32.mrf.mxu0  ;;  %v989_v12 = vadd.f32 1.0, %v7960_v9  ;;  %7480 = vmatprep.subr.msk.bf16.mxu1 %vm1750_vm2, %v8865_v2 }
 0x181   : > { %v7061_v13 = vpop.f32.mrf.mxu1 }
 0x182   : > { %v8820_v14 = vadd.f32 %v8771_v37, %v895_v10  ;;  %v766_v16 = vpop.f32.mrf.mxu0  ;;  %v7962_v17 = vpop.eup %7961  ;;  %7973 = vrcp.f32 %v989_v12  ;;  %v6545_v10 = vmul.f32 -1.442695, %v8816_v4 }
 0x183   : > { %v899_v18 = vpop.f32.mrf.mxu1  ;;  %v7964_v19 = vpop.eup %7963  ;;  %1045 = vrot.lane.b32.xlu1 %v7962_v17, %s8420_s23 }
 0x184   : > { %v6546_v20 = vmul.f32 -1.442695, %v8820_v14  ;;  %v900_v21 = vadd.f32 %v899_v18, %v766_v16  ;;  %v7032_v22 = vpop.f32.mrf.mxu0  ;;  %v990_v23 = vadd.f32 1.0, %v7964_v19 }
 0x185   : > { %v7064_v25 = vpop.f32.mrf.mxu1 }
 0x186   : > { %7975 = vpow2.f32 %v6546_v20  ;;  %v8825_v26 = vadd.f32 %v8771_v37, %v900_v21  ;;  %v769_v27 = vpop.f32.mrf.mxu0 }
 0x187   : > { %v7966_v28 = vpop.eup %7965  ;;  %7977 = vrcp.f32 %v990_v23  ;;  %v902_v29 = vpop.f32.mrf.mxu1 }
 0x188   : > { %v7968_v30 = vpop.eup %7967  ;;  %v991_v31 = vadd.f32 1.0, %v7966_v28  ;;  %v903_v32 = vadd.f32 %v902_v29, %v769_v27  ;;  %v7033_v34 = vpop.f32.mrf.mxu0  ;;  %v6547_v1 = vmul.f32 -1.442695, %v8825_v26 }
 0x189   : > { %1047 = vrot.lane.b32.xlu0 %v7968_v30, %s8420_s23  ;;  %v7065_v35 = vpop.f32.mrf.mxu1  ;;  %v7901_v34 = vld [vmem:[#allocation8 + $0x8] sm:$0xff]  }
 0x18a   : > { %7979 = vrcp.f32 %v991_v31  ;;  %v8829_v36 = vadd.f32 %v8771_v37, %v903_v32  ;;  %7066 = vmatprep.subr.bf16.mxu0 %v7901_v34  ;;  %v7902_v35 = vld [vmem:[#allocation8] sm:$0xff]  }
 0x18b   : > { %v7970_v38 = vpop.eup %7969  ;;  %7067 = vmatpush3.bf16.msra.mxu0 %v7901_v34 }
 0x18c   : > { %v7972_v39 = vpop.eup %7971  ;;  %v992_v40 = vadd.f32 1.0, %v7970_v38  ;;  %v6548_v9 = vmul.f32 -1.442695, %v8829_v36  ;;  %7068 = vmatprep.subr.bf16.mxu0 %v7902_v35 }
 0x18d   : > { %1049 = vrot.lane.b32.xlu1 %v7972_v39, %s8420_s23 }
 0x18e   : > { %7981 = vrcp.f32 %v992_v40 }
 0x18f   : > { %v7974_v42 = vpop.eup %7973  ;;  %7069 = vmatpush3.bf16.msra.mxu0 %v7902_v35 }
 0x190   : > { %1051 = vrot.lane.b32.xlu0 %v7974_v42, %s8420_s23  ;;  %7132 = vmatprep.subr.bf16.mxu0 %v8418_v0 }
 0x193   : > { %v7976_v43 = vpop.eup %7975 }
 0x194   : > { %v7978_v45 = vpop.eup %7977  ;;  %v994_v46 = vadd.f32 1.0, %v7976_v43 }
 0x195   : > { %1053 = vrot.lane.b32.xlu1 %v7978_v45, %s8420_s23 }
 0x196   : > { %7983 = vrcp.f32 %v994_v46 }
 0x197   : > { %v7980_v47 = vpop.eup %7979  ;;  %7985 = vtanh.f32 %v8774_v41 }
 0x198   : > { %7987 = vtanh.f32 %v8778_v48 }
 0x199   : > { %1055 = vrot.lane.b32.xlu1 %v7980_v47, %s8420_s23  ;;  %7989 = vtanh.f32 %v8782_v55 }
 0x19a   : > { %7991 = vtanh.f32 %v8786_v62 }
 0x19b   : > { %v7982_v37 = vpop.eup %7981  ;;  %7993 = vtanh.f32 %v8790_v6 }
 0x19c   : > { %7995 = vtanh.f32 %v8794_v15 }
 0x19d   : > { %1057 = vrot.lane.b32.xlu1 %v7982_v37, %s8420_s23  ;;  %7997 = vtanh.f32 %v8798_v24  ;;  %v8871_v24 = vsel %vm1750_vm2, %v8865_v2, 0 }
 0x19e   : > { %7999 = vtanh.f32 %v8802_v33  ;;  %7075 = vmatpush3.bf16.msra.mxu1 %v8871_v24 }
 0x19f   : > { %7196 = vmatprep.subr.bf16.mxu1 %v8418_v0  ;;  %8001 = vpow2.f32 %v6547_v1 }
 0x1a0   : > { %8003 = vpow2.f32 %v6548_v9 }
 0x1a1   : > { %8005 = vpow2.f32 %v6545_v10 }
 0x1a3   : > { %v7984_v49 = vpop.eup %7983 }
 0x1a4   : > { %1061 = vrot.lane.b32.xlu1 %v7984_v49, %s8420_s23  ;;  %v7986_v51 = vpop.eup %7985 }
 0x1a5   : > { %v7988_v52 = vpop.eup %7987 }
 0x1a6   : > { %v7990_v55 = vpop.eup %7989 }
 0x1a7   : > { %v7992_v62 = vpop.eup %7991 }
 0x1a8   : > { %v7994_v3 = vpop.eup %7993 }
 0x1a9   : > { %v7996_v5 = vpop.eup %7995 }
 0x1aa   : > { %v7998_v16 = vpop.eup %7997 }
 0x1ab   : > { %v8000_v17 = vpop.eup %7999 }
 0x1ac   : > { %v8002_v25 = vpop.eup %8001 }
 0x1ad   : > { %v995_v28 = vadd.f32 1.0, %v8002_v25  ;;  %v8004_v29 = vpop.eup %8003 }
 0x1ae   : > { %v8006_v30 = vpop.eup %8005  ;;  %v996_v31 = vadd.f32 1.0, %v8004_v29 }
 0x1af   : > { %8007 = vrcp.f32 %v995_v28  ;;  %v993_v32 = vadd.f32 1.0, %v8006_v30 }
 0x1b0   : > { %8009 = vrcp.f32 %v996_v31 }
 0x1b1   : > { %8011 = vrcp.f32 %v993_v32 }
 0x1b2   : > { %8013 = vtanh.f32 %v8806_v44 }
 0x1b3   : > { %8015 = vtanh.f32 %v8811_v56 }
 0x1b4   : > { %8017 = vtanh.f32 %v8820_v14 }
 0x1b5   : > { %8019 = vtanh.f32 %v8816_v4 }
 0x1b6   : > { %8021 = vtanh.f32 %v8825_v26 }
 0x1b7   : > { %8023 = vtanh.f32 %v8829_v36 }
 0x1bc   : > { %v8008_v38 = vpop.eup %8007 }
 0x1bd   : > { %v8010_v39 = vpop.eup %8009 }
 0x1be   : > { %v8012_v40 = vpop.eup %8011 }
 0x1bf   : > { %v8014_v43 = vpop.eup %8013 }
 0x1c0   : > { %v8016_v47 = vpop.eup %8015 }
 0x1c1   : > { %v8018_v56 = vpop.eup %8017 }
 0x1c2   : > { %v8020_v30 = vpop.eup %8019 }
 0x1c3   : > { %v8022_v31 = vpop.eup %8021 }
 0x1c4   : > { %v8024_v4 = vpop.eup %8023 }
 0x1e9   : > { %v1040_v50 = vpop.permute.xlu0 %1039 }
 0x1ea   : > { %v8841_v54 = vmul.f32 %v7986_v51, %v1040_v50 }
 0x1ed   : > { %v1042_v53 = vpop.permute.xlu0 %1041 }
 0x1ee   : > { %v8843_v57 = vmul.f32 %v7988_v52, %v1042_v53 }
 0x1f0   : > { %v1095_v58 = vpack.c.bf16 %v8843_v57, %v8841_v54  ;;  %v7587_v41 = vpack.i.bf16 %v8843_v57, %v8841_v54 }
 0x1f1   : > { %v1044_v48 = vpop.permute.xlu1 %1043 }
 0x1f2   : > { %7588 = vxpose.xlu0.b32.start.end [1/1] (short) (narrow) %v7587_v41, 32  ;;  %v8851_v60 = vmul.f32 %v7990_v55, %v1044_v48 }
 0x1f5   : > { %v1046_v59 = vpop.permute.xlu1 %1045 }
 0x1f6   : > { %v8853_v61 = vmul.f32 %v7992_v62, %v1046_v59 }
 0x1f8   : > { %v1096_v6 = vpack.c.bf16 %v8853_v61, %v8851_v60  ;;  %v7609_v63 = vpack.i.bf16 %v8853_v61, %v8851_v60  ;;  %v7910_v61 = vld [vmem:[#allocation5 + $0x10] sm:$0xff]  }
 0x1fa   : > { %7610 = vxpose.xlu1.b32.start.end [1/1] (short) (narrow) %v7609_v63, 32 }
 0x1fb   : > { %v1048_v15 = vpop.permute.xlu0 %1047 }
 0x1fc   : > { %v1085_v7 = vmul.f32 %v7994_v3, %v1048_v15 }
 0x1ff   : > { %v1050_v33 = vpop.permute.xlu1 %1049 }
 0x200   : > { %v1086_v8 = vmul.f32 %v7996_v5, %v1050_v33 }
 0x202   : > { %v7631_v11 = vpack.i.bf16 %v1086_v8, %v1085_v7  ;;  %v8877_v12 = vpack.c.bf16 %v1086_v8, %v1085_v7  ;;  %v1052_v13 = vpop.permute.xlu0 %1051 }
 0x203   : > { %v1087_v19 = vmul.f32 %v7998_v16, %v1052_v13 }
 0x204   : > { %v1105_v22 = vunpack.c.h.b16 %v8877_v12 }
 0x207   : > { %v1054_v18 = vpop.permute.xlu1 %1053 }
 0x208   : > { %v1088_v20 = vmul.f32 %v8000_v17, %v1054_v18 }
 0x20a   : > { %v8879_v21 = vpack.c.bf16 %v1088_v20, %v1087_v19 }
 0x20b   : > { %v1056_v42 = vpop.permute.xlu1 %1055 }
 0x20c   : > { %v1106_v23 = vunpack.c.l.b16 %v8879_v21  ;;  %v8890_v45 = vmul.f32 %v8014_v43, %v1056_v42 }
 0x20e   : > { %v1120_v27 = vpack.c.b16 %v1106_v23, %v1105_v22 }
 0x20f   : > { %v1058_v46 = vpop.permute.xlu1 %1057 }
 0x210   : > { %7070 = vmatprep.mubr.msk.bf16.mxu0 %vm662_vm1, %v1120_v27  ;;  %v8894_v37 = vmul.f32 %v8016_v47, %v1058_v46 }
 0x212   : > { %v1099_v60 = vpack.c.bf16 %v8894_v37, %v8890_v45 }
 0x216   : > { %v1062_v50 = vpop.permute.xlu1 %1061 }
 0x217   : > { %v8897_v55 = vmul.f32 %v8018_v56, %v1062_v50 }
 0x224   : > { %1063 = vrot.lane.b32.xlu1 %v8008_v38, %s8420_s23 }
 0x227   : > { %1059 = vrot.lane.b32.xlu0 %v8012_v40, %s8420_s23 }
 0x228   : > { %1065 = vrot.lane.b32.xlu1 %v8010_v39, %s8420_s23 }
 0x245   : > { %7632 = vxpose.xlu0.b32.start.end [1/1] (short) (narrow) %v7631_v11, 32 }
 0x251   : > { %1381 = vxpose.xlu1.b32.start.end [1/1] (short) (narrow) %v1087_v19, 32 }
 0x252   : > { %1413 = vxpose.xlu0.b32.start.end [1/1] (short) (narrow) %v1088_v20, 32 }
 0x25f   : > { %1445 = vxpose.xlu0.b32.start.end [1/1] (short) (narrow) %v8890_v45, 32 }
 0x26c   : > { %1477 = vxpose.xlu0.b32.start.end [1/1] (short) (narrow) %v8894_v37, 32 }
 0x26e   : > { %v7589_v49 = vpop.trf.xlu0 }
 0x26f   : > { %v7590_v44 = vunpack.i.l.bf16 %v7589_v49  ;;  %v7593_v62 = vunpack.i.h.bf16 %v7589_v49 }
 0x272   : > { %v7594_v51 = vpop.trf.xlu0 }
 0x273   : > { %v7595_v52 = vunpack.i.l.bf16 %v7594_v51  ;;  %v7598_v14 = vunpack.i.h.bf16 %v7594_v51 }
 0x275   : > { %v1637_v53 = vpack.c.bf16 %v7595_v52, %v7590_v44  ;;  %v1639_v3 = vpack.c.bf16 %v7598_v14, %v7593_v62 }
 0x276   : > { %v7599_v41 = vpop.trf.xlu0  ;;  %v7611_v48 = vpop.trf.xlu1 }
 0x277   : > { %7076 = vmatprep.mubr.msk.bf16.mxu1 %vm1665_vm3, %v1637_v53  ;;  %v7600_v59 = vunpack.i.l.bf16 %v7599_v41  ;;  %v7603_v7 = vunpack.i.h.bf16 %v7599_v41  ;;  %v7612_v9 = vunpack.i.l.bf16 %v7611_v48  ;;  %v7615_v19 = vunpack.i.h.bf16 %v7611_v48 }
 0x279   : > { %1541 = vxpose.xlu0.b32.start.end [1/1] (short) (narrow) %v8897_v55, 32 }
 0x27a   : > { %v7604_v63 = vpop.trf.xlu0  ;;  %v7616_v15 = vpop.trf.xlu1 }
 0x27b   : > { %v7605_v1 = vunpack.i.l.bf16 %v7604_v63  ;;  %v7608_v8 = vunpack.i.h.bf16 %v7604_v63  ;;  %v7617_v10 = vunpack.i.l.bf16 %v7616_v15  ;;  %v7620_v20 = vunpack.i.h.bf16 %v7616_v15 }
 0x27d   : > { %v1638_v5 = vpack.c.bf16 %v7605_v1, %v7600_v59  ;;  %v1640_v13 = vpack.c.bf16 %v7608_v8, %v7603_v7  ;;  %v1641_v16 = vpack.c.bf16 %v7617_v10, %v7612_v9  ;;  %v1643_v23 = vpack.c.bf16 %v7620_v20, %v7615_v19 }
 0x27e   : > { %v7621_v33 = vpop.trf.xlu1 }
 0x27f   : > { %7077 = vmatmul.mubr.msk.bf16.vlgmr.msra.gmra.mxu1 %vm1665_vm3, %v1638_v5  ;;  %v7622_v17 = vunpack.i.l.bf16 %v7621_v33  ;;  %v7625_v25 = vunpack.i.h.bf16 %v7621_v33 }
 0x280   : > { %7080 = vmatprep.mubr.msk.bf16.mxu1 %vm1665_vm3, %v1639_v3 }
 0x282   : > { %v7626_v11 = vpop.trf.xlu1 }
 0x283   : > { %v7627_v18 = vunpack.i.l.bf16 %v7626_v11  ;;  %v7630_v27 = vunpack.i.h.bf16 %v7626_v11 }
 0x285   : > { %v1642_v22 = vpack.c.bf16 %v7627_v18, %v7622_v17  ;;  %v1644_v28 = vpack.c.bf16 %v7630_v27, %v7625_v25 }
 0x287   : > { %7081 = vmatmul.mubr.msk.bf16.gmra.mxu1 %vm1665_vm3, %v1640_v13 }
 0x288   : > { %7084 = vmatprep.mubr.msk.bf16.mxu1 %vm1665_vm3, %v1641_v16 }
 0x28f   : > { %7085 = vmatmul.mubr.msk.bf16.gmra.mxu1 %vm1665_vm3, %v1642_v22 }
 0x290   : > { %7088 = vmatprep.mubr.msk.bf16.mxu1 %vm1665_vm3, %v1643_v23 }
 0x296   : > { %v1064_v29 = vpop.permute.xlu1 %1063 }
 0x297   : > { %7089 = vmatmul.mubr.msk.bf16.gmra.mxu1 %vm1665_vm3, %v1644_v28  ;;  %v1093_v35 = vmul.f32 %v8022_v31, %v1064_v29 }
 0x299   : > { %v1060_v32 = vpop.permute.xlu0 %1059 }
 0x29a   : > { %v8911_v34 = vmul.f32 %v8020_v30, %v1060_v32  ;;  %v1066_v26 = vpop.permute.xlu1 %1065 }
 0x29b   : > { %v1094_v38 = vmul.f32 %v8024_v4, %v1066_v26 }
 0x29c   : > { %v1100_v36 = vpack.c.bf16 %v8897_v55, %v8911_v34  ;;  %1509 = vxpose.xlu1.b32.start.end [1/1] (short) (narrow) %v8911_v34, 32 }
 0x29d   : > { %v8916_v39 = vpack.c.bf16 %v1094_v38, %v1093_v35  ;;  %1605 = vxpose.xlu0.b32.start.end [1/1] (short) (narrow) %v1094_v38, 32 }
 0x29f   : > { %7071 = vmatmul.mubr.msk.bf16.vlgmr.msra.gmra.mxu0 %vm662_vm1, %v8916_v39 }
 0x2a0   : > { %7136 = vmatprep.mubr.msk.bf16.mxu0 %vm8419_vm0, %v8418_v0 }
 0x2a9   : > { %1573 = vxpose.xlu1.b32.start.end [1/1] (short) (narrow) %v1093_v35, 32 }
 0x2c1   : > { %v7633_v40 = vpop.trf.xlu0 }
 0x2c2   : > { %v7634_v42 = vunpack.i.l.bf16 %v7633_v40  ;;  %v7637_v44 = vunpack.i.h.bf16 %v7633_v40 }
 0x2c5   : > { %v7638_v43 = vpop.trf.xlu0 }
 0x2c6   : > { %v7639_v46 = vunpack.i.l.bf16 %v7638_v43  ;;  %v7642_v50 = vunpack.i.h.bf16 %v7638_v43 }
 0x2c8   : > { %v1645_v47 = vpack.c.bf16 %v7639_v46, %v7634_v42  ;;  %v1647_v41 = vpack.c.bf16 %v7642_v50, %v7637_v44 }
 0x2c9   : > { %v7643_v49 = vpop.trf.xlu0 }
 0x2ca   : > { %7092 = vmatprep.mubr.msk.bf16.mxu1 %vm1665_vm3, %v1645_v47  ;;  %v7644_v51 = vunpack.i.l.bf16 %v7643_v49  ;;  %v7647_v59 = vunpack.i.h.bf16 %v7643_v49 }
 0x2cd   : > { %v7648_v52 = vpop.trf.xlu0  ;;  %v1397_v53 = vpop.trf.xlu1 }
 0x2ce   : > { %v7649_v56 = vunpack.i.l.bf16 %v7648_v52  ;;  %v7652_v63 = vunpack.i.h.bf16 %v7648_v52 }
 0x2d0   : > { %v1646_v48 = vpack.c.bf16 %v7649_v56, %v7644_v51  ;;  %v1648_v3 = vpack.c.bf16 %v7652_v63, %v7647_v59 }
 0x2d1   : > { %v1429_v62 = vpop.trf.xlu0  ;;  %v1398_v14 = vpop.trf.xlu1 }
 0x2d2   : > { %7093 = vmatmul.mubr.msk.bf16.gmra.mxu1 %vm1665_vm3, %v1646_v48  ;;  %v1649_v5 = vpack.c.bf16 %v1398_v14, %v1397_v53 }
 0x2d3   : > { %7096 = vmatprep.mubr.msk.bf16.mxu1 %vm1665_vm3, %v1647_v41 }
 0x2d5   : > { %v1430_v15 = vpop.trf.xlu0  ;;  %v1399_v1 = vpop.trf.xlu1 }
 0x2d6   : > { %v1651_v10 = vpack.c.bf16 %v1430_v15, %v1429_v62 }
 0x2d9   : > { %v1431_v33 = vpop.trf.xlu0  ;;  %v1400_v7 = vpop.trf.xlu1 }
 0x2da   : > { %7097 = vmatmul.mubr.msk.bf16.gmra.mxu1 %vm1665_vm3, %v1648_v3  ;;  %v1650_v9 = vpack.c.bf16 %v1400_v7, %v1399_v1 }
 0x2db   : > { %7100 = vmatprep.mubr.msk.bf16.mxu1 %vm1665_vm3, %v1649_v5 }
 0x2dd   : > { %v1432_v8 = vpop.trf.xlu0 }
 0x2de   : > { %v1652_v16 = vpack.c.bf16 %v1432_v8, %v1431_v33 }
 0x2e1   : > { %v1461_v11 = vpop.trf.xlu0 }
 0x2e2   : > { %7101 = vmatmul.mubr.msk.bf16.gmra.mxu1 %vm1665_vm3, %v1650_v9 }
 0x2e3   : > { %7104 = vmatprep.mubr.msk.bf16.mxu1 %vm1665_vm3, %v1651_v10 }
 0x2e5   : > { %v1462_v13 = vpop.trf.xlu0 }
 0x2e6   : > { %v1653_v17 = vpack.c.bf16 %v1462_v13, %v1461_v11 }
 0x2e9   : > { %v1463_v18 = vpop.trf.xlu0 }
 0x2ea   : > { %7105 = vmatmul.mubr.msk.bf16.gmra.mxu1 %vm1665_vm3, %v1652_v16 }
 0x2eb   : > { %7108 = vmatprep.mubr.msk.bf16.mxu1 %vm1665_vm3, %v1653_v17 }
 0x2ed   : > { %v1464_v19 = vpop.trf.xlu0 }
 0x2ee   : > { %v1654_v20 = vpack.c.bf16 %v1464_v19, %v1463_v18 }
 0x2f1   : > { %v1493_v22 = vpop.trf.xlu0 }
 0x2f2   : > { %7109 = vmatmul.mubr.msk.bf16.gmra.mxu1 %vm1665_vm3, %v1654_v20 }
 0x2f5   : > { %v1494_v23 = vpop.trf.xlu0 }
 0x2f6   : > { %v1655_v25 = vpack.c.bf16 %v1494_v23, %v1493_v22 }
 0x2f8   : > { %7112 = vmatprep.mubr.msk.bf16.mxu1 %vm1665_vm3, %v1655_v25 }
 0x2f9   : > { %v1495_v27 = vpop.trf.xlu0 }
 0x2fd   : > { %v1496_v28 = vpop.trf.xlu0 }
 0x2fe   : > { %v1656_v29 = vpack.c.bf16 %v1496_v28, %v1495_v27 }
 0x300   : > { %7113 = vmatmul.mubr.msk.bf16.gmra.mxu1 %vm1665_vm3, %v1656_v29 }
 0x301   : > { %v1557_v30 = vpop.trf.xlu0 }
 0x305   : > { %v1558_v31 = vpop.trf.xlu0 }
 0x306   : > { %v1659_v46 = vpack.c.bf16 %v1558_v31, %v1557_v30  ;;  %v7903_v31 = vld [vmem:[#allocation11 + $0x8] sm:$0xff]  }
 0x307   : > { %7133 = vmatpush3.bf16.msra.mxu0 %v7903_v31 }
 0x308   : > { %7134 = vmatprep.subr.bf16.mxu0 %v8418_v0 }
 0x309   : > { %v1559_v26 = vpop.trf.xlu0 }
 0x30d   : > { %v1560_v40 = vpop.trf.xlu0 }
 0x30e   : > { %v1660_v50 = vpack.c.bf16 %v1560_v40, %v1559_v26 }
 0x318   : > { %v1525_v32 = vpop.trf.xlu1 }
 0x319   : > { %v1621_v49 = vpop.trf.xlu0 }
 0x31c   : > { %v1526_v4 = vpop.trf.xlu1 }
 0x31d   : > { %v1657_v35 = vpack.c.bf16 %v1526_v4, %v1525_v32  ;;  %v1622_v52 = vpop.trf.xlu0  ;;  %v7904_v4 = vld [vmem:[#allocation11] sm:$0xff]  }
 0x31e   : > { %v1663_v62 = vpack.c.bf16 %v1622_v52, %v1621_v49  ;;  %7135 = vmatpush3.bf16.msra.mxu0 %v7904_v4 }
 0x31f   : > { %7116 = vmatprep.mubr.msk.bf16.mxu1 %vm1665_vm3, %v1657_v35  ;;  %7164 = vmatprep.subr.bf16.mxu0 %v8418_v0 }
 0x320   : > { %v1527_v38 = vpop.trf.xlu1 }
 0x321   : > { %v1623_v41 = vpop.trf.xlu0 }
 0x324   : > { %v1528_v42 = vpop.trf.xlu1 }
 0x325   : > { %v1658_v43 = vpack.c.bf16 %v1528_v42, %v1527_v38  ;;  %v1624_v14 = vpop.trf.xlu0 }
 0x326   : > { %v1664_v59 = vpack.c.bf16 %v1624_v14, %v1623_v41 }
 0x327   : > { %7117 = vmatmul.mubr.msk.bf16.gmra.mxu1 %vm1665_vm3, %v1658_v43 }
 0x328   : > { %v1589_v47 = vpop.trf.xlu1  ;;  %7120 = vmatprep.mubr.msk.bf16.mxu1 %vm1665_vm3, %v1659_v46 }
 0x32c   : > { %v1590_v44 = vpop.trf.xlu1 }
 0x32d   : > { %v1661_v51 = vpack.c.bf16 %v1590_v44, %v1589_v47 }
 0x32f   : > { %7121 = vmatmul.mubr.msk.bf16.gmra.mxu1 %vm1665_vm3, %v1660_v50 }
 0x330   : > { %v1591_v53 = vpop.trf.xlu1  ;;  %7124 = vmatprep.mubr.msk.bf16.mxu1 %vm1665_vm3, %v1661_v51 }
 0x334   : > { %v1592_v56 = vpop.trf.xlu1 }
 0x335   : > { %v1662_v48 = vpack.c.bf16 %v1592_v56, %v1591_v53 }
 0x337   : > { %7125 = vmatmul.mubr.msk.bf16.gmra.mxu1 %vm1665_vm3, %v1662_v48 }
 0x338   : > { %7128 = vmatprep.mubr.msk.bf16.mxu1 %vm1665_vm3, %v1663_v62 }
 0x33f   : > { %7129 = vmatmul.mubr.msk.bf16.gmra.mxu1 %vm1665_vm3, %v1664_v59  ;;  %v7078_v63 = vpop.f32.mrf.mxu1 }
 0x340   : > { %7200 = vmatprep.mubr.msk.bf16.mxu1 %vm8419_vm0, %v8418_v0 }
 0x341   : > { %v1788_v15 = vpop.f32.mrf.mxu1 }
 0x343   : > { %v7079_v1 = vpop.f32.mrf.mxu1 }
 0x345   : > { %v1791_v3 = vpop.f32.mrf.mxu1 }
 0x347   : > { %v7082_v5 = vpop.f32.mrf.mxu1 }
 0x348   : > { %v7657_v13 = vpack.i.bf16 %v7082_v5, %v7078_v63 }
 0x349   : > { %v1804_v33 = vpop.f32.mrf.mxu1 }
 0x34a   : > { %v7653_v7 = vpack.i.bf16 %v1804_v33, %v1788_v15 }
 0x34b   : > { %v7083_v8 = vpop.f32.mrf.mxu1 }
 0x34c   : > { %7654 = vxpose.xlu1.b32.start [1/4] (short) (narrow) %v7653_v7, 8  ;;  %v7659_v18 = vpack.i.bf16 %v7083_v8, %v7079_v1 }
 0x34d   : > { %v1807_v9 = vpop.f32.mrf.mxu1 }
 0x34e   : > { %v7655_v10 = vpack.i.bf16 %v1807_v9, %v1791_v3 }
 0x34f   : > { %v7086_v11 = vpop.f32.mrf.mxu1 }
 0x350   : > { %7656 = vxpose.xlu1.b32.cont [2/4] (short) (narrow) %v7655_v10, 8 }
 0x351   : > { %v1820_v16 = vpop.f32.mrf.mxu1 }
 0x353   : > { %v7087_v17 = vpop.f32.mrf.mxu1 }
 0x354   : > { %7658 = vxpose.xlu1.b32.cont [3/4] (short) (narrow) %v7657_v13, 8 }
 0x355   : > { %v1823_v19 = vpop.f32.mrf.mxu1 }
 0x357   : > { %v7090_v20 = vpop.f32.mrf.mxu1 }
 0x358   : > { %7660 = vxpose.xlu1.b32.end [4/4] (short) (narrow) %v7659_v18, 8  ;;  %v7670_v29 = vpack.i.bf16 %v7090_v20, %v7086_v11 }
 0x359   : > { %v1836_v22 = vpop.f32.mrf.mxu1 }
 0x35a   : > { %v7666_v23 = vpack.i.bf16 %v1836_v22, %v1820_v16  ;;  %v7905_v22 = vld [vmem:[#allocation10 + $0x8] sm:$0xff]  }
 0x35b   : > { %v7091_v25 = vpop.f32.mrf.mxu1 }
 0x35c   : > { %7667 = vxpose.xlu0.b32.start [1/4] (short) (narrow) %v7666_v23, 8  ;;  %v7672_v30 = vpack.i.bf16 %v7091_v25, %v7087_v17  ;;  %v7906_v25 = vld [vmem:[#allocation10] sm:$0xff]  }
 0x35d   : > { %v1839_v27 = vpop.f32.mrf.mxu1 }
 0x35e   : > { %v7668_v28 = vpack.i.bf16 %v1839_v27, %v1823_v19 }
 0x360   : > { %7669 = vxpose.xlu0.b32.cont [2/4] (short) (narrow) %v7668_v28, 8 }
 0x364   : > { %7671 = vxpose.xlu0.b32.cont [3/4] (short) (narrow) %v7670_v29, 8 }
 0x368   : > { %7673 = vxpose.xlu0.b32.end [4/4] (short) (narrow) %v7672_v30, 8 }
 0x392   : > { %v7094_v32 = vpop.f32.mrf.mxu1 }
 0x394   : > { %v1852_v26 = vpop.f32.mrf.mxu1 }
 0x396   : > { %v7095_v35 = vpop.f32.mrf.mxu1 }
 0x398   : > { %v1855_v38 = vpop.f32.mrf.mxu1 }
 0x39a   : > { %v7098_v40 = vpop.f32.mrf.mxu1 }
 0x39b   : > { %v7683_v50 = vpack.i.bf16 %v7098_v40, %v7094_v32 }
 0x39c   : > { %v1868_v42 = vpop.f32.mrf.mxu1 }
 0x39d   : > { %v7679_v43 = vpack.i.bf16 %v1868_v42, %v1852_v26 }
 0x39e   : > { %v7099_v46 = vpop.f32.mrf.mxu1 }
 0x39f   : > { %7680 = vxpose.xlu1.b32.start [1/4] (short) (narrow) %v7679_v43, 8  ;;  %v7685_v53 = vpack.i.bf16 %v7099_v46, %v7095_v35 }
 0x3a0   : > { %v1871_v47 = vpop.f32.mrf.mxu1 }
 0x3a1   : > { %v7681_v49 = vpack.i.bf16 %v1871_v47, %v1855_v38 }
 0x3a2   : > { %v7102_v44 = vpop.f32.mrf.mxu1 }
 0x3a3   : > { %7682 = vxpose.xlu1.b32.cont [2/4] (short) (narrow) %v7681_v49, 8 }
 0x3a4   : > { %v1884_v51 = vpop.f32.mrf.mxu1 }
 0x3a6   : > { %v7103_v52 = vpop.f32.mrf.mxu1 }
 0x3a7   : > { %7684 = vxpose.xlu1.b32.cont [3/4] (short) (narrow) %v7683_v50, 8 }
 0x3a8   : > { %v1887_v56 = vpop.f32.mrf.mxu1 }
 0x3aa   : > { %v7106_v41 = vpop.f32.mrf.mxu1 }
 0x3ab   : > { %7686 = vxpose.xlu1.b32.end [4/4] (short) (narrow) %v7685_v53, 8  ;;  %v7696_v1 = vpack.i.bf16 %v7106_v41, %v7102_v44 }
 0x3ac   : > { %v1900_v48 = vpop.f32.mrf.mxu1 }
 0x3ad   : > { %v7692_v62 = vpack.i.bf16 %v1900_v48, %v1884_v51 }
 0x3ae   : > { %v7107_v14 = vpop.f32.mrf.mxu1 }
 0x3af   : > { %7693 = vxpose.xlu0.b32.start [1/4] (short) (narrow) %v7692_v62, 8  ;;  %v7698_v5 = vpack.i.bf16 %v7107_v14, %v7103_v52 }
 0x3b0   : > { %v1903_v59 = vpop.f32.mrf.mxu1 }
 0x3b1   : > { %v7694_v63 = vpack.i.bf16 %v1903_v59, %v1887_v56 }
 0x3b2   : > { %v7110_v15 = vpop.f32.mrf.mxu1 }
 0x3b3   : > { %7695 = vxpose.xlu0.b32.cont [2/4] (short) (narrow) %v7694_v63, 8 }
 0x3b4   : > { %v1916_v3 = vpop.f32.mrf.mxu1 }
 0x3b6   : > { %v7111_v33 = vpop.f32.mrf.mxu1 }
 0x3b7   : > { %7697 = vxpose.xlu0.b32.cont [3/4] (short) (narrow) %v7696_v1, 8 }
 0x3b8   : > { %v1919_v7 = vpop.f32.mrf.mxu1 }
 0x3bb   : > { %7699 = vxpose.xlu0.b32.end [4/4] (short) (narrow) %v7698_v5, 8 }
 0x3c0   : > { %v7114_v8 = vpop.f32.mrf.mxu1 }
 0x3c1   : > { %v7709_v17 = vpack.i.bf16 %v7114_v8, %v7110_v15 }
 0x3c2   : > { %v1932_v9 = vpop.f32.mrf.mxu1 }
 0x3c3   : > { %v7705_v10 = vpack.i.bf16 %v1932_v9, %v1916_v3 }
 0x3c4   : > { %v7115_v11 = vpop.f32.mrf.mxu1 }
 0x3c5   : > { %7706 = vxpose.xlu1.b32.start [1/4] (short) (narrow) %v7705_v10, 8  ;;  %v7711_v27 = vpack.i.bf16 %v7115_v11, %v7111_v33  ;;  %v7907_v11 = vld [vmem:[#allocation7 + $0x18] sm:$0xff]  }
 0x3c6   : > { %v1935_v13 = vpop.f32.mrf.mxu1  ;;  %7197 = vmatpush3.bf16.msra.mxu1 %v7907_v11 }
 0x3c7   : > { %v7707_v16 = vpack.i.bf16 %v1935_v13, %v1919_v7  ;;  %7198 = vmatprep.subr.bf16.mxu1 %v8418_v0 }
 0x3c8   : > { %v7661_v18 = vpop.trf.xlu1 }
 0x3c9   : > { %7708 = vxpose.xlu1.b32.cont [2/4] (short) (narrow) %v7707_v16, 8  ;;  %v7665_v19 = vunpack.i.h.bf16 %v7661_v18  ;;  %v7662_v20 = vunpack.i.l.bf16 %v7661_v18 }
 0x3cb   : > { %v2459_v23 = vpack.c.bf16 %v7665_v19, %v7662_v20 }
 0x3cd   : > { %7710 = vxpose.xlu1.b32.cont [3/4] (short) (narrow) %v7709_v17, 8  ;;  %7137 = vmatmul.mubr.msk.bf16.vlgmr.msra.gmra.mxu0 %vm662_vm1, %v2459_v23  ;;  %v7908_v23 = vld [vmem:[#allocation7 + $0x10] sm:$0xff]  }
 0x3ce   : > { %7165 = vmatpush3.bf16.msra.mxu0 %v7905_v22  ;;  %7140 = vmatprep.mubr.msk.bf16.mxu0 %vm8419_vm0, %v8418_v0 }
 0x3cf   : > { %7166 = vmatprep.subr.bf16.mxu0 %v8418_v0  ;;  %7199 = vmatpush3.bf16.msra.mxu1 %v7908_v23  ;;  %v8159_v23 = vld [vmem:[%s8688_s4 + $0xc] sm:$0xf] }
 0x3d1   : > { %7712 = vxpose.xlu1.b32.end [4/4] (short) (narrow) %v7711_v27, 8  ;;  %v8967_v27 = vpop.f32.mrf.mxu0 }
 0x3d2   : > { %7167 = vmatpush3.bf16.msra.mxu0 %v7906_v25 }
 0x3d3   : > { %7220 = vmatprep.subr.bf16.mxu0 %v8418_v0 }
 0x3d8   : > { %v7674_v28 = vpop.trf.xlu0 }
 0x3d9   : > { %v7678_v29 = vunpack.i.h.bf16 %v7674_v28  ;;  %v7675_v30 = vunpack.i.l.bf16 %v7674_v28 }
 0x3db   : > { %v2460_v31 = vpack.c.bf16 %v7678_v29, %v7675_v30 }
 0x3dd   : > { %7141 = vmatmul.mubr.msk.bf16.gmra.mxu0 %vm662_vm1, %v2460_v31  ;;  %v8969_v31 = vpop.f32.mrf.mxu0 }
 0x3de   : > { %7144 = vmatprep.mubr.msk.bf16.mxu0 %vm8419_vm0, %v8418_v0 }
 0x3e7   : > { %v7118_v32 = vpop.f32.mrf.mxu1 }
 0x3e9   : > { %v1948_v4 = vpop.f32.mrf.mxu1 }
 0x3eb   : > { %v7119_v26 = vpop.f32.mrf.mxu1 }
 0x3ed   : > { %v1951_v35 = vpop.f32.mrf.mxu1 }
 0x3ef   : > { %v7122_v38 = vpop.f32.mrf.mxu1 }
 0x3f0   : > { %v7722_v50 = vpack.i.bf16 %v7122_v38, %v7118_v32 }
 0x3f1   : > { %v1964_v40 = vpop.f32.mrf.mxu1 }
 0x3f2   : > { %v7718_v42 = vpack.i.bf16 %v1964_v40, %v1948_v4  ;;  %v8974_v4 = vpop.f32.mrf.mxu0 }
 0x3f3   : > { %v7123_v43 = vpop.f32.mrf.mxu1 }
 0x3f4   : > { %7719 = vxpose.xlu0.b32.start [1/4] (short) (narrow) %v7718_v42, 8  ;;  %v7724_v53 = vpack.i.bf16 %v7123_v43, %v7119_v26  ;;  %v7909_v26 = vld [vmem:[#allocation5 + $0x18] sm:$0xff]  }
 0x3f5   : > { %v1967_v46 = vpop.f32.mrf.mxu1 }
 0x3f6   : > { %v7720_v47 = vpack.i.bf16 %v1967_v46, %v1951_v35  ;;  %v8976_v35 = vpop.f32.mrf.mxu0 }
 0x3f7   : > { %v7126_v49 = vpop.f32.mrf.mxu1 }
 0x3f8   : > { %7721 = vxpose.xlu0.b32.cont [2/4] (short) (narrow) %v7720_v47, 8 }
 0x3f9   : > { %v1980_v44 = vpop.f32.mrf.mxu1 }
 0x3fb   : > { %v7127_v51 = vpop.f32.mrf.mxu1 }
 0x3fc   : > { %7723 = vxpose.xlu0.b32.cont [3/4] (short) (narrow) %v7722_v50, 8 }
 0x3fd   : > { %v1983_v52 = vpop.f32.mrf.mxu1 }
 0x3ff   : > { %v7130_v56 = vpop.f32.mrf.mxu1 }
 0x400   : > { %7725 = vxpose.xlu0.b32.end [4/4] (short) (narrow) %v7724_v53, 8  ;;  %v7735_v63 = vpack.i.bf16 %v7130_v56, %v7126_v49 }
 0x401   : > { %v1996_v41 = vpop.f32.mrf.mxu1 }
 0x402   : > { %v7731_v48 = vpack.i.bf16 %v1996_v41, %v1980_v44 }
 0x403   : > { %v7131_v62 = vpop.f32.mrf.mxu1 }
 0x404   : > { %7732 = vxpose.xlu1.b32.start [1/4] (short) (narrow) %v7731_v48, 8  ;;  %v7737_v15 = vpack.i.bf16 %v7131_v62, %v7127_v51 }
 0x405   : > { %v1999_v14 = vpop.f32.mrf.mxu1 }
 0x406   : > { %v7733_v59 = vpack.i.bf16 %v1999_v14, %v1983_v52 }
 0x408   : > { %7734 = vxpose.xlu1.b32.cont [2/4] (short) (narrow) %v7733_v59, 8  ;;  %v9035_v59 = vld [vmem:[%s9653_s10] ss:$0 sm:$0xff] }
 0x40c   : > { %7736 = vxpose.xlu1.b32.cont [3/4] (short) (narrow) %v7735_v63, 8 }
 0x410   : > { %7738 = vxpose.xlu1.b32.end [4/4] (short) (narrow) %v7737_v15, 8 }
 0x41b   : > { %v7687_v1 = vpop.trf.xlu1 }
 0x41c   : > { %v7691_v3 = vunpack.i.h.bf16 %v7687_v1  ;;  %v7688_v5 = vunpack.i.l.bf16 %v7687_v1 }
 0x41e   : > { %v2461_v33 = vpack.c.bf16 %v7691_v3, %v7688_v5  ;;  %v8157_v3 = vld [vmem:[%s8688_s4 + $0x4] sm:$0xf] }
 0x41f   : > { %v2739_v5 = vunpack.c.l.bf16 %v8157_v3 }
 0x420   : > { %7145 = vmatmul.mubr.msk.bf16.gmra.mxu0 %vm662_vm1, %v2461_v33 }
 0x421   : > { %7148 = vmatprep.mubr.msk.bf16.mxu0 %vm8419_vm0, %v8418_v0 }
 0x42b   : > { %v7700_v7 = vpop.trf.xlu0 }
 0x42c   : > { %v7704_v8 = vunpack.i.h.bf16 %v7700_v7  ;;  %v7701_v9 = vunpack.i.l.bf16 %v7700_v7  ;;  %v8158_v7 = vld [vmem:[%s8688_s4 + $0x8] sm:$0xf] }
 0x42e   : > { %v2462_v10 = vpack.c.bf16 %v7704_v8, %v7701_v9  ;;  %v2740_v8 = vunpack.c.l.bf16 %v8158_v7 }
 0x430   : > { %7149 = vmatmul.mubr.msk.bf16.gmra.mxu0 %vm662_vm1, %v2462_v10 }
 0x431   : > { %7152 = vmatprep.mubr.msk.bf16.mxu0 %vm8419_vm0, %v8418_v0 }
 0x441   : > { %v7713_v13 = vpop.trf.xlu1 }
 0x442   : > { %v7717_v16 = vunpack.i.h.bf16 %v7713_v13  ;;  %v7714_v17 = vunpack.i.l.bf16 %v7713_v13 }
 0x444   : > { %v2463_v18 = vpack.c.bf16 %v7717_v16, %v7714_v17 }
 0x446   : > { %7153 = vmatmul.mubr.msk.bf16.gmra.mxu0 %vm662_vm1, %v2463_v18 }
 0x447   : > { %7156 = vmatprep.mubr.msk.bf16.mxu0 %vm8419_vm0, %v8418_v0 }
 0x470   : > { %v7726_v19 = vpop.trf.xlu0 }
 0x471   : > { %v7730_v20 = vunpack.i.h.bf16 %v7726_v19  ;;  %v7727_v22 = vunpack.i.l.bf16 %v7726_v19 }
 0x473   : > { %v2464_v25 = vpack.c.bf16 %v7730_v20, %v7727_v22 }
 0x475   : > { %7157 = vmatmul.mubr.msk.bf16.gmra.mxu0 %vm662_vm1, %v2464_v25  ;;  %v2741_v25 = vunpack.c.l.bf16 %v8159_v23 }
 0x476   : > { %7160 = vmatprep.mubr.msk.bf16.mxu0 %vm8419_vm0, %v8418_v0 }
 0x480   : > { %v7739_v28 = vpop.trf.xlu1 }
 0x481   : > { %v7743_v29 = vunpack.i.h.bf16 %v7739_v28  ;;  %v7740_v30 = vunpack.i.l.bf16 %v7739_v28 }
 0x483   : > { %v2465_v32 = vpack.c.bf16 %v7743_v29, %v7740_v30  ;;  %v8160_v29 = vld [vmem:[%s8688_s4 + $0x10] sm:$0xf] }
 0x484   : > { %v2742_v30 = vunpack.c.l.bf16 %v8160_v29 }
 0x485   : > { %7161 = vmatmul.mubr.msk.bf16.gmra.mxu0 %vm662_vm1, %v2465_v32 }
 0x486   : > { %7168 = vmatprep.mubr.msk.bf16.mxu0 %vm8419_vm0, %v8418_v0 }
 0x48d   : > { %7169 = vmatmul.mubr.msk.bf16.vlgmr.msra.gmra.mxu0 %vm662_vm1, %v1095_v58  ;;  %v2541_v38 = vpop.f32.mrf.mxu0 }
 0x48e   : > { %7172 = vmatprep.mubr.msk.bf16.mxu0 %vm8419_vm0, %v8418_v0  ;;  %7221 = vmatpush3.bf16.msra.mxu0 %v7909_v26 }
 0x48f   : > { %v7138_v40 = vpop.f32.mrf.mxu0  ;;  %7222 = vmatprep.subr.bf16.mxu0 %v8418_v0 }
 0x491   : > { %v2544_v42 = vpop.f32.mrf.mxu0 }
 0x492   : > { %7223 = vmatpush3.bf16.msra.mxu0 %v7910_v61 }
 0x493   : > { %v7139_v43 = vpop.f32.mrf.mxu0  ;;  %7481 = vmatprep.subr.msk.bf16.mxu0 %vm1750_vm2, %v8865_v2 }
 0x495   : > { %7173 = vmatmul.mubr.msk.bf16.gmra.mxu0 %vm662_vm1, %v1096_v6 }
 0x496   : > { %7176 = vmatprep.mubr.msk.bf16.mxu0 %vm8419_vm0, %v8418_v0 }
 0x49d   : > { %7177 = vmatmul.mubr.msk.bf16.gmra.mxu0 %vm662_vm1, %v8877_v12  ;;  %v2549_v54 = vpop.f32.mrf.mxu0 }
 0x49e   : > { %7180 = vmatprep.mubr.msk.bf16.mxu0 %vm8419_vm0, %v8418_v0 }
 0x49f   : > { %v7142_v57 = vpop.f32.mrf.mxu0 }
 0x4a1   : > { %v2552_v58 = vpop.f32.mrf.mxu0 }
 0x4a3   : > { %v7143_v46 = vpop.f32.mrf.mxu0 }
 0x4a5   : > { %7181 = vmatmul.mubr.msk.bf16.gmra.mxu0 %vm662_vm1, %v8879_v21 }
 0x4a6   : > { %7184 = vmatprep.mubr.msk.bf16.mxu0 %vm8419_vm0, %v8418_v0 }
 0x4ad   : > { %7185 = vmatmul.mubr.msk.bf16.gmra.mxu0 %vm662_vm1, %v1099_v60  ;;  %v8161_v60 = vld [vmem:[%s8688_s4 + $0x14] sm:$0xf] }
 0x4ae   : > { %7188 = vmatprep.mubr.msk.bf16.mxu0 %vm8419_vm0, %v8418_v0  ;;  %v2743_v61 = vunpack.c.l.bf16 %v8161_v60 }
 0x4b5   : > { %7189 = vmatmul.mubr.msk.bf16.gmra.mxu0 %vm662_vm1, %v1100_v36 }
 0x4b6   : > { %7192 = vmatprep.mubr.msk.bf16.mxu0 %vm8419_vm0, %v8418_v0 }
 0x4bd   : > { %7193 = vmatmul.mubr.msk.bf16.gmra.mxu0 %vm662_vm1, %v8916_v39 }
 0x4be   : > { %7224 = vmatprep.mubr.msk.bf16.mxu0 %vm8419_vm0, %v8418_v0 }
 0x4e0   : > { %v2557_v6 = vpop.f32.mrf.mxu0 }
 0x4e2   : > { %v7146_v12 = vpop.f32.mrf.mxu0 }
 0x4e4   : > { %v2560_v21 = vpop.f32.mrf.mxu0 }
 0x4e6   : > { %v7147_v45 = vpop.f32.mrf.mxu0 }
 0x4e7   : > { %v8162_v45 = vld [vmem:[%s8688_s4 + $0x18] sm:$0xf] }
 0x4f0   : > { %v9016_v37 = vpop.f32.mrf.mxu0 }
 0x4f2   : > { %v7150_v55 = vpop.f32.mrf.mxu0 }
 0x4f3   : > { %v2744_v55 = vunpack.c.l.bf16 %v8162_v45 }
 0x4f4   : > { %v9018_v34 = vpop.f32.mrf.mxu0 }
 0x4f6   : > { %v7151_v36 = vpop.f32.mrf.mxu0 }
 0x506   : > { %v9020_v47 = vpop.f32.mrf.mxu0 }
 0x508   : > { %v7154_v39 = vpop.f32.mrf.mxu0 }
 0x50a   : > { %v9022_v49 = vpop.f32.mrf.mxu0 }
 0x50c   : > { %v7155_v44 = vpop.f32.mrf.mxu0 }
 0x535   : > { %v9024_v50 = vpop.f32.mrf.mxu0 }
 0x537   : > { %v7158_v2 = vpop.f32.mrf.mxu0 }
 0x539   : > { %v9026_v51 = vpop.f32.mrf.mxu0 }
 0x53b   : > { %v7159_v52 = vpop.f32.mrf.mxu0 }
 0x545   : > { %v9028_v53 = vpop.f32.mrf.mxu0 }
 0x547   : > { %v7162_v56 = vpop.f32.mrf.mxu0 }
 0x549   : > { %v9030_v41 = vpop.f32.mrf.mxu0 }
 0x54b   : > { %v7163_v48 = vpop.f32.mrf.mxu0 }
 0x54d   : > { %v2663_v62 = vpop.f32.mrf.mxu0 }
 0x54e   : > { %v2664_v14 = vadd.f32 %v2663_v62, %v2541_v38 }
 0x54f   : > { %v7170_v63 = vpop.f32.mrf.mxu0 }
 0x550   : > { %v2725_v1 = vadd.f32 %v9035_v59, %v2664_v14  ;;  %v8163_v14 = vld [vmem:[%s8688_s4 + $0x1c] sm:$0xf] }
 0x551   : > { %v2666_v15 = vpop.f32.mrf.mxu0  ;;  %v2745_v63 = vunpack.c.l.bf16 %v8163_v14 }
 0x552   : > { %v2667_v33 = vadd.f32 %v2666_v15, %v2544_v42  ;;  %v2753_v13 = vadd.f32 %v2739_v5, %v2725_v1  ;;  %v8164_v1 = vld [vmem:[%s8688_s4 + $0x24] sm:$0xf] }
 0x553   : > { %v7171_v9 = vpop.f32.mrf.mxu0  ;;  %v2746_v3 = vunpack.c.l.bf16 %v8164_v1 }
 0x554   : > { %v2726_v10 = vadd.f32 %v9035_v59, %v2667_v33 }
 0x555   : > { %v2671_v11 = vpop.f32.mrf.mxu0 }
 0x556   : > { %v2754_v16 = vadd.f32 %v2740_v8, %v2726_v10  ;;  %v2672_v17 = vadd.f32 %v2671_v11, %v2549_v54  ;;  %v8165_v11 = vld [vmem:[%s8688_s4 + $0x28] sm:$0xf] }
 0x557   : > { %v7174_v18 = vpop.f32.mrf.mxu0 }
 0x558   : > { %v2767_v19 = vpack.c.bf16 %v2754_v16, %v2753_v13  ;;  %v2727_v22 = vadd.f32 %v9035_v59, %v2672_v17  ;;  %v2747_v13 = vunpack.c.l.bf16 %v8165_v11 }
 0x559   : > { %v2674_v20 = vpop.f32.mrf.mxu0 }
 0x55a   : > { %v2675_v28 = vadd.f32 %v2674_v20, %v2552_v58  ;;  %7225 = vmatmul.mubr.msk.bf16.vlgmr.msra.gmra.mxu0 %vm662_vm1, %v2767_v19  ;;  %v9049_v40 = vadd.f32 %v2741_v25, %v2727_v22  ;;  %v8166_v19 = vld [vmem:[%s8688_s4 + $0x2c] sm:$0xf] }
 0x55b   : > { %v7175_v32 = vpop.f32.mrf.mxu0  ;;  %7228 = vmatprep.mubr.msk.bf16.mxu0 %vm8419_vm0, %v8418_v0  ;;  %7253 = vmatpush3.bf16.msra.mxu0 %v8871_v24  ;;  %v2748_v20 = vunpack.c.l.bf16 %v8166_v19 }
 0x55c   : > { %v2728_v26 = vadd.f32 %v9035_v59, %v2675_v28 }
 0x55d   : > { %v2679_v38 = vpop.f32.mrf.mxu0 }
 0x55e   : > { %v9051_v42 = vadd.f32 %v2742_v30, %v2728_v26  ;;  %v2680_v43 = vadd.f32 %v2679_v38, %v2557_v6  ;;  %v8167_v26 = vld [vmem:[%s8688_s4 + $0x30] sm:$0xf] }
 0x55f   : > { %v7178_v54 = vpop.f32.mrf.mxu0  ;;  %v2749_v38 = vunpack.c.l.bf16 %v8167_v26 }
 0x560   : > { %v2768_v57 = vpack.c.bf16 %v9051_v42, %v9049_v40  ;;  %v2729_v46 = vadd.f32 %v9035_v59, %v2680_v43 }
 0x561   : > { %v2682_v58 = vpop.f32.mrf.mxu0 }
 0x562   : > { %v2683_v12 = vadd.f32 %v2682_v58, %v2560_v21  ;;  %7201 = vmatmul.mubr.msk.bf16.vlgmr.msra.gmra.mxu1 %vm662_vm1, %v2768_v57  ;;  %7229 = vmatmul.mubr.msk.bf16.gmra.mxu0 %vm662_vm1, %v2768_v57  ;;  %v9065_v44 = vadd.f32 %v2743_v61, %v2729_v46  ;;  %v8168_v58 = vld [vmem:[%s8688_s4 + $0x34] sm:$0xf] }
 0x563   : > { %v7179_v36 = vpop.f32.mrf.mxu0  ;;  %7204 = vmatprep.mubr.msk.bf16.mxu1 %vm8419_vm0, %v8418_v0  ;;  %7232 = vmatprep.mubr.msk.bf16.mxu0 %vm8419_vm0, %v8418_v0  ;;  %v2750_v46 = vunpack.c.l.bf16 %v8168_v58 }
 0x564   : > { %v2730_v6 = vadd.f32 %v9035_v59, %v2683_v12 }
 0x565   : > { %v2687_v39 = vpop.f32.mrf.mxu0 }
 0x566   : > { %v9067_v21 = vadd.f32 %v2744_v55, %v2730_v6  ;;  %v2688_v2 = vadd.f32 %v2687_v39, %v9016_v37 }
 0x567   : > { %v7182_v52 = vpop.f32.mrf.mxu0 }
 0x568   : > { %v2769_v56 = vpack.c.bf16 %v9067_v21, %v9065_v44  ;;  %v2731_v62 = vadd.f32 %v9035_v59, %v2688_v2  ;;  %v8169_v52 = vld [vmem:[%s8688_s4 + $0x38] sm:$0xf] }
 0x569   : > { %v2690_v48 = vpop.f32.mrf.mxu0 }
 0x56a   : > { %v2691_v15 = vadd.f32 %v2690_v48, %v9018_v34  ;;  %7205 = vmatmul.mubr.msk.bf16.gmra.mxu1 %vm662_vm1, %v2769_v56  ;;  %v9080_v7 = vadd.f32 %v2745_v63, %v2731_v62  ;;  %v8170_v62 = vld [vmem:[%s8688_s4 + $0x3c] sm:$0xf]  ;;  %s6810_s4 = sshll.u32 %s8525_s22, 9  ;;  %s6347_s22 = scalar_lea.sflag [#allocation4], %s8684_s28 }
 0x56b   : > { %v7183_v5 = vpop.f32.mrf.mxu0  ;;  %7208 = vmatprep.mubr.msk.bf16.mxu1 %vm8419_vm0, %v8418_v0  ;;  %v2752_v14 = vunpack.c.l.bf16 %v8170_v62  ;;  %s9598_s15 = scalar_lea.hbm %s9697_s20, %s6810_s4 }
 0x56c   : > { %v2732_v37 = vadd.f32 %v9035_v59, %v2691_v15 }
 0x56d   : > { %v2695_v33 = vpop.f32.mrf.mxu0 }
 0x56e   : > { %v2760_v8 = vadd.f32 %v2746_v3, %v2732_v37  ;;  %v2696_v9 = vadd.f32 %v2695_v33, %v9020_v47 }
 0x56f   : > { %v7186_v10 = vpop.f32.mrf.mxu0 }
 0x570   : > { %v2770_v34 = vpack.c.bf16 %v2760_v8, %v9080_v7  ;;  %v2733_v17 = vadd.f32 %v9035_v59, %v2696_v9 }
 0x571   : > { %v2698_v16 = vpop.f32.mrf.mxu0 }
 0x572   : > { %v2699_v18 = vadd.f32 %v2698_v16, %v9022_v49  ;;  %v6619_v22 = vsel %vm1750_vm2, %v2769_v56, %v2770_v34  ;;  %v2761_v28 = vadd.f32 %v2747_v13, %v2733_v17  ;;  %v2751_v56 = vunpack.c.l.bf16 %v8169_v52 }
 0x573   : > { %v7187_v23 = vpop.f32.mrf.mxu0  ;;  %7233 = vmatmul.mubr.msk.bf16.gmra.mxu0 %vm662_vm1, %v6619_v22 }
 0x574   : > { %v2734_v47 = vadd.f32 %v9035_v59, %v2699_v18  ;;  %7236 = vmatprep.mubr.msk.bf16.mxu0 %vm8419_vm0, %v8418_v0 }
 0x575   : > { %v2703_v25 = vpop.f32.mrf.mxu0 }
 0x576   : > { %v9093_v29 = vadd.f32 %v2748_v20, %v2734_v47  ;;  %v2704_v30 = vadd.f32 %v2703_v25, %v9024_v50 }
 0x577   : > { %v7190_v49 = vpop.f32.mrf.mxu0 }
 0x578   : > { %v2771_v32 = vpack.c.bf16 %v9093_v29, %v2761_v28  ;;  %v2735_v54 = vadd.f32 %v9035_v59, %v2704_v30 }
 0x579   : > { %v2706_v43 = vpop.f32.mrf.mxu0 }
 0x57a   : > { %v2707_v57 = vadd.f32 %v2706_v43, %v9026_v51  ;;  %v6800_v60 = vsel %vm1750_vm2, %v2770_v34, %v2771_v32  ;;  %v9109_v12 = vadd.f32 %v2749_v38, %v2735_v54 }
 0x57b   : > { %v7191_v61 = vpop.f32.mrf.mxu0  ;;  %7209 = vmatmul.mubr.msk.bf16.gmra.mxu1 %vm662_vm1, %v6800_v60  ;;  %7237 = vmatmul.mubr.msk.bf16.gmra.mxu0 %vm662_vm1, %v2771_v32 }
 0x57c   : > { %v2736_v50 = vadd.f32 %v9035_v59, %v2707_v57  ;;  %7212 = vmatprep.mubr.msk.bf16.mxu1 %vm8419_vm0, %v8418_v0  ;;  %7240 = vmatprep.mubr.msk.bf16.mxu0 %vm8419_vm0, %v8418_v0 }
 0x57d   : > { %v2711_v51 = vpop.f32.mrf.mxu0 }
 0x57e   : > { %v9111_v45 = vadd.f32 %v2750_v46, %v2736_v50  ;;  %v2712_v55 = vadd.f32 %v2711_v51, %v9028_v53 }
 0x57f   : > { %v7194_v36 = vpop.f32.mrf.mxu0 }
 0x580   : > { %v2772_v6 = vpack.c.bf16 %v9111_v45, %v9109_v12  ;;  %v2737_v2 = vadd.f32 %v9035_v59, %v2712_v55 }
 0x581   : > { %v2714_v39 = vpop.f32.mrf.mxu0 }
 0x582   : > { %v2715_v48 = vadd.f32 %v2714_v39, %v9030_v41  ;;  %v9125_v15 = vadd.f32 %v2751_v56, %v2737_v2 }
 0x583   : > { %v7195_v63 = vpop.f32.mrf.mxu0  ;;  %7213 = vmatmul.mubr.msk.bf16.gmra.mxu1 %vm662_vm1, %v2772_v6  ;;  %7241 = vmatmul.mubr.msk.bf16.gmra.mxu0 %vm662_vm1, %v2772_v6 }
 0x584   : > { %v2738_v53 = vadd.f32 %v9035_v59, %v2715_v48  ;;  %7216 = vmatprep.mubr.msk.bf16.mxu1 %vm8419_vm0, %v8418_v0  ;;  %v9135_v59 = vld [vmem:[%s9648_s5 + $0x1] ss:$0 sm:$0xff] }
 0x586   : > { %v9127_v1 = vadd.f32 %v2752_v14, %v2738_v53 }
 0x588   : > { %v2773_v3 = vpack.c.bf16 %v9127_v1, %v9125_v15 }
 0x58b   : > { %7217 = vmatmul.mubr.msk.bf16.gmra.mxu1 %vm662_vm1, %v2773_v3 }
 0x61a   : > { %v2988_v41 = vpop.f32.mrf.mxu0 }
 0x61c   : > { %v7226_v5 = vpop.f32.mrf.mxu0 }
 0x61e   : > { %v2991_v37 = vpop.f32.mrf.mxu0 }
 0x620   : > { %v7227_v33 = vpop.f32.mrf.mxu0 }
 0x622   : > { %v2891_v8 = vpop.f32.mrf.mxu1  ;;  %v2996_v9 = vpop.f32.mrf.mxu0 }
 0x623   : > { %v2989_v10 = vadd.f32 %v2988_v41, %v2891_v8 }
 0x624   : > { %v7202_v34 = vpop.f32.mrf.mxu1  ;;  %v7230_v11 = vpop.f32.mrf.mxu0 }
 0x625   : > { %v9138_v13 = vadd.f32 %v9135_v59, %v2989_v10 }
 0x626   : > { %v2894_v16 = vpop.f32.mrf.mxu1  ;;  %v2999_v17 = vpop.f32.mrf.mxu0 }
 0x627   : > { %v6629_v18 = vmul.f32 -1.442695, %v9138_v13  ;;  %v2992_v19 = vadd.f32 %v2991_v37, %v2894_v16 }
 0x628   : > { %v7203_v20 = vpop.f32.mrf.mxu1  ;;  %v7231_v22 = vpop.f32.mrf.mxu0 }
 0x629   : > { %8025 = vpow2.f32 %v6629_v18  ;;  %v9142_v23 = vadd.f32 %v9135_v59, %v2992_v19 }
 0x62a   : > { %v2899_v47 = vpop.f32.mrf.mxu1 }
 0x62b   : > { %v6630_v25 = vmul.f32 -1.442695, %v9142_v23  ;;  %v2997_v28 = vadd.f32 %v2996_v9, %v2899_v47 }
 0x62c   : > { %v7206_v30 = vpop.f32.mrf.mxu1 }
 0x62d   : > { %8027 = vpow2.f32 %v6630_v25  ;;  %v9146_v49 = vadd.f32 %v9135_v59, %v2997_v28 }
 0x62e   : > { %v2902_v32 = vpop.f32.mrf.mxu1 }
 0x62f   : > { %v6631_v26 = vmul.f32 -1.442695, %v9146_v49  ;;  %v3000_v38 = vadd.f32 %v2999_v17, %v2902_v32 }
 0x630   : > { %v7207_v43 = vpop.f32.mrf.mxu1 }
 0x631   : > { %8029 = vpow2.f32 %v6631_v26  ;;  %v9150_v54 = vadd.f32 %v9135_v59, %v3000_v38 }
 0x633   : > { %v6632_v57 = vmul.f32 -1.442695, %v9150_v54  ;;  %v3004_v58 = vpop.f32.mrf.mxu0 }
 0x635   : > { %8031 = vpow2.f32 %v6632_v57  ;;  %v7234_v46 = vpop.f32.mrf.mxu0 }
 0x636   : > { %v8026_v60 = vpop.eup %8025 }
 0x637   : > { %v3085_v61 = vadd.f32 1.0, %v8026_v60  ;;  %v3007_v50 = vpop.f32.mrf.mxu0 }
 0x639   : > { %8033 = vrcp.f32 %v3085_v61  ;;  %v7235_v51 = vpop.f32.mrf.mxu0 }
 0x63a   : > { %v8028_v55 = vpop.eup %8027 }
 0x63b   : > { %v3086_v36 = vadd.f32 1.0, %v8028_v55  ;;  %v2907_v6 = vpop.f32.mrf.mxu1  ;;  %v3012_v39 = vpop.f32.mrf.mxu0 }
 0x63c   : > { %v3005_v2 = vadd.f32 %v3004_v58, %v2907_v6 }
 0x63d   : > { %8035 = vrcp.f32 %v3086_v36  ;;  %v7210_v52 = vpop.f32.mrf.mxu1  ;;  %v7238_v56 = vpop.f32.mrf.mxu0 }
 0x63e   : > { %v8030_v48 = vpop.eup %8029  ;;  %v9154_v62 = vadd.f32 %v9135_v59, %v3005_v2 }
 0x63f   : > { %v3087_v14 = vadd.f32 1.0, %v8030_v48  ;;  %v2910_v63 = vpop.f32.mrf.mxu1  ;;  %v3015_v53 = vpop.f32.mrf.mxu0 }
 0x640   : > { %v6633_v3 = vmul.f32 -1.442695, %v9154_v62  ;;  %v3008_v41 = vadd.f32 %v3007_v50, %v2910_v63 }
 0x641   : > { %8037 = vrcp.f32 %v3087_v14  ;;  %v7211_v5 = vpop.f32.mrf.mxu1  ;;  %v7239_v37 = vpop.f32.mrf.mxu0 }
 0x642   : > { %v8032_v33 = vpop.eup %8031  ;;  %8039 = vpow2.f32 %v6633_v3  ;;  %v9158_v8 = vadd.f32 %v9135_v59, %v3008_v41 }
 0x643   : > { %v3088_v9 = vadd.f32 1.0, %v8032_v33  ;;  %v2915_v10 = vpop.f32.mrf.mxu1  ;;  %v3020_v34 = vpop.f32.mrf.mxu0  ;;  %v7911_v33 = vld [vmem:[#allocation8 + $0x18] sm:$0xff]  }
 0x644   : > { %v6634_v11 = vmul.f32 -1.442695, %v9158_v8  ;;  %v3013_v16 = vadd.f32 %v3012_v39, %v2915_v10  ;;  %7244 = vmatprep.subr.bf16.mxu1 %v7911_v33 }
 0x645   : > { %8041 = vrcp.f32 %v3088_v9  ;;  %v7214_v17 = vpop.f32.mrf.mxu1  ;;  %v7242_v18 = vpop.f32.mrf.mxu0  ;;  %7245 = vmatpush3.bf16.msra.mxu1 %v7911_v33 }
 0x646   : > { %v8034_v19 = vpop.eup %8033  ;;  %8043 = vpow2.f32 %v6634_v11  ;;  %v9162_v20 = vadd.f32 %v9135_v59, %v3013_v16  ;;  %v7912_v11 = vld [vmem:[#allocation8 + $0x10] sm:$0xff]  }
 0x647   : > { %v2918_v22 = vpop.f32.mrf.mxu1  ;;  %3125 = vrot.lane.b32.xlu0 %v8034_v19, %s8420_s23  ;;  %v3023_v47 = vpop.f32.mrf.mxu0  ;;  %7246 = vmatprep.subr.bf16.mxu1 %v7912_v11 }
 0x648   : > { %v6635_v25 = vmul.f32 -1.442695, %v9162_v20  ;;  %v3016_v28 = vadd.f32 %v3015_v53, %v2918_v22 }
 0x649   : > { %v7215_v30 = vpop.f32.mrf.mxu1  ;;  %v7243_v32 = vpop.f32.mrf.mxu0  ;;  %7247 = vmatpush3.bf16.msra.mxu1 %v7912_v11 }
 0x64a   : > { %v8036_v26 = vpop.eup %8035  ;;  %8045 = vpow2.f32 %v6635_v25  ;;  %v9167_v38 = vadd.f32 %v9135_v59, %v3016_v28  ;;  %7294 = vmatprep.subr.bf16.mxu1 %v8418_v0 }
 0x64b   : > { %v2923_v43 = vpop.f32.mrf.mxu1  ;;  %3127 = vrot.lane.b32.xlu1 %v8036_v26, %s8420_s23 }
 0x64c   : > { %v6636_v57 = vmul.f32 -1.442695, %v9167_v38  ;;  %v3021_v58 = vadd.f32 %v3020_v34, %v2923_v43 }
 0x64d   : > { %v7218_v46 = vpop.f32.mrf.mxu1 }
 0x64e   : > { %v8038_v60 = vpop.eup %8037  ;;  %8047 = vpow2.f32 %v6636_v57  ;;  %v9172_v61 = vadd.f32 %v9135_v59, %v3021_v58 }
 0x64f   : > { %v8040_v50 = vpop.eup %8039  ;;  %v2926_v51 = vpop.f32.mrf.mxu1  ;;  %3129 = vrot.lane.b32.xlu1 %v8038_v60, %s8420_s23 }
 0x650   : > { %v3089_v55 = vadd.f32 1.0, %v8040_v50  ;;  %v6637_v36 = vmul.f32 -1.442695, %v9172_v61  ;;  %v3024_v6 = vadd.f32 %v3023_v47, %v2926_v51 }
 0x651   : > { %v7219_v39 = vpop.f32.mrf.mxu1 }
 0x652   : > { %v8042_v2 = vpop.eup %8041  ;;  %8049 = vrcp.f32 %v3089_v55  ;;  %v9177_v52 = vadd.f32 %v9135_v59, %v3024_v6 }
 0x653   : > { %v8044_v56 = vpop.eup %8043  ;;  %8051 = vpow2.f32 %v6637_v36  ;;  %3131 = vrot.lane.b32.xlu1 %v8042_v2, %s8420_s23 }
 0x654   : > { %v3090_v48 = vadd.f32 1.0, %v8044_v56  ;;  %v6638_v14 = vmul.f32 -1.442695, %v9177_v52 }
 0x656   : > { %8053 = vrcp.f32 %v3090_v48 }
 0x657   : > { %v8046_v63 = vpop.eup %8045  ;;  %8055 = vpow2.f32 %v6638_v14 }
 0x658   : > { %v3091_v53 = vadd.f32 1.0, %v8046_v63 }
 0x65a   : > { %8057 = vrcp.f32 %v3091_v53 }
 0x65b   : > { %v8048_v3 = vpop.eup %8047 }
 0x65c   : > { %v3092_v41 = vadd.f32 1.0, %v8048_v3 }
 0x65e   : > { %8059 = vrcp.f32 %v3092_v41 }
 0x65f   : > { %v8050_v5 = vpop.eup %8049 }
 0x660   : > { %v8052_v37 = vpop.eup %8051  ;;  %3133 = vrot.lane.b32.xlu0 %v8050_v5, %s8420_s23 }
 0x661   : > { %v3093_v59 = vadd.f32 1.0, %v8052_v37 }
 0x663   : > { %v8054_v9 = vpop.eup %8053  ;;  %8061 = vrcp.f32 %v3093_v59 }
 0x664   : > { %v8056_v10 = vpop.eup %8055  ;;  %3135 = vrot.lane.b32.xlu1 %v8054_v9, %s8420_s23 }
 0x665   : > { %v3094_v34 = vadd.f32 1.0, %v8056_v10 }
 0x667   : > { %v8058_v16 = vpop.eup %8057  ;;  %8063 = vrcp.f32 %v3094_v34 }
 0x668   : > { %3137 = vrot.lane.b32.xlu0 %v8058_v16, %s8420_s23  ;;  %8065 = vtanh.f32 %v9138_v13 }
 0x669   : > { %8067 = vtanh.f32 %v9142_v23 }
 0x66a   : > { %8069 = vtanh.f32 %v9146_v49 }
 0x66b   : > { %v8060_v17 = vpop.eup %8059  ;;  %8071 = vtanh.f32 %v9150_v54 }
 0x66c   : > { %3139 = vrot.lane.b32.xlu1 %v8060_v17, %s8420_s23  ;;  %8073 = vtanh.f32 %v9154_v62 }
 0x66d   : > { %8075 = vtanh.f32 %v9158_v8 }
 0x66e   : > { %8077 = vtanh.f32 %v9162_v20 }
 0x66f   : > { %8079 = vtanh.f32 %v9167_v38 }
 0x670   : > { %v8062_v18 = vpop.eup %8061  ;;  %8081 = vtanh.f32 %v9172_v61 }
 0x671   : > { %3141 = vrot.lane.b32.xlu1 %v8062_v18, %s8420_s23  ;;  %8083 = vtanh.f32 %v9177_v52 }
 0x674   : > { %v8064_v19 = vpop.eup %8063 }
 0x675   : > { %3143 = vrot.lane.b32.xlu1 %v8064_v19, %s8420_s23  ;;  %v8066_v47 = vpop.eup %8065 }
 0x676   : > { %v8068_v25 = vpop.eup %8067 }
 0x677   : > { %v8070_v43 = vpop.eup %8069 }
 0x678   : > { %v8072_v49 = vpop.eup %8071 }
 0x679   : > { %v8074_v50 = vpop.eup %8073 }
 0x67a   : > { %v8076_v51 = vpop.eup %8075 }
 0x67b   : > { %v8078_v38 = vpop.eup %8077 }
 0x67c   : > { %v8080_v56 = vpop.eup %8079 }
 0x67d   : > { %v8082_v53 = vpop.eup %8081 }
 0x67e   : > { %v8084_v3 = vpop.eup %8083 }
 0x6b9   : > { %v3126_v22 = vpop.permute.xlu0 %3125 }
 0x6ba   : > { %v9192_v30 = vmul.f32 %v8066_v47, %v3126_v22 }
 0x6bd   : > { %v3128_v28 = vpop.permute.xlu1 %3127 }
 0x6be   : > { %v9194_v32 = vmul.f32 %v8068_v25, %v3128_v28 }
 0x6c0   : > { %v7744_v26 = vpack.i.bf16 %v9194_v32, %v9192_v30  ;;  %v3165_v13 = vpack.c.bf16 %v9194_v32, %v9192_v30  ;;  %v7918_v30 = vld [vmem:[#allocation7 + $0x20] sm:$0xff]   ;;  %v7919_v32 = vld [vmem:[#allocation5 + $0x28] sm:$0xff]  }
 0x6c1   : > { %v3130_v23 = vpop.permute.xlu1 %3129 }
 0x6c2   : > { %v3157_v57 = vmul.f32 %v8070_v43, %v3130_v23  ;;  %7745 = vxpose.xlu0.b32.start.end [1/1] (short) (narrow) %v7744_v26, 32 }
 0x6c4   : > { %3327 = vxpose.xlu1.b32.start.end [1/1] (short) (narrow) %v3157_v57, 32 }
 0x6c5   : > { %v3132_v54 = vpop.permute.xlu1 %3131 }
 0x6c6   : > { %v3158_v58 = vmul.f32 %v8072_v49, %v3132_v54 }
 0x6c8   : > { %v9201_v46 = vpack.c.bf16 %v3158_v58, %v3157_v57 }
 0x6ca   : > { %v3173_v62 = vunpack.c.h.b16 %v9201_v46 }
 0x6cf   : > { %3359 = vxpose.xlu0.b32.start.end [1/1] (short) (narrow) %v3158_v58, 32 }
 0x6d2   : > { %v3134_v60 = vpop.permute.xlu0 %3133 }
 0x6d3   : > { %v3159_v36 = vmul.f32 %v8074_v50, %v3134_v60 }
 0x6d6   : > { %v3136_v55 = vpop.permute.xlu1 %3135 }
 0x6d7   : > { %v3160_v6 = vmul.f32 %v8076_v51, %v3136_v55 }
 0x6d9   : > { %v9207_v39 = vpack.c.bf16 %v3160_v6, %v3159_v36  ;;  %3423 = vxpose.xlu1.b32.start.end [1/1] (short) (narrow) %v3160_v6, 32 }
 0x6da   : > { %v3138_v20 = vpop.permute.xlu0 %3137 }
 0x6db   : > { %v3174_v8 = vunpack.c.l.b16 %v9207_v39  ;;  %v9212_v14 = vmul.f32 %v8078_v38, %v3138_v20 }
 0x6dc   : > { %3391 = vxpose.xlu0.b32.start.end [1/1] (short) (narrow) %v3159_v36, 32 }
 0x6dd   : > { %v3190_v2 = vpack.c.b16 %v3174_v8, %v3173_v62 }
 0x6de   : > { %v3140_v48 = vpop.permute.xlu1 %3139 }
 0x6df   : > { %v9214_v63 = vmul.f32 %v8080_v56, %v3140_v48  ;;  %7248 = vmatprep.mubr.msk.bf16.mxu1 %vm662_vm1, %v3190_v2 }
 0x6e1   : > { %v3168_v61 = vpack.c.bf16 %v9214_v63, %v9212_v14 }
 0x6e3   : > { %v3142_v52 = vpop.permute.xlu1 %3141 }
 0x6e4   : > { %v3163_v5 = vmul.f32 %v8082_v53, %v3142_v52 }
 0x6e6   : > { %3487 = vxpose.xlu1.b32.start.end [1/1] (short) (narrow) %v9214_v63, 32 }
 0x6e7   : > { %v3144_v41 = vpop.permute.xlu1 %3143 }
 0x6e8   : > { %v3164_v37 = vmul.f32 %v8084_v3, %v3144_v41 }
 0x6e9   : > { %3455 = vxpose.xlu0.b32.start.end [1/1] (short) (narrow) %v9212_v14, 32 }
 0x6ea   : > { %v9221_v59 = vpack.c.bf16 %v3164_v37, %v3163_v5 }
 0x6ec   : > { %7249 = vmatmul.mubr.msk.bf16.vlgmr.msra.gmra.mxu1 %vm662_vm1, %v9221_v59 }
 0x6ed   : > { %7298 = vmatprep.mubr.msk.bf16.mxu1 %vm8419_vm0, %v8418_v0 }
 0x6f3   : > { %3551 = vxpose.xlu1.b32.start.end [1/1] (short) (narrow) %v3164_v37, 32 }
 0x6f6   : > { %3519 = vxpose.xlu0.b32.start.end [1/1] (short) (narrow) %v3163_v5, 32 }
 0x73e   : > { %v7746_v33 = vpop.trf.xlu0 }
 0x73f   : > { %v7747_v34 = vunpack.i.l.bf16 %v7746_v33  ;;  %v7750_v26 = vunpack.i.h.bf16 %v7746_v33 }
 0x740   : > { %v3343_v9 = vpop.trf.xlu1 }
 0x742   : > { %v7751_v10 = vpop.trf.xlu0 }
 0x743   : > { %v7752_v11 = vunpack.i.l.bf16 %v7751_v10  ;;  %v7755_v19 = vunpack.i.h.bf16 %v7751_v10 }
 0x744   : > { %v3344_v17 = vpop.trf.xlu1 }
 0x745   : > { %v3583_v16 = vpack.c.bf16 %v7752_v11, %v7747_v34  ;;  %v3585_v57 = vpack.c.bf16 %v7755_v19, %v7750_v26  ;;  %v3587_v55 = vpack.c.bf16 %v3344_v17, %v3343_v9 }
 0x746   : > { %v7756_v18 = vpop.trf.xlu0 }
 0x747   : > { %7254 = vmatprep.mubr.msk.bf16.mxu0 %vm1665_vm3, %v3583_v16  ;;  %v7757_v47 = vunpack.i.l.bf16 %v7756_v18  ;;  %v7760_v60 = vunpack.i.h.bf16 %v7756_v18 }
 0x748   : > { %v3345_v28 = vpop.trf.xlu1 }
 0x74a   : > { %v7761_v22 = vpop.trf.xlu0 }
 0x74b   : > { %v7762_v25 = vunpack.i.l.bf16 %v7761_v22  ;;  %v7765_v49 = vunpack.i.h.bf16 %v7761_v22 }
 0x74c   : > { %v3346_v54 = vpop.trf.xlu1 }
 0x74d   : > { %v3584_v43 = vpack.c.bf16 %v7762_v25, %v7757_v47  ;;  %v3586_v50 = vpack.c.bf16 %v7765_v49, %v7760_v60  ;;  %v3588_v8 = vpack.c.bf16 %v3346_v54, %v3345_v28 }
 0x74e   : > { %v3375_v23 = vpop.trf.xlu0 }
 0x74f   : > { %7255 = vmatmul.mubr.msk.bf16.vlgmr.msra.gmra.mxu0 %vm1665_vm3, %v3584_v43 }
 0x750   : > { %7258 = vmatprep.mubr.msk.bf16.mxu0 %vm1665_vm3, %v3585_v57 }
 0x752   : > { %v3376_v58 = vpop.trf.xlu0 }
 0x753   : > { %v3589_v38 = vpack.c.bf16 %v3376_v58, %v3375_v23 }
 0x755   : > { %v3439_v51 = vpop.trf.xlu1 }
 0x756   : > { %v3377_v36 = vpop.trf.xlu0 }
 0x757   : > { %7259 = vmatmul.mubr.msk.bf16.gmra.mxu0 %vm1665_vm3, %v3586_v50 }
 0x758   : > { %7262 = vmatprep.mubr.msk.bf16.mxu0 %vm1665_vm3, %v3587_v55 }
 0x759   : > { %v3440_v6 = vpop.trf.xlu1 }
 0x75a   : > { %v3378_v62 = vpop.trf.xlu0  ;;  %v3593_v33 = vpack.c.bf16 %v3440_v6, %v3439_v51  ;;  %v6549_v6 = vld [vmem:[%s9650_s7] ss:$0 sm:$0xff] }
 0x75b   : > { %v3590_v52 = vpack.c.bf16 %v3378_v62, %v3377_v36  ;;  %v6640_v62 = vld [vmem:[%s9650_s7 + $0x1] ss:$0 sm:$0xff] }
 0x75d   : > { %v3441_v20 = vpop.trf.xlu1 }
 0x75e   : > { %v3407_v2 = vpop.trf.xlu0 }
 0x75f   : > { %7263 = vmatmul.mubr.msk.bf16.gmra.mxu0 %vm1665_vm3, %v3588_v8 }
 0x760   : > { %7266 = vmatprep.mubr.msk.bf16.mxu0 %vm1665_vm3, %v3589_v38 }
 0x761   : > { %v3442_v48 = vpop.trf.xlu1 }
 0x762   : > { %v3408_v56 = vpop.trf.xlu0  ;;  %v3594_v16 = vpack.c.bf16 %v3442_v48, %v3441_v20  ;;  %v1183_v20 = vadd.f32 %v8967_v27, %v6549_v6 }
 0x763   : > { %v3591_v53 = vpack.c.bf16 %v3408_v56, %v3407_v2  ;;  %v1175_v56 = vadd.f32 %v6549_v6, %v8969_v31 }
 0x765   : > { %v3503_v41 = vpop.trf.xlu1 }
 0x766   : > { %v3409_v3 = vpop.trf.xlu0 }
 0x767   : > { %7267 = vmatmul.mubr.msk.bf16.gmra.mxu0 %vm1665_vm3, %v3590_v52 }
 0x768   : > { %7270 = vmatprep.mubr.msk.bf16.mxu0 %vm1665_vm3, %v3591_v53 }
 0x769   : > { %v3504_v10 = vpop.trf.xlu1 }
 0x76a   : > { %v3410_v5 = vpop.trf.xlu0  ;;  %v3597_v25 = vpack.c.bf16 %v3504_v10, %v3503_v41 }
 0x76b   : > { %v3592_v37 = vpack.c.bf16 %v3410_v5, %v3409_v3  ;;  %v1186_v3 = vadd.f32 %v8974_v4, %v6549_v6 }
 0x76d   : > { %v3505_v11 = vpop.trf.xlu1 }
 0x76e   : > { %v3471_v9 = vpop.trf.xlu0 }
 0x76f   : > { %7271 = vmatmul.mubr.msk.bf16.gmra.mxu0 %vm1665_vm3, %v3592_v37 }
 0x770   : > { %7274 = vmatprep.mubr.msk.bf16.mxu0 %vm1665_vm3, %v3593_v33  ;;  %v7913_v33 = vld [vmem:[#allocation11 + $0x18] sm:$0xff]  }
 0x771   : > { %v3506_v22 = vpop.trf.xlu1  ;;  %7295 = vmatpush3.bf16.msra.mxu1 %v7913_v33 }
 0x772   : > { %v3472_v34 = vpop.trf.xlu0  ;;  %v3598_v23 = vpack.c.bf16 %v3506_v22, %v3505_v11  ;;  %7296 = vmatprep.subr.bf16.mxu1 %v8418_v0 }
 0x773   : > { %v3595_v17 = vpack.c.bf16 %v3472_v34, %v3471_v9 }
 0x775   : > { %v3567_v26 = vpop.trf.xlu1 }
 0x776   : > { %v3473_v18 = vpop.trf.xlu0 }
 0x777   : > { %7275 = vmatmul.mubr.msk.bf16.gmra.mxu0 %vm1665_vm3, %v3594_v16 }
 0x778   : > { %7278 = vmatprep.mubr.msk.bf16.mxu0 %vm1665_vm3, %v3595_v17 }
 0x779   : > { %v3568_v54 = vpop.trf.xlu1 }
 0x77a   : > { %v3474_v19 = vpop.trf.xlu0  ;;  %v3601_v51 = vpack.c.bf16 %v3568_v54, %v3567_v26 }
 0x77b   : > { %v3596_v47 = vpack.c.bf16 %v3474_v19, %v3473_v18  ;;  %v7914_v18 = vld [vmem:[#allocation11 + $0x10] sm:$0xff]  }
 0x77c   : > { %7297 = vmatpush3.bf16.msra.mxu1 %v7914_v18 }
 0x77d   : > { %v3569_v60 = vpop.trf.xlu1  ;;  %7318 = vmatprep.subr.bf16.mxu1 %v8418_v0 }
 0x77e   : > { %v3535_v28 = vpop.trf.xlu0 }
 0x77f   : > { %7279 = vmatmul.mubr.msk.bf16.gmra.mxu0 %vm1665_vm3, %v3596_v47 }
 0x780   : > { %7282 = vmatprep.mubr.msk.bf16.mxu0 %vm1665_vm3, %v3597_v25 }
 0x781   : > { %v3570_v55 = vpop.trf.xlu1 }
 0x782   : > { %v3536_v43 = vpop.trf.xlu0  ;;  %v3602_v36 = vpack.c.bf16 %v3570_v55, %v3569_v60 }
 0x783   : > { %v3599_v57 = vpack.c.bf16 %v3536_v43, %v3535_v28 }
 0x786   : > { %v3537_v49 = vpop.trf.xlu0 }
 0x787   : > { %7283 = vmatmul.mubr.msk.bf16.gmra.mxu0 %vm1665_vm3, %v3598_v23 }
 0x788   : > { %7286 = vmatprep.mubr.msk.bf16.mxu0 %vm1665_vm3, %v3599_v57 }
 0x78a   : > { %v3538_v58 = vpop.trf.xlu0 }
 0x78b   : > { %v3600_v50 = vpack.c.bf16 %v3538_v58, %v3537_v49 }
 0x78f   : > { %7287 = vmatmul.mubr.msk.bf16.gmra.mxu0 %vm1665_vm3, %v3600_v50 }
 0x790   : > { %7290 = vmatprep.mubr.msk.bf16.mxu0 %vm1665_vm3, %v3601_v51 }
 0x797   : > { %7291 = vmatmul.mubr.msk.bf16.gmra.mxu0 %vm1665_vm3, %v3602_v36 }
 0x7ac   : > { %v7250_v8 = vpop.f32.mrf.mxu1 }
 0x7ad   : > { %v3253_v38 = vadd.f32 %v7250_v8, %v6640_v62 }
 0x7ae   : > { %v3244_v2 = vpop.f32.mrf.mxu1 }
 0x7af   : > { %v9255_v48 = vadd.f32 %v3253_v38, %v1183_v20  ;;  %v3245_v52 = vadd.f32 %v6640_v62, %v3244_v2 }
 0x7b0   : > { %v7251_v53 = vpop.f32.mrf.mxu1 }
 0x7b1   : > { %v9258_v41 = vadd.f32 %v3245_v52, %v1175_v56  ;;  %v3256_v5 = vadd.f32 %v7251_v53, %v6640_v62 }
 0x7b3   : > { %v9260_v37 = vadd.f32 %v3256_v5, %v1186_v3 }
 0x80f   : > { %v7256_v27 = vpop.f32.mrf.mxu0 }
 0x811   : > { %v3697_v9 = vpop.f32.mrf.mxu0 }
 0x813   : > { %v7257_v10 = vpop.f32.mrf.mxu0 }
 0x815   : > { %v3700_v34 = vpop.f32.mrf.mxu0 }
 0x817   : > { %v7260_v31 = vpop.f32.mrf.mxu0 }
 0x818   : > { %v7770_v25 = vpack.i.bf16 %v7260_v31, %v7256_v27 }
 0x819   : > { %v3713_v11 = vpop.f32.mrf.mxu0 }
 0x81a   : > { %v7766_v16 = vpack.i.bf16 %v3713_v11, %v3697_v9 }
 0x81b   : > { %v7261_v17 = vpop.f32.mrf.mxu0 }
 0x81c   : > { %7767 = vxpose.xlu0.b32.start [1/4] (short) (narrow) %v7766_v16, 8  ;;  %v7772_v43 = vpack.i.bf16 %v7261_v17, %v7257_v10 }
 0x81d   : > { %v3716_v4 = vpop.f32.mrf.mxu0 }
 0x81e   : > { %v7768_v19 = vpack.i.bf16 %v3716_v4, %v3700_v34 }
 0x81f   : > { %v7264_v22 = vpop.f32.mrf.mxu0 }
 0x820   : > { %7769 = vxpose.xlu0.b32.cont [2/4] (short) (narrow) %v7768_v19, 8 }
 0x821   : > { %v3729_v47 = vpop.f32.mrf.mxu0 }
 0x823   : > { %v7265_v28 = vpop.f32.mrf.mxu0 }
 0x824   : > { %7771 = vxpose.xlu0.b32.cont [3/4] (short) (narrow) %v7770_v25, 8 }
 0x825   : > { %v3732_v26 = vpop.f32.mrf.mxu0 }
 0x827   : > { %v7268_v23 = vpop.f32.mrf.mxu0 }
 0x828   : > { %7773 = vxpose.xlu0.b32.end [4/4] (short) (narrow) %v7772_v43, 8  ;;  %v7783_v55 = vpack.i.bf16 %v7268_v23, %v7264_v22 }
 0x829   : > { %v3745_v57 = vpop.f32.mrf.mxu0 }
 0x82a   : > { %v7779_v49 = vpack.i.bf16 %v3745_v57, %v3729_v47 }
 0x82b   : > { %v7269_v54 = vpop.f32.mrf.mxu0 }
 0x82c   : > { %7780 = vxpose.xlu1.b32.start [1/4] (short) (narrow) %v7779_v49, 8  ;;  %v7785_v62 = vpack.i.bf16 %v7269_v54, %v7265_v28 }
 0x82d   : > { %v3748_v58 = vpop.f32.mrf.mxu0 }
 0x82e   : > { %v7781_v60 = vpack.i.bf16 %v3748_v58, %v3732_v26 }
 0x82f   : > { %v7272_v50 = vpop.f32.mrf.mxu0 }
 0x830   : > { %7782 = vxpose.xlu1.b32.cont [2/4] (short) (narrow) %v7781_v60, 8  ;;  %v7917_v60 = vld [vmem:[#allocation7 + $0x28] sm:$0xff]  }
 0x831   : > { %v3761_v51 = vpop.f32.mrf.mxu0  ;;  %7342 = vmatprep.subr.bf16.mxu0 %v7917_v60 }
 0x832   : > { %7343 = vmatpush3.bf16.msra.mxu0 %v7917_v60 }
 0x833   : > { %v7273_v36 = vpop.f32.mrf.mxu0  ;;  %7344 = vmatprep.subr.bf16.mxu0 %v7918_v30 }
 0x834   : > { %7784 = vxpose.xlu1.b32.cont [3/4] (short) (narrow) %v7783_v55, 8 }
 0x835   : > { %v3764_v6 = vpop.f32.mrf.mxu0 }
 0x836   : > { %7345 = vmatpush3.bf16.msra.mxu0 %v7918_v30 }
 0x837   : > { %v7276_v8 = vpop.f32.mrf.mxu0 }
 0x838   : > { %7786 = vxpose.xlu1.b32.end [4/4] (short) (narrow) %v7785_v62, 8  ;;  %v7796_v5 = vpack.i.bf16 %v7276_v8, %v7272_v50  ;;  %v7916_v62 = vld [vmem:[#allocation10 + $0x10] sm:$0xff]  }
 0x839   : > { %v3777_v20 = vpop.f32.mrf.mxu0 }
 0x83a   : > { %v7792_v38 = vpack.i.bf16 %v3777_v20, %v3761_v51 }
 0x83b   : > { %v7277_v2 = vpop.f32.mrf.mxu0 }
 0x83c   : > { %7793 = vxpose.xlu0.b32.start [1/4] (short) (narrow) %v7792_v38, 8  ;;  %v7798_v9 = vpack.i.bf16 %v7277_v2, %v7273_v36  ;;  %v7915_v36 = vld [vmem:[#allocation10 + $0x18] sm:$0xff]  }
 0x83d   : > { %v3780_v56 = vpop.f32.mrf.mxu0 }
 0x83e   : > { %v7794_v52 = vpack.i.bf16 %v3780_v56, %v3764_v6 }
 0x83f   : > { %v7280_v53 = vpop.f32.mrf.mxu0 }
 0x840   : > { %7795 = vxpose.xlu0.b32.cont [2/4] (short) (narrow) %v7794_v52, 8 }
 0x841   : > { %v3793_v3 = vpop.f32.mrf.mxu0 }
 0x843   : > { %v7281_v33 = vpop.f32.mrf.mxu0 }
 0x844   : > { %7797 = vxpose.xlu0.b32.cont [3/4] (short) (narrow) %v7796_v5, 8 }
 0x845   : > { %v3796_v27 = vpop.f32.mrf.mxu0 }
 0x847   : > { %v7284_v10 = vpop.f32.mrf.mxu0 }
 0x848   : > { %7799 = vxpose.xlu0.b32.end [4/4] (short) (narrow) %v7798_v9, 8  ;;  %v7809_v19 = vpack.i.bf16 %v7284_v10, %v7280_v53 }
 0x849   : > { %v3809_v34 = vpop.f32.mrf.mxu0 }
 0x84a   : > { %v7805_v31 = vpack.i.bf16 %v3809_v34, %v3793_v3 }
 0x84b   : > { %v7285_v11 = vpop.f32.mrf.mxu0 }
 0x84c   : > { %7806 = vxpose.xlu1.b32.start [1/4] (short) (narrow) %v7805_v31, 8  ;;  %v7811_v25 = vpack.i.bf16 %v7285_v11, %v7281_v33 }
 0x84d   : > { %v3812_v16 = vpop.f32.mrf.mxu0 }
 0x84e   : > { %v7807_v17 = vpack.i.bf16 %v3812_v16, %v3796_v27 }
 0x84f   : > { %v7288_v18 = vpop.f32.mrf.mxu0 }
 0x850   : > { %7808 = vxpose.xlu1.b32.cont [2/4] (short) (narrow) %v7807_v17, 8 }
 0x851   : > { %v3825_v4 = vpop.f32.mrf.mxu0 }
 0x853   : > { %v7289_v22 = vpop.f32.mrf.mxu0 }
 0x854   : > { %7810 = vxpose.xlu1.b32.cont [3/4] (short) (narrow) %v7809_v19, 8 }
 0x855   : > { %v3828_v47 = vpop.f32.mrf.mxu0 }
 0x857   : > { %v7292_v28 = vpop.f32.mrf.mxu0 }
 0x858   : > { %7812 = vxpose.xlu1.b32.end [4/4] (short) (narrow) %v7811_v25, 8  ;;  %v7822_v54 = vpack.i.bf16 %v7292_v28, %v7288_v18 }
 0x859   : > { %v3841_v26 = vpop.f32.mrf.mxu0 }
 0x85a   : > { %v7818_v43 = vpack.i.bf16 %v3841_v26, %v3825_v4 }
 0x85b   : > { %v7293_v23 = vpop.f32.mrf.mxu0 }
 0x85c   : > { %7819 = vxpose.xlu0.b32.start [1/4] (short) (narrow) %v7818_v43, 8  ;;  %v7824_v58 = vpack.i.bf16 %v7293_v23, %v7289_v22 }
 0x85d   : > { %v3844_v57 = vpop.f32.mrf.mxu0 }
 0x85e   : > { %v7820_v49 = vpack.i.bf16 %v3844_v57, %v3828_v47 }
 0x860   : > { %7821 = vxpose.xlu0.b32.cont [2/4] (short) (narrow) %v7820_v49, 8 }
 0x864   : > { %7823 = vxpose.xlu0.b32.cont [3/4] (short) (narrow) %v7822_v54, 8 }
 0x868   : > { %7825 = vxpose.xlu0.b32.end [4/4] (short) (narrow) %v7824_v58, 8 }
 0x898   : > { %v7774_v50 = vpop.trf.xlu0 }
 0x899   : > { %v7778_v51 = vunpack.i.h.bf16 %v7774_v50  ;;  %v7775_v55 = vunpack.i.l.bf16 %v7774_v50  ;;  %v9317_v50 = vld [vmem:[%s9653_s10 + $0x1] ss:$0 sm:$0xff] }
 0x89b   : > { %v4176_v6 = vpack.c.bf16 %v7778_v51, %v7775_v55  ;;  %v6789_v55 = vpack.c.bf16 %v9049_v40, %v9049_v40 }
 0x89d   : > { %7299 = vmatmul.mubr.msk.bf16.vlgmr.msra.gmra.mxu1 %vm662_vm1, %v4176_v6 }
 0x89e   : > { %7319 = vmatpush3.bf16.msra.mxu1 %v7915_v36  ;;  %7302 = vmatprep.mubr.msk.bf16.mxu1 %vm8419_vm0, %v8418_v0  ;;  %v6790_v36 = vpack.c.bf16 %v9051_v42, %v9051_v42  ;;  %v6792_v42 = vpack.c.bf16 %v9067_v21, %v9067_v21 }
 0x89f   : > { %7320 = vmatprep.subr.bf16.mxu1 %v8418_v0 }
 0x8a2   : > { %7321 = vmatpush3.bf16.msra.mxu1 %v7916_v62 }
 0x8a3   : > { %7354 = vmatprep.subr.bf16.mxu1 %v7919_v32 }
 0x8a8   : > { %v7787_v8 = vpop.trf.xlu1 }
 0x8a9   : > { %v7791_v20 = vunpack.i.h.bf16 %v7787_v8  ;;  %v7788_v38 = vunpack.i.l.bf16 %v7787_v8 }
 0x8ab   : > { %v4177_v2 = vpack.c.bf16 %v7791_v20, %v7788_v38  ;;  %v6791_v38 = vpack.c.bf16 %v9065_v44, %v9065_v44 }
 0x8ad   : > { %7303 = vmatmul.mubr.msk.bf16.gmra.mxu1 %vm662_vm1, %v4177_v2  ;;  %v4409_v2 = vunpack.c.l.bf16 %v6789_v55 }
 0x8ae   : > { %7306 = vmatprep.mubr.msk.bf16.mxu1 %vm8419_vm0, %v8418_v0 }
 0x8b8   : > { %v7800_v56 = vpop.trf.xlu0 }
 0x8b9   : > { %v7804_v52 = vunpack.i.h.bf16 %v7800_v56  ;;  %v7801_v53 = vunpack.i.l.bf16 %v7800_v56 }
 0x8bb   : > { %v4178_v3 = vpack.c.bf16 %v7804_v52, %v7801_v53  ;;  %v4410_v52 = vunpack.c.l.bf16 %v6790_v36 }
 0x8bd   : > { %7307 = vmatmul.mubr.msk.bf16.gmra.mxu1 %vm662_vm1, %v4178_v3 }
 0x8be   : > { %7310 = vmatprep.mubr.msk.bf16.mxu1 %vm8419_vm0, %v8418_v0 }
 0x8c8   : > { %v7813_v5 = vpop.trf.xlu1 }
 0x8c9   : > { %v7817_v33 = vunpack.i.h.bf16 %v7813_v5  ;;  %v7814_v27 = vunpack.i.l.bf16 %v7813_v5 }
 0x8cb   : > { %v4179_v9 = vpack.c.bf16 %v7817_v33, %v7814_v27 }
 0x8cd   : > { %7311 = vmatmul.mubr.msk.bf16.gmra.mxu1 %vm662_vm1, %v4179_v9 }
 0x8ce   : > { %7314 = vmatprep.mubr.msk.bf16.mxu1 %vm8419_vm0, %v8418_v0 }
 0x8d8   : > { %v7826_v10 = vpop.trf.xlu0 }
 0x8d9   : > { %v7830_v34 = vunpack.i.h.bf16 %v7826_v10  ;;  %v7827_v31 = vunpack.i.l.bf16 %v7826_v10  ;;  %v4411_v10 = vunpack.c.l.bf16 %v6791_v38 }
 0x8db   : > { %v4180_v11 = vpack.c.bf16 %v7830_v34, %v7827_v31 }
 0x8dd   : > { %7315 = vmatmul.mubr.msk.bf16.gmra.mxu1 %vm662_vm1, %v4180_v11 }
 0x8de   : > { %7322 = vmatprep.mubr.msk.bf16.mxu1 %vm8419_vm0, %v8418_v0 }
 0x8e5   : > { %7323 = vmatmul.mubr.msk.bf16.vlgmr.msra.gmra.mxu1 %vm662_vm1, %v3165_v13  ;;  %v7920_v13 = vld [vmem:[#allocation5 + $0x20] sm:$0xff]  }
 0x8e6   : > { %7326 = vmatprep.mubr.msk.bf16.mxu1 %vm8419_vm0, %v8418_v0  ;;  %7355 = vmatpush3.bf16.msra.mxu1 %v7919_v32  ;;  %v4412_v32 = vunpack.c.l.bf16 %v6792_v42 }
 0x8e7   : > { %7356 = vmatprep.subr.bf16.mxu1 %v7920_v13 }
 0x8ea   : > { %7357 = vmatpush3.bf16.msra.mxu1 %v7920_v13 }
 0x8ed   : > { %7327 = vmatmul.mubr.msk.bf16.gmra.mxu1 %vm662_vm1, %v9201_v46  ;;  %v8171_v46 = vld [vmem:[%s9644_s1] sm:$0xf] }
 0x8ee   : > { %7330 = vmatprep.mubr.msk.bf16.mxu1 %vm8419_vm0, %v8418_v0  ;;  %7482 = vmatprep.subr.msk.bf16.mxu1 %vm1750_vm2, %v8171_v46 }
 0x8f5   : > { %7331 = vmatmul.mubr.msk.bf16.gmra.mxu1 %vm662_vm1, %v9207_v39  ;;  %v9306_v39 = vpop.f32.mrf.mxu1 }
 0x8f6   : > { %7334 = vmatprep.mubr.msk.bf16.mxu1 %vm8419_vm0, %v8418_v0 }
 0x8fd   : > { %7335 = vmatmul.mubr.msk.bf16.gmra.mxu1 %vm662_vm1, %v3168_v61 }
 0x8fe   : > { %7338 = vmatprep.mubr.msk.bf16.mxu1 %vm8419_vm0, %v8418_v0 }
 0x905   : > { %7339 = vmatmul.mubr.msk.bf16.gmra.mxu1 %vm662_vm1, %v9221_v59 }
 0x95d   : > { %v4252_v0 = vpop.f32.mrf.mxu1 }
 0x95f   : > { %v7300_v14 = vpop.f32.mrf.mxu1 }
 0x960   : > { %v6793_v14 = vpack.c.bf16 %v9080_v7, %v9080_v7 }
 0x961   : > { %v4255_v63 = vpop.f32.mrf.mxu1 }
 0x963   : > { %v7301_v61 = vpop.f32.mrf.mxu1 }
 0x96d   : > { %v4260_v59 = vpop.f32.mrf.mxu1 }
 0x96f   : > { %v7304_v16 = vpop.f32.mrf.mxu1 }
 0x971   : > { %v4263_v17 = vpop.f32.mrf.mxu1 }
 0x973   : > { %v7305_v18 = vpop.f32.mrf.mxu1 }
 0x97d   : > { %v4268_v4 = vpop.f32.mrf.mxu1 }
 0x97f   : > { %v7308_v19 = vpop.f32.mrf.mxu1 }
 0x981   : > { %v4271_v22 = vpop.f32.mrf.mxu1 }
 0x983   : > { %v7309_v47 = vpop.f32.mrf.mxu1 }
 0x98d   : > { %v4276_v25 = vpop.f32.mrf.mxu1 }
 0x98f   : > { %v7312_v28 = vpop.f32.mrf.mxu1 }
 0x991   : > { %v9308_v26 = vpop.f32.mrf.mxu1 }
 0x993   : > { %v7313_v43 = vpop.f32.mrf.mxu1 }
 0x99d   : > { %v9310_v23 = vpop.f32.mrf.mxu1 }
 0x99f   : > { %v7316_v57 = vpop.f32.mrf.mxu1 }
 0x9a1   : > { %v9312_v49 = vpop.f32.mrf.mxu1 }
 0x9a3   : > { %v7317_v54 = vpop.f32.mrf.mxu1 }
 0x9a5   : > { %v4352_v58 = vpop.f32.mrf.mxu1 }
 0x9a6   : > { %v4353_v60 = vadd.f32 %v4352_v58, %v4252_v0 }
 0x9a7   : > { %v7324_v51 = vpop.f32.mrf.mxu1 }
 0x9a8   : > { %v4399_v62 = vadd.f32 %v9317_v50, %v4353_v60  ;;  %v6796_v51 = vpack.c.bf16 %v9111_v45, %v9111_v45 }
 0x9a9   : > { %v4355_v6 = vpop.f32.mrf.mxu1 }
 0x9aa   : > { %v4356_v8 = vadd.f32 %v4355_v6, %v4255_v63  ;;  %v4419_v3 = vadd.f32 %v4409_v2, %v4399_v62  ;;  %v6794_v63 = vpack.c.bf16 %v9093_v29, %v9093_v29 }
 0x9ab   : > { %v7325_v20 = vpop.f32.mrf.mxu1 }
 0x9ac   : > { %v4400_v56 = vadd.f32 %v9317_v50, %v4356_v8  ;;  %v4414_v28 = vunpack.c.l.bf16 %v6794_v63 }
 0x9ad   : > { %v4360_v53 = vpop.f32.mrf.mxu1 }
 0x9ae   : > { %v9327_v5 = vadd.f32 %v4410_v52, %v4400_v56  ;;  %v4361_v40 = vadd.f32 %v4360_v53, %v4260_v59  ;;  %v4416_v56 = vunpack.c.l.bf16 %v6796_v51 }
 0x9af   : > { %v7328_v33 = vpop.f32.mrf.mxu1 }
 0x9b0   : > { %v4429_v27 = vpack.c.bf16 %v9327_v5, %v4419_v3  ;;  %v4401_v9 = vadd.f32 %v9317_v50, %v4361_v40  ;;  %v6797_v40 = vpack.c.bf16 %v9125_v15, %v9125_v15 }
 0x9b1   : > { %v4363_v34 = vpop.f32.mrf.mxu1 }
 0x9b2   : > { %v9333_v44 = vadd.f32 %v4411_v10, %v4401_v9  ;;  %v4364_v31 = vadd.f32 %v4363_v34, %v4263_v17  ;;  %7358 = vmatprep.mubr.msk.bf16.mxu1 %vm662_vm1, %v4429_v27  ;;  %v4440_v16 = vunpack.c.h.b16 %v4429_v27 }
 0x9b3   : > { %v7329_v11 = vpop.f32.mrf.mxu1 }
 0x9b4   : > { %v4402_v30 = vadd.f32 %v9317_v50, %v4364_v31  ;;  %v4417_v31 = vunpack.c.l.bf16 %v6797_v40 }
 0x9b5   : > { %v4368_v13 = vpop.f32.mrf.mxu1 }
 0x9b6   : > { %v9337_v46 = vadd.f32 %v4412_v32, %v4402_v30  ;;  %v4369_v0 = vadd.f32 %v4368_v13, %v4268_v4  ;;  %v4413_v4 = vunpack.c.l.bf16 %v6793_v14 }
 0x9b7   : > { %v7332_v21 = vpop.f32.mrf.mxu1 }
 0x9b8   : > { %v4430_v61 = vpack.c.bf16 %v9337_v46, %v9333_v44  ;;  %v4403_v17 = vadd.f32 %v9317_v50, %v4369_v0 }
 0x9b9   : > { %v4371_v59 = vpop.f32.mrf.mxu1 }
 0x9ba   : > { %v4372_v18 = vadd.f32 %v4371_v59, %v4271_v22  ;;  %7359 = vmatmul.mubr.msk.bf16.vlgmr.msra.gmra.mxu1 %vm662_vm1, %v4430_v61  ;;  %v4441_v19 = vunpack.c.l.b16 %v4430_v61  ;;  %v9349_v57 = vadd.f32 %v4413_v4, %v4403_v17  ;;  %v6795_v22 = vpack.c.bf16 %v9109_v12, %v9109_v12 }
 0x9bb   : > { %v7333_v47 = vpop.f32.mrf.mxu1  ;;  %7375 = vmatpush3.bf16.msra.mxu1 %v8871_v24  ;;  %v4442_v36 = vunpack.c.h.b16 %v4430_v61  ;;  %v6702_v61 = vld [vmem:[%s9648_s5 + $0x2] ss:$0 sm:$0xff] }
 0x9bc   : > { %v4404_v7 = vadd.f32 %v9317_v50, %v4372_v18  ;;  %v4475_v43 = vpack.c.b16 %v4441_v19, %v4440_v16  ;;  %v4415_v38 = vunpack.c.l.bf16 %v6795_v22 }
 0x9bd   : > { %v4376_v29 = vpop.f32.mrf.mxu1 }
 0x9be   : > { %v4424_v54 = vadd.f32 %v4414_v28, %v4404_v7  ;;  %v4377_v58 = vadd.f32 %v4376_v29, %v4276_v25  ;;  %7346 = vmatprep.mubr.msk.bf16.mxu0 %vm662_vm1, %v4475_v43 }
 0x9bf   : > { %v7336_v60 = vpop.f32.mrf.mxu1 }
 0x9c0   : > { %v4431_v24 = vpack.c.bf16 %v4424_v54, %v9349_v57  ;;  %v4405_v62 = vadd.f32 %v9317_v50, %v4377_v58 }
 0x9c1   : > { %v4379_v55 = vpop.f32.mrf.mxu1 }
 0x9c2   : > { %v4443_v6 = vunpack.c.l.b16 %v4431_v24  ;;  %v4380_v8 = vadd.f32 %v4379_v55, %v9308_v26  ;;  %v9360_v12 = vadd.f32 %v4415_v38, %v4405_v62  ;;  %v6798_v26 = vpack.c.bf16 %v9127_v1, %v9127_v1 }
 0x9c3   : > { %v7337_v20 = vpop.f32.mrf.mxu1  ;;  %v4444_v27 = vunpack.c.h.b16 %v4431_v24 }
 0x9c4   : > { %v4476_v25 = vpack.c.b16 %v4443_v6, %v4442_v36  ;;  %v4406_v2 = vadd.f32 %v9317_v50, %v4380_v8  ;;  %v4418_v15 = vunpack.c.l.bf16 %v6798_v26 }
 0x9c5   : > { %v4384_v52 = vpop.f32.mrf.mxu1 }
 0x9c6   : > { %v9362_v53 = vadd.f32 %v4416_v56, %v4406_v2  ;;  %v4385_v45 = vadd.f32 %v4384_v52, %v9310_v23  ;;  %7347 = vmatmul.mubr.msk.bf16.vlgmr.msra.gmra.mxu0 %vm662_vm1, %v4476_v25 }
 0x9c7   : > { %v7340_v3 = vpop.f32.mrf.mxu1 }
 0x9c8   : > { %v4432_v33 = vpack.c.bf16 %v9362_v53, %v9360_v12  ;;  %v4407_v9 = vadd.f32 %v9317_v50, %v4385_v45 }
 0x9c9   : > { %v4387_v42 = vpop.f32.mrf.mxu1 }
 0x9ca   : > { %v4388_v10 = vadd.f32 %v4387_v42, %v9312_v49  ;;  %7350 = vmatprep.mubr.msk.bf16.mxu0 %vm662_vm1, %v4432_v33  ;;  %v4445_v23 = vunpack.c.l.b16 %v4432_v33  ;;  %v9376_v32 = vadd.f32 %v4417_v31, %v4407_v9  ;;  %v4446_v0 = vunpack.c.h.b16 %v4432_v33 }
 0x9cb   : > { %v7341_v34 = vpop.f32.mrf.mxu1 }
 0x9cc   : > { %v4408_v11 = vadd.f32 %v9317_v50, %v4388_v10  ;;  %v4570_v30 = vpack.c.b16 %v4445_v23, %v4444_v27 }
 0x9ce   : > { %v9378_v1 = vadd.f32 %v4418_v15, %v4408_v11  ;;  %7362 = vmatprep.mubr.msk.bf16.mxu1 %vm662_vm1, %v4570_v30 }
 0x9d0   : > { %v4433_v13 = vpack.c.bf16 %v9378_v1, %v9376_v32 }
 0x9d2   : > { %v4447_v49 = vunpack.c.l.b16 %v4433_v13  ;;  %7351 = vmatmul.mubr.msk.bf16.gmra.mxu0 %vm662_vm1, %v4433_v13 }
 0x9d4   : > { %v4571_v21 = vpack.c.b16 %v4447_v49, %v4446_v0 }
 0x9d6   : > { %7363 = vmatmul.mubr.msk.bf16.gmra.mxu1 %vm662_vm1, %v4571_v21 }
 0xa7a   : > { %v7360_v14 = vpop.f32.mrf.mxu1 }
 0xa7c   : > { %v4630_v50 = vpop.f32.mrf.mxu1 }
 0xa7e   : > { %v7361_v16 = vpop.f32.mrf.mxu1 }
 0xa80   : > { %v4633_v43 = vpop.f32.mrf.mxu1 }
 0xa86   : > { %v7348_v63 = vpop.f32.mrf.mxu0 }
 0xa87   : > { %v4639_v59 = vadd.f32 %v7360_v14, %v7348_v63 }
 0xa88   : > { %v4537_v17 = vpop.f32.mrf.mxu0 }
 0xa89   : > { %v9388_v18 = vadd.f32 %v6702_v61, %v4639_v59  ;;  %v4631_v19 = vadd.f32 %v4630_v50, %v4537_v17 }
 0xa8a   : > { %v7349_v47 = vpop.f32.mrf.mxu0 }
 0xa8b   : > { %v6705_v4 = vmul.f32 -1.442695, %v9388_v18  ;;  %v9391_v7 = vadd.f32 %v6702_v61, %v4631_v19  ;;  %v4642_v28 = vadd.f32 %v7361_v16, %v7349_v47 }
 0xa8c   : > { %v4540_v29 = vpop.f32.mrf.mxu0 }
 0xa8d   : > { %8085 = vpow2.f32 %v6705_v4  ;;  %v6703_v54 = vmul.f32 -1.442695, %v9391_v7  ;;  %v9394_v58 = vadd.f32 %v6702_v61, %v4642_v28  ;;  %v4634_v60 = vadd.f32 %v4633_v43, %v4540_v29  ;;  %v7922_v43 = vld [vmem:[#allocation8 + $0x20] sm:$0xff]  }
 0xa8f   : > { %8087 = vpow2.f32 %v6703_v54  ;;  %v6706_v22 = vmul.f32 -1.442695, %v9394_v58  ;;  %v9397_v51 = vadd.f32 %v6702_v61, %v4634_v60 }
 0xa91   : > { %v6704_v24 = vmul.f32 -1.442695, %v9397_v51  ;;  %8089 = vpow2.f32 %v6706_v22 }
 0xa92   : > { %v7352_v55 = vpop.f32.mrf.mxu0 }
 0xa93   : > { %8091 = vpow2.f32 %v6704_v24 }
 0xa94   : > { %v4553_v36 = vpop.f32.mrf.mxu0 }
 0xa96   : > { %v7364_v6 = vpop.f32.mrf.mxu1  ;;  %v7353_v8 = vpop.f32.mrf.mxu0 }
 0xa97   : > { %v4655_v62 = vadd.f32 %v7364_v6, %v7352_v55 }
 0xa98   : > { %v4646_v20 = vpop.f32.mrf.mxu1  ;;  %v4556_v40 = vpop.f32.mrf.mxu0 }
 0xa99   : > { %v9400_v25 = vadd.f32 %v6702_v61, %v4655_v62  ;;  %v4647_v38 = vadd.f32 %v4646_v20, %v4553_v36 }
 0xa9a   : > { %v8086_v2 = vpop.eup %8085  ;;  %v7365_v56 = vpop.f32.mrf.mxu1 }
 0xa9b   : > { %v6709_v52 = vmul.f32 -1.442695, %v9400_v25  ;;  %v9403_v45 = vadd.f32 %v6702_v61, %v4647_v38  ;;  %v4658_v26 = vadd.f32 %v7365_v56, %v7353_v8  ;;  %v4711_v42 = vadd.f32 1.0, %v8086_v2 }
 0xa9c   : > { %v8088_v3 = vpop.eup %8087  ;;  %v4649_v33 = vpop.f32.mrf.mxu1 }
 0xa9d   : > { %v4709_v27 = vadd.f32 1.0, %v8088_v3  ;;  %v4650_v9 = vadd.f32 %v4649_v33, %v4556_v40  ;;  %8093 = vpow2.f32 %v6709_v52  ;;  %v6707_v10 = vmul.f32 -1.442695, %v9403_v45 }
 0xa9e   : > { %v9406_v23 = vadd.f32 %v6702_v61, %v4658_v26  ;;  %v8090_v34 = vpop.eup %8089 }
 0xa9f   : > { %8095 = vrcp.f32 %v4709_v27  ;;  %v9408_v31 = vadd.f32 %v6702_v61, %v4650_v9  ;;  %v4712_v13 = vadd.f32 1.0, %v8090_v34  ;;  %v7921_v61 = vld [vmem:[#allocation8 + $0x28] sm:$0xff]  }
 0xaa0   : > { %v8092_v11 = vpop.eup %8091  ;;  %8097 = vrcp.f32 %v4711_v42  ;;  %v6710_v30 = vmul.f32 -1.442695, %v9406_v23  ;;  %7366 = vmatprep.subr.bf16.mxu0 %v7921_v61 }
 0xaa1   : > { %v4710_v15 = vadd.f32 1.0, %v8092_v11  ;;  %8099 = vpow2.f32 %v6707_v10  ;;  %v6708_v0 = vmul.f32 -1.442695, %v9408_v31  ;;  %7367 = vmatpush3.bf16.msra.mxu0 %v7921_v61 }
 0xaa2   : > { %7368 = vmatprep.subr.bf16.mxu0 %v7922_v43 }
 0xaa3   : > { %8101 = vrcp.f32 %v4710_v15 }
 0xaa4   : > { %8103 = vpow2.f32 %v6710_v30 }
 0xaa5   : > { %8105 = vrcp.f32 %v4712_v13  ;;  %7369 = vmatpush3.bf16.msra.mxu0 %v7922_v43 }
 0xaa6   : > { %8107 = vpow2.f32 %v6708_v0 }
 0xaaa   : > { %v8094_v49 = vpop.eup %8093 }
 0xaab   : > { %v4715_v14 = vadd.f32 1.0, %v8094_v49 }
 0xaac   : > { %v8096_v21 = vpop.eup %8095 }
 0xaad   : > { %4741 = vrot.lane.b32.xlu1 %v8096_v21, %s8420_s23  ;;  %v8098_v50 = vpop.eup %8097  ;;  %8109 = vrcp.f32 %v4715_v14 }
 0xaae   : > { %v8100_v63 = vpop.eup %8099 }
 0xaaf   : > { %v4713_v16 = vadd.f32 1.0, %v8100_v63 }
 0xab0   : > { %v8102_v59 = vpop.eup %8101 }
 0xab1   : > { %4743 = vrot.lane.b32.xlu0 %v8102_v59, %s8420_s23  ;;  %4745 = vrot.lane.b32.xlu1 %v8098_v50, %s8420_s23  ;;  %v8104_v17 = vpop.eup %8103  ;;  %8111 = vrcp.f32 %v4713_v16 }
 0xab2   : > { %v8106_v19 = vpop.eup %8105  ;;  %v4716_v47 = vadd.f32 1.0, %v8104_v17 }
 0xab3   : > { %v8108_v4 = vpop.eup %8107 }
 0xab4   : > { %8113 = vrcp.f32 %v4716_v47  ;;  %v4714_v28 = vadd.f32 1.0, %v8108_v4 }
 0xab5   : > { %4747 = vrot.lane.b32.xlu1 %v8106_v19, %s8420_s23 }
 0xab6   : > { %8115 = vrcp.f32 %v4714_v28 }
 0xab7   : > { %8117 = vtanh.f32 %v9391_v7 }
 0xab8   : > { %8119 = vtanh.f32 %v9397_v51 }
 0xab9   : > { %8121 = vtanh.f32 %v9388_v18 }
 0xaba   : > { %v8110_v29 = vpop.eup %8109  ;;  %8123 = vtanh.f32 %v9394_v58 }
 0xabb   : > { %4753 = vrot.lane.b32.xlu1 %v8110_v29, %s8420_s23  ;;  %8125 = vtanh.f32 %v9400_v25 }
 0xabc   : > { %8127 = vtanh.f32 %v9406_v23 }
 0xabd   : > { %8129 = vtanh.f32 %v9403_v45 }
 0xabe   : > { %v8112_v54 = vpop.eup %8111  ;;  %8131 = vtanh.f32 %v9408_v31 }
 0xabf   : > { %4749 = vrot.lane.b32.xlu1 %v8112_v54, %s8420_s23 }
 0xac1   : > { %v8114_v60 = vpop.eup %8113 }
 0xac2   : > { %4755 = vrot.lane.b32.xlu0 %v8114_v60, %s8420_s23 }
 0xac3   : > { %v8116_v22 = vpop.eup %8115 }
 0xac4   : > { %4751 = vrot.lane.b32.xlu1 %v8116_v22, %s8420_s23  ;;  %v8118_v24 = vpop.eup %8117 }
 0xac5   : > { %v8120_v6 = vpop.eup %8119 }
 0xac6   : > { %v8122_v38 = vpop.eup %8121 }
 0xac7   : > { %v8124_v18 = vpop.eup %8123 }
 0xac8   : > { %v8126_v40 = vpop.eup %8125 }
 0xac9   : > { %v8128_v25 = vpop.eup %8127 }
 0xaca   : > { %v8130_v33 = vpop.eup %8129 }
 0xacb   : > { %v8132_v9 = vpop.eup %8131 }
 0xb1f   : > { %v4742_v55 = vpop.permute.xlu1 %4741 }
 0xb20   : > { %v9424_v36 = vmul.f32 %v8118_v24, %v4742_v55 }
 0xb22   : > { %4869 = vxpose.xlu1.b32.start.end [1/1] (short) (narrow) %v9424_v36, 32 }
 0xb23   : > { %v4744_v62 = vpop.permute.xlu0 %4743  ;;  %v4746_v8 = vpop.permute.xlu1 %4745 }
 0xb24   : > { %v9427_v20 = vmul.f32 %v8120_v6, %v4744_v62  ;;  %v4767_v51 = vmul.f32 %v8122_v38, %v4746_v8 }
 0xb26   : > { %v4773_v7 = vpack.c.bf16 %v9427_v20, %v9424_v36  ;;  %4901 = vxpose.xlu0.b32.start.end [1/1] (short) (narrow) %v9427_v20, 32 }
 0xb27   : > { %v4748_v58 = vpop.permute.xlu1 %4747 }
 0xb28   : > { %v4768_v2 = vmul.f32 %v8124_v18, %v4748_v58 }
 0xb2a   : > { %v9436_v56 = vpack.c.bf16 %v4768_v2, %v4767_v51 }
 0xb2c   : > { %7370 = vmatprep.mubr.msk.bf16.mxu0 %vm662_vm1, %v9436_v56 }
 0xb2d   : > { %v4754_v52 = vpop.permute.xlu1 %4753 }
 0xb2e   : > { %v4771_v42 = vmul.f32 %v8126_v40, %v4754_v52 }
 0xb2f   : > { %4965 = vxpose.xlu1.b32.start.end [1/1] (short) (narrow) %v4768_v2, 32 }
 0xb31   : > { %v4750_v3 = vpop.permute.xlu1 %4749 }
 0xb32   : > { %v9442_v23 = vmul.f32 %v8130_v33, %v4750_v3 }
 0xb33   : > { %4933 = vxpose.xlu0.b32.start.end [1/1] (short) (narrow) %v4767_v51, 32 }
 0xb34   : > { %v4756_v26 = vpop.permute.xlu0 %4755 }
 0xb35   : > { %v4772_v27 = vmul.f32 %v8128_v25, %v4756_v26 }
 0xb36   : > { %v4752_v10 = vpop.permute.xlu1 %4751 }
 0xb37   : > { %v9440_v45 = vpack.c.bf16 %v4772_v27, %v4771_v42  ;;  %v9444_v34 = vmul.f32 %v8132_v9, %v4752_v10 }
 0xb39   : > { %v4775_v31 = vpack.c.bf16 %v9444_v34, %v9442_v23  ;;  %7371 = vmatmul.mubr.msk.bf16.vlgmr.msra.gmra.mxu0 %vm662_vm1, %v9440_v45 }
 0xb3c   : > { %5029 = vxpose.xlu1.b32.start.end [1/1] (short) (narrow) %v9444_v34, 32 }
 0xb40   : > { %4997 = vxpose.xlu0.b32.start.end [1/1] (short) (narrow) %v9442_v23, 32 }
 0xb49   : > { %5093 = vxpose.xlu1.b32.start.end [1/1] (short) (narrow) %v4772_v27, 32 }
 0xb4d   : > { %5061 = vxpose.xlu0.b32.start.end [1/1] (short) (narrow) %v4771_v42, 32 }
 0xb9e   : > { %v4885_v11 = vpop.trf.xlu1 }
 0xba2   : > { %v4917_v15 = vpop.trf.xlu0  ;;  %v4886_v30 = vpop.trf.xlu1 }
 0xba3   : > { %v5125_v13 = vpack.c.bf16 %v4886_v30, %v4885_v11 }
 0xba5   : > { %7376 = vmatprep.mubr.msk.bf16.mxu1 %vm1665_vm3, %v5125_v13 }
 0xba6   : > { %v4918_v0 = vpop.trf.xlu0  ;;  %v4887_v49 = vpop.trf.xlu1 }
 0xba7   : > { %v5127_v63 = vpack.c.bf16 %v4918_v0, %v4917_v15 }
 0xbaa   : > { %v4919_v21 = vpop.trf.xlu0  ;;  %v4888_v14 = vpop.trf.xlu1 }
 0xbab   : > { %v5126_v50 = vpack.c.bf16 %v4888_v14, %v4887_v49  ;;  %v9471_v49 = vld [vmem:[%s9650_s7 + $0x2] ss:$0 sm:$0xff] }
 0xbad   : > { %7377 = vmatmul.mubr.msk.bf16.vlgmr.msra.gmra.mxu1 %vm1665_vm3, %v5126_v50 }
 0xbae   : > { %v4920_v61 = vpop.trf.xlu0  ;;  %7380 = vmatprep.mubr.msk.bf16.mxu1 %vm1665_vm3, %v5127_v63  ;;  %v4981_v59 = vpop.trf.xlu1 }
 0xbaf   : > { %v5128_v19 = vpack.c.bf16 %v4920_v61, %v4919_v21 }
 0xbb2   : > { %v4949_v16 = vpop.trf.xlu0  ;;  %v4982_v17 = vpop.trf.xlu1 }
 0xbb3   : > { %v5131_v24 = vpack.c.bf16 %v4982_v17, %v4981_v59 }
 0xbb5   : > { %7381 = vmatmul.mubr.msk.bf16.gmra.mxu1 %vm1665_vm3, %v5128_v19 }
 0xbb6   : > { %v4950_v47 = vpop.trf.xlu0  ;;  %v4983_v4 = vpop.trf.xlu1 }
 0xbb7   : > { %v5129_v28 = vpack.c.bf16 %v4950_v47, %v4949_v16  ;;  %v7923_v47 = vld [vmem:[#allocation11 + $0x28] sm:$0xff]  }
 0xbb8   : > { %7408 = vmatprep.subr.bf16.mxu0 %v7923_v47 }
 0xbb9   : > { %7384 = vmatprep.mubr.msk.bf16.mxu1 %vm1665_vm3, %v5129_v28  ;;  %7409 = vmatpush3.bf16.msra.mxu0 %v7923_v47 }
 0xbba   : > { %v4951_v43 = vpop.trf.xlu0  ;;  %v4984_v29 = vpop.trf.xlu1 }
 0xbbb   : > { %v5132_v38 = vpack.c.bf16 %v4984_v29, %v4983_v4 }
 0xbbe   : > { %v4952_v54 = vpop.trf.xlu0  ;;  %v5045_v60 = vpop.trf.xlu1 }
 0xbbf   : > { %v5130_v22 = vpack.c.bf16 %v4952_v54, %v4951_v43 }
 0xbc1   : > { %7385 = vmatmul.mubr.msk.bf16.gmra.mxu1 %vm1665_vm3, %v5130_v22 }
 0xbc2   : > { %v5013_v55 = vpop.trf.xlu0  ;;  %7388 = vmatprep.mubr.msk.bf16.mxu1 %vm1665_vm3, %v5131_v24  ;;  %v5046_v6 = vpop.trf.xlu1 }
 0xbc3   : > { %v5135_v3 = vpack.c.bf16 %v5046_v6, %v5045_v60 }
 0xbc6   : > { %v5014_v62 = vpop.trf.xlu0  ;;  %v5047_v8 = vpop.trf.xlu1 }
 0xbc7   : > { %v5133_v18 = vpack.c.bf16 %v5014_v62, %v5013_v55 }
 0xbc9   : > { %7389 = vmatmul.mubr.msk.bf16.gmra.mxu1 %vm1665_vm3, %v5132_v38 }
 0xbca   : > { %v5015_v58 = vpop.trf.xlu0  ;;  %7392 = vmatprep.mubr.msk.bf16.mxu1 %vm1665_vm3, %v5133_v18  ;;  %v5048_v51 = vpop.trf.xlu1 }
 0xbcb   : > { %v5136_v33 = vpack.c.bf16 %v5048_v51, %v5047_v8 }
 0xbce   : > { %v5016_v2 = vpop.trf.xlu0  ;;  %v5109_v25 = vpop.trf.xlu1 }
 0xbcf   : > { %v5134_v52 = vpack.c.bf16 %v5016_v2, %v5015_v58 }
 0xbd1   : > { %7393 = vmatmul.mubr.msk.bf16.gmra.mxu1 %vm1665_vm3, %v5134_v52  ;;  %v7924_v52 = vld [vmem:[#allocation11 + $0x20] sm:$0xff]  }
 0xbd2   : > { %v5077_v40 = vpop.trf.xlu0  ;;  %7396 = vmatprep.mubr.msk.bf16.mxu1 %vm1665_vm3, %v5135_v3  ;;  %v5110_v27 = vpop.trf.xlu1  ;;  %7410 = vmatprep.subr.bf16.mxu0 %v7924_v52 }
 0xbd3   : > { %v5139_v30 = vpack.c.bf16 %v5110_v27, %v5109_v25  ;;  %7411 = vmatpush3.bf16.msra.mxu0 %v7924_v52 }
 0xbd6   : > { %v5078_v26 = vpop.trf.xlu0  ;;  %v5111_v11 = vpop.trf.xlu1 }
 0xbd7   : > { %v5137_v42 = vpack.c.bf16 %v5078_v26, %v5077_v40  ;;  %v7925_v40 = vld [vmem:[#allocation10 + $0x28] sm:$0xff]  }
 0xbd8   : > { %7420 = vmatprep.subr.bf16.mxu0 %v7925_v40 }
 0xbd9   : > { %7397 = vmatmul.mubr.msk.bf16.gmra.mxu1 %vm1665_vm3, %v5136_v33 }
 0xbda   : > { %v5079_v9 = vpop.trf.xlu0  ;;  %7400 = vmatprep.mubr.msk.bf16.mxu1 %vm1665_vm3, %v5137_v42  ;;  %v5112_v13 = vpop.trf.xlu1 }
 0xbdb   : > { %v5140_v0 = vpack.c.bf16 %v5112_v13, %v5111_v11 }
 0xbde   : > { %v5080_v10 = vpop.trf.xlu0 }
 0xbdf   : > { %v5138_v15 = vpack.c.bf16 %v5080_v10, %v5079_v9 }
 0xbe1   : > { %7401 = vmatmul.mubr.msk.bf16.gmra.mxu1 %vm1665_vm3, %v5138_v15 }
 0xbe2   : > { %7404 = vmatprep.mubr.msk.bf16.mxu1 %vm1665_vm3, %v5139_v30 }
 0xbe9   : > { %7405 = vmatmul.mubr.msk.bf16.gmra.mxu1 %vm1665_vm3, %v5140_v0 }
 0xbf9   : > { %v7372_v21 = vpop.f32.mrf.mxu0 }
 0xbfa   : > { %v4859_v14 = vadd.f32 %v7372_v21, %v9471_v49 }
 0xbfb   : > { %v4850_v50 = vpop.f32.mrf.mxu0 }
 0xbfc   : > { %v9475_v63 = vadd.f32 %v4859_v14, %v9255_v48  ;;  %v4851_v61 = vadd.f32 %v9471_v49, %v4850_v50 }
 0xbfd   : > { %v7373_v59 = vpop.f32.mrf.mxu0 }
 0xbfe   : > { %v9479_v16 = vadd.f32 %v4851_v61, %v9258_v41  ;;  %v4862_v17 = vadd.f32 %v7373_v59, %v9471_v49 }
 0xbff   : > { %v9504_v36 = vpop.f32.mrf.mxu0 }
 0xc00   : > { %v9483_v19 = vadd.f32 %v4862_v17, %v9260_v37 }
 0xc6d   : > { %v7378_v4 = vpop.f32.mrf.mxu1 }
 0xc6f   : > { %v5223_v28 = vpop.f32.mrf.mxu1 }
 0xc71   : > { %v7379_v43 = vpop.f32.mrf.mxu1 }
 0xc73   : > { %v5226_v29 = vpop.f32.mrf.mxu1 }
 0xc75   : > { %v7382_v48 = vpop.f32.mrf.mxu1 }
 0xc76   : > { %v7835_v55 = vpack.i.bf16 %v7382_v48, %v7378_v4 }
 0xc77   : > { %v5239_v54 = vpop.f32.mrf.mxu1 }
 0xc78   : > { %v7831_v60 = vpack.i.bf16 %v5239_v54, %v5223_v28 }
 0xc79   : > { %v7383_v22 = vpop.f32.mrf.mxu1 }
 0xc7a   : > { %7832 = vxpose.xlu0.b32.start [1/4] (short) (narrow) %v7831_v60, 8  ;;  %v7837_v62 = vpack.i.bf16 %v7383_v22, %v7379_v43 }
 0xc7b   : > { %v5242_v24 = vpop.f32.mrf.mxu1 }
 0xc7c   : > { %v7833_v41 = vpack.i.bf16 %v5242_v24, %v5226_v29 }
 0xc7e   : > { %7834 = vxpose.xlu0.b32.cont [2/4] (short) (narrow) %v7833_v41, 8 }
 0xc81   : > { %v7386_v6 = vpop.f32.mrf.mxu1 }
 0xc82   : > { %7836 = vxpose.xlu0.b32.cont [3/4] (short) (narrow) %v7835_v55, 8 }
 0xc83   : > { %v5255_v37 = vpop.f32.mrf.mxu1 }
 0xc85   : > { %v7387_v8 = vpop.f32.mrf.mxu1 }
 0xc86   : > { %7838 = vxpose.xlu0.b32.end [4/4] (short) (narrow) %v7837_v62, 8 }
 0xc87   : > { %v5258_v38 = vpop.f32.mrf.mxu1 }
 0xc89   : > { %v7390_v18 = vpop.f32.mrf.mxu1 }
 0xc8a   : > { %v7848_v42 = vpack.i.bf16 %v7390_v18, %v7386_v6  ;;  %v7926_v18 = vld [vmem:[#allocation10 + $0x20] sm:$0xff]  }
 0xc8b   : > { %v5271_v58 = vpop.f32.mrf.mxu1 }
 0xc8c   : > { %v7844_v51 = vpack.i.bf16 %v5271_v58, %v5255_v37 }
 0xc8d   : > { %v7391_v2 = vpop.f32.mrf.mxu1 }
 0xc8e   : > { %7845 = vxpose.xlu1.b32.start [1/4] (short) (narrow) %v7844_v51, 8  ;;  %v7850_v10 = vpack.i.bf16 %v7391_v2, %v7387_v8 }
 0xc8f   : > { %v5274_v3 = vpop.f32.mrf.mxu1 }
 0xc90   : > { %v7846_v25 = vpack.i.bf16 %v5274_v3, %v5258_v38 }
 0xc91   : > { %v7394_v26 = vpop.f32.mrf.mxu1 }
 0xc92   : > { %7847 = vxpose.xlu1.b32.cont [2/4] (short) (narrow) %v7846_v25, 8 }
 0xc93   : > { %v5287_v33 = vpop.f32.mrf.mxu1 }
 0xc95   : > { %v7395_v27 = vpop.f32.mrf.mxu1 }
 0xc96   : > { %7849 = vxpose.xlu1.b32.cont [3/4] (short) (narrow) %v7848_v42, 8  ;;  %v7928_v42 = vld [vmem:[#allocation7 + $0x30] sm:$0xff]  }
 0xc97   : > { %v5290_v9 = vpop.f32.mrf.mxu1 }
 0xc99   : > { %v7398_v11 = vpop.f32.mrf.mxu1 }
 0xc9a   : > { %7851 = vxpose.xlu1.b32.end [4/4] (short) (narrow) %v7850_v10, 8  ;;  %v7861_v61 = vpack.i.bf16 %v7398_v11, %v7394_v26 }
 0xc9b   : > { %v5303_v15 = vpop.f32.mrf.mxu1 }
 0xc9c   : > { %v7857_v30 = vpack.i.bf16 %v5303_v15, %v5287_v33  ;;  %v6803_v15 = vpack.c.bf16 %v9337_v46, %v9337_v46 }
 0xc9d   : > { %v7399_v13 = vpop.f32.mrf.mxu1 }
 0xc9e   : > { %7858 = vxpose.xlu0.b32.start [1/4] (short) (narrow) %v7857_v30, 8  ;;  %v7863_v47 = vpack.i.bf16 %v7399_v13, %v7395_v27  ;;  %v9501_v27 = vld [vmem:[#allocation5 + $0x38] sm:$0xff]   ;;  %v6746_v30 = vld [vmem:[%s9653_s10 + $0x2] ss:$0 sm:$0xff] }
 0xc9f   : > { %v5306_v0 = vpop.f32.mrf.mxu1 }
 0xca0   : > { %v7859_v21 = vpack.i.bf16 %v5306_v0, %v5290_v9  ;;  %v6804_v0 = vpack.c.bf16 %v9349_v57, %v9349_v57 }
 0xca1   : > { %v7402_v14 = vpop.f32.mrf.mxu1 }
 0xca2   : > { %7860 = vxpose.xlu0.b32.cont [2/4] (short) (narrow) %v7859_v21, 8 }
 0xca3   : > { %v5319_v50 = vpop.f32.mrf.mxu1 }
 0xca5   : > { %v7403_v59 = vpop.f32.mrf.mxu1 }
 0xca6   : > { %7862 = vxpose.xlu0.b32.cont [3/4] (short) (narrow) %v7861_v61, 8 }
 0xca7   : > { %v5322_v17 = vpop.f32.mrf.mxu1 }
 0xca9   : > { %v7406_v4 = vpop.f32.mrf.mxu1 }
 0xcaa   : > { %7864 = vxpose.xlu0.b32.end [4/4] (short) (narrow) %v7863_v47, 8  ;;  %v7874_v60 = vpack.i.bf16 %v7406_v4, %v7402_v14  ;;  %v6801_v14 = vpack.c.bf16 %v9327_v5, %v9327_v5  ;;  %v5816_v47 = vunpack.c.l.bf16 %v6803_v15  ;;  %v6807_v5 = vpack.c.bf16 %v9376_v32, %v9376_v32 }
 0xcab   : > { %v5335_v28 = vpop.f32.mrf.mxu1 }
 0xcac   : > { %v7870_v43 = vpack.i.bf16 %v5335_v28, %v5319_v50  ;;  %v6802_v50 = vpack.c.bf16 %v9333_v44, %v9333_v44  ;;  %v6808_v44 = vpack.c.bf16 %v9378_v1, %v9378_v1  ;;  %v5820_v32 = vunpack.c.l.bf16 %v6807_v5 }
 0xcad   : > { %v7407_v29 = vpop.f32.mrf.mxu1 }
 0xcae   : > { %7871 = vxpose.xlu1.b32.start [1/4] (short) (narrow) %v7870_v43, 8  ;;  %v7876_v22 = vpack.i.bf16 %v7407_v29, %v7403_v59  ;;  %v5817_v43 = vunpack.c.l.bf16 %v6804_v0 }
 0xcaf   : > { %v5338_v48 = vpop.f32.mrf.mxu1 }
 0xcb0   : > { %v7872_v54 = vpack.i.bf16 %v5338_v48, %v5322_v17  ;;  %v5814_v48 = vunpack.c.l.bf16 %v6801_v14 }
 0xcb2   : > { %7873 = vxpose.xlu1.b32.cont [2/4] (short) (narrow) %v7872_v54, 8  ;;  %v5815_v54 = vunpack.c.l.bf16 %v6802_v50 }
 0xcb6   : > { %7875 = vxpose.xlu1.b32.cont [3/4] (short) (narrow) %v7874_v60, 8 }
 0xcba   : > { %7877 = vxpose.xlu1.b32.end [4/4] (short) (narrow) %v7876_v22, 8 }
 0xcf6   : > { %v7839_v24 = vpop.trf.xlu0 }
 0xcf7   : > { %v7843_v41 = vunpack.i.h.bf16 %v7839_v24  ;;  %v7840_v55 = vunpack.i.l.bf16 %v7839_v24 }
 0xcf9   : > { %v5606_v6 = vpack.c.bf16 %v7843_v41, %v7840_v55 }
 0xcfb   : > { %7412 = vmatprep.mubr.msk.bf16.mxu0 %vm662_vm1, %v5606_v6 }
 0xd0a   : > { %v7852_v37 = vpop.trf.xlu1 }
 0xd0b   : > { %v7856_v62 = vunpack.i.h.bf16 %v7852_v37  ;;  %v7853_v8 = vunpack.i.l.bf16 %v7852_v37 }
 0xd0d   : > { %v5607_v38 = vpack.c.bf16 %v7856_v62, %v7853_v8 }
 0xd0f   : > { %7413 = vmatmul.mubr.msk.bf16.vlgmr.msra.gmra.mxu0 %vm662_vm1, %v5607_v38  ;;  %v6805_v38 = vpack.c.bf16 %v9360_v12, %v9360_v12 }
 0xd10   : > { %7421 = vmatpush3.bf16.msra.mxu0 %v7925_v40  ;;  %v7927_v40 = vld [vmem:[#allocation7 + $0x38] sm:$0xff]  }
 0xd11   : > { %7422 = vmatprep.subr.bf16.mxu0 %v7926_v18 }
 0xd14   : > { %7423 = vmatpush3.bf16.msra.mxu0 %v7926_v18 }
 0xd15   : > { %7432 = vmatprep.subr.bf16.mxu0 %v7927_v40 }
 0xd1a   : > { %v7865_v58 = vpop.trf.xlu0 }
 0xd1b   : > { %v7869_v51 = vunpack.i.h.bf16 %v7865_v58  ;;  %v7866_v2 = vunpack.i.l.bf16 %v7865_v58  ;;  %v6806_v58 = vpack.c.bf16 %v9362_v53, %v9362_v53  ;;  %v7930_v53 = vld [vmem:[#allocation5 + $0x30] sm:$0xff]  }
 0xd1d   : > { %v5608_v52 = vpack.c.bf16 %v7869_v51, %v7866_v2  ;;  %v5819_v12 = vunpack.c.l.bf16 %v6806_v58 }
 0xd1f   : > { %7416 = vmatprep.mubr.msk.bf16.mxu0 %vm662_vm1, %v5608_v52 }
 0xd2a   : > { %v7878_v3 = vpop.trf.xlu1 }
 0xd2b   : > { %v7882_v25 = vunpack.i.h.bf16 %v7878_v3  ;;  %v7879_v26 = vunpack.i.l.bf16 %v7878_v3 }
 0xd2d   : > { %v5609_v33 = vpack.c.bf16 %v7882_v25, %v7879_v26  ;;  %v5821_v26 = vunpack.c.l.bf16 %v6808_v44 }
 0xd2f   : > { %7417 = vmatmul.mubr.msk.bf16.gmra.mxu0 %vm662_vm1, %v5609_v33 }
 0xd30   : > { %7424 = vmatprep.mubr.msk.bf16.mxu0 %vm662_vm1, %v4773_v7 }
 0xd37   : > { %7425 = vmatmul.mubr.msk.bf16.vlgmr.msra.gmra.mxu0 %vm662_vm1, %v9436_v56 }
 0xd38   : > { %7428 = vmatprep.mubr.msk.bf16.mxu0 %vm662_vm1, %v4775_v31  ;;  %7433 = vmatpush3.bf16.msra.mxu0 %v7927_v40  ;;  %v5818_v40 = vunpack.c.l.bf16 %v6805_v38 }
 0xd39   : > { %7434 = vmatprep.subr.bf16.mxu0 %v7928_v42 }
 0xd3c   : > { %7435 = vmatpush3.bf16.msra.mxu0 %v7928_v42 }
 0xd3d   : > { %7440 = vmatprep.subr.bf16.mxu0 %v9501_v27 }
 0xd3f   : > { %7429 = vmatmul.mubr.msk.bf16.gmra.mxu0 %vm662_vm1, %v9440_v45 }
 0xdcf   : > { %v7414_v20 = vpop.f32.mrf.mxu0 }
 0xdd1   : > { %v5678_v7 = vpop.f32.mrf.mxu0 }
 0xdd3   : > { %v7415_v56 = vpop.f32.mrf.mxu0 }
 0xdd5   : > { %v5681_v23 = vpop.f32.mrf.mxu0 }
 0xdef   : > { %v7418_v34 = vpop.f32.mrf.mxu0 }
 0xdf1   : > { %v5694_v31 = vpop.f32.mrf.mxu0 }
 0xdf3   : > { %v7419_v9 = vpop.f32.mrf.mxu0 }
 0xdf5   : > { %v5697_v45 = vpop.f32.mrf.mxu0 }
 0xdf7   : > { %v7426_v10 = vpop.f32.mrf.mxu0 }
 0xdf8   : > { %v5776_v11 = vadd.f32 %v7426_v10, %v7414_v20 }
 0xdf9   : > { %v5767_v13 = vpop.f32.mrf.mxu0 }
 0xdfa   : > { %v5768_v21 = vadd.f32 %v5767_v13, %v5678_v7  ;;  %v5808_v59 = vadd.f32 %v6746_v30, %v5776_v11  ;;  %v6756_v13 = vld [vmem:[%s9648_s5 + $0x3] ss:$0 sm:$0xff] }
 0xdfb   : > { %v7427_v61 = vpop.f32.mrf.mxu0 }
 0xdfc   : > { %v5779_v17 = vadd.f32 %v7427_v61, %v7415_v56  ;;  %v5806_v4 = vadd.f32 %v6746_v30, %v5768_v21  ;;  %v5824_v57 = vadd.f32 %v5816_v47, %v5808_v59 }
 0xdfd   : > { %v5770_v46 = vpop.f32.mrf.mxu0 }
 0xdfe   : > { %v5809_v28 = vadd.f32 %v6746_v30, %v5779_v17  ;;  %v5771_v29 = vadd.f32 %v5770_v46, %v5681_v23  ;;  %v5822_v6 = vadd.f32 %v5814_v48, %v5806_v4 }
 0xdff   : > { %v7430_v60 = vpop.f32.mrf.mxu0 }
 0xe00   : > { %v5825_v22 = vadd.f32 %v5817_v43, %v5809_v28  ;;  %v5807_v24 = vadd.f32 %v6746_v30, %v5771_v29  ;;  %v5792_v41 = vadd.f32 %v7430_v60, %v7418_v34 }
 0xe01   : > { %v5783_v55 = vpop.f32.mrf.mxu0 }
 0xe02   : > { %v5831_v37 = vpack.c.bf16 %v5825_v22, %v5824_v57  ;;  %v5823_v62 = vadd.f32 %v5815_v54, %v5807_v24  ;;  %v5784_v8 = vadd.f32 %v5783_v55, %v5694_v31  ;;  %v5812_v2 = vadd.f32 %v6746_v30, %v5792_v41  ;;  %v7931_v41 = vld [vmem:[#allocation8 + $0x38] sm:$0xff]   ;;  %v7932_v55 = vld [vmem:[#allocation8 + $0x30] sm:$0xff]  }
 0xe03   : > { %v7431_v18 = vpop.f32.mrf.mxu0 }
 0xe04   : > { %v5830_v51 = vpack.c.bf16 %v5823_v62, %v5822_v6  ;;  %v5795_v52 = vadd.f32 %v7431_v18, %v7419_v9  ;;  %7436 = vmatprep.mubr.msk.bf16.mxu0 %vm662_vm1, %v5831_v37  ;;  %v5810_v1 = vadd.f32 %v6746_v30, %v5784_v8  ;;  %v5828_v42 = vadd.f32 %v5820_v32, %v5812_v2  ;;  %v7933_v37 = vld [vmem:[%s9654_s11 + $0x18] sm:$0xff]   ;;  %v7934_v62 = vld [vmem:[%s9654_s11 + $0x10] sm:$0xff]   ;;  %v7935_v18 = vld [vmem:[%s9654_s11 + $0x8] sm:$0xff]  }
 0xe05   : > { %v5786_v3 = vpop.f32.mrf.mxu0  ;;  %7456 = vmatprep.subr.bf16.mxu1 %v7933_v37 }
 0xe06   : > { %v5813_v25 = vadd.f32 %v6746_v30, %v5795_v52  ;;  %v5787_v33 = vadd.f32 %v5786_v3, %v5697_v45  ;;  %v5826_v56 = vadd.f32 %v5818_v40, %v5810_v1  ;;  %7457 = vmatpush3.bf16.msra.mxu1 %v7933_v37 }
 0xe07   : > { %7458 = vmatprep.subr.bf16.mxu1 %v7934_v62 }
 0xe08   : > { %v5829_v20 = vadd.f32 %v5821_v26, %v5813_v25  ;;  %v5811_v7 = vadd.f32 %v6746_v30, %v5787_v33 }
 0xe0a   : > { %v5833_v23 = vpack.c.bf16 %v5829_v20, %v5828_v42  ;;  %v5827_v34 = vadd.f32 %v5819_v12, %v5811_v7  ;;  %7459 = vmatpush3.bf16.msra.mxu1 %v7934_v62 }
 0xe0b   : > { %7460 = vmatprep.subr.bf16.mxu1 %v7935_v18 }
 0xe0c   : > { %v5832_v31 = vpack.c.bf16 %v5827_v34, %v5826_v56  ;;  %7437 = vmatmul.mubr.msk.bf16.vlgmr.msra.gmra.mxu0 %vm662_vm1, %v5833_v23  ;;  %v7937_v23 = vld [vmem:[%s9656_s13 + $0x18] sm:$0xff]   ;;  %v6762_v34 = vld [vmem:[%s9650_s7 + $0x3] ss:$0 sm:$0xff] }
 0xe0d   : > { %7441 = vmatpush3.bf16.msra.mxu0 %v9501_v27  ;;  %7444 = vmatprep.mubr.msk.bf16.mxu0 %vm662_vm1, %v5830_v51  ;;  %v7936_v51 = vld [vmem:[%s9654_s11] sm:$0xff]  }
 0xe0e   : > { %7442 = vmatprep.subr.bf16.mxu0 %v7930_v53  ;;  %7461 = vmatpush3.bf16.msra.mxu1 %v7935_v18 }
 0xe0f   : > { %7462 = vmatprep.subr.bf16.mxu1 %v7936_v51 }
 0xe11   : > { %7443 = vmatpush3.bf16.msra.mxu0 %v7930_v53 }
 0xe12   : > { %7448 = vmatprep.subr.bf16.mxu0 %v7931_v41  ;;  %7463 = vmatpush3.bf16.msra.mxu1 %v7936_v51 }
 0xe14   : > { %7445 = vmatmul.mubr.msk.bf16.vlgmr.msra.gmra.mxu0 %vm662_vm1, %v5832_v31  ;;  %v8172_v31 = vld [vmem:[%s9650_s7 + $0x1] ss:$0 sm:$0xff] }
 0xe15   : > { %7449 = vmatpush3.bf16.msra.mxu0 %v7931_v41 }
 0xe16   : > { %7450 = vmatprep.subr.bf16.mxu0 %v7932_v55 }
 0xe19   : > { %7451 = vmatpush3.bf16.msra.mxu0 %v7932_v55 }
 0xe1a   : > { %7468 = vmatprep.subr.bf16.mxu0 %v7937_v23 }
 0xecc   : > { %v7438_v9 = vpop.f32.mrf.mxu0 }
 0xece   : > { %v5910_v45 = vpop.f32.mrf.mxu0 }
 0xed0   : > { %v7439_v10 = vpop.f32.mrf.mxu0 }
 0xed2   : > { %v5913_v11 = vpop.f32.mrf.mxu0 }
 0xed4   : > { %v7446_v15 = vpop.f32.mrf.mxu0 }
 0xed5   : > { %v5988_v30 = vadd.f32 %v7446_v15, %v7438_v9  ;;  %v3248_v9 = vadd.f32 %v8172_v31, %v9306_v39 }
 0xed6   : > { %v5979_v0 = vpop.f32.mrf.mxu0 }
 0xed7   : > { %v5980_v21 = vadd.f32 %v5979_v0, %v5910_v45  ;;  %v6004_v14 = vadd.f32 %v6756_v13, %v5988_v30  ;;  %v4854_v30 = vadd.f32 %v9471_v49, %v9504_v36 }
 0xed8   : > { %v7447_v27 = vpop.f32.mrf.mxu0 }
 0xed9   : > { %v6002_v50 = vadd.f32 %v6756_v13, %v5980_v21  ;;  %v5991_v61 = vadd.f32 %v7447_v27, %v7439_v10  ;;  %v6759_v4 = vmul.f32 -1.442695, %v6004_v14 }
 0xeda   : > { %v5982_v59 = vpop.f32.mrf.mxu0 }
 0xedb   : > { %v6757_v17 = vmul.f32 -1.442695, %v6002_v50  ;;  %v6005_v47 = vadd.f32 %v6756_v13, %v5991_v61  ;;  %v5983_v46 = vadd.f32 %v5982_v59, %v5913_v11  ;;  %v8173_v11 = vld [vmem:[%s9650_s7] ss:$0 sm:$0xff] }
 0xedc   : > { %v1178_v15 = vadd.f32 %v8173_v11, %v8976_v35 }
 0xedd   : > { %8133 = vpow2.f32 %v6757_v17  ;;  %v6760_v28 = vmul.f32 -1.442695, %v6005_v47  ;;  %v6003_v43 = vadd.f32 %v6756_v13, %v5983_v46 }
 0xede   : > { %v3260_v21 = vadd.f32 %v3248_v9, %v1178_v15 }
 0xedf   : > { %8135 = vpow2.f32 %v6760_v28  ;;  %v6758_v29 = vmul.f32 -1.442695, %v6003_v43 }
 0xee0   : > { %8137 = vpow2.f32 %v6759_v4  ;;  %v4866_v61 = vadd.f32 %v4854_v30, %v3260_v21 }
 0xee1   : > { %8139 = vpow2.f32 %v6758_v29 }
 0xeea   : > { %v8134_v48 = vpop.eup %8133 }
 0xeeb   : > { %v6022_v54 = vadd.f32 1.0, %v8134_v48  ;;  %v6767_v48 = vld [vmem:[%s9655_s12] ss:$0 sm:$0xff] }
 0xeec   : > { %v8136_v60 = vpop.eup %8135 }
 0xeed   : > { %v8138_v57 = vpop.eup %8137  ;;  %8141 = vrcp.f32 %v6022_v54  ;;  %v6025_v22 = vadd.f32 1.0, %v8136_v60 }
 0xeee   : > { %v8140_v24 = vpop.eup %8139  ;;  %v6024_v44 = vadd.f32 1.0, %v8138_v57 }
 0xeef   : > { %v6023_v5 = vadd.f32 1.0, %v8140_v24  ;;  %8143 = vrcp.f32 %v6025_v22 }
 0xef1   : > { %8145 = vrcp.f32 %v6023_v5 }
 0xef2   : > { %8147 = vrcp.f32 %v6024_v44 }
 0xef3   : > { %8149 = vtanh.f32 %v6002_v50 }
 0xef4   : > { %8151 = vtanh.f32 %v6003_v43 }
 0xef5   : > { %8153 = vtanh.f32 %v6004_v14 }
 0xef6   : > { %8155 = vtanh.f32 %v6005_v47 }
 0xefa   : > { %v8142_v6 = vpop.eup %8141 }
 0xefb   : > { %6038 = vrot.lane.b32.xlu0 %v8142_v6, %s8420_s23 }
 0xefc   : > { %v8144_v8 = vpop.eup %8143 }
 0xefe   : > { %v8146_v38 = vpop.eup %8145 }
 0xeff   : > { %6040 = vrot.lane.b32.xlu1 %v8146_v38, %s8420_s23  ;;  %6044 = vrot.lane.b32.xlu0 %v8144_v8, %s8420_s23  ;;  %v8148_v58 = vpop.eup %8147  ;;  %v6774_v8 = vld [vmem:[%s9657_s14] ss:$0 sm:$0xff] }
 0xf00   : > { %v8150_v52 = vpop.eup %8149 }
 0xf01   : > { %v8152_v32 = vpop.eup %8151 }
 0xf02   : > { %v8154_v33 = vpop.eup %8153 }
 0xf03   : > { %6042 = vrot.lane.b32.xlu1 %v8148_v58, %s8420_s23  ;;  %v8156_v42 = vpop.eup %8155  ;;  %s8336_s23 = sshll.u32 %s8421_s21, 4  ;;  %s8337_s23 = int_to_ptr.vmem [resolvable:$false] %s8336_s23 }
 0xf04   : > { %s8338_s27 = scalar_lea.vmem %s8337_s23, 1024  ;;  %p8339_p5 = scmp.lt.s32.totalorder %s9592_s24, %s8337_s23 }
 0xf05   : > { %p8340_p9 = scmp.lt.s32.totalorder %s8338_s27, %s8332_s26 }
 0xf07   : > { %p8341_p1 = por %p8340_p9, %p8339_p5 }
 0xf09   : > { %p8342_p3 = pnand %p8341_p1, %p8335_p13 }
 0xf6d   : > { %v6039_v2 = vpop.permute.xlu0 %6038 }
 0xf6e   : > { %v6050_v1 = vmul.f32 %v8150_v52, %v6039_v2 }
 0xf71   : > { %v6041_v3 = vpop.permute.xlu1 %6040  ;;  %v6045_v26 = vpop.permute.xlu0 %6044 }
 0xf72   : > { %v6051_v25 = vmul.f32 %v8152_v32, %v6041_v3  ;;  %v6053_v7 = vmul.f32 %v8156_v42, %v6045_v26 }
 0xf74   : > { %v6054_v40 = vpack.c.bf16 %v6051_v25, %v6050_v1 }
 0xf75   : > { %v6043_v20 = vpop.permute.xlu1 %6042 }
 0xf76   : > { %v6052_v12 = vmul.f32 %v8154_v33, %v6043_v20  ;;  %7452 = vmatprep.mubr.msk.bf16.mxu0 %vm662_vm1, %v6054_v40 }
 0xf78   : > { %v6055_v56 = vpack.c.bf16 %v6053_v7, %v6052_v12 }
 0xf7a   : > { %7453 = vmatmul.mubr.msk.bf16.vlgmr.msra.gmra.mxu0 %vm662_vm1, %v6055_v56 }
 0xf7b   : > { %7469 = vmatpush3.bf16.msra.mxu0 %v7937_v23 }
0x103a   : > { %v7454_v53 = vpop.f32.mrf.mxu0 }
0x103b   : > { %v6130_v45 = vadd.f32 %v7454_v53, %v6762_v34 }
0x103c   : > { %v6121_v10 = vpop.f32.mrf.mxu0 }
0x103d   : > { %v6122_v13 = vadd.f32 %v6762_v34, %v6121_v10  ;;  %v6138_v14 = vadd.f32 %v6130_v45, %v9475_v63  ;;  %v7938_v63 = vld [vmem:[%s9656_s13 + $0x10] sm:$0xff]  }
0x103e   : > { %v7455_v0 = vpop.f32.mrf.mxu0  ;;  %7470 = vmatprep.subr.bf16.mxu0 %v7938_v63 }
0x103f   : > { %v6133_v27 = vadd.f32 %v7455_v0, %v6762_v34  ;;  %v6136_v39 = vadd.f32 %v6122_v13, %v9479_v16  ;;  %v6142_v47 = vmax.f32 %v6138_v14, 0.0  ;;  %7471 = vmatpush3.bf16.msra.mxu0 %v7938_v63  ;;  %v7939_v16 = vld [vmem:[%s9656_s13 + $0x8] sm:$0xff]  }
0x1040   : > { %v6124_v50 = vpop.f32.mrf.mxu0  ;;  %7472 = vmatprep.subr.bf16.mxu0 %v7939_v16 }
0x1041   : > { %v6139_v59 = vadd.f32 %v6133_v27, %v9483_v19  ;;  %v6125_v17 = vadd.f32 %v6762_v34, %v6124_v50  ;;  %v6140_v35 = vmax.f32 %v6136_v39, 0.0  ;;  %v7940_v19 = vld [vmem:[%s9656_s13] sm:$0xff]  }
0x1043   : > { %v6143_v46 = vmax.f32 %v6139_v59, 0.0  ;;  %v6137_v4 = vadd.f32 %v6125_v17, %v4866_v61  ;;  %7473 = vmatpush3.bf16.msra.mxu0 %v7939_v16 }
0x1044   : > { %7474 = vmatprep.subr.bf16.mxu0 %v7940_v19 }
0x1045   : > { %v6145_v28 = vpack.c.bf16 %v6143_v46, %v6142_v47  ;;  %v6141_v43 = vmax.f32 %v6137_v4, 0.0 }
0x1047   : > { %v6144_v49 = vpack.c.bf16 %v6141_v43, %v6140_v35  ;;  %7475 = vmatpush3.bf16.msra.mxu0 %v7940_v19 }
0x1049   : > { %7464 = vmatprep.mubr.msk.bf16.mxu1 %vm6185_vm4, %v6144_v49 }
0x104a   : > { %7465 = vmatmul.mubr.msk.bf16.vlgmr.msra.gmra.mxu1 %vm6185_vm4, %v6145_v28 }
0x110a   : > { %v7466_v36 = vpop.f32.mrf.mxu1 }
0x110b   : > { %v6235_v22 = vadd.f32 %v7466_v36, %v6767_v48 }
0x110c   : > { %v6226_v29 = vpop.f32.mrf.mxu1 }
0x110d   : > { %v6227_v60 = vadd.f32 %v6767_v48, %v6226_v29  ;;  %v6243_v6 = vmax.f32 %v6235_v22, 0.0 }
0x110e   : > { %v7467_v54 = vpop.f32.mrf.mxu1 }
0x110f   : > { %v6238_v57 = vadd.f32 %v7467_v54, %v6767_v48  ;;  %v6241_v44 = vmax.f32 %v6227_v60, 0.0 }
0x1110   : > { %v6229_v24 = vpop.f32.mrf.mxu1 }
0x1111   : > { %v6230_v41 = vadd.f32 %v6767_v48, %v6229_v24  ;;  %v6244_v5 = vmax.f32 %v6238_v57, 0.0 }
0x1113   : > { %v6242_v55 = vmax.f32 %v6230_v41, 0.0  ;;  %v6246_v62 = vpack.c.bf16 %v6244_v5, %v6243_v6 }
0x1115   : > { %v6245_v37 = vpack.c.bf16 %v6242_v55, %v6241_v44 }
0x1117   : > { %7476 = vmatprep.mubr.msk.bf16.mxu0 %vm6185_vm4, %v6245_v37 }
0x1118   : > { %7477 = vmatmul.mubr.msk.bf16.vlgmr.msra.gmra.mxu0 %vm6185_vm4, %v6246_v62 }
0x11d8   : > { %v7478_v38 = vpop.f32.mrf.mxu0 }
0x11d9   : > { %v6335_v18 = vadd.f32 %v7478_v38, %v6774_v8 }
0x11da   : > { %v6326_v58 = vpop.f32.mrf.mxu0 }
0x11db   : > { %6344 = vst.msk [vmem:[%s586_s19 + $0x10] sm:$0xff] %vm6341_vm5, %v6335_v18  ;;  %v6327_v51 = vadd.f32 %v6774_v8, %v6326_v58 }
0x11dc   : > { %v7479_v2 = vpop.f32.mrf.mxu0 }
0x11dd   : > { %6342 = vst.msk [vmem:[%s586_s19] sm:$0xff] %vm6341_vm5, %v6327_v51  ;;  %v6338_v52 = vadd.f32 %v7479_v2, %v6774_v8 }
0x11de   : > { %v6329_v32 = vpop.f32.mrf.mxu0 }
0x11df   : > { %6345 = vst.msk [vmem:[%s586_s19 + $0x18] sm:$0xff] %vm6341_vm5, %v6338_v52  ;;  %v6330_v3 = vadd.f32 %v6774_v8, %v6329_v32 }
0x11e1   : > { %6343 = vst.msk [vmem:[%s586_s19 + $0x8] sm:$0xff] %vm6341_vm5, %v6330_v3 }
0x11e2   : > { %8345 = shalt.err (!%p8342_p3)
}
0x11e3   : > { %s8346_s16 = scalar_lea.hbm %s9598_s15, 512  ;;  %s8350_s19 = scalar_lea.hbm %s9697_s20, 1024 }
0x11e4   : > { %p8347_p4 = scmp.ne.s32.totalorder %s9598_s15, %s8346_s16  ;;  %p8351_p2 = scmp.lt.s32.totalorder %s9598_s15, %s9697_s20 }
0x11e5   : > { %p8352_p7 = scmp.lt.s32.totalorder %s8350_s19, %s8346_s16 }
0x11e6   : > { %p8348_p12 = pnand %p8347_p4, %p9698_p11 }
0x11e7   : > { %p8353_p8 = por %p8352_p7, %p8351_p2 }
0x11e8   : > { %p8349_p6 = pneg %p8348_p12 }
0x11ea   : > { %p8354_p10 = pnand %p8353_p8, %p8349_p6 }
0x11ec   : > { %8357 = shalt.err (!%p8354_p10)
}
0x11ed   : > { %s8422_s8 = smov 128   ;;  %s8423_s26 = smov 8  }
0x11ee   : > { %7505 = dma.vmem_to_hbm [thread:$0]  (%p9698_p11), %s9592_s24, 512, %s9598_s15, %s6347_s22, %s8422_s8, %s8422_s8, %s8423_s26  }
0x11ef PF: > { %s6376_s21 = sand.u32 1, %s8396_s17   ;;  %p9699_p0 = scmp.ne.s32.totalorder %s9685_s25, 0 }
0x11f0   : > { %p9700_p13 = scmp.ge.s32.totalorder %s8408_s2, 2  ;;  %s6377_s23 = scalar_lea.sflag [#allocation4], %s6376_s21 }
0x11f2   : > { %p7528_p5 = pnand %p9700_p13, %p9699_p0 }
0x11f4   : > { %p7529_p9 = pneg %p7528_p5 }
0x11f6   : > { %8391 = dma.done.wait (%p7529_p9), %s6377_s23, 512  }
0x11f7   : > { %8393 = vsyncadd (%p7529_p9), %s6377_s23, 4294966784  ;;  %s9701_s27 = sld [smem:[#allocation19_spill]]  ;;  %p31_p1 = scmp.ge.s32.totalorder %s8615_s29, 4  }
0x11f8   : > { %s9702_s19 = sld [smem:[#allocation20_spill]]  ;;  %s9703_s17 = smov %s8400_s18 }
0x11f9   : > { %s9705_s2 = smov %s8615_s29  ;;  %33 = sbr.rel (!%p31_p1) target bundleno = 15 (0xf), region = 166 }
0x11fd   : > { %s9704_s18 = smov %s9701_s27 }
0x11fe   :  { %6382 = vsyncpa [#allocation3], 1 }
0x11ff   :  { %6384 = vsyncpa [#allocation3 + $0x1], 1 }
0x1200   :  { %6385 = vsyncpa [#allocation6], 1 }
0x1201   :  { %6386 = vsyncpa [#allocation9], 1 }
0x1202   :  { %6387 = vsyncpa [#allocation12], 1 }
0x1203   :  { %6388 = vsyncpa [#allocation4], 1 }
0x1204   :  { %6390 = vsyncpa [#allocation4 + $0x1], 1 }

// kernel: tpu_custom_call.1
= control target key start
LH: loop header
LB: loop body
LE: loop exit
PB: predicated region body
PF: predicated region fallthrough
CT: control target
= control target key end

     0   :  { %s8144_s0 = inlined_call_operand.hbm [shape: bf16[4,8,8,32], index: 0, kind: input, shape index: {}]   ;;  %s8145_s1 = inlined_call_operand.vmem [shape: bf16[8,8], index: 1, kind: input, shape index: {}]   ;;  %s8146_s2 = inlined_call_operand.vmem [shape: bf16[8,8], index: 2, kind: input, shape index: {}]   ;;  %s8147_s3 = inlined_call_operand.hbm [shape: bf16[4,32,64], index: 3, kind: input, shape index: {}]   ;;  %s8148_s4 = inlined_call_operand.hbm [shape: bf16[4,32,64], index: 4, kind: input, shape index: {}]   ;;  %s8149_s5 = inlined_call_operand.vmem [shape: f32[4,1,64], index: 5, kind: input, shape index: {}]   ;;  %s8150_s6 = inlined_call_operand.hbm [shape: bf16[4,32,64], index: 6, kind: input, shape index: {}]   ;;  %s8151_s7 = inlined_call_operand.vmem [shape: f32[4,1,64], index: 7, kind: input, shape index: {}]   ;;  %s8152_s8 = inlined_call_operand.hbm [shape: bf16[4,32,32], index: 8, kind: input, shape index: {}]   ;;  %s8153_s9 = inlined_call_operand.hbm [shape: bf16[4,32,32], index: 9, kind: input, shape index: {}]   ;;  %s8154_s10 = inlined_call_operand.vmem [shape: f32[4,1,32], index: 10, kind: input, shape index: {}]   ;;  %s8155_s11 = inlined_call_operand.vmem [shape: bf16[64,64], index: 11, kind: input, shape index: {}]   ;;  %s8156_s12 = inlined_call_operand.vmem [shape: f32[1,64], index: 12, kind: input, shape index: {}]   ;;  %s8157_s13 = inlined_call_operand.vmem [shape: bf16[64,12], index: 13, kind: input, shape index: {}]   ;;  %s8158_s14 = inlined_call_operand.vmem [shape: f32[1,12], index: 14, kind: input, shape index: {}]   ;;  %s8159_s15 = inlined_call_operand.hbm [shape: f32[4,2,8,12], index: 15, kind: output, shape index: {}]  }
   0x1   :  { %8168 = sst [smem:[#allocation21_spill]] %s8147_s3 }
   0x2   :  { %8169 = sst [smem:[#allocation22_spill]] %s8148_s4 }
   0x3   :  { %8170 = sst [smem:[#allocation23_spill]] %s8150_s6 }
   0x4   :  { %8171 = sst [smem:[#allocation24_spill]] %s8152_s8 }
   0x5   :  { %8172 = sst [smem:[#allocation25_spill]] %s8153_s9 }
   0x6   :  { %8173 = sst [smem:[#allocation26_spill]] %s8159_s15 }
   0x7   :  { %20 = vsyncpa [#allocation3], 0 }
   0x8   :  { %22 = vsyncpa [#allocation3 + $0x1], 0 }
   0x9   :  { %23 = vsyncpa [#allocation6], 0 }
   0xa   :  { %24 = vsyncpa [#allocation9], 0 }
   0xb   :  { %25 = vsyncpa [#allocation12], 0 }
   0xc   :  { %26 = vsyncpa [#allocation4], 0 }
   0xd   :  { %28 = vsyncpa [#allocation4 + $0x1], 0  ;;  %s6811_s17 = smov 0   ;;  %s6813_s1 = smov 0  }
   0xe   :  { %s6815_s18 = smov 0   ;;  %s6817_s19 = smov 0  }
   0xf LB: > { %8174 = sst [smem:[#allocation19_spill]] %s6711_s18  ;;  %s6717_s20 = smov [#allocation5]   ;;  %s6715_s19 = sphi %s6817_s19, %s8206_s19   ;;  %s6711_s18 = sphi %s6815_s18, %s8203_s18   ;;  %s6707_s1 = sphi %s6813_s1, %s8205_s1   ;;  %s6703_s17 = sphi %s6811_s17, %s8204_s17  }
  0x10   : > { %s403_s21 = sshll.u32 %s6717_s20, 4  ;;  %s6832_s22 = sadd.s32 4294967295, %s6715_s19   ;;  %s404_s21 = int_to_ptr.vmem [resolvable:$true] %s403_s21 }
  0x11   : > { %p5004_p0 = scmp.ge.s32.totalorder %s6715_s19, 1  ;;  %p8163_p1 = scmp.eq.s32.totalorder %s6832_s22, 0 }
  0x12   : > { %p385_p2 = scmp.lt.s32.totalorder %s6715_s19, 3  ;;  %s6718_s24 = smov [#allocation8]  }
  0x13   : > { %s432_s25 = sshll.u32 %s6718_s24, 4  ;;  %s6719_s27 = smov [#allocation7]   ;;  %s6850_s25 = int_to_ptr.vmem [resolvable:$true] %s432_s25 }
  0x14   : > { %p6837_p3 = pnand %p5004_p0, %p385_p2  ;;  %s416_s28 = sshll.u32 %s6719_s27, 4  ;;  %s6852_s28 = int_to_ptr.vmem [resolvable:$true] %s416_s28 }
  0x15   : > { %s6492_s30 = scalar_lea.vmem %s404_s21, 1024  ;;  %p6500_p11 = scmp.lt.s32.totalorder %s404_s21, %s404_s21 }
  0x16   : > { %s8175_s23 = scalar_select %p6837_p3, 1, 0 }
  0x17   : > { %p6112_p5 = pneg %p6837_p3  ;;  %p6493_p8 = scmp.ne.s32.totalorder %s404_s21, %s6492_s30 }
  0x18   : > { %p6501_p12 = scmp.lt.s32.totalorder %s6492_s30, %s6492_s30 }
  0x19   : > { %p6846_p6 = pnand %p6112_p5, %p8163_p1 }
  0x1a   : > { %p6502_p13 = por %p6501_p12, %p6500_p11 }
  0x1b   : > { %p6856_p7 = pneg %p6846_p6 }
  0x1d   : > { %p6495_p9 = pnand %p6493_p8, %p6856_p7 }
  0x1f   : > { %p6496_p10 = pneg %p6495_p9 }
  0x21   : > { %p6503_p0 = pnand %p6502_p13, %p6496_p10 }
  0x23   : > { %6506 = shalt.err (!%p6503_p0)
}
  0x24   : > { %s8161_s16 = smov 64   ;;  %s8162_s20 = smov 4  }
  0x25   : > { %s8178_s3 = sld [smem:[#allocation21_spill]]  ;;  %s6518_s15 = scalar_lea.vmem %s6850_s25, 1024 }
  0x26   : > { %p6519_p2 = scmp.ne.s32.totalorder %s6850_s25, %s6518_s15  ;;  %p6526_p9 = scmp.lt.s32.totalorder %s6850_s25, %s6850_s25 }
  0x27   : > { %p6527_p10 = scmp.lt.s32.totalorder %s6518_s15, %s6518_s15 }
  0x28   : > { %p6521_p5 = pnand %p6519_p2, %p6856_p7 }
  0x29   : > { %p6528_p11 = por %p6527_p10, %p6526_p9 }
  0x2a   : > { %p6522_p8 = pneg %p6521_p5 }
  0x2b   : > { %6115 = dma.hbm_to_vmem [thread:$0]  (!%p6846_p6), %s8178_s3, 1024, %s404_s21, [#allocation6], %s8161_s16, %s8161_s16, %s8162_s20  }
  0x2c   : > { %p6529_p12 = pnand %p6528_p11, %p6522_p8 }
  0x2e   : > { %6532 = shalt.err (!%p6529_p12)
}
  0x2f   : > { %s8179_s6 = sld [smem:[#allocation23_spill]]  ;;  %s6544_s21 = scalar_lea.vmem %s6852_s28, 1024 }
  0x30   : > { %p6545_p13 = scmp.ne.s32.totalorder %s6852_s28, %s6544_s21  ;;  %p6552_p5 = scmp.lt.s32.totalorder %s6852_s28, %s6852_s28 }
  0x31   : > { %p6553_p8 = scmp.lt.s32.totalorder %s6544_s21, %s6544_s21 }
  0x32   : > { %p6547_p0 = pnand %p6545_p13, %p6856_p7 }
  0x33   : > { %p6554_p9 = por %p6553_p8, %p6552_p5 }
  0x34   : > { %p6548_p2 = pneg %p6547_p0 }
  0x35   : > { %6121 = dma.hbm_to_vmem [thread:$0]  (!%p6846_p6), %s8179_s6, 1024, %s6850_s25, [#allocation9], %s8161_s16, %s8161_s16, %s8162_s20  }
  0x36   : > { %p6555_p10 = pnand %p6554_p9, %p6548_p2 }
  0x38   : > { %6558 = shalt.err (!%p6555_p10)
}
  0x39   : > { %s8180_s4 = sld [smem:[#allocation22_spill]]  ;;  %s6722_s25 = smov [#allocation10]  }
  0x3a   : > { %s448_s30 = sshll.u32 %s6722_s25, 4  ;;  %s6723_s24 = smov [#allocation11]   ;;  %s449_s30 = int_to_ptr.vmem [resolvable:$true] %s448_s30 }
  0x3b   : > { %s461_s3 = sshll.u32 %s6723_s24, 4  ;;  %s6570_s21 = scalar_lea.vmem %s449_s30, 1024  ;;  %s462_s3 = int_to_ptr.vmem [resolvable:$true] %s461_s3 }
  0x3c   : > { %p6571_p11 = scmp.ne.s32.totalorder %s449_s30, %s6570_s21  ;;  %p6578_p0 = scmp.lt.s32.totalorder %s449_s30, %s449_s30 }
  0x3d   : > { %p6579_p2 = scmp.lt.s32.totalorder %s6570_s21, %s6570_s21 }
  0x3e   : > { %p6573_p12 = pnand %p6571_p11, %p6856_p7 }
  0x3f   : > { %6118 = dma.hbm_to_vmem [thread:$0]  (!%p6846_p6), %s8180_s4, 1024, %s6852_s28, [#allocation6], %s8161_s16, %s8161_s16, %s8162_s20  }
  0x40   : > { %p6574_p13 = pneg %p6573_p12  ;;  %p6580_p5 = por %p6579_p2, %p6578_p0 }
  0x42   : > { %p6581_p8 = pnand %p6580_p5, %p6574_p13 }
  0x44   : > { %6584 = shalt.err (!%p6581_p8)
}
  0x45   : > { %s8181_s8 = sld [smem:[#allocation24_spill]]  ;;  %s6596_s27 = scalar_lea.vmem %s462_s3, 1024 }
  0x46   : > { %p6597_p9 = scmp.ne.s32.totalorder %s462_s3, %s6596_s27  ;;  %p6604_p12 = scmp.lt.s32.totalorder %s462_s3, %s462_s3 }
  0x47   : > { %p6605_p0 = scmp.lt.s32.totalorder %s6596_s27, %s6596_s27 }
  0x48   : > { %p6599_p10 = pnand %p6597_p9, %p6856_p7 }
  0x49   : > { %p6606_p13 = por %p6605_p0, %p6604_p12 }
  0x4a   : > { %p6600_p11 = pneg %p6599_p10 }
  0x4b   : > { %6124 = dma.hbm_to_vmem [thread:$0]  (!%p6846_p6), %s8181_s8, 1024, %s449_s30, [#allocation9], %s8161_s16, %s8161_s16, %s8162_s20  }
  0x4c   : > { %p6607_p2 = pnand %p6606_p13, %p6600_p11 }
  0x4e   : > { %6610 = shalt.err (!%p6607_p2)
}
  0x4f   : > { %s8182_s9 = sld [smem:[#allocation25_spill]]  ;;  %s5003_s26 = sadd.s32 4294967294, %s6715_s19  }
  0x50   : > { %s6922_s29 = sadd.s32 1, %s6715_s19   ;;  %s41_s30 = sadd.s32 1, %s6711_s18 }
  0x51   : > { %s38_s21 = ssub.s32 %s6715_s19, %s6922_s29  ;;  %p48_p7 = scmp.ne.s32.totalorder %s6711_s18, %s6707_s1 }
  0x52   : > { %p39_p5 = scmp.eq.s32.totalorder %s38_s21, 0  ;;  %p49_p8 = scmp.eq.s32.totalorder %s6715_s19, 0 }
  0x53   : > { %p54_p9 = scmp.ne.s32.totalorder %s6707_s1, %s6703_s17  ;;  %p372_p10 = scmp.eq.s32.totalorder %s6832_s22, 1 }
  0x54   : > { %s6934_s28 = scalar_select %p39_p5, %s6711_s18, %s41_s30  }
  0x55   : > { %6127 = dma.hbm_to_vmem [thread:$0]  (!%p6846_p6), %s8182_s9, 1024, %s462_s3, [#allocation12], %s8161_s16, %s8161_s16, %s8162_s20  }
  0x56   : > { %8183 = sst [smem:[#allocation20_spill]] %s6934_s28  ;;  %p50_p11 = por %p49_p8, %p48_p7 }
  0x57   : > { %p6938_p12 = por %p8163_p1, %p54_p9  ;;  %p6942_p6 = por %p372_p10, %p48_p7 }
  0x58   : > { %p378_p0 = scmp.eq.s32.totalorder %s5003_s26, 1  ;;  %p6141_p13 = scmp.lt.s32.totalorder %s6715_s19, 2 }
  0x59   : > { %s8184_s15 = scalar_select %p6938_p12, 1, 0 }
  0x5a   : > { %s8185_s3 = scalar_select %p6942_p6, 1, 0 }
  0x5b   : > { %s490_s27 = sand.u32 1, %s6711_s18   ;;  %p6948_p2 = por %p378_p0, %p54_p9 }
  0x5c   : > { %s5011_s24 = sshll.u32 %s490_s27, 6  ;;  %s5309_s30 = sshll.u32 %s6715_s19, 10 }
  0x5d   : > { %s8186_s25 = scalar_select %p6948_p2, 1, 0 }
  0x5e   : > { %s6956_s20 = scalar_lea.hbm %s8144_s0, %s5309_s30  ;;  %s494_s4 = scalar_lea.vmem [#allocation2], %s5011_s24 }
  0x5f   : > { %s502_s6 = sshll.u32 %s494_s4, 4  ;;  %p6958_p7 = pnand %p6141_p13, %p50_p11  ;;  %s6962_s6 = int_to_ptr.vmem [resolvable:$true] %s502_s6 }
  0x60   : > { %s6964_s8 = scalar_lea.sflag [#allocation3], %s490_s27  ;;  %s6611_s9 = scalar_lea.hbm %s6956_s20, 1024 }
  0x61   : > { %p6612_p5 = scmp.ne.s32.totalorder %s6956_s20, %s6611_s9  ;;  %p6613_p8 = pneg %p6958_p7 }
  0x62   : > { %s6616_s24 = scalar_lea.hbm %s8144_s0, 2048  ;;  %p6617_p11 = scmp.lt.s32.totalorder %s6956_s20, %s8144_s0 }
  0x63   : > { %p6614_p9 = pnand %p6613_p8, %p6612_p5  ;;  %p6618_p0 = scmp.lt.s32.totalorder %s6616_s24, %s6611_s9 }
  0x65   : > { %p6615_p10 = pneg %p6614_p9  ;;  %p6619_p13 = por %p6618_p0, %p6617_p11 }
  0x67   : > { %p6620_p4 = pnand %p6619_p13, %p6615_p10 }
  0x69   : > { %6623 = shalt.err (!%p6620_p4)
}
  0x6a   : > { %s6624_s27 = scalar_lea.vmem %s6962_s6, 1024  ;;  %s6724_s28 = smov [#allocation2]  }
  0x6b   : > { %p6625_p1 = scmp.ne.s32.totalorder %s6962_s6, %s6624_s27  ;;  %s6629_s18 = sshll.u32 %s6724_s28, 4  ;;  %s6630_s18 = int_to_ptr.vmem [resolvable:$false] %s6629_s18 }
  0x6c   : > { %s6631_s16 = scalar_lea.vmem %s6630_s18, 2048  ;;  %p6632_p9 = scmp.lt.s32.totalorder %s6962_s6, %s6630_s18 }
  0x6d   : > { %p6627_p2 = pnand %p6625_p1, %p6613_p8  ;;  %p6633_p6 = scmp.lt.s32.totalorder %s6631_s16, %s6624_s27 }
  0x6f   : > { %p6628_p5 = pneg %p6627_p2  ;;  %p6634_p12 = por %p6633_p6, %p6632_p9 }
  0x71   : > { %p6635_p3 = pnand %p6634_p12, %p6628_p5 }
  0x73   : > { %6638 = shalt.err (!%p6635_p3)
}
  0x74   : > { %s8188_s9 = smov 4   ;;  %s8189_s30 = smov 64  }
  0x75   : > { %6131 = dma.hbm_to_vmem [thread:$0]  (!%p6958_p7), %s6956_s20, 1024, %s6962_s6, %s6964_s8, %s8189_s30, %s8189_s30, %s8188_s9  }
  0x76   : > { %p8190_p1 = scmp.ne.s32.totalorder %s8175_s23, 0 }
  0x77   : > { %s6991_s28 = sand.u32 (!%p8190_p1), 1, %s6707_s1   ;;  %p8191_p3 = scmp.ne.s32.totalorder (!%p8190_p1), %s8184_s15, 0 }
  0x78   : > { %514 = sbr.rel (%p8190_p1) target bundleno = 3576 (0xdf8), region = 80  ;;  %s5016_s18 = sshll.u32 (!%p8190_p1), %s6991_s28, 6 }
  0x79   : > { %s517_s24 = scalar_lea.sflag (!%p8190_p1), [#allocation3], %s6991_s28  ;;  %s6995_s4 = scalar_lea.vmem (!%p8190_p1), [#allocation2], %s5016_s18 }
  0x7d   : > { %6682 = dma.done.wait (%p8191_p3), %s517_s24, 1024  }
  0x7e   : > { %6684 = vsyncadd (%p8191_p3), %s517_s24, 4294966272  ;;  %p8192_p4 = scmp.eq.s32.totalorder %s6832_s22, 0 }
  0x80   : > { %6686 = dma.done.wait (%p8192_p4), [#allocation6], 2048   ;;  %p8193_p12 = pmov %p8192_p4 }
  0x81   : > { %p8194_p6 = pmov %p8192_p4 }
  0x82   : > { %6688 = vsyncadd (%p8193_p12), [#allocation6], 4294965248 }
  0x83   : > { %6690 = dma.done.wait (%p8194_p6), [#allocation9], 2048   ;;  %p8195_p2 = pmov %p8192_p4 }
  0x85   : > { %6692 = vsyncadd (%p8195_p2), [#allocation9], 4294965248  ;;  %p8196_p7 = pmov %p8195_p2 }
  0x86   : > { %p8197_p8 = pmov %p8195_p2 }
  0x87   : > { %6694 = dma.done.wait (%p8196_p7), [#allocation12], 1024  }
  0x88   : > { %6696 = vsyncadd (%p8197_p8), [#allocation12], 4294966272  ;;  %v6725_v0 = vmov 0.0   ;;  %vm6726_vm0 = vmmov 0   ;;  %v6192_v1 = vld [vmem:[#allocation7 + $0x8] sm:$0xff]   ;;  %v6194_v3 = vld [vmem:[#allocation7] sm:$0xff]  }
  0x89   : > { %5552 = vmatprep.subr.bf16.mxu0 %v6725_v0  ;;  %5584 = vmatprep.subr.bf16.mxu1 %v6725_v0  ;;  %v6193_v2 = vld [vmem:[#allocation5 + $0x8] sm:$0xff]   ;;  %v6195_v4 = vld [vmem:[#allocation5] sm:$0xff]   ;;  %vm662_vm1 = vcmask 261120   ;;  %v594_v11 = vld [vmem:[%s6995_s4 + $0x10] sm:$0xf]  ;;  %s6727_s23 = smov 96  }
  0x8a   : > { %5556 = vmatprep.mubr.msk.bf16.mxu0 %vm6726_vm0, %v6725_v0  ;;  %5588 = vmatprep.mubr.msk.bf16.mxu1 %vm6726_vm0, %v6725_v0  ;;  %v591_v5 = vld [vmem:[%s6995_s4 + $0x4] sm:$0xf]  ;;  %v592_v6 = vld [vmem:[%s6995_s4 + $0x8] sm:$0xf]  ;;  %v590_v7 = vld [vmem:[%s6995_s4] sm:$0xf] }
  0x8b   : > { %5553 = vmatpush3.bf16.msra.mxu0 %v6192_v1  ;;  %5585 = vmatpush3.bf16.msra.mxu1 %v6193_v2  ;;  %v5023_v8 = vcombine.low %v591_v5, %v592_v6  ;;  %v5039_v9 = vcombine.low %v590_v7, %v591_v5  ;;  %v593_v10 = vld [vmem:[%s6995_s4 + $0xc] sm:$0xf]  ;;  %v595_v14 = vld [vmem:[%s6995_s4 + $0x14] sm:$0xf]  ;;  %v596_v15 = vld [vmem:[%s6995_s4 + $0x18] sm:$0xf] }
  0x8c   : > { %5554 = vmatprep.subr.bf16.mxu0 %v6725_v0  ;;  %5586 = vmatprep.subr.bf16.mxu1 %v6725_v0  ;;  %v5024_v12 = vcombine.low %v593_v10, %v594_v11  ;;  %v5040_v13 = vcombine.low %v592_v6, %v593_v10  ;;  %v5025_v16 = vcombine.low %v595_v14, %v596_v15  ;;  %v597_v18 = vld [vmem:[%s6995_s4 + $0x1c] sm:$0xf]  ;;  %v599_v19 = vld [vmem:[%s6995_s4 + $0x24] sm:$0xf]  ;;  %v598_v20 = vld [vmem:[%s6995_s4 + $0x20] sm:$0xf] }
  0x8d   : > { %v5041_v17 = vcombine.low %v594_v11, %v595_v14  ;;  %v5026_v21 = vcombine.low %v597_v18, %v599_v19  ;;  %v5042_v22 = vcombine.low %v596_v15, %v598_v20  ;;  %v600_v23 = vld [vmem:[%s6995_s4 + $0x28] sm:$0xf]  ;;  %v601_v24 = vld [vmem:[%s6995_s4 + $0x2c] sm:$0xf]  ;;  %v602_v27 = vld [vmem:[%s6995_s4 + $0x30] sm:$0xf] }
  0x8e   : > { %v5027_v25 = vcombine.low %v600_v23, %v601_v24  ;;  %v5043_v26 = vcombine.low %v599_v19, %v600_v23  ;;  %v603_v28 = vld [vmem:[%s6995_s4 + $0x34] sm:$0xf]  ;;  %v5044_v30 = vcombine.low %v601_v24, %v602_v27  ;;  %v604_v31 = vld [vmem:[%s6995_s4 + $0x38] sm:$0xf]  ;;  %v605_v32 = vld [vmem:[%s6995_s4 + $0x3c] sm:$0xf] }
  0x8f   : > { %5555 = vmatpush3.bf16.msra.mxu0 %v6194_v3  ;;  %5587 = vmatpush3.bf16.msra.mxu1 %v6195_v4  ;;  %v5028_v29 = vcombine.low %v602_v27, %v603_v28  ;;  %v5029_v33 = vcombine.low %v604_v31, %v605_v32  ;;  %v5045_v34 = vcombine.low %v603_v28, %v604_v31  ;;  %v7097_v55 = vld [vmem:[%s8149_s5] ss:$0 sm:$0xff]  ;;  %vm1221_vm2 = vcmask 1043456   ;;  %s5022_s15 = sshll.u32 %s6991_s28, 5  ;;  %s5363_s9 = sshll.u32 %s6832_s22, 9 }
  0x90   : > { %5624 = vmatprep.subr.bf16.mxu1 %v6725_v0  ;;  %vm1217_vm3 = vcmask 64512   ;;  %vm4706_vm4 = vcmask 523264   ;;  %vm4862_vm5 = vcmask 97280   ;;  %s586_s27 = scalar_lea.vmem [#allocation13], %s5022_s15  ;;  %s4868_s22 = scalar_lea.sflag [#allocation4], %s6991_s28 }
  0x91   : > { %s4882_s16 = sshll.u32 %s586_s27, 4  ;;  %p8199_p11 = scmp.ne.s32.totalorder %s8185_s3, 0  ;;  %s8093_s16 = int_to_ptr.vmem [resolvable:$true] %s4882_s16 }
  0x92   : > { %5557 = vmatmul.mubr.msk.bf16.vlgmr.msra.gmra.mxu0 %vm662_vm1, %v5023_v8  ;;  %5589 = vmatmul.mubr.msk.bf16.vlgmr.msra.gmra.mxu1 %vm662_vm1, %v5039_v9  ;;  %s6728_s6 = smov [#allocation13]  }
  0x93   : > { %5560 = vmatprep.mubr.msk.bf16.mxu0 %vm6726_vm0, %v6725_v0  ;;  %5592 = vmatprep.mubr.msk.bf16.mxu1 %vm6726_vm0, %v6725_v0  ;;  %s6643_s8 = sshll.u32 %s6728_s6, 4  ;;  %s6644_s8 = int_to_ptr.vmem [resolvable:$false] %s6643_s8 }
  0x94   : > { %s6645_s20 = scalar_lea.vmem %s6644_s8, 1024  ;;  %p6646_p5 = scmp.lt.s32.totalorder %s8093_s16, %s6644_s8 }
  0x9a   : > { %5561 = vmatmul.mubr.msk.bf16.gmra.mxu0 %vm662_vm1, %v5024_v12  ;;  %5593 = vmatmul.mubr.msk.bf16.gmra.mxu1 %vm662_vm1, %v5040_v13 }
  0x9b   : > { %5564 = vmatprep.mubr.msk.bf16.mxu0 %vm6726_vm0, %v6725_v0  ;;  %5596 = vmatprep.mubr.msk.bf16.mxu1 %vm6726_vm0, %v6725_v0 }
  0xa2   : > { %5565 = vmatmul.mubr.msk.bf16.gmra.mxu0 %vm662_vm1, %v5025_v16  ;;  %5597 = vmatmul.mubr.msk.bf16.gmra.mxu1 %vm662_vm1, %v5041_v17 }
  0xa3   : > { %5568 = vmatprep.mubr.msk.bf16.mxu0 %vm6726_vm0, %v6725_v0  ;;  %5600 = vmatprep.mubr.msk.bf16.mxu1 %vm6726_vm0, %v6725_v0 }
  0xaa   : > { %5569 = vmatmul.mubr.msk.bf16.gmra.mxu0 %vm662_vm1, %v5026_v21  ;;  %5601 = vmatmul.mubr.msk.bf16.gmra.mxu1 %vm662_vm1, %v5042_v22 }
  0xab   : > { %5572 = vmatprep.mubr.msk.bf16.mxu0 %vm6726_vm0, %v6725_v0  ;;  %5604 = vmatprep.mubr.msk.bf16.mxu1 %vm6726_vm0, %v6725_v0 }
  0xb2   : > { %5573 = vmatmul.mubr.msk.bf16.gmra.mxu0 %vm662_vm1, %v5027_v25  ;;  %5605 = vmatmul.mubr.msk.bf16.gmra.mxu1 %vm662_vm1, %v5043_v26 }
  0xb3   : > { %5576 = vmatprep.mubr.msk.bf16.mxu0 %vm6726_vm0, %v6725_v0  ;;  %5608 = vmatprep.mubr.msk.bf16.mxu1 %vm6726_vm0, %v6725_v0 }
  0xba   : > { %5577 = vmatmul.mubr.msk.bf16.gmra.mxu0 %vm662_vm1, %v5028_v29  ;;  %5609 = vmatmul.mubr.msk.bf16.gmra.mxu1 %vm662_vm1, %v5044_v30 }
  0xbb   : > { %5580 = vmatprep.mubr.msk.bf16.mxu0 %vm6726_vm0, %v6725_v0  ;;  %5612 = vmatprep.mubr.msk.bf16.mxu1 %vm6726_vm0, %v6725_v0 }
  0xc2   : > { %5581 = vmatmul.mubr.msk.bf16.gmra.mxu0 %vm662_vm1, %v5029_v33  ;;  %5613 = vmatmul.mubr.msk.bf16.gmra.mxu1 %vm662_vm1, %v5045_v34 }
  0xc3   : > { %5626 = vmatprep.mubr.msk.bf16.mxu1 %vm6726_vm0, %v6725_v0 }
 0x152   : > { %v7078_v35 = vpop.f32.mrf.mxu0  ;;  %v7080_v36 = vpop.f32.mrf.mxu1 }
 0x153   : > { %v852_v31 = vadd.f32 %v7080_v36, %v7078_v35 }
 0x154   : > { %v5558_v37 = vpop.f32.mrf.mxu0  ;;  %v5590_v38 = vpop.f32.mrf.mxu1 }
 0x156   : > { %v7082_v39 = vpop.f32.mrf.mxu0  ;;  %v7084_v40 = vpop.f32.mrf.mxu1 }
 0x158   : > { %v5559_v41 = vpop.f32.mrf.mxu0  ;;  %v5591_v42 = vpop.f32.mrf.mxu1 }
 0x159   : > { %v7118_v42 = vadd.f32 %v7097_v55, %v852_v31 }
 0x15a   : > { %v7086_v43 = vpop.f32.mrf.mxu0  ;;  %v7088_v44 = vpop.f32.mrf.mxu1 }
 0x15c   : > { %v5562_v45 = vpop.f32.mrf.mxu0  ;;  %v5594_v46 = vpop.f32.mrf.mxu1 }
 0x15d   : > { %v855_v45 = vadd.f32 %v7084_v40, %v7082_v39 }
 0x15e   : > { %v7090_v47 = vpop.f32.mrf.mxu0  ;;  %v7092_v48 = vpop.f32.mrf.mxu1 }
 0x15f   : > { %v863_v40 = vadd.f32 %v7092_v48, %v7090_v47 }
 0x160   : > { %v5563_v49 = vpop.f32.mrf.mxu0  ;;  %v5595_v50 = vpop.f32.mrf.mxu1 }
 0x161   : > { %v860_v50 = vadd.f32 %v7088_v44, %v7086_v43  ;;  %v7141_v48 = vadd.f32 %v7097_v55, %v863_v40 }
 0x162   : > { %v734_v51 = vpop.f32.mrf.mxu0  ;;  %v867_v52 = vpop.f32.mrf.mxu1 }
 0x163   : > { %v868_v53 = vadd.f32 %v867_v52, %v734_v51  ;;  %v7129_v39 = vadd.f32 %v7097_v55, %v860_v50 }
 0x164   : > { %v5566_v54 = vpop.f32.mrf.mxu0  ;;  %v5598_v56 = vpop.f32.mrf.mxu1 }
 0x165   : > { %v7100_v57 = vadd.f32 %v7097_v55, %v868_v53  ;;  %v5056_v54 = vmul.f32 -1.442695, %v7118_v42  ;;  %v7126_v56 = vadd.f32 %v7097_v55, %v855_v45  ;;  %v5058_v47 = vmul.f32 -1.442695, %v7129_v39 }
 0x166   : > { %v737_v58 = vpop.f32.mrf.mxu0  ;;  %v870_v59 = vpop.f32.mrf.mxu1 }
 0x167   : > { %v5060_v60 = vmul.f32 -1.442695, %v7100_v57  ;;  %v871_v61 = vadd.f32 %v870_v59, %v737_v58 }
 0x168   : > { %v5567_v62 = vpop.f32.mrf.mxu0  ;;  %v5599_v63 = vpop.f32.mrf.mxu1 }
 0x169   : > { %v7104_v1 = vadd.f32 %v7097_v55, %v871_v61  ;;  %6250 = vpow2.f32 %v5060_v60 }
 0x16a   : > { %v742_v2 = vpop.f32.mrf.mxu0  ;;  %v875_v3 = vpop.f32.mrf.mxu1 }
 0x16b   : > { %v5061_v4 = vmul.f32 -1.442695, %v7104_v1  ;;  %v876_v5 = vadd.f32 %v875_v3, %v742_v2 }
 0x16c   : > { %v5570_v6 = vpop.f32.mrf.mxu0  ;;  %v5602_v7 = vpop.f32.mrf.mxu1 }
 0x16d   : > { %v7108_v8 = vadd.f32 %v7097_v55, %v876_v5  ;;  %6252 = vpow2.f32 %v5061_v4  ;;  %v5057_v4 = vmul.f32 -1.442695, %v7126_v56 }
 0x16e   : > { %v745_v9 = vpop.f32.mrf.mxu0  ;;  %v878_v10 = vpop.f32.mrf.mxu1 }
 0x16f   : > { %v5062_v11 = vmul.f32 -1.442695, %v7108_v8  ;;  %v879_v12 = vadd.f32 %v878_v10, %v745_v9 }
 0x170   : > { %v5571_v13 = vpop.f32.mrf.mxu0  ;;  %v5603_v14 = vpop.f32.mrf.mxu1 }
 0x171   : > { %v7112_v15 = vadd.f32 %v7097_v55, %v879_v12  ;;  %6254 = vpow2.f32 %v5062_v11  ;;  %v5059_v13 = vmul.f32 -1.442695, %v7141_v48 }
 0x172   : > { %v750_v16 = vpop.f32.mrf.mxu0  ;;  %v883_v17 = vpop.f32.mrf.mxu1 }
 0x173   : > { %v5063_v18 = vmul.f32 -1.442695, %v7112_v15  ;;  %v884_v60 = vadd.f32 %v883_v17, %v750_v16 }
 0x174   : > { %v5574_v19 = vpop.f32.mrf.mxu0  ;;  %v5606_v20 = vpop.f32.mrf.mxu1 }
 0x175   : > { %6256 = vpow2.f32 %v5063_v18  ;;  %v7147_v9 = vadd.f32 %v7097_v55, %v884_v60 }
 0x176   : > { %v753_v21 = vpop.f32.mrf.mxu0  ;;  %v886_v22 = vpop.f32.mrf.mxu1 }
 0x177   : > { %v6251_v23 = vpop.eup %6250  ;;  %v887_v6 = vadd.f32 %v886_v22, %v753_v21  ;;  %v5064_v17 = vmul.f32 -1.442695, %v7147_v9 }
 0x178   : > { %v5575_v24 = vpop.f32.mrf.mxu0  ;;  %v987_v25 = vadd.f32 1.0, %v6251_v23  ;;  %v5607_v26 = vpop.f32.mrf.mxu1 }
 0x179   : > { %v7153_v14 = vadd.f32 %v7097_v55, %v887_v6 }
 0x17a   : > { %v758_v27 = vpop.f32.mrf.mxu0  ;;  %6258 = vrcp.f32 %v987_v25  ;;  %v891_v28 = vpop.f32.mrf.mxu1 }
 0x17b   : > { %v6253_v29 = vpop.eup %6252  ;;  %v892_v10 = vadd.f32 %v891_v28, %v758_v27  ;;  %v5065_v20 = vmul.f32 -1.442695, %v7153_v14 }
 0x17c   : > { %v5578_v30 = vpop.f32.mrf.mxu0  ;;  %v988_v32 = vadd.f32 1.0, %v6253_v29  ;;  %v5610_v33 = vpop.f32.mrf.mxu1 }
 0x17d   : > { %v7157_v18 = vadd.f32 %v7097_v55, %v892_v10  ;;  %v6210_v30 = vld [vmem:[#allocation8 + $0x8] sm:$0xff]  }
 0x17e   : > { %v761_v34 = vpop.f32.mrf.mxu0  ;;  %6260 = vrcp.f32 %v988_v32  ;;  %v894_v37 = vpop.f32.mrf.mxu1  ;;  %5616 = vmatprep.subr.bf16.mxu0 %v6210_v30 }
 0x17f   : > { %v6255_v38 = vpop.eup %6254  ;;  %v895_v16 = vadd.f32 %v894_v37, %v761_v34  ;;  %v5066_v22 = vmul.f32 -1.442695, %v7157_v18  ;;  %5617 = vmatpush3.bf16.msra.mxu0 %v6210_v30  ;;  %v6211_v34 = vld [vmem:[#allocation8] sm:$0xff]  }
 0x180   : > { %v5579_v41 = vpop.f32.mrf.mxu0  ;;  %v989_v46 = vadd.f32 1.0, %v6255_v38  ;;  %v5611_v49 = vpop.f32.mrf.mxu1  ;;  %5618 = vmatprep.subr.bf16.mxu0 %v6211_v34 }
 0x181   : > { %v7162_v21 = vadd.f32 %v7097_v55, %v895_v16 }
 0x182   : > { %v766_v51 = vpop.f32.mrf.mxu0  ;;  %6262 = vrcp.f32 %v989_v46  ;;  %v899_v35 = vpop.f32.mrf.mxu1 }
 0x183   : > { %v6257_v36 = vpop.eup %6256  ;;  %v900_v52 = vadd.f32 %v899_v35, %v766_v51  ;;  %v5067_v25 = vmul.f32 -1.442695, %v7162_v21  ;;  %5619 = vmatpush3.bf16.msra.mxu0 %v6211_v34 }
 0x184   : > { %v5582_v53 = vpop.f32.mrf.mxu0  ;;  %v990_v58 = vadd.f32 1.0, %v6257_v36  ;;  %v5614_v59 = vpop.f32.mrf.mxu1  ;;  %5630 = vmatprep.subr.bf16.mxu0 %v6725_v0 }
 0x185   : > { %v7134_v43 = vadd.f32 %v7097_v55, %v900_v52 }
 0x186   : > { %v769_v44 = vpop.f32.mrf.mxu0  ;;  %6264 = vrcp.f32 %v990_v58  ;;  %v902_v61 = vpop.f32.mrf.mxu1 }
 0x187   : > { %v6259_v62 = vpop.eup %6258  ;;  %v5068_v63 = vmul.f32 -1.442695, %v7134_v43  ;;  %v903_v2 = vadd.f32 %v902_v61, %v769_v44  ;;  %6266 = vpow2.f32 %v5056_v54 }
 0x188   : > { %v5583_v3 = vpop.f32.mrf.mxu0  ;;  %1047 = vrot.lane.b32.xlu0 %v6259_v62, %s6727_s23  ;;  %v5615_v5 = vpop.f32.mrf.mxu1 }
 0x189   : > { %v7144_v7 = vadd.f32 %v7097_v55, %v903_v2  ;;  %6268 = vpow2.f32 %v5068_v63 }
 0x18a   : > { %6270 = vpow2.f32 %v5057_v4 }
 0x18b   : > { %v6261_v11 = vpop.eup %6260  ;;  %v5069_v12 = vmul.f32 -1.442695, %v7144_v7  ;;  %6272 = vpow2.f32 %v5058_v47 }
 0x18c   : > { %1049 = vrot.lane.b32.xlu0 %v6261_v11, %s6727_s23 }
 0x18d   : > { %6274 = vpow2.f32 %v5069_v12 }
 0x18e   : > { %6276 = vpow2.f32 %v5059_v13 }
 0x18f   : > { %v6263_v19 = vpop.eup %6262  ;;  %6278 = vpow2.f32 %v5064_v17 }
 0x190   : > { %1051 = vrot.lane.b32.xlu1 %v6263_v19, %s6727_s23  ;;  %6280 = vpow2.f32 %v5065_v20 }
 0x191   : > { %6282 = vpow2.f32 %v5066_v22 }
 0x192   : > { %6284 = vpow2.f32 %v5067_v25 }
 0x193   : > { %v6265_v23 = vpop.eup %6264 }
 0x194   : > { %1053 = vrot.lane.b32.xlu1 %v6265_v23, %s6727_s23  ;;  %v6267_v24 = vpop.eup %6266 }
 0x195   : > { %v983_v29 = vadd.f32 1.0, %v6267_v24 }
 0x196   : > { %v6269_v26 = vpop.eup %6268 }
 0x197   : > { %v995_v27 = vadd.f32 1.0, %v6269_v26  ;;  %v6271_v28 = vpop.eup %6270 }
 0x198   : > { %v6273_v31 = vpop.eup %6272  ;;  %v984_v33 = vadd.f32 1.0, %v6271_v28 }
 0x199   : > { %6286 = vrcp.f32 %v995_v27  ;;  %v985_v38 = vadd.f32 1.0, %v6273_v31 }
 0x19a   : > { %v6275_v55 = vpop.eup %6274  ;;  %6288 = vrcp.f32 %v983_v29 }
 0x19b   : > { %v996_v32 = vadd.f32 1.0, %v6275_v55  ;;  %v6277_v37 = vpop.eup %6276 }
 0x19c   : > { %v6279_v41 = vpop.eup %6278  ;;  %v986_v45 = vadd.f32 1.0, %v6277_v37 }
 0x19d   : > { %6290 = vrcp.f32 %v996_v32  ;;  %v6281_v46 = vpop.eup %6280  ;;  %v991_v49 = vadd.f32 1.0, %v6279_v41 }
 0x19e   : > { %6292 = vrcp.f32 %v984_v33  ;;  %v6283_v50 = vpop.eup %6282  ;;  %v992_v51 = vadd.f32 1.0, %v6281_v46 }
 0x19f   : > { %6294 = vrcp.f32 %v985_v38  ;;  %v6285_v35 = vpop.eup %6284  ;;  %v993_v36 = vadd.f32 1.0, %v6283_v50 }
 0x1a0   : > { %6296 = vrcp.f32 %v986_v45  ;;  %v994_v54 = vadd.f32 1.0, %v6285_v35 }
 0x1a1   : > { %6298 = vrcp.f32 %v991_v49 }
 0x1a2   : > { %6300 = vrcp.f32 %v992_v51 }
 0x1a3   : > { %6302 = vrcp.f32 %v993_v36 }
 0x1a4   : > { %6304 = vrcp.f32 %v994_v54 }
 0x1a5   : > { %6306 = vtanh.f32 %v7100_v57 }
 0x1a6   : > { %v6287_v52 = vpop.eup %6286  ;;  %6308 = vtanh.f32 %v7104_v1 }
 0x1a7   : > { %1063 = vrot.lane.b32.xlu0 %v6287_v52, %s6727_s23  ;;  %v6289_v53 = vpop.eup %6288  ;;  %6310 = vtanh.f32 %v7108_v8 }
 0x1a8   : > { %6312 = vtanh.f32 %v7112_v15 }
 0x1a9   : > { %6314 = vtanh.f32 %v7118_v42 }
 0x1aa   : > { %v6291_v58 = vpop.eup %6290  ;;  %6316 = vtanh.f32 %v7134_v43 }
 0x1ab   : > { %1039 = vrot.lane.b32.xlu0 %v6289_v53, %s6727_s23  ;;  %1065 = vrot.lane.b32.xlu1 %v6291_v58, %s6727_s23  ;;  %v6293_v59 = vpop.eup %6292  ;;  %6318 = vtanh.f32 %v7144_v7 }
 0x1ac   : > { %v6295_v40 = vpop.eup %6294  ;;  %6320 = vtanh.f32 %v7126_v56 }
 0x1ad   : > { %v6297_v44 = vpop.eup %6296  ;;  %6322 = vtanh.f32 %v7129_v39 }
 0x1ae   : > { %v6299_v60 = vpop.eup %6298  ;;  %6324 = vtanh.f32 %v7141_v48 }
 0x1af   : > { %1043 = vrot.lane.b32.xlu0 %v6295_v40, %s6727_s23  ;;  %1041 = vrot.lane.b32.xlu1 %v6293_v59, %s6727_s23  ;;  %v6301_v61 = vpop.eup %6300  ;;  %6326 = vtanh.f32 %v7147_v9 }
 0x1b0   : > { %v6303_v62 = vpop.eup %6302  ;;  %6328 = vtanh.f32 %v7153_v14 }
 0x1b1   : > { %v6305_v63 = vpop.eup %6304  ;;  %6330 = vtanh.f32 %v7157_v18 }
 0x1b2   : > { %v6307_v3 = vpop.eup %6306  ;;  %6332 = vtanh.f32 %v7162_v21  ;;  %v7233_v21 = vld [vmem:[%s8146_s2] sm:$0xf] }
 0x1b3   : > { %1055 = vrot.lane.b32.xlu0 %v6299_v60, %s6727_s23  ;;  %1045 = vrot.lane.b32.xlu1 %v6297_v44, %s6727_s23  ;;  %v6309_v4 = vpop.eup %6308 }
 0x1b4   : > { %v6311_v57 = vpop.eup %6310 }
 0x1b5   : > { %v6313_v12 = vpop.eup %6312 }
 0x1b6   : > { %v6315_v22 = vpop.eup %6314 }
 0x1b7   : > { %1059 = vrot.lane.b32.xlu0 %v6303_v62, %s6727_s23  ;;  %1057 = vrot.lane.b32.xlu1 %v6301_v61, %s6727_s23  ;;  %v6317_v23 = vpop.eup %6316 }
 0x1b8   : > { %v6319_v42 = vpop.eup %6318 }
 0x1b9   : > { %v6321_v56 = vpop.eup %6320 }
 0x1ba   : > { %v6323_v9 = vpop.eup %6322 }
 0x1bb   : > { %1061 = vrot.lane.b32.xlu1 %v6305_v63, %s6727_s23  ;;  %v6325_v32 = vpop.eup %6324 }
 0x1bc   : > { %v6327_v45 = vpop.eup %6326 }
 0x1bd   : > { %v6329_v50 = vpop.eup %6328 }
 0x1be   : > { %v6331_v58 = vpop.eup %6330 }
 0x1bf   : > { %v6333_v40 = vpop.eup %6332 }
 0x1fa   : > { %v1048_v2 = vpop.permute.xlu0 %1047 }
 0x1fb   : > { %v7182_v47 = vmul.f32 %v6307_v3, %v1048_v2 }
 0x1fd   : > { %v5314_v35 = vpack.c.bf16 %v7182_v47, %v7182_v47 }
 0x1fe   : > { %v1050_v5 = vpop.permute.xlu0 %1049 }
 0x1ff   : > { %v7184_v6 = vmul.f32 %v6309_v4, %v1050_v5  ;;  %v1395_v63 = vsel %vm1221_vm2, %v5314_v35, 0 }
 0x201   : > { %v7188_v10 = vpack.c.bf16 %v7184_v6, %v7182_v47  ;;  %v5315_v60 = vpack.c.bf16 %v7184_v6, %v7184_v6 }
 0x202   : > { %v1052_v11 = vpop.permute.xlu1 %1051 }
 0x203   : > { %v7190_v13 = vmul.f32 %v6311_v57, %v1052_v11  ;;  %v1105_v16 = vunpack.c.h.b16 %v7188_v10  ;;  %v1438_v4 = vsel %vm1221_vm2, %v5315_v60, 0 }
 0x205   : > { %v5316_v3 = vpack.c.bf16 %v7190_v13, %v7190_v13 }
 0x206   : > { %v1054_v1 = vpop.permute.xlu1 %1053 }
 0x207   : > { %v7192_v8 = vmul.f32 %v6313_v12, %v1054_v1  ;;  %v1481_v47 = vsel %vm1221_vm2, %v5316_v3, 0 }
 0x209   : > { %v7196_v15 = vpack.c.bf16 %v7192_v8, %v7190_v13  ;;  %v5317_v5 = vpack.c.bf16 %v7192_v8, %v7192_v8 }
 0x20b   : > { %v1106_v17 = vunpack.c.l.b16 %v7196_v15  ;;  %v1524_v11 = vsel %vm1221_vm2, %v5317_v5, 0 }
 0x20d   : > { %v1120_v19 = vpack.c.b16 %v1106_v17, %v1105_v16 }
 0x20f   : > { %5620 = vmatprep.mubr.msk.bf16.mxu0 %vm662_vm1, %v1120_v19 }
 0x219   : > { %v1064_v20 = vpop.permute.xlu0 %1063 }
 0x21a   : > { %v7209_v26 = vmul.f32 %v6317_v23, %v1064_v20 }
 0x21c   : > { %v5322_v17 = vpack.c.bf16 %v7209_v26, %v7209_v26 }
 0x21d   : > { %v1040_v24 = vpop.permute.xlu0 %1039  ;;  %v1066_v25 = vpop.permute.xlu1 %1065 }
 0x21e   : > { %v7211_v43 = vmul.f32 %v6315_v22, %v1040_v24  ;;  %v7213_v7 = vmul.f32 %v6319_v42, %v1066_v25  ;;  %v1739_v22 = vsel %vm1221_vm2, %v5322_v17, 0  ;;  %v6212_v42 = vld [vmem:[#allocation10 + $0x8] sm:$0xff]   ;;  %v6213_v24 = vld [vmem:[#allocation10] sm:$0xff]  }
 0x21f   : > { %v6214_v25 = vld [vmem:[#allocation11 + $0x8] sm:$0xff]  }
 0x220   : > { %v5310_v39 = vpack.c.bf16 %v7211_v43, %v7211_v43  ;;  %v7221_v48 = vpack.c.bf16 %v7213_v7, %v7209_v26  ;;  %v5323_v20 = vpack.c.bf16 %v7213_v7, %v7213_v7  ;;  %v6215_v26 = vld [vmem:[#allocation11] sm:$0xff]  }
 0x221   : > { %v1044_v14 = vpop.permute.xlu0 %1043  ;;  %v1042_v27 = vpop.permute.xlu1 %1041 }
 0x222   : > { %v7223_v28 = vmul.f32 %v6323_v9, %v1044_v14  ;;  %v7225_v29 = vmul.f32 %v6321_v56, %v1042_v27  ;;  %5621 = vmatmul.mubr.msk.bf16.vlgmr.msra.gmra.mxu0 %vm662_vm1, %v7221_v48  ;;  %v1223_v18 = vsel %vm1221_vm2, %v5310_v39, 0  ;;  %v1782_v23 = vsel %vm1221_vm2, %v5323_v20, 0 }
 0x223   : > { %5625 = vmatpush3.bf16.msra.mxu1 %v1223_v18  ;;  %5632 = vmatprep.mubr.msk.bf16.mxu0 %vm6726_vm0, %v6725_v0 }
 0x224   : > { %v5312_v30 = vpack.c.bf16 %v7223_v28, %v7223_v28  ;;  %v1095_v31 = vpack.c.bf16 %v7225_v29, %v7211_v43  ;;  %v5311_v55 = vpack.c.bf16 %v7225_v29, %v7225_v29  ;;  %5636 = vmatprep.subr.bf16.mxu1 %v6725_v0 }
 0x225   : > { %v1056_v33 = vpop.permute.xlu0 %1055  ;;  %v1046_v34 = vpop.permute.xlu1 %1045 }
 0x226   : > { %v7244_v37 = vmul.f32 %v6325_v32, %v1046_v34  ;;  %5627 = vmatmul.mubr.msk.bf16.vlgmr.msra.gmra.mxu1 %vm1217_vm3, %v7233_v21  ;;  %v1266_v38 = vsel %vm1221_vm2, %v5311_v55, 0  ;;  %v1309_v41 = vsel %vm1221_vm2, %v5312_v30, 0  ;;  %v7260_v36 = vmul.f32 %v6327_v45, %v1056_v33 }
 0x227   : > { %5631 = vmatpush3.bf16.msra.mxu0 %v1266_v38  ;;  %5637 = vmatpush3.bf16.msra.mxu1 %v1309_v41 }
 0x228   : > { %v1096_v46 = vpack.c.bf16 %v7244_v37, %v7223_v28  ;;  %v5313_v49 = vpack.c.bf16 %v7244_v37, %v7244_v37  ;;  %5642 = vmatprep.subr.bf16.mxu0 %v6725_v0  ;;  %5638 = vmatprep.mubr.msk.bf16.mxu1 %vm6726_vm0, %v6725_v0  ;;  %v5318_v6 = vpack.c.bf16 %v7260_v36, %v7260_v36 }
 0x229   : > { %v1058_v51 = vpop.permute.xlu1 %1057  ;;  %5648 = vmatprep.subr.bf16.mxu1 %v6725_v0  ;;  %v1060_v54 = vpop.permute.xlu0 %1059 }
 0x22a   : > { %v7262_v52 = vmul.f32 %v6329_v50, %v1058_v51  ;;  %5633 = vmatmul.mubr.msk.bf16.vlgmr.msra.gmra.mxu0 %vm1217_vm3, %v7233_v21  ;;  %v1352_v53 = vsel %vm1221_vm2, %v5313_v49, 0  ;;  %v7274_v61 = vmul.f32 %v6331_v58, %v1060_v54  ;;  %v1567_v12 = vsel %vm1221_vm2, %v5318_v6, 0 }
 0x22b   : > { %5643 = vmatpush3.bf16.msra.mxu0 %v1352_v53  ;;  %5644 = vmatprep.mubr.msk.bf16.mxu0 %vm6726_vm0, %v6725_v0 }
 0x22c   : > { %v1099_v59 = vpack.c.bf16 %v7262_v52, %v7260_v36  ;;  %5654 = vmatprep.subr.bf16.mxu0 %v6725_v0  ;;  %v5319_v57 = vpack.c.bf16 %v7262_v52, %v7262_v52  ;;  %v5320_v1 = vpack.c.bf16 %v7274_v61, %v7274_v61 }
 0x22d   : > { %v1062_v44 = vpop.permute.xlu1 %1061 }
 0x22e   : > { %v7276_v62 = vmul.f32 %v6333_v40, %v1062_v44  ;;  %5639 = vmatmul.mubr.msk.bf16.vlgmr.msra.gmra.mxu1 %vm1217_vm3, %v7233_v21  ;;  %v1610_v13 = vsel %vm1221_vm2, %v5319_v57, 0  ;;  %v1653_v16 = vsel %vm1221_vm2, %v5320_v1, 0 }
 0x22f   : > { %5649 = vmatpush3.bf16.msra.mxu1 %v1395_v63  ;;  %5650 = vmatprep.mubr.msk.bf16.mxu1 %vm6726_vm0, %v6725_v0 }
 0x230   : > { %v1100_v2 = vpack.c.bf16 %v7276_v62, %v7274_v61  ;;  %5660 = vmatprep.subr.bf16.mxu1 %v6725_v0  ;;  %v5321_v8 = vpack.c.bf16 %v7276_v62, %v7276_v62 }
 0x232   : > { %5645 = vmatmul.mubr.msk.bf16.vlgmr.msra.gmra.mxu0 %vm1217_vm3, %v7233_v21  ;;  %v1696_v19 = vsel %vm1221_vm2, %v5321_v8, 0 }
 0x233   : > { %5655 = vmatpush3.bf16.msra.mxu0 %v1438_v4  ;;  %5656 = vmatprep.mubr.msk.bf16.mxu0 %vm6726_vm0, %v6725_v0 }
 0x234   : > { %5666 = vmatprep.subr.bf16.mxu0 %v6725_v0 }
 0x236   : > { %5651 = vmatmul.mubr.msk.bf16.vlgmr.msra.gmra.mxu1 %vm1217_vm3, %v7233_v21 }
 0x237   : > { %5661 = vmatpush3.bf16.msra.mxu1 %v1481_v47  ;;  %5662 = vmatprep.mubr.msk.bf16.mxu1 %vm6726_vm0, %v6725_v0 }
 0x238   : > { %5672 = vmatprep.subr.bf16.mxu1 %v6725_v0 }
 0x23a   : > { %5657 = vmatmul.mubr.msk.bf16.vlgmr.msra.gmra.mxu0 %vm1217_vm3, %v7233_v21 }
 0x23b   : > { %5667 = vmatpush3.bf16.msra.mxu0 %v1524_v11  ;;  %5668 = vmatprep.mubr.msk.bf16.mxu0 %vm6726_vm0, %v6725_v0 }
 0x23c   : > { %5678 = vmatprep.subr.bf16.mxu0 %v6725_v0 }
 0x23e   : > { %5663 = vmatmul.mubr.msk.bf16.vlgmr.msra.gmra.mxu1 %vm1217_vm3, %v7233_v21 }
 0x23f   : > { %5673 = vmatpush3.bf16.msra.mxu1 %v1567_v12  ;;  %5674 = vmatprep.mubr.msk.bf16.mxu1 %vm6726_vm0, %v6725_v0 }
 0x240   : > { %5684 = vmatprep.subr.bf16.mxu1 %v6725_v0 }
 0x242   : > { %5669 = vmatmul.mubr.msk.bf16.vlgmr.msra.gmra.mxu0 %vm1217_vm3, %v7233_v21 }
 0x243   : > { %5679 = vmatpush3.bf16.msra.mxu0 %v1610_v13  ;;  %5680 = vmatprep.mubr.msk.bf16.mxu0 %vm6726_vm0, %v6725_v0 }
 0x244   : > { %5690 = vmatprep.subr.bf16.mxu0 %v6725_v0 }
 0x246   : > { %5675 = vmatmul.mubr.msk.bf16.vlgmr.msra.gmra.mxu1 %vm1217_vm3, %v7233_v21 }
 0x247   : > { %5685 = vmatpush3.bf16.msra.mxu1 %v1653_v16  ;;  %5686 = vmatprep.mubr.msk.bf16.mxu1 %vm6726_vm0, %v6725_v0 }
 0x248   : > { %5696 = vmatprep.subr.bf16.mxu1 %v6725_v0 }
 0x24a   : > { %5681 = vmatmul.mubr.msk.bf16.vlgmr.msra.gmra.mxu0 %vm1217_vm3, %v7233_v21 }
 0x24b   : > { %5691 = vmatpush3.bf16.msra.mxu0 %v1696_v19  ;;  %5692 = vmatprep.mubr.msk.bf16.mxu0 %vm6726_vm0, %v6725_v0 }
 0x24c   : > { %5702 = vmatprep.subr.bf16.mxu0 %v6725_v0 }
 0x24e   : > { %5687 = vmatmul.mubr.msk.bf16.vlgmr.msra.gmra.mxu1 %vm1217_vm3, %v7233_v21 }
 0x24f   : > { %5697 = vmatpush3.bf16.msra.mxu1 %v1739_v22  ;;  %5698 = vmatprep.mubr.msk.bf16.mxu1 %vm6726_vm0, %v6725_v0 }
 0x250   : > { %5708 = vmatprep.subr.bf16.mxu1 %v6725_v0 }
 0x252   : > { %5693 = vmatmul.mubr.msk.bf16.vlgmr.msra.gmra.mxu0 %vm1217_vm3, %v7233_v21 }
 0x253   : > { %5703 = vmatpush3.bf16.msra.mxu0 %v1782_v23  ;;  %5704 = vmatprep.mubr.msk.bf16.mxu0 %vm6726_vm0, %v6725_v0 }
 0x254   : > { %5740 = vmatprep.subr.bf16.mxu0 %v6725_v0 }
 0x256   : > { %5699 = vmatmul.mubr.msk.bf16.vlgmr.msra.gmra.mxu1 %vm1217_vm3, %v7233_v21 }
 0x257   : > { %5712 = vmatprep.mubr.msk.bf16.mxu1 %vm6726_vm0, %v6725_v0  ;;  %5709 = vmatpush3.bf16.msra.mxu1 %v6214_v25 }
 0x258   : > { %5710 = vmatprep.subr.bf16.mxu1 %v6725_v0 }
 0x25a   : > { %5705 = vmatmul.mubr.msk.bf16.vlgmr.msra.gmra.mxu0 %vm1217_vm3, %v7233_v21 }
 0x25b   : > { %5741 = vmatpush3.bf16.msra.mxu0 %v6212_v42  ;;  %5744 = vmatprep.mubr.msk.bf16.mxu0 %vm6726_vm0, %v6725_v0 }
 0x25c   : > { %5742 = vmatprep.subr.bf16.mxu0 %v6725_v0  ;;  %5711 = vmatpush3.bf16.msra.mxu1 %v6215_v26 }
 0x25d   : > { %5772 = vmatprep.subr.bf16.mxu1 %v6725_v0 }
 0x25f   : > { %5743 = vmatpush3.bf16.msra.mxu0 %v6213_v24 }
 0x260   : > { %5796 = vmatprep.subr.bf16.mxu0 %v6725_v0 }
 0x262   : > { %5745 = vmatmul.mubr.msk.bf16.vlgmr.msra.gmra.mxu0 %vm662_vm1, %v1095_v31 }
 0x263   : > { %5748 = vmatprep.mubr.msk.bf16.mxu0 %vm6726_vm0, %v6725_v0 }
 0x26a   : > { %5749 = vmatmul.mubr.msk.bf16.gmra.mxu0 %vm662_vm1, %v1096_v46 }
 0x26b   : > { %5752 = vmatprep.mubr.msk.bf16.mxu0 %vm6726_vm0, %v6725_v0 }
 0x272   : > { %5753 = vmatmul.mubr.msk.bf16.gmra.mxu0 %vm662_vm1, %v7188_v10 }
 0x273   : > { %5756 = vmatprep.mubr.msk.bf16.mxu0 %vm6726_vm0, %v6725_v0 }
 0x27a   : > { %5757 = vmatmul.mubr.msk.bf16.gmra.mxu0 %vm662_vm1, %v7196_v15 }
 0x27b   : > { %5760 = vmatprep.mubr.msk.bf16.mxu0 %vm6726_vm0, %v6725_v0 }
 0x282   : > { %5761 = vmatmul.mubr.msk.bf16.gmra.mxu0 %vm662_vm1, %v1099_v59 }
 0x283   : > { %5764 = vmatprep.mubr.msk.bf16.mxu0 %vm6726_vm0, %v6725_v0 }
 0x28a   : > { %5765 = vmatmul.mubr.msk.bf16.gmra.mxu0 %vm662_vm1, %v1100_v2 }
 0x28b   : > { %5768 = vmatprep.mubr.msk.bf16.mxu0 %vm6726_vm0, %v6725_v0 }
 0x292   : > { %5769 = vmatmul.mubr.msk.bf16.gmra.mxu0 %vm662_vm1, %v7221_v48 }
 0x293   : > { %5800 = vmatprep.mubr.msk.bf16.mxu0 %vm6726_vm0, %v6725_v0 }
 0x2e2   : > { %v7404_v10 = vpop.f32.mrf.mxu0 }
 0x2e4   : > { %v7406_v15 = vpop.f32.mrf.mxu0 }
 0x2e6   : > { %v7408_v43 = vpop.f32.mrf.mxu0  ;;  %v1259_v7 = vpop.f32.mrf.mxu1 }
 0x2e8   : > { %v7410_v56 = vpop.f32.mrf.mxu0  ;;  %v5628_v39 = vpop.f32.mrf.mxu1 }
 0x2ea   : > { %v1302_v9 = vpop.f32.mrf.mxu0  ;;  %v1262_v14 = vpop.f32.mrf.mxu1 }
 0x2eb   : > { %v1824_v27 = vpack.c.bf16 %v1302_v9, %v1259_v7 }
 0x2ec   : > { %v5634_v28 = vpop.f32.mrf.mxu0  ;;  %v5629_v29 = vpop.f32.mrf.mxu1 }
 0x2ed   : > { %5713 = vmatmul.mubr.msk.bf16.vlgmr.msra.gmra.mxu1 %vm662_vm1, %v1824_v27 }
 0x2ee   : > { %v1305_v48 = vpop.f32.mrf.mxu0  ;;  %v1345_v18 = vpop.f32.mrf.mxu1  ;;  %5716 = vmatprep.mubr.msk.bf16.mxu1 %vm6726_vm0, %v6725_v0 }
 0x2f0   : > { %v5635_v21 = vpop.f32.mrf.mxu0  ;;  %v5640_v30 = vpop.f32.mrf.mxu1 }
 0x2f2   : > { %v1388_v31 = vpop.f32.mrf.mxu0  ;;  %v1348_v55 = vpop.f32.mrf.mxu1 }
 0x2f3   : > { %v1825_v32 = vpack.c.bf16 %v1388_v31, %v1345_v18 }
 0x2f4   : > { %v5646_v33 = vpop.f32.mrf.mxu0  ;;  %v5641_v34 = vpop.f32.mrf.mxu1 }
 0x2f5   : > { %5717 = vmatmul.mubr.msk.bf16.gmra.mxu1 %vm662_vm1, %v1825_v32  ;;  %v6216_v32 = vld [vmem:[#allocation5 + $0x18] sm:$0xff]  }
 0x2f6   : > { %v1391_v37 = vpop.f32.mrf.mxu0  ;;  %v1431_v38 = vpop.f32.mrf.mxu1  ;;  %5720 = vmatprep.mubr.msk.bf16.mxu1 %vm6726_vm0, %v6725_v0  ;;  %5797 = vmatpush3.bf16.msra.mxu0 %v6216_v32 }
 0x2f7   : > { %5798 = vmatprep.subr.bf16.mxu0 %v6725_v0  ;;  %v6217_v37 = vld [vmem:[#allocation5 + $0x10] sm:$0xff]  }
 0x2f8   : > { %v5647_v41 = vpop.f32.mrf.mxu0  ;;  %v5652_v45 = vpop.f32.mrf.mxu1 }
 0x2f9   : > { %v6218_v45 = vld [vmem:[#allocation7 + $0x18] sm:$0xff]  }
 0x2fa   : > { %v1474_v46 = vpop.f32.mrf.mxu0  ;;  %v1434_v49 = vpop.f32.mrf.mxu1  ;;  %5799 = vmatpush3.bf16.msra.mxu0 %v6217_v37  ;;  %5773 = vmatpush3.bf16.msra.mxu1 %v6218_v45  ;;  %v6471_v45 = vld [vmem:[%s6995_s4 + $0x18] sm:$0xf] }
 0x2fb   : > { %v1826_v50 = vpack.c.bf16 %v1474_v46, %v1431_v38  ;;  %5828 = vmatprep.subr.bf16.mxu0 %v6725_v0  ;;  %5774 = vmatprep.subr.bf16.mxu1 %v6725_v0 }
 0x2fc   : > { %v5658_v51 = vpop.f32.mrf.mxu0  ;;  %v5653_v35 = vpop.f32.mrf.mxu1 }
 0x2fd   : > { %5721 = vmatmul.mubr.msk.bf16.gmra.mxu1 %vm662_vm1, %v1826_v50  ;;  %v6219_v50 = vld [vmem:[#allocation7 + $0x10] sm:$0xff]  }
 0x2fe   : > { %v1477_v36 = vpop.f32.mrf.mxu0  ;;  %v1517_v52 = vpop.f32.mrf.mxu1  ;;  %5724 = vmatprep.mubr.msk.bf16.mxu1 %vm6726_vm0, %v6725_v0  ;;  %5775 = vmatpush3.bf16.msra.mxu1 %v6219_v50 }
 0x300   : > { %v5659_v53 = vpop.f32.mrf.mxu0  ;;  %v5664_v54 = vpop.f32.mrf.mxu1 }
 0x302   : > { %v1560_v58 = vpop.f32.mrf.mxu0  ;;  %v1520_v59 = vpop.f32.mrf.mxu1 }
 0x303   : > { %v1827_v40 = vpack.c.bf16 %v1560_v58, %v1517_v52 }
 0x304   : > { %v5670_v44 = vpop.f32.mrf.mxu0  ;;  %v5665_v60 = vpop.f32.mrf.mxu1 }
 0x305   : > { %5725 = vmatmul.mubr.msk.bf16.gmra.mxu1 %vm662_vm1, %v1827_v40 }
 0x306   : > { %v1563_v61 = vpop.f32.mrf.mxu0  ;;  %v1603_v62 = vpop.f32.mrf.mxu1  ;;  %5728 = vmatprep.mubr.msk.bf16.mxu1 %vm6726_vm0, %v6725_v0 }
 0x308   : > { %v5671_v63 = vpop.f32.mrf.mxu0  ;;  %v5676_v2 = vpop.f32.mrf.mxu1 }
 0x30a   : > { %v1646_v3 = vpop.f32.mrf.mxu0  ;;  %v1606_v4 = vpop.f32.mrf.mxu1 }
 0x30b   : > { %v1828_v5 = vpack.c.bf16 %v1646_v3, %v1603_v62  ;;  %v7459_v3 = vld [vmem:[%s8154_s10] ss:$0 sm:$0xff] }
 0x30c   : > { %v5682_v47 = vpop.f32.mrf.mxu0  ;;  %v5677_v6 = vpop.f32.mrf.mxu1 }
 0x30d   : > { %5729 = vmatmul.mubr.msk.bf16.gmra.mxu1 %vm662_vm1, %v1828_v5  ;;  %v6466_v6 = vld [vmem:[%s6995_s4 + $0x4] sm:$0xf] }
 0x30e   : > { %v1649_v11 = vpop.f32.mrf.mxu0  ;;  %v1689_v57 = vpop.f32.mrf.mxu1  ;;  %5732 = vmatprep.mubr.msk.bf16.mxu1 %vm6726_vm0, %v6725_v0 }
 0x30f   : > { %v2104_v11 = vunpack.c.l.bf16 %v6466_v6 }
 0x310   : > { %v5683_v12 = vpop.f32.mrf.mxu0  ;;  %v5688_v1 = vpop.f32.mrf.mxu1 }
 0x311   : > { %v6467_v12 = vld [vmem:[%s6995_s4 + $0x8] sm:$0xf] }
 0x312   : > { %v1732_v13 = vpop.f32.mrf.mxu0  ;;  %v1692_v8 = vpop.f32.mrf.mxu1  ;;  %v2105_v1 = vunpack.c.l.bf16 %v6467_v12 }
 0x313   : > { %v1829_v16 = vpack.c.bf16 %v1732_v13, %v1689_v57 }
 0x314   : > { %v5694_v17 = vpop.f32.mrf.mxu0  ;;  %v5689_v19 = vpop.f32.mrf.mxu1 }
 0x315   : > { %5733 = vmatmul.mubr.msk.bf16.gmra.mxu1 %vm662_vm1, %v1829_v16 }
 0x316   : > { %v1735_v20 = vpop.f32.mrf.mxu0  ;;  %v1775_v22 = vpop.f32.mrf.mxu1  ;;  %5736 = vmatprep.mubr.msk.bf16.mxu1 %vm6726_vm0, %v6725_v0 }
 0x318   : > { %v5695_v23 = vpop.f32.mrf.mxu0  ;;  %v5700_v42 = vpop.f32.mrf.mxu1 }
 0x31a   : > { %v1818_v24 = vpop.f32.mrf.mxu0  ;;  %v1778_v25 = vpop.f32.mrf.mxu1 }
 0x31b   : > { %v1830_v26 = vpack.c.bf16 %v1818_v24, %v1775_v22  ;;  %v6468_v25 = vld [vmem:[%s6995_s4 + $0xc] sm:$0xf] }
 0x31c   : > { %v5706_v7 = vpop.f32.mrf.mxu0  ;;  %v5701_v39 = vpop.f32.mrf.mxu1 }
 0x31d   : > { %5737 = vmatmul.mubr.msk.bf16.gmra.mxu1 %vm662_vm1, %v1830_v26  ;;  %v2106_v26 = vunpack.c.l.bf16 %v6468_v25  ;;  %v6469_v39 = vld [vmem:[%s6995_s4 + $0x10] sm:$0xf] }
 0x31e   : > { %v1821_v9 = vpop.f32.mrf.mxu0  ;;  %5776 = vmatprep.mubr.msk.bf16.mxu1 %vm6726_vm0, %v6725_v0 }
 0x31f   : > { %v2107_v9 = vunpack.c.l.bf16 %v6469_v39 }
 0x320   : > { %v5707_v14 = vpop.f32.mrf.mxu0 }
 0x322   : > { %v2028_v27 = vpop.f32.mrf.mxu0 }
 0x324   : > { %v5746_v28 = vpop.f32.mrf.mxu0 }
 0x326   : > { %v2031_v29 = vpop.f32.mrf.mxu0 }
 0x328   : > { %v5747_v48 = vpop.f32.mrf.mxu0 }
 0x32a   : > { %v2036_v18 = vpop.f32.mrf.mxu0 }
 0x32c   : > { %v5750_v21 = vpop.f32.mrf.mxu0 }
 0x32e   : > { %v2039_v30 = vpop.f32.mrf.mxu0 }
 0x330   : > { %v5751_v31 = vpop.f32.mrf.mxu0 }
 0x332   : > { %v7433_v55 = vpop.f32.mrf.mxu0 }
 0x334   : > { %v5754_v33 = vpop.f32.mrf.mxu0 }
 0x335   : > { %v6470_v33 = vld [vmem:[%s6995_s4 + $0x14] sm:$0xf] }
 0x336   : > { %v7436_v34 = vpop.f32.mrf.mxu0  ;;  %v2108_v37 = vunpack.c.l.bf16 %v6470_v33 }
 0x338   : > { %v5755_v38 = vpop.f32.mrf.mxu0 }
 0x33a   : > { %v7439_v41 = vpop.f32.mrf.mxu0 }
 0x33c   : > { %v5758_v46 = vpop.f32.mrf.mxu0 }
 0x33d   : > { %v2109_v46 = vunpack.c.l.bf16 %v6471_v45 }
 0x33e   : > { %v7442_v49 = vpop.f32.mrf.mxu0 }
 0x340   : > { %v5759_v51 = vpop.f32.mrf.mxu0 }
 0x342   : > { %v7444_v35 = vpop.f32.mrf.mxu0 }
 0x344   : > { %v5762_v36 = vpop.f32.mrf.mxu0 }
 0x346   : > { %v7446_v52 = vpop.f32.mrf.mxu0 }
 0x348   : > { %v5763_v53 = vpop.f32.mrf.mxu0 }
 0x34a   : > { %v7448_v54 = vpop.f32.mrf.mxu0 }
 0x34c   : > { %v5766_v58 = vpop.f32.mrf.mxu0 }
 0x34e   : > { %v7450_v59 = vpop.f32.mrf.mxu0 }
 0x350   : > { %v5767_v40 = vpop.f32.mrf.mxu0 }
 0x352   : > { %v7452_v44 = vpop.f32.mrf.mxu0 }
 0x354   : > { %v5770_v60 = vpop.f32.mrf.mxu0 }
 0x356   : > { %v7454_v61 = vpop.f32.mrf.mxu0 }
 0x358   : > { %v5771_v62 = vpop.f32.mrf.mxu0 }
 0x3ad   : > { %v1906_v63 = vpop.f32.mrf.mxu1 }
 0x3ae   : > { %v2029_v2 = vadd.f32 %v2028_v27, %v1906_v63  ;;  %v6472_v63 = vld [vmem:[%s6995_s4 + $0x1c] sm:$0xf] }
 0x3af   : > { %v5714_v4 = vpop.f32.mrf.mxu1 }
 0x3b0   : > { %v2090_v47 = vadd.f32 %v7459_v3, %v2029_v2  ;;  %v2110_v2 = vunpack.c.l.bf16 %v6472_v63 }
 0x3b1   : > { %v1909_v5 = vpop.f32.mrf.mxu1 }
 0x3b2   : > { %v2032_v57 = vadd.f32 %v2031_v29, %v1909_v5  ;;  %v2118_v17 = vadd.f32 %v2104_v11, %v2090_v47  ;;  %v6473_v5 = vld [vmem:[%s6995_s4 + $0x24] sm:$0xf] }
 0x3b3   : > { %v5715_v13 = vpop.f32.mrf.mxu1  ;;  %v2111_v47 = vunpack.c.l.bf16 %v6473_v5 }
 0x3b4   : > { %v2091_v8 = vadd.f32 %v7459_v3, %v2032_v57 }
 0x3b5   : > { %v1914_v16 = vpop.f32.mrf.mxu1 }
 0x3b6   : > { %v2119_v19 = vadd.f32 %v2105_v1, %v2091_v8  ;;  %v2037_v20 = vadd.f32 %v2036_v18, %v1914_v16  ;;  %v6474_v8 = vld [vmem:[%s6995_s4 + $0x28] sm:$0xf] }
 0x3b7   : > { %v5718_v22 = vpop.f32.mrf.mxu1  ;;  %v2112_v16 = vunpack.c.l.bf16 %v6474_v8 }
 0x3b8   : > { %v2132_v23 = vpack.c.bf16 %v2119_v19, %v2118_v17  ;;  %v2092_v24 = vadd.f32 %v7459_v3, %v2037_v20  ;;  %v6475_v22 = vld [vmem:[%s6995_s4 + $0x2c] sm:$0xf] }
 0x3b9   : > { %v1917_v42 = vpop.f32.mrf.mxu1 }
 0x3ba   : > { %v2040_v7 = vadd.f32 %v2039_v30, %v1917_v42  ;;  %5801 = vmatmul.mubr.msk.bf16.vlgmr.msra.gmra.mxu0 %vm662_vm1, %v2132_v23  ;;  %v7472_v29 = vadd.f32 %v2106_v26, %v2092_v24  ;;  %v2113_v23 = vunpack.c.l.bf16 %v6475_v22 }
 0x3bb   : > { %v5719_v14 = vpop.f32.mrf.mxu1  ;;  %5804 = vmatprep.mubr.msk.bf16.mxu0 %vm6726_vm0, %v6725_v0 }
 0x3bc   : > { %v2093_v27 = vadd.f32 %v7459_v3, %v2040_v7  ;;  %v6476_v14 = vld [vmem:[%s6995_s4 + $0x30] sm:$0xf] }
 0x3bd   : > { %v1922_v28 = vpop.f32.mrf.mxu1 }
 0x3be   : > { %v7474_v48 = vadd.f32 %v2107_v9, %v2093_v27  ;;  %v2045_v18 = vadd.f32 %v7433_v55, %v1922_v28  ;;  %v2114_v27 = vunpack.c.l.bf16 %v6476_v14 }
 0x3bf   : > { %v5722_v21 = vpop.f32.mrf.mxu1 }
 0x3c0   : > { %v2133_v30 = vpack.c.bf16 %v7474_v48, %v7472_v29  ;;  %v2094_v32 = vadd.f32 %v7459_v3, %v2045_v18 }
 0x3c1   : > { %v1925_v31 = vpop.f32.mrf.mxu1 }
 0x3c2   : > { %v2048_v38 = vadd.f32 %v7436_v34, %v1925_v31  ;;  %5777 = vmatmul.mubr.msk.bf16.vlgmr.msra.gmra.mxu1 %vm662_vm1, %v2133_v30  ;;  %5805 = vmatmul.mubr.msk.bf16.gmra.mxu0 %vm662_vm1, %v2133_v30  ;;  %v7490_v36 = vadd.f32 %v2108_v37, %v2094_v32  ;;  %v6477_v30 = vld [vmem:[%s6995_s4 + $0x34] sm:$0xf] }
 0x3c3   : > { %v5723_v55 = vpop.f32.mrf.mxu1  ;;  %5780 = vmatprep.mubr.msk.bf16.mxu1 %vm6726_vm0, %v6725_v0  ;;  %5808 = vmatprep.mubr.msk.bf16.mxu0 %vm6726_vm0, %v6725_v0  ;;  %v2115_v31 = vunpack.c.l.bf16 %v6477_v30 }
 0x3c4   : > { %v2095_v50 = vadd.f32 %v7459_v3, %v2048_v38 }
 0x3c5   : > { %v1930_v51 = vpop.f32.mrf.mxu1 }
 0x3c6   : > { %v7492_v34 = vadd.f32 %v2109_v46, %v2095_v50  ;;  %v2053_v53 = vadd.f32 %v7439_v41, %v1930_v51 }
 0x3c7   : > { %v5726_v58 = vpop.f32.mrf.mxu1 }
 0x3c8   : > { %v2134_v40 = vpack.c.bf16 %v7492_v34, %v7490_v36  ;;  %v2096_v62 = vadd.f32 %v7459_v3, %v2053_v53  ;;  %v6478_v53 = vld [vmem:[%s6995_s4 + $0x38] sm:$0xf] }
 0x3c9   : > { %v1933_v60 = vpop.f32.mrf.mxu1  ;;  %v2116_v58 = vunpack.c.l.bf16 %v6478_v53 }
 0x3ca   : > { %v2056_v4 = vadd.f32 %v7442_v49, %v1933_v60  ;;  %5781 = vmatmul.mubr.msk.bf16.gmra.mxu1 %vm662_vm1, %v2134_v40  ;;  %v7505_v57 = vadd.f32 %v2110_v2, %v2096_v62  ;;  %v6479_v60 = vld [vmem:[%s6995_s4 + $0x3c] sm:$0xf]  ;;  %s6639_s4 = scalar_lea.vmem %s8093_s16, 512 }
 0x3cb   : > { %v5727_v6 = vpop.f32.mrf.mxu1  ;;  %5784 = vmatprep.mubr.msk.bf16.mxu1 %vm6726_vm0, %v6725_v0  ;;  %v2117_v62 = vunpack.c.l.bf16 %v6479_v60  ;;  %p6640_p10 = scmp.ne.s32.totalorder %s8093_s16, %s6639_s4  ;;  %p6647_p9 = scmp.lt.s32.totalorder %s6645_s20, %s6639_s4 }
 0x3cc   : > { %v2097_v41 = vadd.f32 %v7459_v3, %v2056_v4 }
 0x3cd   : > { %v1938_v11 = vpop.f32.mrf.mxu1  ;;  %p6641_p0 = pnand %p6640_p10, %p8199_p11  ;;  %p6648_p1 = por %p6647_p9, %p6646_p5 }
 0x3ce   : > { %v2125_v12 = vadd.f32 %v2111_v47, %v2097_v41  ;;  %v2061_v1 = vadd.f32 %v7444_v35, %v1938_v11 }
 0x3cf   : > { %v5730_v13 = vpop.f32.mrf.mxu1  ;;  %p6642_p13 = pneg %p6641_p0 }
 0x3d0   : > { %v2135_v49 = vpack.c.bf16 %v2125_v12, %v7505_v57  ;;  %v2098_v19 = vadd.f32 %v7459_v3, %v2061_v1 }
 0x3d1   : > { %v1941_v17 = vpop.f32.mrf.mxu1  ;;  %p6649_p3 = pnand %p6648_p1, %p6642_p13 }
 0x3d2   : > { %v2064_v20 = vadd.f32 %v7446_v52, %v1941_v17  ;;  %v5140_v42 = vsel %vm1221_vm2, %v2134_v40, %v2135_v49  ;;  %v2126_v26 = vadd.f32 %v2112_v16, %v2098_v19 }
 0x3d3   : > { %v5731_v24 = vpop.f32.mrf.mxu1  ;;  %5809 = vmatmul.mubr.msk.bf16.gmra.mxu0 %vm662_vm1, %v5140_v42 }
 0x3d4   : > { %v2099_v35 = vadd.f32 %v7459_v3, %v2064_v20  ;;  %5812 = vmatprep.mubr.msk.bf16.mxu0 %vm6726_vm0, %v6725_v0  ;;  %v7562_v20 = vld [vmem:[%s8149_s5 + $0x1] ss:$0 sm:$0xff] }
 0x3d5   : > { %v1946_v25 = vpop.f32.mrf.mxu1 }
 0x3d6   : > { %v7518_v7 = vadd.f32 %v2113_v23, %v2099_v35  ;;  %v2069_v39 = vadd.f32 %v7448_v54, %v1946_v25 }
 0x3d7   : > { %v5734_v52 = vpop.f32.mrf.mxu1 }
 0x3d8   : > { %v2136_v9 = vpack.c.bf16 %v7518_v7, %v2126_v26  ;;  %v2100_v18 = vadd.f32 %v7459_v3, %v2069_v39 }
 0x3d9   : > { %v1949_v28 = vpop.f32.mrf.mxu1 }
 0x3da   : > { %v2072_v21 = vadd.f32 %v7450_v59, %v1949_v28  ;;  %v5335_v32 = vsel %vm1221_vm2, %v2135_v49, %v2136_v9  ;;  %v7534_v37 = vadd.f32 %v2114_v27, %v2100_v18 }
 0x3db   : > { %v5735_v33 = vpop.f32.mrf.mxu1  ;;  %5785 = vmatmul.mubr.msk.bf16.gmra.mxu1 %vm662_vm1, %v5335_v32  ;;  %5813 = vmatmul.mubr.msk.bf16.gmra.mxu0 %vm662_vm1, %v2136_v9 }
 0x3dc   : > { %v2101_v54 = vadd.f32 %v7459_v3, %v2072_v21  ;;  %5788 = vmatprep.mubr.msk.bf16.mxu1 %vm6726_vm0, %v6725_v0  ;;  %5816 = vmatprep.mubr.msk.bf16.mxu0 %vm6726_vm0, %v6725_v0 }
 0x3dd   : > { %v1954_v59 = vpop.f32.mrf.mxu1 }
 0x3de   : > { %v7536_v38 = vadd.f32 %v2115_v31, %v2101_v54  ;;  %v2077_v45 = vadd.f32 %v7452_v44, %v1954_v59 }
 0x3df   : > { %v5738_v46 = vpop.f32.mrf.mxu1 }
 0x3e0   : > { %v2137_v55 = vpack.c.bf16 %v7536_v38, %v7534_v37  ;;  %v2102_v51 = vadd.f32 %v7459_v3, %v2077_v45 }
 0x3e1   : > { %v1957_v50 = vpop.f32.mrf.mxu1 }
 0x3e2   : > { %v2080_v40 = vadd.f32 %v7454_v61, %v1957_v50  ;;  %v7552_v2 = vadd.f32 %v2116_v58, %v2102_v51 }
 0x3e3   : > { %5789 = vmatmul.mubr.msk.bf16.gmra.mxu1 %vm662_vm1, %v2137_v55  ;;  %5817 = vmatmul.mubr.msk.bf16.gmra.mxu0 %vm662_vm1, %v2137_v55  ;;  %v5739_v63 = vpop.f32.mrf.mxu1 }
 0x3e4   : > { %v2103_v44 = vadd.f32 %v7459_v3, %v2080_v40  ;;  %5792 = vmatprep.mubr.msk.bf16.mxu1 %vm6726_vm0, %v6725_v0  ;;  %5830 = vmatprep.mubr.msk.bf16.mxu0 %vm6726_vm0, %v6725_v0 }
 0x3e6   : > { %v7554_v4 = vadd.f32 %v2117_v62, %v2103_v44 }
 0x3e8   : > { %v2138_v61 = vpack.c.bf16 %v7554_v4, %v7552_v2 }
 0x3eb   : > { %5793 = vmatmul.mubr.msk.bf16.gmra.mxu1 %vm662_vm1, %v2138_v61 }
 0x47a   : > { %v2353_v5 = vpop.f32.mrf.mxu0 }
 0x47c   : > { %v5802_v47 = vpop.f32.mrf.mxu0 }
 0x47e   : > { %v2356_v6 = vpop.f32.mrf.mxu0 }
 0x480   : > { %v5803_v41 = vpop.f32.mrf.mxu0 }
 0x482   : > { %v2256_v3 = vpop.f32.mrf.mxu1  ;;  %v2361_v11 = vpop.f32.mrf.mxu0 }
 0x483   : > { %v2354_v44 = vadd.f32 %v2353_v5, %v2256_v3 }
 0x484   : > { %v5778_v12 = vpop.f32.mrf.mxu1  ;;  %v5806_v1 = vpop.f32.mrf.mxu0 }
 0x485   : > { %v7581_v1 = vadd.f32 %v7562_v20, %v2354_v44 }
 0x486   : > { %v2259_v13 = vpop.f32.mrf.mxu1  ;;  %v2364_v49 = vpop.f32.mrf.mxu0 }
 0x487   : > { %v2357_v12 = vadd.f32 %v2356_v6, %v2259_v13  ;;  %v5150_v5 = vmul.f32 -1.442695, %v7581_v1 }
 0x488   : > { %v5779_v8 = vpop.f32.mrf.mxu1  ;;  %v5807_v16 = vpop.f32.mrf.mxu0 }
 0x48a   : > { %v2264_v17 = vpop.f32.mrf.mxu1 }
 0x48b   : > { %v2362_v19 = vadd.f32 %v2361_v11, %v2264_v17 }
 0x48c   : > { %v5782_v22 = vpop.f32.mrf.mxu1 }
 0x48d   : > { %v7565_v23 = vadd.f32 %v7562_v20, %v2362_v19  ;;  %v7584_v19 = vadd.f32 %v7562_v20, %v2357_v12 }
 0x48e   : > { %v2267_v42 = vpop.f32.mrf.mxu1 }
 0x48f   : > { %v5152_v24 = vmul.f32 -1.442695, %v7565_v23  ;;  %v2365_v35 = vadd.f32 %v2364_v49, %v2267_v42 }
 0x490   : > { %v5783_v25 = vpop.f32.mrf.mxu1 }
 0x491   : > { %6334 = vpow2.f32 %v5152_v24  ;;  %v7569_v26 = vadd.f32 %v7562_v20, %v2365_v35 }
 0x493   : > { %v5153_v39 = vmul.f32 -1.442695, %v7569_v26  ;;  %v2369_v52 = vpop.f32.mrf.mxu0 }
 0x495   : > { %6336 = vpow2.f32 %v5153_v39  ;;  %v5810_v9 = vpop.f32.mrf.mxu0  ;;  %v5151_v39 = vmul.f32 -1.442695, %v7584_v19 }
 0x497   : > { %v2372_v14 = vpop.f32.mrf.mxu0 }
 0x499   : > { %v5811_v27 = vpop.f32.mrf.mxu0 }
 0x49b   : > { %v2272_v28 = vpop.f32.mrf.mxu1  ;;  %v2377_v18 = vpop.f32.mrf.mxu0 }
 0x49c   : > { %v2370_v21 = vadd.f32 %v2369_v52, %v2272_v28 }
 0x49d   : > { %v5786_v30 = vpop.f32.mrf.mxu1  ;;  %v5814_v31 = vpop.f32.mrf.mxu0 }
 0x49e   : > { %v6335_v32 = vpop.eup %6334  ;;  %v7573_v33 = vadd.f32 %v7562_v20, %v2370_v21 }
 0x49f   : > { %v2452_v54 = vadd.f32 1.0, %v6335_v32  ;;  %v2275_v59 = vpop.f32.mrf.mxu1  ;;  %v2380_v45 = vpop.f32.mrf.mxu0 }
 0x4a0   : > { %v5154_v46 = vmul.f32 -1.442695, %v7573_v33  ;;  %v2373_v55 = vadd.f32 %v2372_v14, %v2275_v59 }
 0x4a1   : > { %6338 = vrcp.f32 %v2452_v54  ;;  %v5787_v50 = vpop.f32.mrf.mxu1  ;;  %v5815_v51 = vpop.f32.mrf.mxu0 }
 0x4a2   : > { %v6337_v53 = vpop.eup %6336  ;;  %6340 = vpow2.f32 %v5154_v46  ;;  %v7577_v58 = vadd.f32 %v7562_v20, %v2373_v55 }
 0x4a3   : > { %v2453_v40 = vadd.f32 1.0, %v6337_v53  ;;  %v2280_v60 = vpop.f32.mrf.mxu1  ;;  %v2385_v62 = vpop.f32.mrf.mxu0 }
 0x4a4   : > { %v5155_v63 = vmul.f32 -1.442695, %v7577_v58  ;;  %v2378_v49 = vadd.f32 %v2377_v18, %v2280_v60 }
 0x4a5   : > { %6342 = vrcp.f32 %v2453_v40  ;;  %v5790_v61 = vpop.f32.mrf.mxu1  ;;  %v5818_v47 = vpop.f32.mrf.mxu0  ;;  %v6220_v40 = vld [vmem:[#allocation8 + $0x18] sm:$0xff]  }
 0x4a6   : > { %6344 = vpow2.f32 %v5155_v63  ;;  %v7588_v3 = vadd.f32 %v7562_v20, %v2378_v49  ;;  %5820 = vmatprep.subr.bf16.mxu1 %v6220_v40  ;;  %v6221_v61 = vld [vmem:[#allocation8 + $0x10] sm:$0xff]  }
 0x4a7   : > { %v2283_v41 = vpop.f32.mrf.mxu1  ;;  %v2388_v11 = vpop.f32.mrf.mxu0  ;;  %6346 = vpow2.f32 %v5150_v5  ;;  %5821 = vmatpush3.bf16.msra.mxu1 %v6220_v40 }
 0x4a8   : > { %v2381_v35 = vadd.f32 %v2380_v45, %v2283_v41  ;;  %v5156_v27 = vmul.f32 -1.442695, %v7588_v3  ;;  %5822 = vmatprep.subr.bf16.mxu1 %v6221_v61 }
 0x4a9   : > { %v5791_v8 = vpop.f32.mrf.mxu1  ;;  %v5819_v16 = vpop.f32.mrf.mxu0 }
 0x4aa   : > { %v7601_v31 = vadd.f32 %v7562_v20, %v2381_v35 }
 0x4ab   : > { %v2288_v17 = vpop.f32.mrf.mxu1  ;;  %5823 = vmatpush3.bf16.msra.mxu1 %v6221_v61 }
 0x4ac   : > { %v2386_v22 = vadd.f32 %v2385_v62, %v2288_v17  ;;  %v5157_v59 = vmul.f32 -1.442695, %v7601_v31  ;;  %5834 = vmatprep.subr.bf16.mxu1 %v6725_v0 }
 0x4ad   : > { %v5794_v42 = vpop.f32.mrf.mxu1 }
 0x4ae   : > { %v6339_v24 = vpop.eup %6338  ;;  %v7591_v6 = vadd.f32 %v7562_v20, %v2386_v22 }
 0x4af   : > { %v6341_v13 = vpop.eup %6340  ;;  %2494 = vrot.lane.b32.xlu0 %v6339_v24, %s6727_s23  ;;  %v2291_v25 = vpop.f32.mrf.mxu1 }
 0x4b0   : > { %v2454_v52 = vadd.f32 1.0, %v6341_v13  ;;  %v5158_v9 = vmul.f32 -1.442695, %v7591_v6  ;;  %v2389_v14 = vadd.f32 %v2388_v11, %v2291_v25 }
 0x4b1   : > { %v5795_v28 = vpop.f32.mrf.mxu1 }
 0x4b2   : > { %v6343_v18 = vpop.eup %6342  ;;  %6348 = vrcp.f32 %v2454_v52  ;;  %v7598_v21 = vadd.f32 %v7562_v20, %v2389_v14 }
 0x4b3   : > { %v6345_v30 = vpop.eup %6344  ;;  %6350 = vpow2.f32 %v5158_v9  ;;  %2496 = vrot.lane.b32.xlu1 %v6343_v18, %s6727_s23 }
 0x4b4   : > { %6352 = vpow2.f32 %v5151_v39  ;;  %v2455_v32 = vadd.f32 1.0, %v6345_v30  ;;  %v5159_v54 = vmul.f32 -1.442695, %v7598_v21  ;;  %v6347_v45 = vpop.eup %6346 }
 0x4b5   : > { %6354 = vpow2.f32 %v5156_v27  ;;  %v2450_v53 = vadd.f32 1.0, %v6347_v45 }
 0x4b6   : > { %6356 = vrcp.f32 %v2455_v32 }
 0x4b7   : > { %6358 = vpow2.f32 %v5159_v54 }
 0x4b8   : > { %6360 = vpow2.f32 %v5157_v59 }
 0x4bf   : > { %v6349_v46 = vpop.eup %6348 }
 0x4c0   : > { %v6351_v55 = vpop.eup %6350  ;;  %2498 = vrot.lane.b32.xlu0 %v6349_v46, %s6727_s23 }
 0x4c1   : > { %v6353_v20 = vpop.eup %6352  ;;  %v2458_v50 = vadd.f32 1.0, %v6351_v55 }
 0x4c2   : > { %v6355_v51 = vpop.eup %6354  ;;  %v2451_v44 = vadd.f32 1.0, %v6353_v20 }
 0x4c3   : > { %v6357_v60 = vpop.eup %6356  ;;  %6362 = vrcp.f32 %v2458_v50  ;;  %v2456_v47 = vadd.f32 1.0, %v6355_v51 }
 0x4c4   : > { %v6359_v62 = vpop.eup %6358  ;;  %2500 = vrot.lane.b32.xlu1 %v6357_v60, %s6727_s23  ;;  %6364 = vrcp.f32 %v2450_v53 }
 0x4c5   : > { %v2459_v63 = vadd.f32 1.0, %v6359_v62  ;;  %v6361_v41 = vpop.eup %6360 }
 0x4c6   : > { %v2457_v11 = vadd.f32 1.0, %v6361_v41 }
 0x4c7   : > { %6366 = vrcp.f32 %v2459_v63 }
 0x4c8   : > { %6368 = vrcp.f32 %v2451_v44 }
 0x4c9   : > { %6370 = vrcp.f32 %v2456_v47 }
 0x4ca   : > { %6372 = vrcp.f32 %v2457_v11 }
 0x4cb   : > { %6374 = vtanh.f32 %v7565_v23 }
 0x4cc   : > { %6376 = vtanh.f32 %v7569_v26 }
 0x4cd   : > { %6378 = vtanh.f32 %v7573_v33 }
 0x4ce   : > { %6380 = vtanh.f32 %v7577_v58 }
 0x4cf   : > { %6382 = vtanh.f32 %v7581_v1 }
 0x4d0   : > { %v6363_v12 = vpop.eup %6362  ;;  %6384 = vtanh.f32 %v7591_v6 }
 0x4d1   : > { %2506 = vrot.lane.b32.xlu0 %v6363_v12, %s6727_s23  ;;  %v6365_v49 = vpop.eup %6364  ;;  %6386 = vtanh.f32 %v7598_v21  ;;  %v7672_v12 = vld [vmem:[%s8146_s2] sm:$0xf] }
 0x4d2   : > { %6388 = vtanh.f32 %v7584_v19 }
 0x4d3   : > { %6390 = vtanh.f32 %v7588_v3 }
 0x4d4   : > { %v6367_v8 = vpop.eup %6366  ;;  %6392 = vtanh.f32 %v7601_v31 }
 0x4d5   : > { %2490 = vrot.lane.b32.xlu0 %v6365_v49, %s6727_s23  ;;  %2508 = vrot.lane.b32.xlu1 %v6367_v8, %s6727_s23  ;;  %v6369_v16 = vpop.eup %6368 }
 0x4d6   : > { %v6371_v17 = vpop.eup %6370 }
 0x4d7   : > { %v6373_v22 = vpop.eup %6372 }
 0x4d8   : > { %v6375_v42 = vpop.eup %6374 }
 0x4d9   : > { %2502 = vrot.lane.b32.xlu0 %v6371_v17, %s6727_s23  ;;  %2492 = vrot.lane.b32.xlu1 %v6369_v16, %s6727_s23  ;;  %v6377_v24 = vpop.eup %6376 }
 0x4da   : > { %v6379_v9 = vpop.eup %6378 }
 0x4db   : > { %v6381_v14 = vpop.eup %6380 }
 0x4dc   : > { %v6383_v6 = vpop.eup %6382 }
 0x4dd   : > { %2504 = vrot.lane.b32.xlu1 %v6373_v22, %s6727_s23  ;;  %v6385_v30 = vpop.eup %6384 }
 0x4de   : > { %v6387_v32 = vpop.eup %6386 }
 0x4df   : > { %v6389_v31 = vpop.eup %6388 }
 0x4e0   : > { %v6391_v40 = vpop.eup %6390 }
 0x4e1   : > { %v6393_v63 = vpop.eup %6392 }
 0x521   : > { %v2495_v5 = vpop.permute.xlu0 %2494 }
 0x522   : > { %v2522_v35 = vmul.f32 %v6375_v42, %v2495_v5 }
 0x524   : > { %v5338_v55 = vpack.c.bf16 %v2522_v35, %v2522_v35 }
 0x525   : > { %v2497_v13 = vpop.permute.xlu1 %2496 }
 0x526   : > { %v7617_v25 = vmul.f32 %v6377_v24, %v2497_v13  ;;  %v2733_v61 = vsel %vm1221_vm2, %v5338_v55, 0 }
 0x528   : > { %v7621_v39 = vpack.c.bf16 %v7617_v25, %v2522_v35  ;;  %v5339_v47 = vpack.c.bf16 %v7617_v25, %v7617_v25 }
 0x52a   : > { %v2538_v33 = vunpack.c.h.b16 %v7621_v39  ;;  %v2776_v17 = vsel %vm1221_vm2, %v5339_v47, 0 }
 0x532   : > { %v2499_v52 = vpop.permute.xlu0 %2498 }
 0x533   : > { %v2524_v27 = vmul.f32 %v6379_v9, %v2499_v52 }
 0x535   : > { %v5340_v16 = vpack.c.bf16 %v2524_v27, %v2524_v27 }
 0x536   : > { %v2501_v23 = vpop.permute.xlu1 %2500 }
 0x537   : > { %v7624_v26 = vmul.f32 %v6381_v14, %v2501_v23  ;;  %v2819_v5 = vsel %vm1221_vm2, %v5340_v16, 0 }
 0x539   : > { %v7629_v28 = vpack.c.bf16 %v7624_v26, %v2524_v27  ;;  %v5341_v22 = vpack.c.bf16 %v7624_v26, %v7624_v26  ;;  %v6222_v27 = vld [vmem:[#allocation10 + $0x18] sm:$0xff]   ;;  %v6223_v26 = vld [vmem:[#allocation10 + $0x10] sm:$0xff]  }
 0x53b   : > { %v2539_v58 = vunpack.c.l.b16 %v7629_v28  ;;  %v2862_v24 = vsel %vm1221_vm2, %v5341_v22, 0 }
 0x53d   : > { %v2555_v18 = vpack.c.b16 %v2539_v58, %v2538_v33  ;;  %v6224_v33 = vld [vmem:[#allocation11 + $0x18] sm:$0xff]   ;;  %v6225_v58 = vld [vmem:[#allocation11 + $0x10] sm:$0xff]  }
 0x53f   : > { %5824 = vmatprep.mubr.msk.bf16.mxu1 %vm662_vm1, %v2555_v18 }
 0x543   : > { %v2507_v1 = vpop.permute.xlu0 %2506 }
 0x544   : > { %v7638_v21 = vmul.f32 %v6385_v30, %v2507_v1 }
 0x546   : > { %v5344_v25 = vpack.c.bf16 %v7638_v21, %v7638_v21 }
 0x547   : > { %v2491_v54 = vpop.permute.xlu0 %2490  ;;  %v2509_v59 = vpop.permute.xlu1 %2508 }
 0x548   : > { %v7640_v45 = vmul.f32 %v6383_v6, %v2491_v54  ;;  %v7642_v46 = vmul.f32 %v6387_v32, %v2509_v59  ;;  %v2991_v14 = vsel %vm1221_vm2, %v5344_v25, 0 }
 0x54a   : > { %v5336_v19 = vpack.c.bf16 %v7640_v45, %v7640_v45  ;;  %v7648_v3 = vpack.c.bf16 %v7642_v46, %v7638_v21  ;;  %v5345_v9 = vpack.c.bf16 %v7642_v46, %v7642_v46 }
 0x54b   : > { %v2493_v20 = vpop.permute.xlu1 %2492  ;;  %v2503_v53 = vpop.permute.xlu0 %2502 }
 0x54c   : > { %v7650_v50 = vmul.f32 %v6389_v31, %v2493_v20  ;;  %5825 = vmatmul.mubr.msk.bf16.vlgmr.msra.gmra.mxu1 %vm662_vm1, %v7648_v3  ;;  %v2647_v51 = vsel %vm1221_vm2, %v5336_v19, 0  ;;  %v7665_v41 = vmul.f32 %v6391_v40, %v2503_v53  ;;  %v3034_v23 = vsel %vm1221_vm2, %v5345_v9, 0 }
 0x54d   : > { %5829 = vmatpush3.bf16.msra.mxu0 %v2647_v51  ;;  %5836 = vmatprep.mubr.msk.bf16.mxu1 %vm6726_vm0, %v6725_v0 }
 0x54e   : > { %v2530_v60 = vpack.c.bf16 %v7650_v50, %v7640_v45  ;;  %v5337_v62 = vpack.c.bf16 %v7650_v50, %v7650_v50  ;;  %5840 = vmatprep.subr.bf16.mxu0 %v6725_v0  ;;  %v5342_v42 = vpack.c.bf16 %v7665_v41, %v7665_v41 }
 0x54f   : > { %v2505_v44 = vpop.permute.xlu1 %2504 }
 0x550   : > { %v7667_v11 = vmul.f32 %v6393_v63, %v2505_v44  ;;  %5831 = vmatmul.mubr.msk.bf16.vlgmr.msra.gmra.mxu0 %vm1217_vm3, %v7672_v12  ;;  %v2690_v49 = vsel %vm1221_vm2, %v5337_v62, 0  ;;  %v2905_v35 = vsel %vm1221_vm2, %v5342_v42, 0 }
 0x551   : > { %5835 = vmatpush3.bf16.msra.mxu1 %v2690_v49  ;;  %5841 = vmatpush3.bf16.msra.mxu0 %v2733_v61 }
 0x552   : > { %v2533_v8 = vpack.c.bf16 %v7667_v11, %v7665_v41  ;;  %5846 = vmatprep.subr.bf16.mxu1 %v6725_v0  ;;  %5842 = vmatprep.mubr.msk.bf16.mxu0 %vm6726_vm0, %v6725_v0  ;;  %v5343_v13 = vpack.c.bf16 %v7667_v11, %v7667_v11 }
 0x553   : > { %5852 = vmatprep.subr.bf16.mxu0 %v6725_v0 }
 0x554   : > { %5837 = vmatmul.mubr.msk.bf16.vlgmr.msra.gmra.mxu1 %vm1217_vm3, %v7672_v12  ;;  %v2948_v52 = vsel %vm1221_vm2, %v5343_v13, 0 }
 0x555   : > { %5847 = vmatpush3.bf16.msra.mxu1 %v2776_v17  ;;  %5848 = vmatprep.mubr.msk.bf16.mxu1 %vm6726_vm0, %v6725_v0 }
 0x556   : > { %5858 = vmatprep.subr.bf16.mxu1 %v6725_v0 }
 0x558   : > { %5843 = vmatmul.mubr.msk.bf16.vlgmr.msra.gmra.mxu0 %vm1217_vm3, %v7672_v12 }
 0x559   : > { %5853 = vmatpush3.bf16.msra.mxu0 %v2819_v5  ;;  %5854 = vmatprep.mubr.msk.bf16.mxu0 %vm6726_vm0, %v6725_v0 }
 0x55a   : > { %5864 = vmatprep.subr.bf16.mxu0 %v6725_v0 }
 0x55c   : > { %5849 = vmatmul.mubr.msk.bf16.vlgmr.msra.gmra.mxu1 %vm1217_vm3, %v7672_v12 }
 0x55d   : > { %5859 = vmatpush3.bf16.msra.mxu1 %v2862_v24  ;;  %5860 = vmatprep.mubr.msk.bf16.mxu1 %vm6726_vm0, %v6725_v0 }
 0x55e   : > { %5870 = vmatprep.subr.bf16.mxu1 %v6725_v0 }
 0x560   : > { %5855 = vmatmul.mubr.msk.bf16.vlgmr.msra.gmra.mxu0 %vm1217_vm3, %v7672_v12 }
 0x561   : > { %5865 = vmatpush3.bf16.msra.mxu0 %v2905_v35  ;;  %5866 = vmatprep.mubr.msk.bf16.mxu0 %vm6726_vm0, %v6725_v0 }
 0x562   : > { %5876 = vmatprep.subr.bf16.mxu0 %v6725_v0 }
 0x564   : > { %5861 = vmatmul.mubr.msk.bf16.vlgmr.msra.gmra.mxu1 %vm1217_vm3, %v7672_v12 }
 0x565   : > { %5871 = vmatpush3.bf16.msra.mxu1 %v2948_v52  ;;  %5872 = vmatprep.mubr.msk.bf16.mxu1 %vm6726_vm0, %v6725_v0 }
 0x566   : > { %5882 = vmatprep.subr.bf16.mxu1 %v6725_v0 }
 0x568   : > { %5867 = vmatmul.mubr.msk.bf16.vlgmr.msra.gmra.mxu0 %vm1217_vm3, %v7672_v12 }
 0x569   : > { %5877 = vmatpush3.bf16.msra.mxu0 %v2991_v14  ;;  %5878 = vmatprep.mubr.msk.bf16.mxu0 %vm6726_vm0, %v6725_v0 }
 0x56a   : > { %5888 = vmatprep.subr.bf16.mxu0 %v6725_v0 }
 0x56c   : > { %5873 = vmatmul.mubr.msk.bf16.vlgmr.msra.gmra.mxu1 %vm1217_vm3, %v7672_v12 }
 0x56d   : > { %5883 = vmatpush3.bf16.msra.mxu1 %v3034_v23  ;;  %5884 = vmatprep.mubr.msk.bf16.mxu1 %vm6726_vm0, %v6725_v0 }
 0x56e   : > { %5912 = vmatprep.subr.bf16.mxu1 %v6725_v0 }
 0x570   : > { %5879 = vmatmul.mubr.msk.bf16.vlgmr.msra.gmra.mxu0 %vm1217_vm3, %v7672_v12 }
 0x571   : > { %5892 = vmatprep.mubr.msk.bf16.mxu0 %vm6726_vm0, %v6725_v0  ;;  %5889 = vmatpush3.bf16.msra.mxu0 %v6224_v33 }
 0x572   : > { %5890 = vmatprep.subr.bf16.mxu0 %v6725_v0 }
 0x574   : > { %5885 = vmatmul.mubr.msk.bf16.vlgmr.msra.gmra.mxu1 %vm1217_vm3, %v7672_v12 }
 0x575   : > { %5913 = vmatpush3.bf16.msra.mxu1 %v6222_v27  ;;  %5916 = vmatprep.mubr.msk.bf16.mxu1 %vm6726_vm0, %v6725_v0 }
 0x576   : > { %5914 = vmatprep.subr.bf16.mxu1 %v6725_v0  ;;  %5891 = vmatpush3.bf16.msra.mxu0 %v6225_v58 }
 0x579   : > { %5915 = vmatpush3.bf16.msra.mxu1 %v6223_v26 }
 0x57c   : > { %5917 = vmatmul.mubr.msk.bf16.vlgmr.msra.gmra.mxu1 %vm662_vm1, %v2530_v60 }
 0x57d   : > { %5920 = vmatprep.mubr.msk.bf16.mxu1 %vm6726_vm0, %v6725_v0 }
 0x584   : > { %5921 = vmatmul.mubr.msk.bf16.gmra.mxu1 %vm662_vm1, %v7621_v39  ;;  %v7770_v39 = vld [vmem:[%s8151_s7] ss:$0 sm:$0xff] }
 0x585   : > { %5924 = vmatprep.mubr.msk.bf16.mxu1 %vm6726_vm0, %v6725_v0  ;;  %v1183_v1 = vadd.f32 %v7404_v10, %v7770_v39  ;;  %v1175_v32 = vadd.f32 %v7770_v39, %v7406_v15  ;;  %v1186_v46 = vadd.f32 %v7408_v43, %v7770_v39 }
 0x58c   : > { %5925 = vmatmul.mubr.msk.bf16.gmra.mxu1 %vm662_vm1, %v7629_v28  ;;  %v7775_v28 = vld [vmem:[%s8151_s7 + $0x1] ss:$0 sm:$0xff] }
 0x58d   : > { %5928 = vmatprep.mubr.msk.bf16.mxu1 %vm6726_vm0, %v6725_v0 }
 0x594   : > { %5929 = vmatmul.mubr.msk.bf16.gmra.mxu1 %vm662_vm1, %v2533_v8 }
 0x595   : > { %5932 = vmatprep.mubr.msk.bf16.mxu1 %vm6726_vm0, %v6725_v0 }
 0x59c   : > { %5933 = vmatmul.mubr.msk.bf16.gmra.mxu1 %vm662_vm1, %v7648_v3 }
 0x60c   : > { %v5826_v18 = vpop.f32.mrf.mxu1 }
 0x60d   : > { %v2618_v6 = vadd.f32 %v5826_v18, %v7775_v28 }
 0x60e   : > { %v2609_v30 = vpop.f32.mrf.mxu1 }
 0x60f   : > { %v7782_v54 = vadd.f32 %v2618_v6, %v1183_v1  ;;  %v2610_v59 = vadd.f32 %v7775_v28, %v2609_v30 }
 0x610   : > { %v5827_v21 = vpop.f32.mrf.mxu1  ;;  %v2683_v45 = vpop.f32.mrf.mxu0 }
 0x611   : > { %v7787_v19 = vadd.f32 %v2610_v59, %v1175_v32  ;;  %v2621_v3 = vadd.f32 %v5827_v21, %v7775_v28 }
 0x612   : > { %v7790_v10 = vpop.f32.mrf.mxu1  ;;  %v5832_v31 = vpop.f32.mrf.mxu0 }
 0x613   : > { %v7792_v55 = vadd.f32 %v2621_v3, %v1186_v46 }
 0x614   : > { %v2726_v20 = vpop.f32.mrf.mxu1  ;;  %v2686_v15 = vpop.f32.mrf.mxu0 }
 0x615   : > { %v3076_v50 = vpack.c.bf16 %v2726_v20, %v2683_v45 }
 0x616   : > { %v5838_v51 = vpop.f32.mrf.mxu1  ;;  %v5833_v53 = vpop.f32.mrf.mxu0 }
 0x617   : > { %5893 = vmatmul.mubr.msk.bf16.vlgmr.msra.gmra.mxu0 %vm662_vm1, %v3076_v50 }
 0x618   : > { %v2729_v40 = vpop.f32.mrf.mxu1  ;;  %v2769_v60 = vpop.f32.mrf.mxu0  ;;  %5896 = vmatprep.mubr.msk.bf16.mxu0 %vm6726_vm0, %v6725_v0 }
 0x61a   : > { %v5839_v43 = vpop.f32.mrf.mxu1  ;;  %v5844_v62 = vpop.f32.mrf.mxu0 }
 0x61c   : > { %v2812_v63 = vpop.f32.mrf.mxu1  ;;  %v2772_v44 = vpop.f32.mrf.mxu0 }
 0x61d   : > { %v3077_v61 = vpack.c.bf16 %v2812_v63, %v2769_v60 }
 0x61e   : > { %v5850_v47 = vpop.f32.mrf.mxu1  ;;  %v5845_v41 = vpop.f32.mrf.mxu0 }
 0x61f   : > { %5897 = vmatmul.mubr.msk.bf16.gmra.mxu0 %vm662_vm1, %v3077_v61 }
 0x620   : > { %v2815_v11 = vpop.f32.mrf.mxu1  ;;  %v2855_v49 = vpop.f32.mrf.mxu0  ;;  %5900 = vmatprep.mubr.msk.bf16.mxu0 %vm6726_vm0, %v6725_v0 }
 0x622   : > { %v5851_v8 = vpop.f32.mrf.mxu1  ;;  %v5856_v16 = vpop.f32.mrf.mxu0 }
 0x624   : > { %v2898_v17 = vpop.f32.mrf.mxu1  ;;  %v2858_v22 = vpop.f32.mrf.mxu0 }
 0x625   : > { %v3078_v5 = vpack.c.bf16 %v2898_v17, %v2855_v49  ;;  %v6226_v17 = vld [vmem:[#allocation5 + $0x28] sm:$0xff]   ;;  %v6227_v22 = vld [vmem:[#allocation5 + $0x20] sm:$0xff]  }
 0x626   : > { %v5862_v42 = vpop.f32.mrf.mxu1  ;;  %v5857_v24 = vpop.f32.mrf.mxu0  ;;  %5948 = vmatprep.subr.bf16.mxu1 %v6226_v17 }
 0x627   : > { %5901 = vmatmul.mubr.msk.bf16.gmra.mxu0 %vm662_vm1, %v3078_v5  ;;  %5949 = vmatpush3.bf16.msra.mxu1 %v6226_v17  ;;  %v6228_v5 = vld [vmem:[#allocation7 + $0x28] sm:$0xff]   ;;  %v6229_v42 = vld [vmem:[#allocation7 + $0x20] sm:$0xff]  }
 0x628   : > { %v2901_v13 = vpop.f32.mrf.mxu1  ;;  %v2941_v35 = vpop.f32.mrf.mxu0  ;;  %5904 = vmatprep.mubr.msk.bf16.mxu0 %vm6726_vm0, %v6725_v0  ;;  %5950 = vmatprep.subr.bf16.mxu1 %v6227_v22 }
 0x629   : > { %5936 = vmatprep.subr.bf16.mxu0 %v6228_v5 }
 0x62a   : > { %v5863_v25 = vpop.f32.mrf.mxu1  ;;  %v5868_v52 = vpop.f32.mrf.mxu0  ;;  %5937 = vmatpush3.bf16.msra.mxu0 %v6228_v5 }
 0x62b   : > { %5951 = vmatpush3.bf16.msra.mxu1 %v6227_v22  ;;  %5938 = vmatprep.subr.bf16.mxu0 %v6229_v42  ;;  %v5324_v52 = vpack.c.bf16 %v7472_v29, %v7472_v29  ;;  %v5326_v29 = vpack.c.bf16 %v7490_v36, %v7490_v36 }
 0x62c   : > { %v2984_v9 = vpop.f32.mrf.mxu1  ;;  %v2944_v14 = vpop.f32.mrf.mxu0  ;;  %5968 = vmatprep.subr.bf16.mxu1 %v6725_v0 }
 0x62d   : > { %v3079_v23 = vpack.c.bf16 %v2984_v9, %v2941_v35  ;;  %v7821_v35 = vld [vmem:[%s8154_s10 + $0x1] ss:$0 sm:$0xff]  ;;  %v5325_v9 = vpack.c.bf16 %v7474_v48, %v7474_v48  ;;  %v5327_v48 = vpack.c.bf16 %v7492_v34, %v7492_v34 }
 0x62e   : > { %v5874_v27 = vpop.f32.mrf.mxu1  ;;  %v5869_v26 = vpop.f32.mrf.mxu0  ;;  %5939 = vmatpush3.bf16.msra.mxu0 %v6229_v42 }
 0x62f   : > { %5905 = vmatmul.mubr.msk.bf16.gmra.mxu0 %vm662_vm1, %v3079_v23 }
 0x630   : > { %v2987_v33 = vpop.f32.mrf.mxu1  ;;  %v3027_v58 = vpop.f32.mrf.mxu0  ;;  %5908 = vmatprep.mubr.msk.bf16.mxu0 %vm6726_vm0, %v6725_v0 }
 0x631   : > { %v3309_v33 = vunpack.c.l.bf16 %v5324_v52 }
 0x632   : > { %v5875_v18 = vpop.f32.mrf.mxu1  ;;  %v5880_v1 = vpop.f32.mrf.mxu0 }
 0x633   : > { %v3310_v18 = vunpack.c.l.bf16 %v5325_v9 }
 0x634   : > { %v3070_v6 = vpop.f32.mrf.mxu1  ;;  %v3030_v30 = vpop.f32.mrf.mxu0 }
 0x635   : > { %v3080_v32 = vpack.c.bf16 %v3070_v6, %v3027_v58 }
 0x636   : > { %v5886_v59 = vpop.f32.mrf.mxu1  ;;  %v5881_v21 = vpop.f32.mrf.mxu0 }
 0x637   : > { %5909 = vmatmul.mubr.msk.bf16.gmra.mxu0 %vm662_vm1, %v3080_v32 }
 0x638   : > { %v3073_v45 = vpop.f32.mrf.mxu1 }
 0x63a   : > { %v5887_v46 = vpop.f32.mrf.mxu1 }
 0x63c   : > { %v3252_v3 = vpop.f32.mrf.mxu1 }
 0x63e   : > { %v5918_v31 = vpop.f32.mrf.mxu1 }
 0x640   : > { %v3255_v20 = vpop.f32.mrf.mxu1 }
 0x642   : > { %v5919_v15 = vpop.f32.mrf.mxu1 }
 0x644   : > { %v3260_v50 = vpop.f32.mrf.mxu1 }
 0x646   : > { %v5922_v51 = vpop.f32.mrf.mxu1 }
 0x648   : > { %v3263_v53 = vpop.f32.mrf.mxu1 }
 0x64a   : > { %v5923_v40 = vpop.f32.mrf.mxu1 }
 0x64c   : > { %v3268_v60 = vpop.f32.mrf.mxu1 }
 0x64e   : > { %v5926_v43 = vpop.f32.mrf.mxu1 }
 0x650   : > { %v7807_v62 = vpop.f32.mrf.mxu1 }
 0x652   : > { %v5927_v63 = vpop.f32.mrf.mxu1 }
 0x653   : > { %v5328_v63 = vpack.c.bf16 %v7505_v57, %v7505_v57 }
 0x654   : > { %v7809_v44 = vpop.f32.mrf.mxu1 }
 0x655   : > { %v3313_v5 = vunpack.c.l.bf16 %v5328_v63 }
 0x656   : > { %v5930_v61 = vpop.f32.mrf.mxu1 }
 0x658   : > { %v7811_v47 = vpop.f32.mrf.mxu1 }
 0x65a   : > { %v5931_v41 = vpop.f32.mrf.mxu1 }
 0x65c   : > { %v7813_v11 = vpop.f32.mrf.mxu1 }
 0x65e   : > { %v5934_v49 = vpop.f32.mrf.mxu1 }
 0x660   : > { %v7815_v8 = vpop.f32.mrf.mxu1 }
 0x662   : > { %v5935_v16 = vpop.f32.mrf.mxu1 }
 0x6d7   : > { %v3152_v24 = vpop.f32.mrf.mxu0 }
 0x6d8   : > { %v3253_v13 = vadd.f32 %v3252_v3, %v3152_v24 }
 0x6d9   : > { %v5894_v25 = vpop.f32.mrf.mxu0 }
 0x6da   : > { %v3299_v23 = vadd.f32 %v7821_v35, %v3253_v13 }
 0x6db   : > { %v3155_v14 = vpop.f32.mrf.mxu0 }
 0x6dc   : > { %v3256_v27 = vadd.f32 %v3255_v20, %v3155_v14  ;;  %v3319_v6 = vadd.f32 %v3309_v33, %v3299_v23  ;;  %v3311_v20 = vunpack.c.l.bf16 %v5326_v29  ;;  %v5331_v14 = vpack.c.bf16 %v7536_v38, %v7536_v38 }
 0x6dd   : > { %v5895_v26 = vpop.f32.mrf.mxu0 }
 0x6de   : > { %v3300_v58 = vadd.f32 %v7821_v35, %v3256_v27 }
 0x6df   : > { %v3160_v1 = vpop.f32.mrf.mxu0 }
 0x6e0   : > { %v7829_v30 = vadd.f32 %v3310_v18, %v3300_v58  ;;  %v3261_v32 = vadd.f32 %v3260_v50, %v3160_v1  ;;  %v3312_v50 = vunpack.c.l.bf16 %v5327_v48 }
 0x6e1   : > { %v5898_v59 = vpop.f32.mrf.mxu0 }
 0x6e2   : > { %v3329_v21 = vpack.c.bf16 %v7829_v30, %v3319_v6  ;;  %v3301_v46 = vadd.f32 %v7821_v35, %v3261_v32  ;;  %v3316_v59 = vunpack.c.l.bf16 %v5331_v14 }
 0x6e3   : > { %v3163_v45 = vpop.f32.mrf.mxu0 }
 0x6e4   : > { %v3264_v3 = vadd.f32 %v3263_v53, %v3163_v45  ;;  %5952 = vmatprep.mubr.msk.bf16.mxu1 %vm662_vm1, %v3329_v21  ;;  %v7839_v40 = vadd.f32 %v3311_v20, %v3301_v46  ;;  %v5329_v53 = vpack.c.bf16 %v7518_v7, %v7518_v7  ;;  %v3340_v49 = vunpack.c.h.b16 %v3329_v21 }
 0x6e5   : > { %v5899_v31 = vpop.f32.mrf.mxu0  ;;  %v5332_v45 = vpack.c.bf16 %v7552_v2, %v7552_v2 }
 0x6e6   : > { %v3302_v15 = vadd.f32 %v7821_v35, %v3264_v3  ;;  %v3314_v57 = vunpack.c.l.bf16 %v5329_v53 }
 0x6e7   : > { %v3168_v51 = vpop.f32.mrf.mxu0 }
 0x6e8   : > { %v7841_v36 = vadd.f32 %v3312_v50, %v3302_v15  ;;  %v3269_v43 = vadd.f32 %v3268_v60, %v3168_v51  ;;  %v3317_v51 = vunpack.c.l.bf16 %v5332_v45 }
 0x6e9   : > { %v5902_v34 = vpop.f32.mrf.mxu0 }
 0x6ea   : > { %v3330_v61 = vpack.c.bf16 %v7841_v36, %v7839_v40  ;;  %v3303_v16 = vadd.f32 %v7821_v35, %v3269_v43 }
 0x6eb   : > { %v3171_v41 = vpop.f32.mrf.mxu0 }
 0x6ec   : > { %v3272_v17 = vadd.f32 %v7807_v62, %v3171_v41  ;;  %5953 = vmatmul.mubr.msk.bf16.vlgmr.msra.gmra.mxu1 %vm662_vm1, %v3330_v61  ;;  %v3341_v22 = vunpack.c.l.b16 %v3330_v61  ;;  %v7853_v7 = vadd.f32 %v3313_v5, %v3303_v16  ;;  %v5330_v62 = vpack.c.bf16 %v7534_v37, %v7534_v37 }
 0x6ed   : > { %v5903_v60 = vpop.f32.mrf.mxu0  ;;  %v3342_v26 = vunpack.c.h.b16 %v3330_v61 }
 0x6ee   : > { %v3304_v42 = vadd.f32 %v7821_v35, %v3272_v17  ;;  %v3375_v24 = vpack.c.b16 %v3341_v22, %v3340_v49  ;;  %v3315_v6 = vunpack.c.l.bf16 %v5330_v62  ;;  %v5223_v17 = vld [vmem:[%s8149_s5 + $0x2] ss:$0 sm:$0xff] }
 0x6ef   : > { %v3176_v13 = vpop.f32.mrf.mxu0 }
 0x6f0   : > { %v3324_v25 = vadd.f32 %v3314_v57, %v3304_v42  ;;  %v3277_v52 = vadd.f32 %v7809_v44, %v3176_v13  ;;  %5940 = vmatprep.mubr.msk.bf16.mxu0 %vm662_vm1, %v3375_v24 }
 0x6f1   : > { %v5906_v9 = vpop.f32.mrf.mxu0 }
 0x6f2   : > { %v3331_v23 = vpack.c.bf16 %v3324_v25, %v7853_v7  ;;  %v3305_v58 = vadd.f32 %v7821_v35, %v3277_v52 }
 0x6f3   : > { %v3179_v27 = vpop.f32.mrf.mxu0 }
 0x6f4   : > { %v3343_v33 = vunpack.c.l.b16 %v3331_v23  ;;  %v3280_v18 = vadd.f32 %v7811_v47, %v3179_v27  ;;  %v7865_v37 = vadd.f32 %v3315_v6, %v3305_v58  ;;  %v5333_v47 = vpack.c.bf16 %v7554_v4, %v7554_v4 }
 0x6f5   : > { %v5907_v1 = vpop.f32.mrf.mxu0  ;;  %v3344_v31 = vunpack.c.h.b16 %v3331_v23 }
 0x6f6   : > { %v3376_v44 = vpack.c.b16 %v3343_v33, %v3342_v26  ;;  %v3306_v32 = vadd.f32 %v7821_v35, %v3280_v18  ;;  %v3318_v2 = vunpack.c.l.bf16 %v5333_v47 }
 0x6f7   : > { %v3184_v29 = vpop.f32.mrf.mxu0 }
 0x6f8   : > { %v7867_v48 = vadd.f32 %v3316_v59, %v3306_v32  ;;  %v3285_v38 = vadd.f32 %v7813_v11, %v3184_v29  ;;  %5941 = vmatmul.mubr.msk.bf16.vlgmr.msra.gmra.mxu0 %vm662_vm1, %v3376_v44 }
 0x6f9   : > { %v5910_v21 = vpop.f32.mrf.mxu0 }
 0x6fa   : > { %v3332_v46 = vpack.c.bf16 %v7867_v48, %v7865_v37  ;;  %v3307_v20 = vadd.f32 %v7821_v35, %v3285_v38 }
 0x6fb   : > { %v3187_v3 = vpop.f32.mrf.mxu0 }
 0x6fc   : > { %v3288_v15 = vadd.f32 %v7815_v8, %v3187_v3  ;;  %5944 = vmatprep.mubr.msk.bf16.mxu0 %vm662_vm1, %v3332_v46  ;;  %v3345_v11 = vunpack.c.l.b16 %v3332_v46  ;;  %v7881_v63 = vadd.f32 %v3317_v51, %v3307_v20  ;;  %v3346_v61 = vunpack.c.h.b16 %v3332_v46 }
 0x6fd   : > { %v5911_v50 = vpop.f32.mrf.mxu0 }
 0x6fe   : > { %v3308_v43 = vadd.f32 %v7821_v35, %v3288_v15  ;;  %v3470_v34 = vpack.c.b16 %v3345_v11, %v3344_v31 }
 0x700   : > { %v7883_v4 = vadd.f32 %v3318_v2, %v3308_v43  ;;  %5956 = vmatprep.mubr.msk.bf16.mxu1 %vm662_vm1, %v3470_v34 }
 0x702   : > { %v3333_v53 = vpack.c.bf16 %v7883_v4, %v7881_v63 }
 0x704   : > { %v3347_v8 = vunpack.c.l.b16 %v3333_v53  ;;  %5945 = vmatmul.mubr.msk.bf16.gmra.mxu0 %vm662_vm1, %v3333_v53 }
 0x706   : > { %v3471_v41 = vpack.c.b16 %v3347_v8, %v3346_v61 }
 0x708   : > { %5957 = vmatmul.mubr.msk.bf16.gmra.mxu1 %vm662_vm1, %v3471_v41 }
 0x709   : > { %5970 = vmatprep.mubr.msk.bf16.mxu1 %vm6726_vm0, %v6725_v0 }
 0x7ac   : > { %v5954_v35 = vpop.f32.mrf.mxu1 }
 0x7ae   : > { %v3530_v49 = vpop.f32.mrf.mxu1 }
 0x7b0   : > { %v5955_v42 = vpop.f32.mrf.mxu1 }
 0x7b2   : > { %v3533_v23 = vpop.f32.mrf.mxu1 }
 0x7b8   : > { %v5942_v16 = vpop.f32.mrf.mxu0 }
 0x7b9   : > { %v3539_v22 = vadd.f32 %v5954_v35, %v5942_v16 }
 0x7ba   : > { %v3437_v60 = vpop.f32.mrf.mxu0 }
 0x7bb   : > { %v7895_v5 = vadd.f32 %v5223_v17, %v3539_v22  ;;  %v3531_v9 = vadd.f32 %v3530_v49, %v3437_v60 }
 0x7bc   : > { %v5943_v57 = vpop.f32.mrf.mxu0 }
 0x7bd   : > { %v5226_v24 = vmul.f32 -1.442695, %v7895_v5  ;;  %v3542_v13 = vadd.f32 %v5955_v42, %v5943_v57  ;;  %v7901_v27 = vadd.f32 %v5223_v17, %v3531_v9  ;;  %v6230_v57 = vld [vmem:[#allocation8 + $0x28] sm:$0xff]   ;;  %v6231_v9 = vld [vmem:[#allocation8 + $0x20] sm:$0xff]  }
 0x7be   : > { %v3440_v62 = vpop.f32.mrf.mxu0  ;;  %5960 = vmatprep.subr.bf16.mxu0 %v6230_v57 }
 0x7bf   : > { %6394 = vpow2.f32 %v5226_v24  ;;  %v7898_v25 = vadd.f32 %v5223_v17, %v3542_v13  ;;  %v5224_v18 = vmul.f32 -1.442695, %v7901_v27  ;;  %v3534_v1 = vadd.f32 %v3533_v23, %v3440_v62  ;;  %5961 = vmatpush3.bf16.msra.mxu0 %v6230_v57 }
 0x7c0   : > { %5962 = vmatprep.subr.bf16.mxu0 %v6231_v9 }
 0x7c1   : > { %v5227_v52 = vmul.f32 -1.442695, %v7898_v25  ;;  %v7909_v46 = vadd.f32 %v5223_v17, %v3534_v1 }
 0x7c3   : > { %6396 = vpow2.f32 %v5227_v52  ;;  %v5225_v2 = vmul.f32 -1.442695, %v7909_v46  ;;  %5963 = vmatpush3.bf16.msra.mxu0 %v6231_v9 }
 0x7c4   : > { %v5946_v14 = vpop.f32.mrf.mxu0  ;;  %6398 = vpow2.f32 %v5224_v18  ;;  %5974 = vmatprep.subr.bf16.mxu0 %v6725_v0 }
 0x7c6   : > { %v3453_v26 = vpop.f32.mrf.mxu0 }
 0x7c8   : > { %v5958_v33 = vpop.f32.mrf.mxu1  ;;  %v5947_v44 = vpop.f32.mrf.mxu0 }
 0x7c9   : > { %v3555_v58 = vadd.f32 %v5958_v33, %v5946_v14 }
 0x7ca   : > { %v3546_v6 = vpop.f32.mrf.mxu1  ;;  %v3456_v3 = vpop.f32.mrf.mxu0 }
 0x7cb   : > { %v7904_v32 = vadd.f32 %v5223_v17, %v3555_v58  ;;  %v3547_v59 = vadd.f32 %v3546_v6, %v3453_v26 }
 0x7cc   : > { %v6395_v29 = vpop.eup %6394  ;;  %v5959_v38 = vpop.f32.mrf.mxu1 }
 0x7cd   : > { %v3611_v21 = vadd.f32 1.0, %v6395_v29  ;;  %v5230_v45 = vmul.f32 -1.442695, %v7904_v32  ;;  %v7907_v47 = vadd.f32 %v5223_v17, %v3547_v59  ;;  %v3558_v31 = vadd.f32 %v5959_v38, %v5947_v44 }
 0x7ce   : > { %v3549_v20 = vpop.f32.mrf.mxu1 }
 0x7cf   : > { %6400 = vrcp.f32 %v3611_v21  ;;  %v3550_v15 = vadd.f32 %v3549_v20, %v3456_v3  ;;  %v5228_v50 = vmul.f32 -1.442695, %v7907_v47  ;;  %v7912_v51 = vadd.f32 %v5223_v17, %v3558_v31 }
 0x7d0   : > { %v6397_v11 = vpop.eup %6396  ;;  %6402 = vpow2.f32 %v5230_v45 }
 0x7d1   : > { %v3612_v43 = vadd.f32 1.0, %v6397_v11  ;;  %v5231_v34 = vmul.f32 -1.442695, %v7912_v51  ;;  %v3574_v53 = vadd.f32 %v5223_v17, %v3550_v15  ;;  %v6399_v8 = vpop.eup %6398 }
 0x7d2   : > { %v3609_v22 = vadd.f32 1.0, %v6399_v8 }
 0x7d3   : > { %6404 = vrcp.f32 %v3612_v43  ;;  %v5229_v61 = vmul.f32 -1.442695, %v3574_v53 }
 0x7d4   : > { %6406 = vpow2.f32 %v5228_v50 }
 0x7d5   : > { %6408 = vpow2.f32 %v5225_v2 }
 0x7d6   : > { %6410 = vpow2.f32 %v5231_v34 }
 0x7d7   : > { %6412 = vpow2.f32 %v5229_v61 }
 0x7dc   : > { %v6401_v41 = vpop.eup %6400 }
 0x7dd   : > { %v6403_v35 = vpop.eup %6402  ;;  %3645 = vrot.lane.b32.xlu0 %v6401_v41, %s6727_s23 }
 0x7de   : > { %v3615_v49 = vadd.f32 1.0, %v6403_v35 }
 0x7e0   : > { %v6405_v16 = vpop.eup %6404  ;;  %6414 = vrcp.f32 %v3615_v49 }
 0x7e1   : > { %v6407_v60 = vpop.eup %6406  ;;  %3647 = vrot.lane.b32.xlu1 %v6405_v16, %s6727_s23  ;;  %6416 = vrcp.f32 %v3609_v22 }
 0x7e2   : > { %v6409_v42 = vpop.eup %6408  ;;  %v3613_v24 = vadd.f32 1.0, %v6407_v60 }
 0x7e3   : > { %v6411_v17 = vpop.eup %6410  ;;  %v3610_v52 = vadd.f32 1.0, %v6409_v42 }
 0x7e4   : > { %v3616_v13 = vadd.f32 1.0, %v6411_v17  ;;  %v6413_v62 = vpop.eup %6412 }
 0x7e5   : > { %v3614_v14 = vadd.f32 1.0, %v6413_v62 }
 0x7e6   : > { %6418 = vrcp.f32 %v3616_v13 }
 0x7e7   : > { %6420 = vrcp.f32 %v3613_v24 }
 0x7e8   : > { %6422 = vrcp.f32 %v3610_v52 }
 0x7e9   : > { %6424 = vrcp.f32 %v3614_v14 }
 0x7ea   : > { %6426 = vtanh.f32 %v7895_v5 }
 0x7eb   : > { %6428 = vtanh.f32 %v7898_v25 }
 0x7ec   : > { %6430 = vtanh.f32 %v7901_v27 }
 0x7ed   : > { %v6415_v23 = vpop.eup %6414  ;;  %6432 = vtanh.f32 %v7904_v32 }
 0x7ee   : > { %3653 = vrot.lane.b32.xlu0 %v6415_v23, %s6727_s23  ;;  %v6417_v26 = vpop.eup %6416  ;;  %6434 = vtanh.f32 %v7912_v51 }
 0x7ef   : > { %6436 = vtanh.f32 %v7909_v46 }
 0x7f0   : > { %6438 = vtanh.f32 %v7907_v47 }
 0x7f1   : > { %6440 = vtanh.f32 %v3574_v53 }
 0x7f2   : > { %3641 = vrot.lane.b32.xlu0 %v6417_v26, %s6727_s23 }
 0x7f3   : > { %v6419_v33 = vpop.eup %6418 }
 0x7f4   : > { %v6421_v58 = vpop.eup %6420  ;;  %3655 = vrot.lane.b32.xlu1 %v6419_v33, %s6727_s23  ;;  %v6232_v33 = vld [vmem:[#allocation10 + $0x28] sm:$0xff]  }
 0x7f5   : > { %v6423_v18 = vpop.eup %6422 }
 0x7f6   : > { %3649 = vrot.lane.b32.xlu0 %v6421_v58, %s6727_s23  ;;  %v6425_v1 = vpop.eup %6424 }
 0x7f7   : > { %v6427_v6 = vpop.eup %6426 }
 0x7f8   : > { %3643 = vrot.lane.b32.xlu1 %v6423_v18, %s6727_s23  ;;  %v6429_v59 = vpop.eup %6428  ;;  %v6233_v18 = vld [vmem:[#allocation10 + $0x20] sm:$0xff]  }
 0x7f9   : > { %v6431_v25 = vpop.eup %6430 }
 0x7fa   : > { %v6433_v20 = vpop.eup %6432 }
 0x7fb   : > { %v6435_v15 = vpop.eup %6434 }
 0x7fc   : > { %3651 = vrot.lane.b32.xlu1 %v6425_v1, %s6727_s23  ;;  %v6437_v2 = vpop.eup %6436  ;;  %v6235_v1 = vld [vmem:[#allocation11 + $0x20] sm:$0xff]  }
 0x7fd   : > { %v6439_v53 = vpop.eup %6438 }
 0x7fe   : > { %v6441_v16 = vpop.eup %6440 }
 0x84f   : > { %v3646_v44 = vpop.permute.xlu0 %3645 }
 0x850   : > { %v3667_v38 = vmul.f32 %v6427_v6, %v3646_v44 }
 0x852   : > { %v5356_v43 = vpack.c.bf16 %v3667_v38, %v3667_v38 }
 0x853   : > { %v3648_v29 = vpop.permute.xlu1 %3647 }
 0x854   : > { %v3668_v21 = vmul.f32 %v6429_v59, %v3648_v29  ;;  %v3870_v41 = vsel %vm1221_vm2, %v5356_v43, 0 }
 0x856   : > { %v7927_v45 = vpack.c.bf16 %v3668_v21, %v3667_v38  ;;  %v5357_v60 = vpack.c.bf16 %v3668_v21, %v3668_v21  ;;  %v2613_v38 = vadd.f32 %v7775_v28, %v7790_v10 }
 0x858   : > { %5964 = vmatprep.mubr.msk.bf16.mxu0 %vm662_vm1, %v7927_v45  ;;  %v3913_v13 = vsel %vm1221_vm2, %v5357_v60, 0 }
 0x860   : > { %v3654_v5 = vpop.permute.xlu0 %3653 }
 0x861   : > { %v3671_v50 = vmul.f32 %v6433_v20, %v3654_v5 }
 0x863   : > { %v5360_v62 = vpack.c.bf16 %v3671_v50, %v3671_v50 }
 0x864   : > { %v3642_v3 = vpop.permute.xlu0 %3641 }
 0x865   : > { %v7936_v31 = vmul.f32 %v6431_v25, %v3642_v3  ;;  %v4042_v23 = vsel %vm1221_vm2, %v5360_v62, 0  ;;  %v1178_v3 = vadd.f32 %v7770_v39, %v7410_v56 }
 0x866   : > { %v3656_v27 = vpop.permute.xlu1 %3655 }
 0x867   : > { %v5354_v11 = vpack.c.bf16 %v7936_v31, %v7936_v31  ;;  %v3672_v32 = vmul.f32 %v6435_v15, %v3656_v27 }
 0x868   : > { %v3650_v47 = vpop.permute.xlu0 %3649 }
 0x869   : > { %v3784_v51 = vsel %vm1221_vm2, %v5354_v11, 0  ;;  %v7941_v46 = vpack.c.bf16 %v3672_v32, %v3671_v50  ;;  %v3669_v8 = vmul.f32 %v6439_v53, %v3650_v47  ;;  %v5361_v26 = vpack.c.bf16 %v3672_v32, %v3672_v32 }
 0x86a   : > { %5969 = vmatpush3.bf16.msra.mxu1 %v3784_v51  ;;  %v3644_v34 = vpop.permute.xlu1 %3643  ;;  %v2625_v11 = vadd.f32 %v2613_v38, %v1178_v3 }
 0x86b   : > { %5980 = vmatprep.subr.bf16.mxu1 %v6725_v0  ;;  %v3666_v61 = vmul.f32 %v6437_v2, %v3644_v34  ;;  %5965 = vmatmul.mubr.msk.bf16.vlgmr.msra.gmra.mxu0 %vm662_vm1, %v7941_v46  ;;  %v5358_v17 = vpack.c.bf16 %v3669_v8, %v3669_v8  ;;  %v4085_v58 = vsel %vm1221_vm2, %v5361_v26, 0 }
 0x86c   : > { %5976 = vmatprep.mubr.msk.bf16.mxu0 %vm6726_vm0, %v6725_v0 }
 0x86d   : > { %5971 = vmatmul.mubr.msk.bf16.vlgmr.msra.gmra.mxu1 %vm1217_vm3, %v7672_v12  ;;  %v3673_v35 = vpack.c.bf16 %v3666_v61, %v7936_v31  ;;  %v5355_v49 = vpack.c.bf16 %v3666_v61, %v3666_v61  ;;  %v3956_v52 = vsel %vm1221_vm2, %v5358_v17, 0 }
 0x86e   : > { %5981 = vmatpush3.bf16.msra.mxu1 %v3870_v41  ;;  %5982 = vmatprep.mubr.msk.bf16.mxu1 %vm6726_vm0, %v6725_v0  ;;  %v3652_v22 = vpop.permute.xlu1 %3651 }
 0x86f   : > { %5992 = vmatprep.subr.bf16.mxu1 %v6725_v0  ;;  %v3670_v42 = vmul.f32 %v6441_v16, %v3652_v22  ;;  %v3827_v57 = vsel %vm1221_vm2, %v5355_v49, 0 }
 0x870   : > { %5975 = vmatpush3.bf16.msra.mxu0 %v3827_v57 }
 0x871   : > { %v3675_v24 = vpack.c.bf16 %v3670_v42, %v3669_v8  ;;  %5986 = vmatprep.subr.bf16.mxu0 %v6725_v0  ;;  %v5359_v9 = vpack.c.bf16 %v3670_v42, %v3670_v42 }
 0x873   : > { %5977 = vmatmul.mubr.msk.bf16.vlgmr.msra.gmra.mxu0 %vm1217_vm3, %v7672_v12  ;;  %v3999_v14 = vsel %vm1221_vm2, %v5359_v9, 0 }
 0x874   : > { %5987 = vmatpush3.bf16.msra.mxu0 %v3913_v13  ;;  %5988 = vmatprep.mubr.msk.bf16.mxu0 %vm6726_vm0, %v6725_v0 }
 0x875   : > { %5983 = vmatmul.mubr.msk.bf16.vlgmr.msra.gmra.mxu1 %vm1217_vm3, %v7672_v12  ;;  %5998 = vmatprep.subr.bf16.mxu0 %v6725_v0 }
 0x876   : > { %5993 = vmatpush3.bf16.msra.mxu1 %v3956_v52  ;;  %5994 = vmatprep.mubr.msk.bf16.mxu1 %vm6726_vm0, %v6725_v0 }
 0x877   : > { %6004 = vmatprep.subr.bf16.mxu1 %v6725_v0 }
 0x87b   : > { %5989 = vmatmul.mubr.msk.bf16.vlgmr.msra.gmra.mxu0 %vm1217_vm3, %v7672_v12 }
 0x87c   : > { %5999 = vmatpush3.bf16.msra.mxu0 %v3999_v14  ;;  %6000 = vmatprep.mubr.msk.bf16.mxu0 %vm6726_vm0, %v6725_v0 }
 0x87d   : > { %5995 = vmatmul.mubr.msk.bf16.vlgmr.msra.gmra.mxu1 %vm1217_vm3, %v7672_v12  ;;  %6010 = vmatprep.subr.bf16.mxu0 %v6725_v0 }
 0x87e   : > { %6005 = vmatpush3.bf16.msra.mxu1 %v4042_v23  ;;  %6006 = vmatprep.mubr.msk.bf16.mxu1 %vm6726_vm0, %v6725_v0 }
 0x883   : > { %6001 = vmatmul.mubr.msk.bf16.vlgmr.msra.gmra.mxu0 %vm1217_vm3, %v7672_v12 }
 0x884   : > { %6011 = vmatpush3.bf16.msra.mxu0 %v4085_v58  ;;  %6012 = vmatprep.mubr.msk.bf16.mxu0 %vm6726_vm0, %v6725_v0  ;;  %v6234_v0 = vld [vmem:[#allocation11 + $0x28] sm:$0xff]   ;;  %v6236_v58 = vld [vmem:[#allocation7 + $0x38] sm:$0xff]  }
 0x885   : > { %6007 = vmatmul.mubr.msk.bf16.vlgmr.msra.gmra.mxu1 %vm1217_vm3, %v7672_v12  ;;  %6028 = vmatprep.subr.bf16.mxu0 %v6232_v33 }
 0x886   : > { %6016 = vmatprep.subr.bf16.mxu1 %v6234_v0 }
 0x887   : > { %6017 = vmatpush3.bf16.msra.mxu1 %v6234_v0  ;;  %v6238_v0 = vld [vmem:[#allocation7 + $0x30] sm:$0xff]  }
 0x888   : > { %6018 = vmatprep.subr.bf16.mxu1 %v6235_v1 }
 0x88b   : > { %6013 = vmatmul.mubr.msk.bf16.vlgmr.msra.gmra.mxu0 %vm1217_vm3, %v7672_v12  ;;  %6019 = vmatpush3.bf16.msra.mxu1 %v6235_v1  ;;  %v5233_v12 = vld [vmem:[%s8151_s7 + $0x2] ss:$0 sm:$0xff]  ;;  %v6239_v1 = vld [vmem:[#allocation5 + $0x30] sm:$0xff]  }
 0x88c   : > { %6029 = vmatpush3.bf16.msra.mxu0 %v6232_v33  ;;  %6032 = vmatprep.mubr.msk.bf16.mxu0 %vm662_vm1, %v3673_v35 }
 0x88d   : > { %6030 = vmatprep.subr.bf16.mxu0 %v6233_v18  ;;  %6040 = vmatprep.subr.bf16.mxu1 %v6236_v58 }
 0x890   : > { %6031 = vmatpush3.bf16.msra.mxu0 %v6233_v18  ;;  %v6237_v18 = vld [vmem:[#allocation5 + $0x38] sm:$0xff]  }
 0x891   : > { %6048 = vmatprep.subr.bf16.mxu0 %v6237_v18 }
 0x893   : > { %6033 = vmatmul.mubr.msk.bf16.vlgmr.msra.gmra.mxu0 %vm662_vm1, %v7927_v45 }
 0x894   : > { %6036 = vmatprep.mubr.msk.bf16.mxu0 %vm662_vm1, %v3675_v24  ;;  %6049 = vmatpush3.bf16.msra.mxu0 %v6237_v18 }
 0x895   : > { %6050 = vmatprep.subr.bf16.mxu0 %v6239_v1 }
 0x898   : > { %6051 = vmatpush3.bf16.msra.mxu0 %v6239_v1 }
 0x89b   : > { %6037 = vmatmul.mubr.msk.bf16.gmra.mxu0 %vm662_vm1, %v7941_v46 }
 0x92b   : > { %v5966_v44 = vpop.f32.mrf.mxu0 }
 0x92c   : > { %v3759_v6 = vadd.f32 %v5966_v44, %v5233_v12 }
 0x92d   : > { %v3820_v59 = vpop.f32.mrf.mxu1  ;;  %v3750_v29 = vpop.f32.mrf.mxu0 }
 0x92e   : > { %v8001_v21 = vadd.f32 %v3759_v6, %v7782_v54  ;;  %v3751_v45 = vadd.f32 %v5233_v12, %v3750_v29  ;;  %v5348_v29 = vpack.c.bf16 %v7841_v36, %v7841_v36 }
 0x92f   : > { %v5972_v5 = vpop.f32.mrf.mxu1  ;;  %v5967_v25 = vpop.f32.mrf.mxu0 }
 0x930   : > { %v8006_v31 = vadd.f32 %v3751_v45, %v7787_v19  ;;  %v3762_v20 = vadd.f32 %v5967_v25, %v5233_v12  ;;  %v5267_v45 = vld [vmem:[%s8154_s10 + $0x2] ss:$0 sm:$0xff]  ;;  %v5349_v25 = vpack.c.bf16 %v7853_v7, %v7853_v7 }
 0x931   : > { %v3823_v15 = vpop.f32.mrf.mxu1  ;;  %v3753_v27 = vpop.f32.mrf.mxu0 }
 0x932   : > { %v8009_v50 = vadd.f32 %v3762_v20, %v7792_v55  ;;  %v3754_v28 = vadd.f32 %v5233_v12, %v3753_v27  ;;  %v5346_v20 = vpack.c.bf16 %v7829_v30, %v7829_v30  ;;  %v5347_v27 = vpack.c.bf16 %v7839_v40, %v7839_v40 }
 0x933   : > { %v5973_v10 = vpop.f32.mrf.mxu1  ;;  %v3863_v54 = vpop.f32.mrf.mxu0 }
 0x934   : > { %v8011_v32 = vadd.f32 %v3754_v28, %v2625_v11  ;;  %v4127_v43 = vpack.c.bf16 %v3863_v54, %v3820_v59  ;;  %v4337_v10 = vunpack.c.l.bf16 %v5348_v29  ;;  %v5277_v29 = vld [vmem:[%s8149_s5 + $0x3] ss:$0 sm:$0xff] }
 0x935   : > { %v3906_v51 = vpop.f32.mrf.mxu1  ;;  %v5978_v46 = vpop.f32.mrf.mxu0 }
 0x936   : > { %6020 = vmatprep.mubr.msk.bf16.mxu1 %vm662_vm1, %v4127_v43  ;;  %v4338_v46 = vunpack.c.l.bf16 %v5349_v25 }
 0x937   : > { %v5984_v47 = vpop.f32.mrf.mxu1  ;;  %v3866_v56 = vpop.f32.mrf.mxu0 }
 0x938   : > { %v4335_v56 = vunpack.c.l.bf16 %v5346_v20 }
 0x939   : > { %v3909_v39 = vpop.f32.mrf.mxu1  ;;  %v5979_v19 = vpop.f32.mrf.mxu0 }
 0x93b   : > { %v5985_v2 = vpop.f32.mrf.mxu1  ;;  %v3949_v34 = vpop.f32.mrf.mxu0 }
 0x93c   : > { %v4128_v53 = vpack.c.bf16 %v3949_v34, %v3906_v51  ;;  %v4336_v2 = vunpack.c.l.bf16 %v5347_v27 }
 0x93d   : > { %v3992_v61 = vpop.f32.mrf.mxu1  ;;  %v5990_v55 = vpop.f32.mrf.mxu0 }
 0x93e   : > { %6021 = vmatmul.mubr.msk.bf16.vlgmr.msra.gmra.mxu1 %vm662_vm1, %v4128_v53 }
 0x93f   : > { %v5996_v8 = vpop.f32.mrf.mxu1  ;;  %v3952_v41 = vpop.f32.mrf.mxu0  ;;  %6041 = vmatpush3.bf16.msra.mxu1 %v6236_v58 }
 0x940   : > { %6042 = vmatprep.subr.bf16.mxu1 %v6238_v0 }
 0x941   : > { %v3995_v35 = vpop.f32.mrf.mxu1  ;;  %v5991_v49 = vpop.f32.mrf.mxu0 }
 0x942   : > { %v5352_v35 = vpack.c.bf16 %v7881_v63, %v7881_v63 }
 0x943   : > { %v5997_v16 = vpop.f32.mrf.mxu1  ;;  %v4035_v22 = vpop.f32.mrf.mxu0  ;;  %6043 = vmatpush3.bf16.msra.mxu1 %v6238_v0 }
 0x944   : > { %v4129_v60 = vpack.c.bf16 %v4035_v22, %v3992_v61  ;;  %v5353_v22 = vpack.c.bf16 %v7883_v4, %v7883_v4 }
 0x945   : > { %v6002_v42 = vpop.f32.mrf.mxu0  ;;  %v4078_v57 = vpop.f32.mrf.mxu1 }
 0x946   : > { %6024 = vmatprep.mubr.msk.bf16.mxu1 %vm662_vm1, %v4129_v60  ;;  %v5350_v42 = vpack.c.bf16 %v7865_v37, %v7865_v37 }
 0x947   : > { %v4038_v17 = vpop.f32.mrf.mxu0  ;;  %v6008_v24 = vpop.f32.mrf.mxu1 }
 0x948   : > { %v5351_v17 = vpack.c.bf16 %v7867_v48, %v7867_v48 }
 0x949   : > { %v6003_v13 = vpop.f32.mrf.mxu0  ;;  %v4081_v52 = vpop.f32.mrf.mxu1 }
 0x94a   : > { %v4340_v0 = vunpack.c.l.bf16 %v5351_v17 }
 0x94b   : > { %v4121_v9 = vpop.f32.mrf.mxu0  ;;  %v6009_v62 = vpop.f32.mrf.mxu1 }
 0x94c   : > { %v4130_v14 = vpack.c.bf16 %v4121_v9, %v4078_v57  ;;  %v4341_v9 = vunpack.c.l.bf16 %v5352_v35 }
 0x94d   : > { %v6014_v23 = vpop.f32.mrf.mxu0 }
 0x94e   : > { %6025 = vmatmul.mubr.msk.bf16.gmra.mxu1 %vm662_vm1, %v4130_v14  ;;  %v4342_v23 = vunpack.c.l.bf16 %v5353_v22 }
 0x94f   : > { %v4124_v26 = vpop.f32.mrf.mxu0 }
 0x951   : > { %v6015_v33 = vpop.f32.mrf.mxu0 }
 0x952   : > { %v4339_v33 = vunpack.c.l.bf16 %v5350_v42 }
 0x953   : > { %v6034_v12 = vpop.f32.mrf.mxu0 }
 0x955   : > { %v4288_v44 = vpop.f32.mrf.mxu0 }
 0x957   : > { %v6035_v38 = vpop.f32.mrf.mxu0 }
 0x959   : > { %v4291_v36 = vpop.f32.mrf.mxu0 }
 0x95b   : > { %v6038_v34 = vpop.f32.mrf.mxu0 }
 0x95d   : > { %v4304_v40 = vpop.f32.mrf.mxu0 }
 0x95f   : > { %v6039_v49 = vpop.f32.mrf.mxu0 }
 0x961   : > { %v4307_v52 = vpop.f32.mrf.mxu0 }
 0x9fe   : > { %v6022_v6 = vpop.f32.mrf.mxu1 }
 0x9ff   : > { %v4297_v59 = vadd.f32 %v6034_v12, %v6022_v6 }
 0xa00   : > { %v4199_v5 = vpop.f32.mrf.mxu1 }
 0xa01   : > { %v4289_v3 = vadd.f32 %v4288_v44, %v4199_v5  ;;  %v4329_v11 = vadd.f32 %v5267_v45, %v4297_v59 }
 0xa02   : > { %v6023_v15 = vpop.f32.mrf.mxu1 }
 0xa03   : > { %v4300_v28 = vadd.f32 %v6035_v38, %v6023_v15  ;;  %v4327_v43 = vadd.f32 %v5267_v45, %v4289_v3  ;;  %v4345_v39 = vadd.f32 %v4337_v10, %v4329_v11 }
 0xa04   : > { %v4202_v54 = vpop.f32.mrf.mxu1 }
 0xa05   : > { %v4330_v51 = vadd.f32 %v5267_v45, %v4300_v28  ;;  %v4292_v47 = vadd.f32 %v4291_v36, %v4202_v54  ;;  %v4343_v30 = vadd.f32 %v4335_v56, %v4327_v43 }
 0xa07   : > { %v4346_v7 = vadd.f32 %v4338_v46, %v4330_v51  ;;  %v4328_v19 = vadd.f32 %v5267_v45, %v4292_v47 }
 0xa09   : > { %v4352_v53 = vpack.c.bf16 %v4346_v7, %v4345_v39  ;;  %v4344_v61 = vadd.f32 %v4336_v2, %v4328_v19 }
 0xa0b   : > { %v4351_v55 = vpack.c.bf16 %v4344_v61, %v4343_v30  ;;  %6044 = vmatprep.mubr.msk.bf16.mxu1 %vm662_vm1, %v4352_v53  ;;  %v6240_v61 = vld [vmem:[#allocation8 + $0x38] sm:$0xff]  }
 0xa0c   : > { %6056 = vmatprep.subr.bf16.mxu1 %v6240_v61 }
 0xa0d   : > { %6052 = vmatprep.mubr.msk.bf16.mxu0 %vm662_vm1, %v4351_v55  ;;  %v6241_v55 = vld [vmem:[#allocation8 + $0x30] sm:$0xff]  }
 0xa0e   : > { %v6026_v8 = vpop.f32.mrf.mxu1 }
 0xa0f   : > { %v4313_v41 = vadd.f32 %v6038_v34, %v6026_v8 }
 0xa10   : > { %v4215_v16 = vpop.f32.mrf.mxu1 }
 0xa11   : > { %v4305_v60 = vadd.f32 %v4304_v40, %v4215_v16  ;;  %v4333_v24 = vadd.f32 %v5267_v45, %v4313_v41 }
 0xa12   : > { %v6027_v57 = vpop.f32.mrf.mxu1 }
 0xa13   : > { %v4316_v13 = vadd.f32 %v6039_v49, %v6027_v57  ;;  %v4331_v14 = vadd.f32 %v5267_v45, %v4305_v60  ;;  %v4349_v58 = vadd.f32 %v4341_v9, %v4333_v24 }
 0xa14   : > { %v4218_v62 = vpop.f32.mrf.mxu1 }
 0xa15   : > { %v4334_v63 = vadd.f32 %v5267_v45, %v4316_v13  ;;  %v4308_v26 = vadd.f32 %v4307_v52, %v4218_v62  ;;  %v4347_v1 = vadd.f32 %v4339_v33, %v4331_v14  ;;  %v6244_v33 = vld [vmem:[%s8155_s11 + $0x8] sm:$0xff]  }
 0xa17   : > { %v4350_v4 = vadd.f32 %v4342_v23, %v4334_v63  ;;  %v4332_v18 = vadd.f32 %v5267_v45, %v4308_v26  ;;  %v6242_v23 = vld [vmem:[%s8155_s11 + $0x18] sm:$0xff]   ;;  %v6243_v26 = vld [vmem:[%s8155_s11 + $0x10] sm:$0xff]  }
 0xa18   : > { %6064 = vmatprep.subr.bf16.mxu0 %v6242_v23 }
 0xa19   : > { %v4354_v37 = vpack.c.bf16 %v4350_v4, %v4349_v58  ;;  %v4348_v12 = vadd.f32 %v4340_v0, %v4332_v18  ;;  %v6245_v58 = vld [vmem:[%s8155_s11] sm:$0xff]   ;;  %v6246_v4 = vld [vmem:[%s8157_s13 + $0x18] sm:$0xff]  }
 0xa1a   : > { %v5283_v18 = vld [vmem:[%s8151_s7 + $0x3] ss:$0 sm:$0xff] }
 0xa1b   : > { %v4353_v44 = vpack.c.bf16 %v4348_v12, %v4347_v1  ;;  %6045 = vmatmul.mubr.msk.bf16.vlgmr.msra.gmra.mxu1 %vm662_vm1, %v4354_v37 }
 0xa1c   : > { %6057 = vmatpush3.bf16.msra.mxu1 %v6240_v61 }
 0xa1d   : > { %6053 = vmatmul.mubr.msk.bf16.vlgmr.msra.gmra.mxu0 %vm662_vm1, %v4353_v44  ;;  %6058 = vmatprep.subr.bf16.mxu1 %v6241_v55 }
 0xa1e   : > { %6065 = vmatpush3.bf16.msra.mxu0 %v6242_v23 }
 0xa1f   : > { %6066 = vmatprep.subr.bf16.mxu0 %v6243_v26 }
 0xa20   : > { %6059 = vmatpush3.bf16.msra.mxu1 %v6241_v55 }
 0xa21   : > { %6076 = vmatprep.subr.bf16.mxu1 %v6246_v4 }
 0xa22   : > { %6067 = vmatpush3.bf16.msra.mxu0 %v6243_v26 }
 0xa23   : > { %6068 = vmatprep.subr.bf16.mxu0 %v6244_v33 }
 0xa26   : > { %6069 = vmatpush3.bf16.msra.mxu0 %v6244_v33 }
 0xa27   : > { %6070 = vmatprep.subr.bf16.mxu0 %v6245_v58 }
 0xa2a   : > { %6071 = vmatpush3.bf16.msra.mxu0 %v6245_v58 }
 0xadb   : > { %v6046_v48 = vpop.f32.mrf.mxu1 }
 0xadd   : > { %v4431_v6 = vpop.f32.mrf.mxu1  ;;  %v6054_v59 = vpop.f32.mrf.mxu0 }
 0xade   : > { %v4509_v38 = vadd.f32 %v6054_v59, %v6046_v48 }
 0xadf   : > { %v6047_v5 = vpop.f32.mrf.mxu1  ;;  %v4500_v25 = vpop.f32.mrf.mxu0 }
 0xae0   : > { %v4525_v45 = vadd.f32 %v5277_v29, %v4509_v38  ;;  %v4501_v3 = vadd.f32 %v4500_v25, %v4431_v6 }
 0xae1   : > { %v6055_v20 = vpop.f32.mrf.mxu0  ;;  %v4434_v28 = vpop.f32.mrf.mxu1 }
 0xae2   : > { %v5280_v15 = vmul.f32 -1.442695, %v4525_v45  ;;  %v4523_v27 = vadd.f32 %v5277_v29, %v4501_v3  ;;  %v4512_v11 = vadd.f32 %v6055_v20, %v6047_v5 }
 0xae3   : > { %v4503_v36 = vpop.f32.mrf.mxu0 }
 0xae4   : > { %v5278_v10 = vmul.f32 -1.442695, %v4523_v27  ;;  %v4526_v54 = vadd.f32 %v5277_v29, %v4512_v11  ;;  %v4504_v43 = vadd.f32 %v4503_v36, %v4434_v28  ;;  %6442 = vpow2.f32 %v5280_v15  ;;  %v5288_v36 = vld [vmem:[%s8156_s12] ss:$0 sm:$0xff] }
 0xae6   : > { %6444 = vpow2.f32 %v5278_v10  ;;  %v5281_v51 = vmul.f32 -1.442695, %v4526_v54  ;;  %v4524_v46 = vadd.f32 %v5277_v29, %v4504_v43 }
 0xae8   : > { %v5279_v47 = vmul.f32 -1.442695, %v4524_v46  ;;  %6446 = vpow2.f32 %v5281_v51 }
 0xaea   : > { %6448 = vpow2.f32 %v5279_v47 }
 0xaf1   : > { %v6443_v56 = vpop.eup %6442 }
 0xaf2   : > { %v4545_v19 = vadd.f32 1.0, %v6443_v56 }
 0xaf3   : > { %v6445_v39 = vpop.eup %6444 }
 0xaf4   : > { %v4543_v7 = vadd.f32 1.0, %v6445_v39 }
 0xaf5   : > { %v6447_v2 = vpop.eup %6446 }
 0xaf6   : > { %6450 = vrcp.f32 %v4543_v7  ;;  %v4546_v53 = vadd.f32 1.0, %v6447_v2 }
 0xaf7   : > { %v6449_v34 = vpop.eup %6448  ;;  %6452 = vrcp.f32 %v4545_v19 }
 0xaf8   : > { %v4544_v30 = vadd.f32 1.0, %v6449_v34 }
 0xafa   : > { %6454 = vrcp.f32 %v4544_v30  ;;  %v5295_v30 = vld [vmem:[%s8158_s14] ss:$0 sm:$0xff] }
 0xafb   : > { %6456 = vrcp.f32 %v4546_v53 }
 0xafc   : > { %6458 = vtanh.f32 %v4523_v27 }
 0xafd   : > { %6460 = vtanh.f32 %v4524_v46 }
 0xafe   : > { %6462 = vtanh.f32 %v4525_v45 }
 0xaff   : > { %6464 = vtanh.f32 %v4526_v54 }
 0xb03   : > { %v6451_v40 = vpop.eup %6450 }
 0xb04   : > { %4559 = vrot.lane.b32.xlu0 %v6451_v40, %s6727_s23  ;;  %v6453_v8 = vpop.eup %6452 }
 0xb07   : > { %v6455_v41 = vpop.eup %6454 }
 0xb08   : > { %4561 = vrot.lane.b32.xlu1 %v6455_v41, %s6727_s23  ;;  %4563 = vrot.lane.b32.xlu0 %v6453_v8, %s6727_s23  ;;  %v6457_v35 = vpop.eup %6456 }
 0xb09   : > { %v6459_v16 = vpop.eup %6458 }
 0xb0a   : > { %v6461_v22 = vpop.eup %6460 }
 0xb0b   : > { %v6463_v24 = vpop.eup %6462 }
 0xb0c   : > { %4565 = vrot.lane.b32.xlu1 %v6457_v35, %s6727_s23  ;;  %v6465_v52 = vpop.eup %6464  ;;  %s8198_s23 = sld [smem:[#allocation26_spill]] }
 0xb12   : > { %s8099_s24 = scalar_lea.hbm %s8198_s23, %s5363_s9 }
 0xb76   : > { %v4560_v49 = vpop.permute.xlu0 %4559 }
 0xb77   : > { %v4571_v42 = vmul.f32 %v6459_v16, %v4560_v49 }
 0xb7a   : > { %v4562_v60 = vpop.permute.xlu1 %4561  ;;  %v4564_v17 = vpop.permute.xlu0 %4563 }
 0xb7b   : > { %v4572_v57 = vmul.f32 %v6461_v22, %v4562_v60  ;;  %v4573_v62 = vmul.f32 %v6463_v24, %v4564_v17 }
 0xb7d   : > { %v4575_v13 = vpack.c.bf16 %v4572_v57, %v4571_v42 }
 0xb7e   : > { %v4566_v9 = vpop.permute.xlu1 %4565 }
 0xb7f   : > { %v4574_v14 = vmul.f32 %v6465_v52, %v4566_v9  ;;  %6060 = vmatprep.mubr.msk.bf16.mxu1 %vm662_vm1, %v4575_v13 }
 0xb81   : > { %v4576_v63 = vpack.c.bf16 %v4574_v14, %v4573_v62 }
 0xb83   : > { %6061 = vmatmul.mubr.msk.bf16.vlgmr.msra.gmra.mxu1 %vm662_vm1, %v4576_v63 }
 0xb84   : > { %6077 = vmatpush3.bf16.msra.mxu1 %v6246_v4 }
 0xc43   : > { %v6062_v0 = vpop.f32.mrf.mxu1 }
 0xc44   : > { %v4651_v1 = vadd.f32 %v6062_v0, %v5283_v18 }
 0xc45   : > { %v4642_v37 = vpop.f32.mrf.mxu1 }
 0xc46   : > { %v4643_v12 = vadd.f32 %v5283_v18, %v4642_v37  ;;  %v4659_v48 = vadd.f32 %v4651_v1, %v8001_v21  ;;  %v6247_v21 = vld [vmem:[%s8157_s13 + $0x10] sm:$0xff]  }
 0xc47   : > { %v6063_v44 = vpop.f32.mrf.mxu1  ;;  %6078 = vmatprep.subr.bf16.mxu1 %v6247_v21 }
 0xc48   : > { %v4654_v6 = vadd.f32 %v6063_v44, %v5283_v18  ;;  %v4657_v29 = vadd.f32 %v4643_v12, %v8006_v31  ;;  %v4663_v25 = vmax.f32 %v4659_v48, 0.0  ;;  %6079 = vmatpush3.bf16.msra.mxu1 %v6247_v21  ;;  %v6248_v31 = vld [vmem:[%s8157_s13 + $0x8] sm:$0xff]  }
 0xc49   : > { %v4645_v59 = vpop.f32.mrf.mxu1  ;;  %6080 = vmatprep.subr.bf16.mxu1 %v6248_v31 }
 0xc4a   : > { %v4660_v38 = vadd.f32 %v4654_v6, %v8009_v50  ;;  %v4646_v5 = vadd.f32 %v5283_v18, %v4645_v59  ;;  %v4661_v20 = vmax.f32 %v4657_v29, 0.0  ;;  %v6249_v50 = vld [vmem:[%s8157_s13] sm:$0xff]  }
 0xc4c   : > { %v4664_v45 = vmax.f32 %v4660_v38, 0.0  ;;  %v4658_v3 = vadd.f32 %v4646_v5, %v8011_v32  ;;  %6081 = vmatpush3.bf16.msra.mxu1 %v6248_v31 }
 0xc4d   : > { %6082 = vmatprep.subr.bf16.mxu1 %v6249_v50 }
 0xc4e   : > { %v4666_v15 = vpack.c.bf16 %v4664_v45, %v4663_v25  ;;  %v4662_v27 = vmax.f32 %v4658_v3, 0.0 }
 0xc50   : > { %v4665_v11 = vpack.c.bf16 %v4662_v27, %v4661_v20  ;;  %6083 = vmatpush3.bf16.msra.mxu1 %v6249_v50 }
 0xc52   : > { %6072 = vmatprep.mubr.msk.bf16.mxu0 %vm4706_vm4, %v4665_v11 }
 0xc53   : > { %6073 = vmatmul.mubr.msk.bf16.vlgmr.msra.gmra.mxu0 %vm4706_vm4, %v4666_v15 }
 0xd13   : > { %v6074_v32 = vpop.f32.mrf.mxu0 }
 0xd14   : > { %v4756_v51 = vadd.f32 %v6074_v32, %v5288_v36 }
 0xd15   : > { %v4747_v28 = vpop.f32.mrf.mxu0 }
 0xd16   : > { %v4748_v54 = vadd.f32 %v5288_v36, %v4747_v28  ;;  %v4764_v19 = vmax.f32 %v4756_v51, 0.0 }
 0xd17   : > { %v6075_v10 = vpop.f32.mrf.mxu0 }
 0xd18   : > { %v4759_v43 = vadd.f32 %v6075_v10, %v5288_v36  ;;  %v4762_v39 = vmax.f32 %v4748_v54, 0.0 }
 0xd19   : > { %v4750_v46 = vpop.f32.mrf.mxu0 }
 0xd1a   : > { %v4751_v47 = vadd.f32 %v5288_v36, %v4750_v46  ;;  %v4765_v56 = vmax.f32 %v4759_v43, 0.0 }
 0xd1c   : > { %v4763_v7 = vmax.f32 %v4751_v47, 0.0  ;;  %v4767_v34 = vpack.c.bf16 %v4765_v56, %v4764_v19 }
 0xd1e   : > { %v4766_v2 = vpack.c.bf16 %v4763_v7, %v4762_v39 }
 0xd20   : > { %6084 = vmatprep.mubr.msk.bf16.mxu1 %vm4706_vm4, %v4766_v2 }
 0xd21   : > { %6085 = vmatmul.mubr.msk.bf16.vlgmr.msra.gmra.mxu1 %vm4706_vm4, %v4767_v34 }
 0xde1   : > { %v6086_v53 = vpop.f32.mrf.mxu1 }
 0xde2   : > { %v4856_v61 = vadd.f32 %v6086_v53, %v5295_v30 }
 0xde3   : > { %v4847_v55 = vpop.f32.mrf.mxu1 }
 0xde4   : > { %4865 = vst.msk [vmem:[%s586_s27 + $0x10] sm:$0xff] %vm4862_vm5, %v4856_v61  ;;  %v4848_v40 = vadd.f32 %v5295_v30, %v4847_v55 }
 0xde5   : > { %v6087_v8 = vpop.f32.mrf.mxu1 }
 0xde6   : > { %4863 = vst.msk [vmem:[%s586_s27] sm:$0xff] %vm4862_vm5, %v4848_v40  ;;  %v4859_v41 = vadd.f32 %v6087_v8, %v5295_v30 }
 0xde7   : > { %v4850_v35 = vpop.f32.mrf.mxu1 }
 0xde8   : > { %4866 = vst.msk [vmem:[%s586_s27 + $0x18] sm:$0xff] %vm4862_vm5, %v4859_v41  ;;  %v4851_v49 = vadd.f32 %v5295_v30, %v4850_v35 }
 0xdea   : > { %4864 = vst.msk [vmem:[%s586_s27 + $0x8] sm:$0xff] %vm4862_vm5, %v4851_v49 }
 0xdeb   : > { %6652 = shalt.err (!%p6649_p3)
}
 0xdec   : > { %s6653_s15 = scalar_lea.hbm %s8099_s24, 512  ;;  %s6657_s27 = scalar_lea.hbm %s8198_s23, 1024 }
 0xded   : > { %p6654_p4 = scmp.ne.s32.totalorder %s8099_s24, %s6653_s15  ;;  %p6658_p2 = scmp.lt.s32.totalorder %s8099_s24, %s8198_s23 }
 0xdee   : > { %p6659_p7 = scmp.lt.s32.totalorder %s6657_s27, %s6653_s15 }
 0xdef   : > { %p6655_p12 = pnand %p6654_p4, %p8199_p11 }
 0xdf0   : > { %p6660_p8 = por %p6659_p7, %p6658_p2 }
 0xdf1   : > { %p6656_p6 = pneg %p6655_p12 }
 0xdf3   : > { %p6661_p10 = pnand %p6660_p8, %p6656_p6 }
 0xdf5   : > { %6664 = shalt.err (!%p6661_p10)
}
 0xdf6   : > { %s6729_s18 = smov 128   ;;  %s6730_s4 = smov 8  }
 0xdf7   : > { %6110 = dma.vmem_to_hbm [thread:$0]  (%p8199_p11), %s8093_s16, 512, %s8099_s24, %s4868_s22, %s6729_s18, %s6729_s18, %s6730_s4  }
 0xdf8 PF: > { %s4897_s6 = sand.u32 1, %s6703_s17   ;;  %p8200_p0 = scmp.ne.s32.totalorder %s8186_s25, 0 }
 0xdf9   : > { %p8201_p13 = scmp.ge.s32.totalorder %s6715_s19, 2  ;;  %s4898_s8 = scalar_lea.sflag [#allocation4], %s4897_s6 }
 0xdfb   : > { %p6133_p5 = pnand %p8201_p13, %p8200_p0 }
 0xdfd   : > { %p6134_p9 = pneg %p6133_p5 }
 0xdff   : > { %6698 = dma.done.wait (%p6134_p9), %s4898_s8, 512  }
 0xe00   : > { %6700 = vsyncadd (%p6134_p9), %s4898_s8, 4294966784  ;;  %s8202_s20 = sld [smem:[#allocation19_spill]]  ;;  %p31_p1 = scmp.ge.s32.totalorder %s6922_s29, 4  }
 0xe01   : > { %s8203_s18 = sld [smem:[#allocation20_spill]]  ;;  %s8204_s17 = smov %s6707_s1 }
 0xe02   : > { %s8206_s19 = smov %s6922_s29  ;;  %33 = sbr.rel (!%p31_p1) target bundleno = 15 (0xf), region = 166 }
 0xe06   : > { %s8205_s1 = smov %s8202_s20 }
 0xe07   :  { %4903 = vsyncpa [#allocation3], 1 }
 0xe08   :  { %4905 = vsyncpa [#allocation3 + $0x1], 1 }
 0xe09   :  { %4906 = vsyncpa [#allocation6], 1 }
 0xe0a   :  { %4907 = vsyncpa [#allocation9], 1 }
 0xe0b   :  { %4908 = vsyncpa [#allocation12], 1 }
 0xe0c   :  { %4909 = vsyncpa [#allocation4], 1 }
 0xe0d   :  { %4911 = vsyncpa [#allocation4 + $0x1], 1 }

</bundles_post_ra>
